<compile_context>
chip_gen: v6e
topology: v6e:2x2x1
jax: 0.10.0
libtpu: 0.0.40
codegen_flags: <defaults>
</compile_context>

<pallas_src>
import functools

import jax
import jax.numpy as jnp
from jax.experimental import pallas as pl
from jax.experimental.pallas import tpu as pltpu

NEG_INF = -10000000000.0
LANE = 128
SUB = 16  # bf16 sublane packing


def _rup(x, m):
    return ((x + m - 1) // m) * m


def _dot(a, b):
    # MXU matmul; operands bf16, accumulation f32.
    return jnp.dot(a, b, preferred_element_type=jnp.float32)


# ------------------------- Fused Seq2Seq kernel -------------------------
def _seq2seq_kernel(emb_src_ref, dec_emb_ref, mask_ref,
                    enc_Wi, enc_Wh, enc_bi, enc_bhn, enc_Wfc, enc_bfc,
                    att_We, att_b, att_v,
                    dec_Whh, dec_We, dec_Wc, dec_bi, dec_bhn,
                    out_W, out_b,
                    out_ref,
                    enc_scr, eproj_scr, gi_scr, gx_scr):
    S, Bp, Ep = emb_src_ref.shape
    Tm1, _, Edp = dec_emb_ref.shape
    Hep = enc_Wh.shape[0]
    Hdp = dec_bhn.shape[1]
    Vp = out_ref.shape[2]

    # ---- Hoisted input-side gate projections (two large-M matmuls) ----
    src_flat = emb_src_ref[...].reshape(S * Bp, Ep)                     # bf16
    gi_scr[...] = (_dot(src_flat, enc_Wi[...]) + enc_bi[...]).reshape(S, Bp, 3 * Hep)

    dec_flat = dec_emb_ref[...].reshape(Tm1 * Bp, Edp)                  # bf16
    gx_scr[...] = (_dot(dec_flat, dec_We[...]) + dec_bi[...]).reshape(Tm1, Bp, 3 * Hdp)

    # ---- Encoder GRU (unrolled; 1 matmul per serial step) ----
    h = jnp.zeros((Bp, Hep), jnp.float32)
    for t in range(S):
        gi = gi_scr[t]                                                  # (Bp, 3Hep) f32
        gh = _dot(h.astype(jnp.bfloat16), enc_Wh[...])                  # (Bp, 3Hep) f32
        r = jax.nn.sigmoid(gi[:, :Hep] + gh[:, :Hep])
        z = jax.nn.sigmoid(gi[:, Hep:2 * Hep] + gh[:, Hep:2 * Hep])
        n = jnp.tanh(gi[:, 2 * Hep:] + r * (gh[:, 2 * Hep:] + enc_bhn[...]))
        h_new = (1.0 - z) * n + z * h
        valid = mask_ref[t] > 0.0                                       # (Bp, 1)
        enc_scr[t] = jnp.where(valid, h_new, 0.0)   # pad_packed zero-pads outputs
        h = jnp.where(valid, h_new, h)              # packed GRU freezes hidden

    # Encoder fc -> initial decoder hidden (once, not per step).
    hd = jnp.tanh(_dot(h.astype(jnp.bfloat16), enc_Wfc[...]) + enc_bfc[...])

    # Hoisted, time-invariant attention projection of encoder outputs (+ bias).
    enc_flat = enc_scr[...].reshape(S * Bp, Hep).astype(jnp.bfloat16)
    eproj_scr[...] = (_dot(enc_flat, att_We[...]) + att_b[...]).reshape(S, Bp, Hdp)

    out_ref[0] = jnp.zeros((Bp, Vp), jnp.float32)   # outputs[0] stays zero

    mask3 = mask_ref[...]                                               # (S, Bp, 1) f32

    # ---- Decoder: attention + GRU + fused output projection (3 matmuls/step) ----
    for t in range(Tm1):
        emb = dec_emb_ref[t]                                            # (Bp, Edp) bf16
        hd_bf = hd.astype(jnp.bfloat16)

        # One fused matmul for everything sourced from hd: [att_Wh | Wh_r|Wh_z|Wh_n].
        hg = _dot(hd_bf, dec_Whh[...])                                  # (Bp, 4Hdp) f32
        h_proj = hg[:, :Hdp]
        gh = hg[:, Hdp:]

        # Additive attention, scores kept in (S, Bp, 1) layout (no relayouts).
        energy = jnp.tanh(eproj_scr[...] + h_proj[None, :, :])          # (S,Bp,Hdp) f32
        scores = jnp.sum(energy * att_v[...], axis=-1, keepdims=True)   # (S, Bp, 1)
        scores = jnp.where(mask3 > 0.0, scores, NEG_INF)                # f32 masking
        p = jnp.exp(scores - jnp.max(scores, axis=0, keepdims=True))
        attn = p * pl.reciprocal(jnp.sum(p, axis=0, keepdims=True), approx=True)
        ctx = jnp.sum(attn * enc_scr[...], axis=0)                      # (Bp, Hep) f32
        ctx_bf = ctx.astype(jnp.bfloat16)

        # GRU step: hoisted emb gates + per-step context gates.
        gx = gx_scr[t] + _dot(ctx_bf, dec_Wc[...])                      # (Bp, 3Hdp) f32
        r = jax.nn.sigmoid(gx[:, :Hdp] + gh[:, :Hdp])
        z = jax.nn.sigmoid(gx[:, Hdp:2 * Hdp] + gh[:, Hdp:2 * Hdp])
        n = jnp.tanh(gx[:, 2 * Hdp:] + r * (gh[:, 2 * Hdp:] + dec_bhn[...]))
        hd = (1.0 - z) * n + z * hd

        # Fused output projection over in-vreg [output | embedded | weighted].
        feat = jnp.concatenate([hd.astype(jnp.bfloat16), emb, ctx_bf], axis=-1)
        out_ref[t + 1] = _dot(feat, out_W[...]) + out_b[...]


_WEIGHT_ORDER = ("enc_Wi", "enc_Wh", "enc_bi", "enc_bhn", "enc_Wfc", "enc_bfc",
                 "att_We", "att_b", "att_v",
                 "dec_Whh", "dec_We", "dec_Wc", "dec_bi", "dec_bhn",
                 "out_W", "out_b")


def _fused_seq2seq_call(emb_src, dec_emb_in, mask, w):
    S, Bp, _ = emb_src.shape
    Tm1 = dec_emb_in.shape[0]
    T = Tm1 + 1
    Hep = w["enc_Wh"].shape[0]
    Hdp = w["dec_bhn"].shape[1]
    Vp = w["out_b"].shape[1]
    weights = [w[k] for k in _WEIGHT_ORDER]
    return pl.pallas_call(
        _seq2seq_kernel,
        out_shape=jax.ShapeDtypeStruct((T, Bp, Vp), jnp.float32),
        scratch_shapes=[pltpu.VMEM((S, Bp, Hep), jnp.float32),        # encoder outputs
                        pltpu.VMEM((S, Bp, Hdp), jnp.float32),        # hoisted e_proj
                        pltpu.VMEM((S, Bp, 3 * Hep), jnp.float32),    # hoisted enc gi
                        pltpu.VMEM((Tm1, Bp, 3 * Hdp), jnp.float32)], # hoisted dec gx
        compiler_params=pltpu.CompilerParams(vmem_limit_bytes=32 * 1024 * 1024),
    )(emb_src, dec_emb_in, mask, *weights)


# ------------------------- Weight packing (host-side, once) -------------------------
def pack_params(p):
    E = p["enc_W_ir"].shape[0]
    He = p["enc_W_hr"].shape[0]
    Hd = p["dec_W_hr"].shape[0]
    Ed = p["dec_W_er"].shape[0]
    V = p["out_b"].shape[1]
    Ep, Hep, Hdp, Edp, Vp = (_rup(E, LANE), _rup(He, LANE), _rup(Hd, LANE),
                             _rup(Ed, LANE), _rup(V, LANE))

    def padf(a, r, c):  # f32 (biases / attention vector)
        return jnp.pad(a, ((0, r - a.shape[0]), (0, c - a.shape[1])))

    def padb(a, r, c):  # bf16 (MXU operands)
        return padf(a, r, c).astype(jnp.bfloat16)

    w = {
        # encoder GRU, gates fused [r|z|n]
        "enc_Wi": jnp.concatenate([padb(p["enc_W_ir"], Ep, Hep),
                                   padb(p["enc_W_iz"], Ep, Hep),
                                   padb(p["enc_W_in"], Ep, Hep)], axis=1),
        "enc_Wh": jnp.concatenate([padb(p["enc_W_hr"], Hep, Hep),
                                   padb(p["enc_W_hz"], Hep, Hep),
                                   padb(p["enc_W_hn"], Hep, Hep)], axis=1),
        "enc_bi": jnp.concatenate([padf(p["enc_b_r"], 1, Hep),
                                   padf(p["enc_b_z"], 1, Hep),
                                   padf(p["enc_b_in"], 1, Hep)], axis=1),
        "enc_bhn": padf(p["enc_b_hn"], 1, Hep),
        "enc_Wfc": padb(p["enc_W_fc"], Hep, Hdp),
        "enc_bfc": padf(p["enc_b_fc"], 1, Hdp),
        # attention (time-invariant projection; bias folded into it in-kernel)
        "att_We": padb(p["att_W_e"], Hep, Hdp),
        "att_b": padf(p["att_b"], 1, Hdp),
        "att_v": padf(p["att_v"], 1, Hdp),
        # all hd-sourced matmuls fused: [att_Wh | Wh_r | Wh_z | Wh_n]
        "dec_Whh": jnp.concatenate([padb(p["att_W_h"], Hdp, Hdp),
                                    padb(p["dec_W_hr"], Hdp, Hdp),
                                    padb(p["dec_W_hz"], Hdp, Hdp),
                                    padb(p["dec_W_hn"], Hdp, Hdp)], axis=1),
        # decoder GRU input-side, gates fused [r|z|n]
        "dec_We": jnp.concatenate([padb(p["dec_W_er"], Edp, Hdp),
                                   padb(p["dec_W_ez"], Edp, Hdp),
                                   padb(p["dec_W_en"], Edp, Hdp)], axis=1),
        "dec_Wc": jnp.concatenate([padb(p["dec_W_cr"], Hep, Hdp),
                                   padb(p["dec_W_cz"], Hep, Hdp),
                                   padb(p["dec_W_cn"], Hep, Hdp)], axis=1),
        "dec_bi": jnp.concatenate([padf(p["dec_b_r"], 1, Hdp),
                                   padf(p["dec_b_z"], 1, Hdp),
                                   padf(p["dec_b_in"], 1, Hdp)], axis=1),
        "dec_bhn": padf(p["dec_b_hn"], 1, Hdp),
        # fused output projection, rows ordered [h | emb | ctx]
        "out_W": jnp.concatenate([padb(p["out_W_h"], Hdp, Vp),
                                  padb(p["out_W_e"], Edp, Vp),
                                  padb(p["out_W_c"], Hep, Vp)], axis=0),
        "out_b": padf(p["out_b"], 1, Vp),
        # embedding tables, feature dim padded; gather stays in the wrapper
        "enc_emb": jnp.pad(p["enc_emb"], ((0, 0), (0, Ep - E))).astype(jnp.bfloat16),
        "dec_emb": jnp.pad(p["dec_emb"], ((0, 0), (0, Edp - Ed))).astype(jnp.bfloat16),
    }
    return w


# ------------------------- Seq2Seq forward wrapper -------------------------
@functools.partial(jax.jit, static_argnames=("src_padded_idx", "trg_vocab_size",
                                             "teacher_forcing_ratio"))
def seq2seq_forward(packed, source, source_length, target, src_padded_idx,
                    trg_vocab_size, teacher_forcing_ratio=1.0):
    assert teacher_forcing_ratio >= 1.0  # full teacher forcing (deterministic)
    S, B = source.shape
    Bp = _rup(B, SUB)
    pb = Bp - B

    # Embedding gathers (nn.Embedding) done as JAX glue; tables are bf16.
    emb_src = packed["enc_emb"][source]                     # (S, B, Ep) bf16
    dec_in = packed["dec_emb"][target[:-1]]                 # (T-1, B, Edp) bf16

    # Single validity mask: t < length  (== source != PAD under the usual
    # data contract). Serves both pack/freeze and attention masking.
    mask = (jnp.arange(S)[:, None] < source_length[None, :]).astype(jnp.float32)

    # Pad batch to 16 (bf16 sublane packing); padded rows are sliced off below.
    emb_src = jnp.pad(emb_src, ((0, 0), (0, pb), (0, 0)))
    dec_in = jnp.pad(dec_in, ((0, 0), (0, pb), (0, 0)))
    mask = jnp.pad(mask, ((0, 0), (0, pb)))[:, :, None]     # (S, Bp, 1)

    out_p = _fused_seq2seq_call(emb_src, dec_in, mask, packed)
    return out_p[:, :B, :trg_vocab_size]


# ------------------------- Pure-JAX reference (sanity only) -------------------------
def seq2seq_reference(params, source, source_length, target, src_padded_idx):
    p = params
    S, B = source.shape
    T = target.shape[0]
    V = p["out_b"].shape[1]
    He = p["enc_W_hr"].shape[0]

    emb = p["enc_emb"][source]
    h = jnp.zeros((B, He), jnp.float32)
    enc_outs = []
    for t in range(S):
        x = emb[t]
        r = jax.nn.sigmoid(x @ p["enc_W_ir"] + h @ p["enc_W_hr"] + p["enc_b_r"])
        z = jax.nn.sigmoid(x @ p["enc_W_iz"] + h @ p["enc_W_hz"] + p["enc_b_z"])
        n = jnp.tanh(x @ p["enc_W_in"] + p["enc_b_in"] + r * (h @ p["enc_W_hn"] + p["enc_b_hn"]))
        h_new = (1.0 - z) * n + z * h
        m = (t < source_length).astype(jnp.float32)[:, None]
        enc_outs.append(m * h_new)
        h = m * h_new + (1.0 - m) * h
    enc = jnp.stack(enc_outs, axis=0)
    hd = jnp.tanh(h @ p["enc_W_fc"] + p["enc_b_fc"])
    masked = (source != src_padded_idx).astype(jnp.float32).T

    preds = []
    for t in range(T - 1):
        e = p["dec_emb"][target[t]]
        h_proj = hd @ p["att_W_h"]
        e_proj = jnp.einsum("sbe,eh->sbh", enc, p["att_W_e"])
        energy = jnp.tanh(e_proj + h_proj[None] + p["att_b"][None])
        scores = jnp.sum(energy * p["att_v"][None], axis=-1).T
        scores = jnp.where(masked == 0.0, NEG_INF, scores)
        attn = jax.nn.softmax(scores, axis=1)
        ctx = jnp.sum(attn.T[:, :, None] * enc, axis=0)
        r = jax.nn.sigmoid(e @ p["dec_W_er"] + ctx @ p["dec_W_cr"] + hd @ p["dec_W_hr"] + p["dec_b_r"])
        z = jax.nn.sigmoid(e @ p["dec_W_ez"] + ctx @ p["dec_W_cz"] + hd @ p["dec_W_hz"] + p["dec_b_z"])
        n = jnp.tanh(e @ p["dec_W_en"] + ctx @ p["dec_W_cn"] + p["dec_b_in"]
                     + r * (hd @ p["dec_W_hn"] + p["dec_b_hn"]))
        hd = (1.0 - z) * n + z * hd
        preds.append(hd @ p["out_W_h"] + e @ p["out_W_e"] + ctx @ p["out_W_c"] + p["out_b"])
    return jnp.concatenate([jnp.zeros((1, B, V), jnp.float32), jnp.stack(preds, 0)], axis=0)


# ------------------------- Parameter init -------------------------
def make_params(key, Vs, Vt, E, Ed, He, Hd):
    shapes = [
        ("enc_emb", (Vs, E)),
        ("enc_W_ir", (E, He)), ("enc_W_iz", (E, He)), ("enc_W_in", (E, He)),
        ("enc_W_hr", (He, He)), ("enc_W_hz", (He, He)), ("enc_W_hn", (He, He)),
        ("enc_b_r", (1, He)), ("enc_b_z", (1, He)), ("enc_b_in", (1, He)), ("enc_b_hn", (1, He)),
        ("enc_W_fc", (He, Hd)), ("enc_b_fc", (1, Hd)),
        ("dec_emb", (Vt, Ed)),
        ("att_W_h", (Hd, Hd)), ("att_W_e", (He, Hd)), ("att_b", (1, Hd)), ("att_v", (1, Hd)),
        ("dec_W_er", (Ed, Hd)), ("dec_W_ez", (Ed, Hd)), ("dec_W_en", (Ed, Hd)),
        ("dec_W_cr", (He, Hd)), ("dec_W_cz", (He, Hd)), ("dec_W_cn", (He, Hd)),
        ("dec_W_hr", (Hd, Hd)), ("dec_W_hz", (Hd, Hd)), ("dec_W_hn", (Hd, Hd)),
        ("dec_b_r", (1, Hd)), ("dec_b_z", (1, Hd)), ("dec_b_in", (1, Hd)), ("dec_b_hn", (1, Hd)),
        ("out_W_h", (Hd, Vt)), ("out_W_e", (Ed, Vt)), ("out_W_c", (He, Vt)), ("out_b", (1, Vt)),
    ]
    keys = jax.random.split(key, len(shapes))
    return {name: jax.random.uniform(k, shape, jnp.float32, -0.1, 0.1)
            for (name, shape), k in zip(shapes, keys)}


if __name__ == "__main__":
    # Small, module-consistent sizes.
    SRC_VOCAB, TRG_VOCAB = 32, 32
    ENC_EMB, DEC_EMB = 16, 16
    ENC_HID, DEC_HID = 32, 32
    SRC_LEN, TRG_LEN, BATCH = 8, 6, 4
    PAD_IDX = 0

    key = jax.random.PRNGKey(0)
    kp, ks, kt = jax.random.split(key, 3)
    params = make_params(kp, SRC_VOCAB, TRG_VOCAB, ENC_EMB, DEC_EMB, ENC_HID, DEC_HID)
    packed = pack_params(params)

    source_length = jnp.array([8, 7, 6, 5], dtype=jnp.int32)  # sorted, max == SRC_LEN
    source = jax.random.randint(ks, (SRC_LEN, BATCH), 1, SRC_VOCAB, dtype=jnp.int32)
    pad_mask = jnp.arange(SRC_LEN)[:, None] < source_length[None, :]
    source = jnp.where(pad_mask, source, PAD_IDX)
    target = jax.random.randint(kt, (TRG_LEN, BATCH), 0, TRG_VOCAB, dtype=jnp.int32)

    out = seq2seq_forward(packed, source, source_length, target,
                          src_padded_idx=PAD_IDX, trg_vocab_size=TRG_VOCAB,
                          teacher_forcing_ratio=1.0)
    out = jax.block_until_ready(out)

    assert out.shape == (TRG_LEN, BATCH, TRG_VOCAB)
    assert bool(jnp.all(jnp.isfinite(out)))

    ref = seq2seq_reference(params, source, source_length, target, PAD_IDX)
    max_diff = float(jnp.max(jnp.abs(out - ref)))
    if max_diff > 0.1:  # loose structural check (bf16-MXU noise << 0.1 at these sizes)
        raise AssertionError(f"Pallas output diverges from reference: {max_diff}")

    print("KERNEL_OK")
</pallas_src>

<mosaic_0001>
module attributes {stable_mosaic.version = 11 : i64} {
  func.func @_seq2seq_kernel(%arg0: memref<8x16x128xbf16, #tpu.memory_space<vmem>>, %arg1: memref<5x16x128xbf16, #tpu.memory_space<vmem>>, %arg2: memref<8x16x1xf32, #tpu.memory_space<vmem>>, %arg3: memref<128x384xbf16, #tpu.memory_space<vmem>>, %arg4: memref<128x384xbf16, #tpu.memory_space<vmem>>, %arg5: memref<1x384xf32, #tpu.memory_space<vmem>>, %arg6: memref<1x128xf32, #tpu.memory_space<vmem>>, %arg7: memref<128x128xbf16, #tpu.memory_space<vmem>>, %arg8: memref<1x128xf32, #tpu.memory_space<vmem>>, %arg9: memref<128x128xbf16, #tpu.memory_space<vmem>>, %arg10: memref<1x128xf32, #tpu.memory_space<vmem>>, %arg11: memref<1x128xf32, #tpu.memory_space<vmem>>, %arg12: memref<128x512xbf16, #tpu.memory_space<vmem>>, %arg13: memref<128x384xbf16, #tpu.memory_space<vmem>>, %arg14: memref<128x384xbf16, #tpu.memory_space<vmem>>, %arg15: memref<1x384xf32, #tpu.memory_space<vmem>>, %arg16: memref<1x128xf32, #tpu.memory_space<vmem>>, %arg17: memref<384x128xbf16, #tpu.memory_space<vmem>>, %arg18: memref<1x128xf32, #tpu.memory_space<vmem>>, %arg19: memref<6x16x128xf32, #tpu.memory_space<vmem>>, %arg20: memref<8x16x128xf32, #tpu.memory_space<vmem>>, %arg21: memref<8x16x128xf32, #tpu.memory_space<vmem>>, %arg22: memref<8x16x384xf32, #tpu.memory_space<vmem>>, %arg23: memref<5x16x384xf32, #tpu.memory_space<vmem>>) attributes {dimension_semantics = [], scalar_prefetch = 0 : i64, scratch_operands = 4 : i64, tpu.core_type = #tpu.core_type<tc>} {
    %c0 = arith.constant 0 : index
    %c0_0 = arith.constant 0 : index
    %c0_1 = arith.constant 0 : index
    %0 = vector.load %arg0[%c0, %c0_0, %c0_1] : memref<8x16x128xbf16, #tpu.memory_space<vmem>>, vector<8x16x128xbf16>
    %1 = vector.shape_cast %0 : vector<8x16x128xbf16> to vector<128x128xbf16>
    %c0_2 = arith.constant 0 : index
    %c0_3 = arith.constant 0 : index
    %2 = vector.load %arg3[%c0_2, %c0_3] : memref<128x384xbf16, #tpu.memory_space<vmem>>, vector<128x384xbf16>
    %cst = arith.constant dense<0.000000e+00> : vector<128x384xf32>
    %3 = tpu.matmul %1, %2, %cst {dimension_numbers = #tpu.dot_dimension_numbers<[1], [0], [0], [1], [0, 0, 1, 1], [], []>} : vector<128x128xbf16>, vector<128x384xbf16>, vector<128x384xf32> -> vector<128x384xf32>
    %c0_4 = arith.constant 0 : index
    %c0_5 = arith.constant 0 : index
    %4 = vector.load %arg5[%c0_4, %c0_5] : memref<1x384xf32, #tpu.memory_space<vmem>>, vector<1x384xf32>
    %5 = vector.broadcast %4 : vector<1x384xf32> to vector<128x384xf32>
    %6 = arith.addf %3, %5 : vector<128x384xf32>
    %7 = vector.shape_cast %6 : vector<128x384xf32> to vector<8x16x384xf32>
    %c0_6 = arith.constant 0 : index
    %c0_7 = arith.constant 0 : index
    %c0_8 = arith.constant 0 : index
    %8 = vector.load %arg22[%c0_6, %c0_7, %c0_8] : memref<8x16x384xf32, #tpu.memory_space<vmem>>, vector<8x16x384xf32>
    tpu.vector_store %arg22[%c0_6, %c0_7, %c0_8], %7 {strides = array<i32>} : memref<8x16x384xf32, #tpu.memory_space<vmem>>, vector<8x16x384xf32>,
    %c0_9 = arith.constant 0 : index
    %c0_10 = arith.constant 0 : index
    %c0_11 = arith.constant 0 : index
    %9 = vector.load %arg1[%c0_9, %c0_10, %c0_11] : memref<5x16x128xbf16, #tpu.memory_space<vmem>>, vector<5x16x128xbf16>
    %10 = vector.shape_cast %9 : vector<5x16x128xbf16> to vector<80x128xbf16>
    %c0_12 = arith.constant 0 : index
    %c0_13 = arith.constant 0 : index
    %11 = vector.load %arg13[%c0_12, %c0_13] : memref<128x384xbf16, #tpu.memory_space<vmem>>, vector<128x384xbf16>
    %cst_14 = arith.constant dense<0.000000e+00> : vector<80x384xf32>
    %12 = tpu.matmul %10, %11, %cst_14 {dimension_numbers = #tpu.dot_dimension_numbers<[1], [0], [0], [1], [0, 0, 1, 1], [], []>} : vector<80x128xbf16>, vector<128x384xbf16>, vector<80x384xf32> -> vector<80x384xf32>
    %c0_15 = arith.constant 0 : index
    %c0_16 = arith.constant 0 : index
    %13 = vector.load %arg15[%c0_15, %c0_16] : memref<1x384xf32, #tpu.memory_space<vmem>>, vector<1x384xf32>
    %14 = vector.broadcast %13 : vector<1x384xf32> to vector<80x384xf32>
    %15 = arith.addf %12, %14 : vector<80x384xf32>
    %16 = vector.shape_cast %15 : vector<80x384xf32> to vector<5x16x384xf32>
    %c0_17 = arith.constant 0 : index
    %c0_18 = arith.constant 0 : index
    %c0_19 = arith.constant 0 : index
    %17 = vector.load %arg23[%c0_17, %c0_18, %c0_19] : memref<5x16x384xf32, #tpu.memory_space<vmem>>, vector<5x16x384xf32>
    tpu.vector_store %arg23[%c0_17, %c0_18, %c0_19], %16 {strides = array<i32>} : memref<5x16x384xf32, #tpu.memory_space<vmem>>, vector<5x16x384xf32>,
    %cst_20 = arith.constant 0.000000e+00 : f32
    %18 = vector.broadcast %cst_20 : f32 to vector<16x128xf32>
    %c0_21 = arith.constant 0 : index
    %c0_22 = arith.constant 0 : index
    %c0_23 = arith.constant 0 : index
    %19 = vector.load %arg22[%c0_21, %c0_22, %c0_23] : memref<8x16x384xf32, #tpu.memory_space<vmem>>, vector<1x16x384xf32>
    %20 = vector.shape_cast %19 : vector<1x16x384xf32> to vector<16x384xf32>
    %21 = arith.truncf %18 : vector<16x128xf32> to vector<16x128xbf16>
    %c0_24 = arith.constant 0 : index
    %c0_25 = arith.constant 0 : index
    %22 = vector.load %arg4[%c0_24, %c0_25] : memref<128x384xbf16, #tpu.memory_space<vmem>>, vector<128x384xbf16>
    %cst_26 = arith.constant dense<0.000000e+00> : vector<16x384xf32>
    %23 = tpu.matmul %21, %22, %cst_26 {dimension_numbers = #tpu.dot_dimension_numbers<[1], [0], [0], [1], [0, 0, 1, 1], [], []>} : vector<16x128xbf16>, vector<128x384xbf16>, vector<16x384xf32> -> vector<16x384xf32>
    %24 = vector.extract_strided_slice %20 {offsets = [0, 0], sizes = [16, 128], strides = [1, 1]} : vector<16x384xf32> to vector<16x128xf32>
    %25 = vector.extract_strided_slice %23 {offsets = [0, 0], sizes = [16, 128], strides = [1, 1]} : vector<16x384xf32> to vector<16x128xf32>
    %26 = arith.addf %24, %25 : vector<16x128xf32>
    %27 = arith.negf %26 : vector<16x128xf32>
    %28 = math.exp %27 : vector<16x128xf32>
    %cst_27 = arith.constant 1.000000e+00 : f32
    %29 = vector.broadcast %cst_27 : f32 to vector<16x128xf32>
    %30 = arith.addf %29, %28 : vector<16x128xf32>
    %31 = arith.divf %29, %30 : vector<16x128xf32>
    %32 = vector.extract_strided_slice %20 {offsets = [0, 128], sizes = [16, 128], strides = [1, 1]} : vector<16x384xf32> to vector<16x128xf32>
    %33 = vector.extract_strided_slice %23 {offsets = [0, 128], sizes = [16, 128], strides = [1, 1]} : vector<16x384xf32> to vector<16x128xf32>
    %34 = arith.addf %32, %33 : vector<16x128xf32>
    %35 = arith.negf %34 : vector<16x128xf32>
    %36 = math.exp %35 : vector<16x128xf32>
    %cst_28 = arith.constant 1.000000e+00 : f32
    %37 = vector.broadcast %cst_28 : f32 to vector<16x128xf32>
    %38 = arith.addf %37, %36 : vector<16x128xf32>
    %39 = arith.divf %37, %38 : vector<16x128xf32>
    %40 = vector.extract_strided_slice %20 {offsets = [0, 256], sizes = [16, 128], strides = [1, 1]} : vector<16x384xf32> to vector<16x128xf32>
    %41 = vector.extract_strided_slice %23 {offsets = [0, 256], sizes = [16, 128], strides = [1, 1]} : vector<16x384xf32> to vector<16x128xf32>
    %c0_29 = arith.constant 0 : index
    %c0_30 = arith.constant 0 : index
    %42 = vector.load %arg6[%c0_29, %c0_30] : memref<1x128xf32, #tpu.memory_space<vmem>>, vector<1x128xf32>
    %43 = vector.broadcast %42 : vector<1x128xf32> to vector<16x128xf32>
    %44 = arith.addf %41, %43 : vector<16x128xf32>
    %45 = arith.mulf %31, %44 : vector<16x128xf32>
    %46 = arith.addf %40, %45 : vector<16x128xf32>
    %47 = math.tanh %46 : vector<16x128xf32>
    %cst_31 = arith.constant 1.000000e+00 : f32
    %48 = vector.broadcast %cst_31 : f32 to vector<16x128xf32>
    %49 = arith.subf %48, %39 : vector<16x128xf32>
    %50 = arith.mulf %49, %47 : vector<16x128xf32>
    %51 = arith.mulf %39, %18 : vector<16x128xf32>
    %52 = arith.addf %50, %51 : vector<16x128xf32>
    %c0_32 = arith.constant 0 : index
    %c0_33 = arith.constant 0 : index
    %c0_34 = arith.constant 0 : index
    %53 = vector.load %arg2[%c0_32, %c0_33, %c0_34] : memref<8x16x1xf32, #tpu.memory_space<vmem>>, vector<1x16x1xf32>
    %54 = vector.shape_cast %53 : vector<1x16x1xf32> to vector<16x1xf32>
    %cst_35 = arith.constant 0.000000e+00 : f32
    %55 = vector.broadcast %cst_35 : f32 to vector<16x1xf32>
    %56 = arith.cmpf ogt, %54, %55 : vector<16x1xf32>
    %cst_36 = arith.constant 0.000000e+00 : f32
    %57 = vector.shape_cast %56 : vector<16x1xi1> to vector<16x1xi1>
    %58 = vector.broadcast %57 : vector<16x1xi1> to vector<16x128xi1>
    %59 = vector.broadcast %cst_36 : f32 to vector<16x128xf32>
    %60 = arith.select %58, %52, %59 : vector<16x128xi1>, vector<16x128xf32>
    %c0_37 = arith.constant 0 : index
    %c0_38 = arith.constant 0 : index
    %c0_39 = arith.constant 0 : index
    %61 = vector.load %arg20[%c0_37, %c0_38, %c0_39] : memref<8x16x128xf32, #tpu.memory_space<vmem>>, vector<1x16x128xf32>
    %62 = vector.shape_cast %61 : vector<1x16x128xf32> to vector<16x128xf32>
    %63 = vector.shape_cast %60 : vector<16x128xf32> to vector<1x16x128xf32>
    tpu.vector_store %arg20[%c0_37, %c0_38, %c0_39], %63 {strides = array<i32>} : memref<8x16x128xf32, #tpu.memory_space<vmem>>, vector<1x16x128xf32>,
    %64 = vector.shape_cast %56 : vector<16x1xi1> to vector<16x1xi1>
    %65 = vector.broadcast %64 : vector<16x1xi1> to vector<16x128xi1>
    %66 = arith.select %65, %52, %18 : vector<16x128xi1>, vector<16x128xf32>
    %c1 = arith.constant 1 : index
    %c0_40 = arith.constant 0 : index
    %c0_41 = arith.constant 0 : index
    %67 = vector.load %arg22[%c1, %c0_40, %c0_41] : memref<8x16x384xf32, #tpu.memory_space<vmem>>, vector<1x16x384xf32>
    %68 = vector.shape_cast %67 : vector<1x16x384xf32> to vector<16x384xf32>
    %69 = arith.truncf %66 : vector<16x128xf32> to vector<16x128xbf16>
    %c0_42 = arith.constant 0 : index
    %c0_43 = arith.constant 0 : index
    %70 = vector.load %arg4[%c0_42, %c0_43] : memref<128x384xbf16, #tpu.memory_space<vmem>>, vector<128x384xbf16>
    %cst_44 = arith.constant dense<0.000000e+00> : vector<16x384xf32>
    %71 = tpu.matmul %69, %70, %cst_44 {dimension_numbers = #tpu.dot_dimension_numbers<[1], [0], [0], [1], [0, 0, 1, 1], [], []>} : vector<16x128xbf16>, vector<128x384xbf16>, vector<16x384xf32> -> vector<16x384xf32>
    %72 = vector.extract_strided_slice %68 {offsets = [0, 0], sizes = [16, 128], strides = [1, 1]} : vector<16x384xf32> to vector<16x128xf32>
    %73 = vector.extract_strided_slice %71 {offsets = [0, 0], sizes = [16, 128], strides = [1, 1]} : vector<16x384xf32> to vector<16x128xf32>
    %74 = arith.addf %72, %73 : vector<16x128xf32>
    %75 = arith.negf %74 : vector<16x128xf32>
    %76 = math.exp %75 : vector<16x128xf32>
    %cst_45 = arith.constant 1.000000e+00 : f32
    %77 = vector.broadcast %cst_45 : f32 to vector<16x128xf32>
    %78 = arith.addf %77, %76 : vector<16x128xf32>
    %79 = arith.divf %77, %78 : vector<16x128xf32>
    %80 = vector.extract_strided_slice %68 {offsets = [0, 128], sizes = [16, 128], strides = [1, 1]} : vector<16x384xf32> to vector<16x128xf32>
    %81 = vector.extract_strided_slice %71 {offsets = [0, 128], sizes = [16, 128], strides = [1, 1]} : vector<16x384xf32> to vector<16x128xf32>
    %82 = arith.addf %80, %81 : vector<16x128xf32>
    %83 = arith.negf %82 : vector<16x128xf32>
    %84 = math.exp %83 : vector<16x128xf32>
    %cst_46 = arith.constant 1.000000e+00 : f32
    %85 = vector.broadcast %cst_46 : f32 to vector<16x128xf32>
    %86 = arith.addf %85, %84 : vector<16x128xf32>
    %87 = arith.divf %85, %86 : vector<16x128xf32>
    %88 = vector.extract_strided_slice %68 {offsets = [0, 256], sizes = [16, 128], strides = [1, 1]} : vector<16x384xf32> to vector<16x128xf32>
    %89 = vector.extract_strided_slice %71 {offsets = [0, 256], sizes = [16, 128], strides = [1, 1]} : vector<16x384xf32> to vector<16x128xf32>
    %c0_47 = arith.constant 0 : index
    %c0_48 = arith.constant 0 : index
    %90 = vector.load %arg6[%c0_47, %c0_48] : memref<1x128xf32, #tpu.memory_space<vmem>>, vector<1x128xf32>
    %91 = vector.broadcast %90 : vector<1x128xf32> to vector<16x128xf32>
    %92 = arith.addf %89, %91 : vector<16x128xf32>
    %93 = arith.mulf %79, %92 : vector<16x128xf32>
    %94 = arith.addf %88, %93 : vector<16x128xf32>
    %95 = math.tanh %94 : vector<16x128xf32>
    %cst_49 = arith.constant 1.000000e+00 : f32
    %96 = vector.broadcast %cst_49 : f32 to vector<16x128xf32>
    %97 = arith.subf %96, %87 : vector<16x128xf32>
    %98 = arith.mulf %97, %95 : vector<16x128xf32>
    %99 = arith.mulf %87, %66 : vector<16x128xf32>
    %100 = arith.addf %98, %99 : vector<16x128xf32>
    %c1_50 = arith.constant 1 : index
    %c0_51 = arith.constant 0 : index
    %c0_52 = arith.constant 0 : index
    %101 = vector.load %arg2[%c1_50, %c0_51, %c0_52] : memref<8x16x1xf32, #tpu.memory_space<vmem>>, vector<1x16x1xf32>
    %102 = vector.shape_cast %101 : vector<1x16x1xf32> to vector<16x1xf32>
    %cst_53 = arith.constant 0.000000e+00 : f32
    %103 = vector.broadcast %cst_53 : f32 to vector<16x1xf32>
    %104 = arith.cmpf ogt, %102, %103 : vector<16x1xf32>
    %cst_54 = arith.constant 0.000000e+00 : f32
    %105 = vector.shape_cast %104 : vector<16x1xi1> to vector<16x1xi1>
    %106 = vector.broadcast %105 : vector<16x1xi1> to vector<16x128xi1>
    %107 = vector.broadcast %cst_54 : f32 to vector<16x128xf32>
    %108 = arith.select %106, %100, %107 : vector<16x128xi1>, vector<16x128xf32>
    %c1_55 = arith.constant 1 : index
    %c0_56 = arith.constant 0 : index
    %c0_57 = arith.constant 0 : index
    %109 = vector.load %arg20[%c1_55, %c0_56, %c0_57] : memref<8x16x128xf32, #tpu.memory_space<vmem>>, vector<1x16x128xf32>
    %110 = vector.shape_cast %109 : vector<1x16x128xf32> to vector<16x128xf32>
    %111 = vector.shape_cast %108 : vector<16x128xf32> to vector<1x16x128xf32>
    tpu.vector_store %arg20[%c1_55, %c0_56, %c0_57], %111 {strides = array<i32>} : memref<8x16x128xf32, #tpu.memory_space<vmem>>, vector<1x16x128xf32>,
    %112 = vector.shape_cast %104 : vector<16x1xi1> to vector<16x1xi1>
    %113 = vector.broadcast %112 : vector<16x1xi1> to vector<16x128xi1>
    %114 = arith.select %113, %100, %66 : vector<16x128xi1>, vector<16x128xf32>
    %c2 = arith.constant 2 : index
    %c0_58 = arith.constant 0 : index
    %c0_59 = arith.constant 0 : index
    %115 = vector.load %arg22[%c2, %c0_58, %c0_59] : memref<8x16x384xf32, #tpu.memory_space<vmem>>, vector<1x16x384xf32>
    %116 = vector.shape_cast %115 : vector<1x16x384xf32> to vector<16x384xf32>
    %117 = arith.truncf %114 : vector<16x128xf32> to vector<16x128xbf16>
    %c0_60 = arith.constant 0 : index
    %c0_61 = arith.constant 0 : index
    %118 = vector.load %arg4[%c0_60, %c0_61] : memref<128x384xbf16, #tpu.memory_space<vmem>>, vector<128x384xbf16>
    %cst_62 = arith.constant dense<0.000000e+00> : vector<16x384xf32>
    %119 = tpu.matmul %117, %118, %cst_62 {dimension_numbers = #tpu.dot_dimension_numbers<[1], [0], [0], [1], [0, 0, 1, 1], [], []>} : vector<16x128xbf16>, vector<128x384xbf16>, vector<16x384xf32> -> vector<16x384xf32>
    %120 = vector.extract_strided_slice %116 {offsets = [0, 0], sizes = [16, 128], strides = [1, 1]} : vector<16x384xf32> to vector<16x128xf32>
    %121 = vector.extract_strided_slice %119 {offsets = [0, 0], sizes = [16, 128], strides = [1, 1]} : vector<16x384xf32> to vector<16x128xf32>
    %122 = arith.addf %120, %121 : vector<16x128xf32>
    %123 = arith.negf %122 : vector<16x128xf32>
    %124 = math.exp %123 : vector<16x128xf32>
    %cst_63 = arith.constant 1.000000e+00 : f32
    %125 = vector.broadcast %cst_63 : f32 to vector<16x128xf32>
    %126 = arith.addf %125, %124 : vector<16x128xf32>
    %127 = arith.divf %125, %126 : vector<16x128xf32>
    %128 = vector.extract_strided_slice %116 {offsets = [0, 128], sizes = [16, 128], strides = [1, 1]} : vector<16x384xf32> to vector<16x128xf32>
    %129 = vector.extract_strided_slice %119 {offsets = [0, 128], sizes = [16, 128], strides = [1, 1]} : vector<16x384xf32> to vector<16x128xf32>
    %130 = arith.addf %128, %129 : vector<16x128xf32>
    %131 = arith.negf %130 : vector<16x128xf32>
    %132 = math.exp %131 : vector<16x128xf32>
    %cst_64 = arith.constant 1.000000e+00 : f32
    %133 = vector.broadcast %cst_64 : f32 to vector<16x128xf32>
    %134 = arith.addf %133, %132 : vector<16x128xf32>
    %135 = arith.divf %133, %134 : vector<16x128xf32>
    %136 = vector.extract_strided_slice %116 {offsets = [0, 256], sizes = [16, 128], strides = [1, 1]} : vector<16x384xf32> to vector<16x128xf32>
    %137 = vector.extract_strided_slice %119 {offsets = [0, 256], sizes = [16, 128], strides = [1, 1]} : vector<16x384xf32> to vector<16x128xf32>
    %c0_65 = arith.constant 0 : index
    %c0_66 = arith.constant 0 : index
    %138 = vector.load %arg6[%c0_65, %c0_66] : memref<1x128xf32, #tpu.memory_space<vmem>>, vector<1x128xf32>
    %139 = vector.broadcast %138 : vector<1x128xf32> to vector<16x128xf32>
    %140 = arith.addf %137, %139 : vector<16x128xf32>
    %141 = arith.mulf %127, %140 : vector<16x128xf32>
    %142 = arith.addf %136, %141 : vector<16x128xf32>
    %143 = math.tanh %142 : vector<16x128xf32>
    %cst_67 = arith.constant 1.000000e+00 : f32
    %144 = vector.broadcast %cst_67 : f32 to vector<16x128xf32>
    %145 = arith.subf %144, %135 : vector<16x128xf32>
    %146 = arith.mulf %145, %143 : vector<16x128xf32>
    %147 = arith.mulf %135, %114 : vector<16x128xf32>
    %148 = arith.addf %146, %147 : vector<16x128xf32>
    %c2_68 = arith.constant 2 : index
    %c0_69 = arith.constant 0 : index
    %c0_70 = arith.constant 0 : index
    %149 = vector.load %arg2[%c2_68, %c0_69, %c0_70] : memref<8x16x1xf32, #tpu.memory_space<vmem>>, vector<1x16x1xf32>
    %150 = vector.shape_cast %149 : vector<1x16x1xf32> to vector<16x1xf32>
    %cst_71 = arith.constant 0.000000e+00 : f32
    %151 = vector.broadcast %cst_71 : f32 to vector<16x1xf32>
    %152 = arith.cmpf ogt, %150, %151 : vector<16x1xf32>
    %cst_72 = arith.constant 0.000000e+00 : f32
    %153 = vector.shape_cast %152 : vector<16x1xi1> to vector<16x1xi1>
    %154 = vector.broadcast %153 : vector<16x1xi1> to vector<16x128xi1>
    %155 = vector.broadcast %cst_72 : f32 to vector<16x128xf32>
    %156 = arith.select %154, %148, %155 : vector<16x128xi1>, vector<16x128xf32>
    %c2_73 = arith.constant 2 : index
    %c0_74 = arith.constant 0 : index
    %c0_75 = arith.constant 0 : index
    %157 = vector.load %arg20[%c2_73, %c0_74, %c0_75] : memref<8x16x128xf32, #tpu.memory_space<vmem>>, vector<1x16x128xf32>
    %158 = vector.shape_cast %157 : vector<1x16x128xf32> to vector<16x128xf32>
    %159 = vector.shape_cast %156 : vector<16x128xf32> to vector<1x16x128xf32>
    tpu.vector_store %arg20[%c2_73, %c0_74, %c0_75], %159 {strides = array<i32>} : memref<8x16x128xf32, #tpu.memory_space<vmem>>, vector<1x16x128xf32>,
    %160 = vector.shape_cast %152 : vector<16x1xi1> to vector<16x1xi1>
    %161 = vector.broadcast %160 : vector<16x1xi1> to vector<16x128xi1>
    %162 = arith.select %161, %148, %114 : vector<16x128xi1>, vector<16x128xf32>
    %c3 = arith.constant 3 : index
    %c0_76 = arith.constant 0 : index
    %c0_77 = arith.constant 0 : index
    %163 = vector.load %arg22[%c3, %c0_76, %c0_77] : memref<8x16x384xf32, #tpu.memory_space<vmem>>, vector<1x16x384xf32>
    %164 = vector.shape_cast %163 : vector<1x16x384xf32> to vector<16x384xf32>
    %165 = arith.truncf %162 : vector<16x128xf32> to vector<16x128xbf16>
    %c0_78 = arith.constant 0 : index
    %c0_79 = arith.constant 0 : index
    %166 = vector.load %arg4[%c0_78, %c0_79] : memref<128x384xbf16, #tpu.memory_space<vmem>>, vector<128x384xbf16>
    %cst_80 = arith.constant dense<0.000000e+00> : vector<16x384xf32>
    %167 = tpu.matmul %165, %166, %cst_80 {dimension_numbers = #tpu.dot_dimension_numbers<[1], [0], [0], [1], [0, 0, 1, 1], [], []>} : vector<16x128xbf16>, vector<128x384xbf16>, vector<16x384xf32> -> vector<16x384xf32>
    %168 = vector.extract_strided_slice %164 {offsets = [0, 0], sizes = [16, 128], strides = [1, 1]} : vector<16x384xf32> to vector<16x128xf32>
    %169 = vector.extract_strided_slice %167 {offsets = [0, 0], sizes = [16, 128], strides = [1, 1]} : vector<16x384xf32> to vector<16x128xf32>
    %170 = arith.addf %168, %169 : vector<16x128xf32>
    %171 = arith.negf %170 : vector<16x128xf32>
    %172 = math.exp %171 : vector<16x128xf32>
    %cst_81 = arith.constant 1.000000e+00 : f32
    %173 = vector.broadcast %cst_81 : f32 to vector<16x128xf32>
    %174 = arith.addf %173, %172 : vector<16x128xf32>
    %175 = arith.divf %173, %174 : vector<16x128xf32>
    %176 = vector.extract_strided_slice %164 {offsets = [0, 128], sizes = [16, 128], strides = [1, 1]} : vector<16x384xf32> to vector<16x128xf32>
    %177 = vector.extract_strided_slice %167 {offsets = [0, 128], sizes = [16, 128], strides = [1, 1]} : vector<16x384xf32> to vector<16x128xf32>
    %178 = arith.addf %176, %177 : vector<16x128xf32>
    %179 = arith.negf %178 : vector<16x128xf32>
    %180 = math.exp %179 : vector<16x128xf32>
    %cst_82 = arith.constant 1.000000e+00 : f32
    %181 = vector.broadcast %cst_82 : f32 to vector<16x128xf32>
    %182 = arith.addf %181, %180 : vector<16x128xf32>
    %183 = arith.divf %181, %182 : vector<16x128xf32>
    %184 = vector.extract_strided_slice %164 {offsets = [0, 256], sizes = [16, 128], strides = [1, 1]} : vector<16x384xf32> to vector<16x128xf32>
    %185 = vector.extract_strided_slice %167 {offsets = [0, 256], sizes = [16, 128], strides = [1, 1]} : vector<16x384xf32> to vector<16x128xf32>
    %c0_83 = arith.constant 0 : index
    %c0_84 = arith.constant 0 : index
    %186 = vector.load %arg6[%c0_83, %c0_84] : memref<1x128xf32, #tpu.memory_space<vmem>>, vector<1x128xf32>
    %187 = vector.broadcast %186 : vector<1x128xf32> to vector<16x128xf32>
    %188 = arith.addf %185, %187 : vector<16x128xf32>
    %189 = arith.mulf %175, %188 : vector<16x128xf32>
    %190 = arith.addf %184, %189 : vector<16x128xf32>
    %191 = math.tanh %190 : vector<16x128xf32>
    %cst_85 = arith.constant 1.000000e+00 : f32
    %192 = vector.broadcast %cst_85 : f32 to vector<16x128xf32>
    %193 = arith.subf %192, %183 : vector<16x128xf32>
    %194 = arith.mulf %193, %191 : vector<16x128xf32>
    %195 = arith.mulf %183, %162 : vector<16x128xf32>
    %196 = arith.addf %194, %195 : vector<16x128xf32>
    %c3_86 = arith.constant 3 : index
    %c0_87 = arith.constant 0 : index
    %c0_88 = arith.constant 0 : index
    %197 = vector.load %arg2[%c3_86, %c0_87, %c0_88] : memref<8x16x1xf32, #tpu.memory_space<vmem>>, vector<1x16x1xf32>
    %198 = vector.shape_cast %197 : vector<1x16x1xf32> to vector<16x1xf32>
    %cst_89 = arith.constant 0.000000e+00 : f32
    %199 = vector.broadcast %cst_89 : f32 to vector<16x1xf32>
    %200 = arith.cmpf ogt, %198, %199 : vector<16x1xf32>
    %cst_90 = arith.constant 0.000000e+00 : f32
    %201 = vector.shape_cast %200 : vector<16x1xi1> to vector<16x1xi1>
    %202 = vector.broadcast %201 : vector<16x1xi1> to vector<16x128xi1>
    %203 = vector.broadcast %cst_90 : f32 to vector<16x128xf32>
    %204 = arith.select %202, %196, %203 : vector<16x128xi1>, vector<16x128xf32>
    %c3_91 = arith.constant 3 : index
    %c0_92 = arith.constant 0 : index
    %c0_93 = arith.constant 0 : index
    %205 = vector.load %arg20[%c3_91, %c0_92, %c0_93] : memref<8x16x128xf32, #tpu.memory_space<vmem>>, vector<1x16x128xf32>
    %206 = vector.shape_cast %205 : vector<1x16x128xf32> to vector<16x128xf32>
    %207 = vector.shape_cast %204 : vector<16x128xf32> to vector<1x16x128xf32>
    tpu.vector_store %arg20[%c3_91, %c0_92, %c0_93], %207 {strides = array<i32>} : memref<8x16x128xf32, #tpu.memory_space<vmem>>, vector<1x16x128xf32>,
    %208 = vector.shape_cast %200 : vector<16x1xi1> to vector<16x1xi1>
    %209 = vector.broadcast %208 : vector<16x1xi1> to vector<16x128xi1>
    %210 = arith.select %209, %196, %162 : vector<16x128xi1>, vector<16x128xf32>
    %c4 = arith.constant 4 : index
    %c0_94 = arith.constant 0 : index
    %c0_95 = arith.constant 0 : index
    %211 = vector.load %arg22[%c4, %c0_94, %c0_95] : memref<8x16x384xf32, #tpu.memory_space<vmem>>, vector<1x16x384xf32>
    %212 = vector.shape_cast %211 : vector<1x16x384xf32> to vector<16x384xf32>
    %213 = arith.truncf %210 : vector<16x128xf32> to vector<16x128xbf16>
    %c0_96 = arith.constant 0 : index
    %c0_97 = arith.constant 0 : index
    %214 = vector.load %arg4[%c0_96, %c0_97] : memref<128x384xbf16, #tpu.memory_space<vmem>>, vector<128x384xbf16>
    %cst_98 = arith.constant dense<0.000000e+00> : vector<16x384xf32>
    %215 = tpu.matmul %213, %214, %cst_98 {dimension_numbers = #tpu.dot_dimension_numbers<[1], [0], [0], [1], [0, 0, 1, 1], [], []>} : vector<16x128xbf16>, vector<128x384xbf16>, vector<16x384xf32> -> vector<16x384xf32>
    %216 = vector.extract_strided_slice %212 {offsets = [0, 0], sizes = [16, 128], strides = [1, 1]} : vector<16x384xf32> to vector<16x128xf32>
    %217 = vector.extract_strided_slice %215 {offsets = [0, 0], sizes = [16, 128], strides = [1, 1]} : vector<16x384xf32> to vector<16x128xf32>
    %218 = arith.addf %216, %217 : vector<16x128xf32>
    %219 = arith.negf %218 : vector<16x128xf32>
    %220 = math.exp %219 : vector<16x128xf32>
    %cst_99 = arith.constant 1.000000e+00 : f32
    %221 = vector.broadcast %cst_99 : f32 to vector<16x128xf32>
    %222 = arith.addf %221, %220 : vector<16x128xf32>
    %223 = arith.divf %221, %222 : vector<16x128xf32>
    %224 = vector.extract_strided_slice %212 {offsets = [0, 128], sizes = [16, 128], strides = [1, 1]} : vector<16x384xf32> to vector<16x128xf32>
    %225 = vector.extract_strided_slice %215 {offsets = [0, 128], sizes = [16, 128], strides = [1, 1]} : vector<16x384xf32> to vector<16x128xf32>
    %226 = arith.addf %224, %225 : vector<16x128xf32>
    %227 = arith.negf %226 : vector<16x128xf32>
    %228 = math.exp %227 : vector<16x128xf32>
    %cst_100 = arith.constant 1.000000e+00 : f32
    %229 = vector.broadcast %cst_100 : f32 to vector<16x128xf32>
    %230 = arith.addf %229, %228 : vector<16x128xf32>
    %231 = arith.divf %229, %230 : vector<16x128xf32>
    %232 = vector.extract_strided_slice %212 {offsets = [0, 256], sizes = [16, 128], strides = [1, 1]} : vector<16x384xf32> to vector<16x128xf32>
    %233 = vector.extract_strided_slice %215 {offsets = [0, 256], sizes = [16, 128], strides = [1, 1]} : vector<16x384xf32> to vector<16x128xf32>
    %c0_101 = arith.constant 0 : index
    %c0_102 = arith.constant 0 : index
    %234 = vector.load %arg6[%c0_101, %c0_102] : memref<1x128xf32, #tpu.memory_space<vmem>>, vector<1x128xf32>
    %235 = vector.broadcast %234 : vector<1x128xf32> to vector<16x128xf32>
    %236 = arith.addf %233, %235 : vector<16x128xf32>
    %237 = arith.mulf %223, %236 : vector<16x128xf32>
    %238 = arith.addf %232, %237 : vector<16x128xf32>
    %239 = math.tanh %238 : vector<16x128xf32>
    %cst_103 = arith.constant 1.000000e+00 : f32
    %240 = vector.broadcast %cst_103 : f32 to vector<16x128xf32>
    %241 = arith.subf %240, %231 : vector<16x128xf32>
    %242 = arith.mulf %241, %239 : vector<16x128xf32>
    %243 = arith.mulf %231, %210 : vector<16x128xf32>
    %244 = arith.addf %242, %243 : vector<16x128xf32>
    %c4_104 = arith.constant 4 : index
    %c0_105 = arith.constant 0 : index
    %c0_106 = arith.constant 0 : index
    %245 = vector.load %arg2[%c4_104, %c0_105, %c0_106] : memref<8x16x1xf32, #tpu.memory_space<vmem>>, vector<1x16x1xf32>
    %246 = vector.shape_cast %245 : vector<1x16x1xf32> to vector<16x1xf32>
    %cst_107 = arith.constant 0.000000e+00 : f32
    %247 = vector.broadcast %cst_107 : f32 to vector<16x1xf32>
    %248 = arith.cmpf ogt, %246, %247 : vector<16x1xf32>
    %cst_108 = arith.constant 0.000000e+00 : f32
    %249 = vector.shape_cast %248 : vector<16x1xi1> to vector<16x1xi1>
    %250 = vector.broadcast %249 : vector<16x1xi1> to vector<16x128xi1>
    %251 = vector.broadcast %cst_108 : f32 to vector<16x128xf32>
    %252 = arith.select %250, %244, %251 : vector<16x128xi1>, vector<16x128xf32>
    %c4_109 = arith.constant 4 : index
    %c0_110 = arith.constant 0 : index
    %c0_111 = arith.constant 0 : index
    %253 = vector.load %arg20[%c4_109, %c0_110, %c0_111] : memref<8x16x128xf32, #tpu.memory_space<vmem>>, vector<1x16x128xf32>
    %254 = vector.shape_cast %253 : vector<1x16x128xf32> to vector<16x128xf32>
    %255 = vector.shape_cast %252 : vector<16x128xf32> to vector<1x16x128xf32>
    tpu.vector_store %arg20[%c4_109, %c0_110, %c0_111], %255 {strides = array<i32>} : memref<8x16x128xf32, #tpu.memory_space<vmem>>, vector<1x16x128xf32>,
    %256 = vector.shape_cast %248 : vector<16x1xi1> to vector<16x1xi1>
    %257 = vector.broadcast %256 : vector<16x1xi1> to vector<16x128xi1>
    %258 = arith.select %257, %244, %210 : vector<16x128xi1>, vector<16x128xf32>
    %c5 = arith.constant 5 : index
    %c0_112 = arith.constant 0 : index
    %c0_113 = arith.constant 0 : index
    %259 = vector.load %arg22[%c5, %c0_112, %c0_113] : memref<8x16x384xf32, #tpu.memory_space<vmem>>, vector<1x16x384xf32>
    %260 = vector.shape_cast %259 : vector<1x16x384xf32> to vector<16x384xf32>
    %261 = arith.truncf %258 : vector<16x128xf32> to vector<16x128xbf16>
    %c0_114 = arith.constant 0 : index
    %c0_115 = arith.constant 0 : index
    %262 = vector.load %arg4[%c0_114, %c0_115] : memref<128x384xbf16, #tpu.memory_space<vmem>>, vector<128x384xbf16>
    %cst_116 = arith.constant dense<0.000000e+00> : vector<16x384xf32>
    %263 = tpu.matmul %261, %262, %cst_116 {dimension_numbers = #tpu.dot_dimension_numbers<[1], [0], [0], [1], [0, 0, 1, 1], [], []>} : vector<16x128xbf16>, vector<128x384xbf16>, vector<16x384xf32> -> vector<16x384xf32>
    %264 = vector.extract_strided_slice %260 {offsets = [0, 0], sizes = [16, 128], strides = [1, 1]} : vector<16x384xf32> to vector<16x128xf32>
    %265 = vector.extract_strided_slice %263 {offsets = [0, 0], sizes = [16, 128], strides = [1, 1]} : vector<16x384xf32> to vector<16x128xf32>
    %266 = arith.addf %264, %265 : vector<16x128xf32>
    %267 = arith.negf %266 : vector<16x128xf32>
    %268 = math.exp %267 : vector<16x128xf32>
    %cst_117 = arith.constant 1.000000e+00 : f32
    %269 = vector.broadcast %cst_117 : f32 to vector<16x128xf32>
    %270 = arith.addf %269, %268 : vector<16x128xf32>
    %271 = arith.divf %269, %270 : vector<16x128xf32>
    %272 = vector.extract_strided_slice %260 {offsets = [0, 128], sizes = [16, 128], strides = [1, 1]} : vector<16x384xf32> to vector<16x128xf32>
    %273 = vector.extract_strided_slice %263 {offsets = [0, 128], sizes = [16, 128], strides = [1, 1]} : vector<16x384xf32> to vector<16x128xf32>
    %274 = arith.addf %272, %273 : vector<16x128xf32>
    %275 = arith.negf %274 : vector<16x128xf32>
    %276 = math.exp %275 : vector<16x128xf32>
    %cst_118 = arith.constant 1.000000e+00 : f32
    %277 = vector.broadcast %cst_118 : f32 to vector<16x128xf32>
    %278 = arith.addf %277, %276 : vector<16x128xf32>
    %279 = arith.divf %277, %278 : vector<16x128xf32>
    %280 = vector.extract_strided_slice %260 {offsets = [0, 256], sizes = [16, 128], strides = [1, 1]} : vector<16x384xf32> to vector<16x128xf32>
    %281 = vector.extract_strided_slice %263 {offsets = [0, 256], sizes = [16, 128], strides = [1, 1]} : vector<16x384xf32> to vector<16x128xf32>
    %c0_119 = arith.constant 0 : index
    %c0_120 = arith.constant 0 : index
    %282 = vector.load %arg6[%c0_119, %c0_120] : memref<1x128xf32, #tpu.memory_space<vmem>>, vector<1x128xf32>
    %283 = vector.broadcast %282 : vector<1x128xf32> to vector<16x128xf32>
    %284 = arith.addf %281, %283 : vector<16x128xf32>
    %285 = arith.mulf %271, %284 : vector<16x128xf32>
    %286 = arith.addf %280, %285 : vector<16x128xf32>
    %287 = math.tanh %286 : vector<16x128xf32>
    %cst_121 = arith.constant 1.000000e+00 : f32
    %288 = vector.broadcast %cst_121 : f32 to vector<16x128xf32>
    %289 = arith.subf %288, %279 : vector<16x128xf32>
    %290 = arith.mulf %289, %287 : vector<16x128xf32>
    %291 = arith.mulf %279, %258 : vector<16x128xf32>
    %292 = arith.addf %290, %291 : vector<16x128xf32>
    %c5_122 = arith.constant 5 : index
    %c0_123 = arith.constant 0 : index
    %c0_124 = arith.constant 0 : index
    %293 = vector.load %arg2[%c5_122, %c0_123, %c0_124] : memref<8x16x1xf32, #tpu.memory_space<vmem>>, vector<1x16x1xf32>
    %294 = vector.shape_cast %293 : vector<1x16x1xf32> to vector<16x1xf32>
    %cst_125 = arith.constant 0.000000e+00 : f32
    %295 = vector.broadcast %cst_125 : f32 to vector<16x1xf32>
    %296 = arith.cmpf ogt, %294, %295 : vector<16x1xf32>
    %cst_126 = arith.constant 0.000000e+00 : f32
    %297 = vector.shape_cast %296 : vector<16x1xi1> to vector<16x1xi1>
    %298 = vector.broadcast %297 : vector<16x1xi1> to vector<16x128xi1>
    %299 = vector.broadcast %cst_126 : f32 to vector<16x128xf32>
    %300 = arith.select %298, %292, %299 : vector<16x128xi1>, vector<16x128xf32>
    %c5_127 = arith.constant 5 : index
    %c0_128 = arith.constant 0 : index
    %c0_129 = arith.constant 0 : index
    %301 = vector.load %arg20[%c5_127, %c0_128, %c0_129] : memref<8x16x128xf32, #tpu.memory_space<vmem>>, vector<1x16x128xf32>
    %302 = vector.shape_cast %301 : vector<1x16x128xf32> to vector<16x128xf32>
    %303 = vector.shape_cast %300 : vector<16x128xf32> to vector<1x16x128xf32>
    tpu.vector_store %arg20[%c5_127, %c0_128, %c0_129], %303 {strides = array<i32>} : memref<8x16x128xf32, #tpu.memory_space<vmem>>, vector<1x16x128xf32>,
    %304 = vector.shape_cast %296 : vector<16x1xi1> to vector<16x1xi1>
    %305 = vector.broadcast %304 : vector<16x1xi1> to vector<16x128xi1>
    %306 = arith.select %305, %292, %258 : vector<16x128xi1>, vector<16x128xf32>
    %c6 = arith.constant 6 : index
    %c0_130 = arith.constant 0 : index
    %c0_131 = arith.constant 0 : index
    %307 = vector.load %arg22[%c6, %c0_130, %c0_131] : memref<8x16x384xf32, #tpu.memory_space<vmem>>, vector<1x16x384xf32>
    %308 = vector.shape_cast %307 : vector<1x16x384xf32> to vector<16x384xf32>
    %309 = arith.truncf %306 : vector<16x128xf32> to vector<16x128xbf16>
    %c0_132 = arith.constant 0 : index
    %c0_133 = arith.constant 0 : index
    %310 = vector.load %arg4[%c0_132, %c0_133] : memref<128x384xbf16, #tpu.memory_space<vmem>>, vector<128x384xbf16>
    %cst_134 = arith.constant dense<0.000000e+00> : vector<16x384xf32>
    %311 = tpu.matmul %309, %310, %cst_134 {dimension_numbers = #tpu.dot_dimension_numbers<[1], [0], [0], [1], [0, 0, 1, 1], [], []>} : vector<16x128xbf16>, vector<128x384xbf16>, vector<16x384xf32> -> vector<16x384xf32>
    %312 = vector.extract_strided_slice %308 {offsets = [0, 0], sizes = [16, 128], strides = [1, 1]} : vector<16x384xf32> to vector<16x128xf32>
    %313 = vector.extract_strided_slice %311 {offsets = [0, 0], sizes = [16, 128], strides = [1, 1]} : vector<16x384xf32> to vector<16x128xf32>
    %314 = arith.addf %312, %313 : vector<16x128xf32>
    %315 = arith.negf %314 : vector<16x128xf32>
    %316 = math.exp %315 : vector<16x128xf32>
    %cst_135 = arith.constant 1.000000e+00 : f32
    %317 = vector.broadcast %cst_135 : f32 to vector<16x128xf32>
    %318 = arith.addf %317, %316 : vector<16x128xf32>
    %319 = arith.divf %317, %318 : vector<16x128xf32>
    %320 = vector.extract_strided_slice %308 {offsets = [0, 128], sizes = [16, 128], strides = [1, 1]} : vector<16x384xf32> to vector<16x128xf32>
    %321 = vector.extract_strided_slice %311 {offsets = [0, 128], sizes = [16, 128], strides = [1, 1]} : vector<16x384xf32> to vector<16x128xf32>
    %322 = arith.addf %320, %321 : vector<16x128xf32>
    %323 = arith.negf %322 : vector<16x128xf32>
    %324 = math.exp %323 : vector<16x128xf32>
    %cst_136 = arith.constant 1.000000e+00 : f32
    %325 = vector.broadcast %cst_136 : f32 to vector<16x128xf32>
    %326 = arith.addf %325, %324 : vector<16x128xf32>
    %327 = arith.divf %325, %326 : vector<16x128xf32>
    %328 = vector.extract_strided_slice %308 {offsets = [0, 256], sizes = [16, 128], strides = [1, 1]} : vector<16x384xf32> to vector<16x128xf32>
    %329 = vector.extract_strided_slice %311 {offsets = [0, 256], sizes = [16, 128], strides = [1, 1]} : vector<16x384xf32> to vector<16x128xf32>
    %c0_137 = arith.constant 0 : index
    %c0_138 = arith.constant 0 : index
    %330 = vector.load %arg6[%c0_137, %c0_138] : memref<1x128xf32, #tpu.memory_space<vmem>>, vector<1x128xf32>
    %331 = vector.broadcast %330 : vector<1x128xf32> to vector<16x128xf32>
    %332 = arith.addf %329, %331 : vector<16x128xf32>
    %333 = arith.mulf %319, %332 : vector<16x128xf32>
    %334 = arith.addf %328, %333 : vector<16x128xf32>
    %335 = math.tanh %334 : vector<16x128xf32>
    %cst_139 = arith.constant 1.000000e+00 : f32
    %336 = vector.broadcast %cst_139 : f32 to vector<16x128xf32>
    %337 = arith.subf %336, %327 : vector<16x128xf32>
    %338 = arith.mulf %337, %335 : vector<16x128xf32>
    %339 = arith.mulf %327, %306 : vector<16x128xf32>
    %340 = arith.addf %338, %339 : vector<16x128xf32>
    %c6_140 = arith.constant 6 : index
    %c0_141 = arith.constant 0 : index
    %c0_142 = arith.constant 0 : index
    %341 = vector.load %arg2[%c6_140, %c0_141, %c0_142] : memref<8x16x1xf32, #tpu.memory_space<vmem>>, vector<1x16x1xf32>
    %342 = vector.shape_cast %341 : vector<1x16x1xf32> to vector<16x1xf32>
    %cst_143 = arith.constant 0.000000e+00 : f32
    %343 = vector.broadcast %cst_143 : f32 to vector<16x1xf32>
    %344 = arith.cmpf ogt, %342, %343 : vector<16x1xf32>
    %cst_144 = arith.constant 0.000000e+00 : f32
    %345 = vector.shape_cast %344 : vector<16x1xi1> to vector<16x1xi1>
    %346 = vector.broadcast %345 : vector<16x1xi1> to vector<16x128xi1>
    %347 = vector.broadcast %cst_144 : f32 to vector<16x128xf32>
    %348 = arith.select %346, %340, %347 : vector<16x128xi1>, vector<16x128xf32>
    %c6_145 = arith.constant 6 : index
    %c0_146 = arith.constant 0 : index
    %c0_147 = arith.constant 0 : index
    %349 = vector.load %arg20[%c6_145, %c0_146, %c0_147] : memref<8x16x128xf32, #tpu.memory_space<vmem>>, vector<1x16x128xf32>
    %350 = vector.shape_cast %349 : vector<1x16x128xf32> to vector<16x128xf32>
    %351 = vector.shape_cast %348 : vector<16x128xf32> to vector<1x16x128xf32>
    tpu.vector_store %arg20[%c6_145, %c0_146, %c0_147], %351 {strides = array<i32>} : memref<8x16x128xf32, #tpu.memory_space<vmem>>, vector<1x16x128xf32>,
    %352 = vector.shape_cast %344 : vector<16x1xi1> to vector<16x1xi1>
    %353 = vector.broadcast %352 : vector<16x1xi1> to vector<16x128xi1>
    %354 = arith.select %353, %340, %306 : vector<16x128xi1>, vector<16x128xf32>
    %c7 = arith.constant 7 : index
    %c0_148 = arith.constant 0 : index
    %c0_149 = arith.constant 0 : index
    %355 = vector.load %arg22[%c7, %c0_148, %c0_149] : memref<8x16x384xf32, #tpu.memory_space<vmem>>, vector<1x16x384xf32>
    %356 = vector.shape_cast %355 : vector<1x16x384xf32> to vector<16x384xf32>
    %357 = arith.truncf %354 : vector<16x128xf32> to vector<16x128xbf16>
    %c0_150 = arith.constant 0 : index
    %c0_151 = arith.constant 0 : index
    %358 = vector.load %arg4[%c0_150, %c0_151] : memref<128x384xbf16, #tpu.memory_space<vmem>>, vector<128x384xbf16>
    %cst_152 = arith.constant dense<0.000000e+00> : vector<16x384xf32>
    %359 = tpu.matmul %357, %358, %cst_152 {dimension_numbers = #tpu.dot_dimension_numbers<[1], [0], [0], [1], [0, 0, 1, 1], [], []>} : vector<16x128xbf16>, vector<128x384xbf16>, vector<16x384xf32> -> vector<16x384xf32>
    %360 = vector.extract_strided_slice %356 {offsets = [0, 0], sizes = [16, 128], strides = [1, 1]} : vector<16x384xf32> to vector<16x128xf32>
    %361 = vector.extract_strided_slice %359 {offsets = [0, 0], sizes = [16, 128], strides = [1, 1]} : vector<16x384xf32> to vector<16x128xf32>
    %362 = arith.addf %360, %361 : vector<16x128xf32>
    %363 = arith.negf %362 : vector<16x128xf32>
    %364 = math.exp %363 : vector<16x128xf32>
    %cst_153 = arith.constant 1.000000e+00 : f32
    %365 = vector.broadcast %cst_153 : f32 to vector<16x128xf32>
    %366 = arith.addf %365, %364 : vector<16x128xf32>
    %367 = arith.divf %365, %366 : vector<16x128xf32>
    %368 = vector.extract_strided_slice %356 {offsets = [0, 128], sizes = [16, 128], strides = [1, 1]} : vector<16x384xf32> to vector<16x128xf32>
    %369 = vector.extract_strided_slice %359 {offsets = [0, 128], sizes = [16, 128], strides = [1, 1]} : vector<16x384xf32> to vector<16x128xf32>
    %370 = arith.addf %368, %369 : vector<16x128xf32>
    %371 = arith.negf %370 : vector<16x128xf32>
    %372 = math.exp %371 : vector<16x128xf32>
    %cst_154 = arith.constant 1.000000e+00 : f32
    %373 = vector.broadcast %cst_154 : f32 to vector<16x128xf32>
    %374 = arith.addf %373, %372 : vector<16x128xf32>
    %375 = arith.divf %373, %374 : vector<16x128xf32>
    %376 = vector.extract_strided_slice %356 {offsets = [0, 256], sizes = [16, 128], strides = [1, 1]} : vector<16x384xf32> to vector<16x128xf32>
    %377 = vector.extract_strided_slice %359 {offsets = [0, 256], sizes = [16, 128], strides = [1, 1]} : vector<16x384xf32> to vector<16x128xf32>
    %c0_155 = arith.constant 0 : index
    %c0_156 = arith.constant 0 : index
    %378 = vector.load %arg6[%c0_155, %c0_156] : memref<1x128xf32, #tpu.memory_space<vmem>>, vector<1x128xf32>
    %379 = vector.broadcast %378 : vector<1x128xf32> to vector<16x128xf32>
    %380 = arith.addf %377, %379 : vector<16x128xf32>
    %381 = arith.mulf %367, %380 : vector<16x128xf32>
    %382 = arith.addf %376, %381 : vector<16x128xf32>
    %383 = math.tanh %382 : vector<16x128xf32>
    %cst_157 = arith.constant 1.000000e+00 : f32
    %384 = vector.broadcast %cst_157 : f32 to vector<16x128xf32>
    %385 = arith.subf %384, %375 : vector<16x128xf32>
    %386 = arith.mulf %385, %383 : vector<16x128xf32>
    %387 = arith.mulf %375, %354 : vector<16x128xf32>
    %388 = arith.addf %386, %387 : vector<16x128xf32>
    %c7_158 = arith.constant 7 : index
    %c0_159 = arith.constant 0 : index
    %c0_160 = arith.constant 0 : index
    %389 = vector.load %arg2[%c7_158, %c0_159, %c0_160] : memref<8x16x1xf32, #tpu.memory_space<vmem>>, vector<1x16x1xf32>
    %390 = vector.shape_cast %389 : vector<1x16x1xf32> to vector<16x1xf32>
    %cst_161 = arith.constant 0.000000e+00 : f32
    %391 = vector.broadcast %cst_161 : f32 to vector<16x1xf32>
    %392 = arith.cmpf ogt, %390, %391 : vector<16x1xf32>
    %cst_162 = arith.constant 0.000000e+00 : f32
    %393 = vector.shape_cast %392 : vector<16x1xi1> to vector<16x1xi1>
    %394 = vector.broadcast %393 : vector<16x1xi1> to vector<16x128xi1>
    %395 = vector.broadcast %cst_162 : f32 to vector<16x128xf32>
    %396 = arith.select %394, %388, %395 : vector<16x128xi1>, vector<16x128xf32>
    %c7_163 = arith.constant 7 : index
    %c0_164 = arith.constant 0 : index
    %c0_165 = arith.constant 0 : index
    %397 = vector.load %arg20[%c7_163, %c0_164, %c0_165] : memref<8x16x128xf32, #tpu.memory_space<vmem>>, vector<1x16x128xf32>
    %398 = vector.shape_cast %397 : vector<1x16x128xf32> to vector<16x128xf32>
    %399 = vector.shape_cast %396 : vector<16x128xf32> to vector<1x16x128xf32>
    tpu.vector_store %arg20[%c7_163, %c0_164, %c0_165], %399 {strides = array<i32>} : memref<8x16x128xf32, #tpu.memory_space<vmem>>, vector<1x16x128xf32>,
    %400 = vector.shape_cast %392 : vector<16x1xi1> to vector<16x1xi1>
    %401 = vector.broadcast %400 : vector<16x1xi1> to vector<16x128xi1>
    %402 = arith.select %401, %388, %354 : vector<16x128xi1>, vector<16x128xf32>
    %403 = arith.truncf %402 : vector<16x128xf32> to vector<16x128xbf16>
    %c0_166 = arith.constant 0 : index
    %c0_167 = arith.constant 0 : index
    %404 = vector.load %arg7[%c0_166, %c0_167] : memref<128x128xbf16, #tpu.memory_space<vmem>>, vector<128x128xbf16>
    %cst_168 = arith.constant dense<0.000000e+00> : vector<16x128xf32>
    %405 = tpu.matmul %403, %404, %cst_168 {dimension_numbers = #tpu.dot_dimension_numbers<[1], [0], [0], [1], [0, 0, 1, 1], [], []>} : vector<16x128xbf16>, vector<128x128xbf16>, vector<16x128xf32> -> vector<16x128xf32>
    %c0_169 = arith.constant 0 : index
    %c0_170 = arith.constant 0 : index
    %406 = vector.load %arg8[%c0_169, %c0_170] : memref<1x128xf32, #tpu.memory_space<vmem>>, vector<1x128xf32>
    %407 = vector.broadcast %406 : vector<1x128xf32> to vector<16x128xf32>
    %408 = arith.addf %405, %407 : vector<16x128xf32>
    %409 = math.tanh %408 : vector<16x128xf32>
    %c0_171 = arith.constant 0 : index
    %c0_172 = arith.constant 0 : index
    %c0_173 = arith.constant 0 : index
    %410 = vector.load %arg20[%c0_171, %c0_172, %c0_173] : memref<8x16x128xf32, #tpu.memory_space<vmem>>, vector<8x16x128xf32>
    %411 = vector.shape_cast %410 : vector<8x16x128xf32> to vector<128x128xf32>
    %412 = arith.truncf %411 : vector<128x128xf32> to vector<128x128xbf16>
    %c0_174 = arith.constant 0 : index
    %c0_175 = arith.constant 0 : index
    %413 = vector.load %arg9[%c0_174, %c0_175] : memref<128x128xbf16, #tpu.memory_space<vmem>>, vector<128x128xbf16>
    %cst_176 = arith.constant dense<0.000000e+00> : vector<128x128xf32>
    %414 = tpu.matmul %412, %413, %cst_176 {dimension_numbers = #tpu.dot_dimension_numbers<[1], [0], [0], [1], [0, 0, 1, 1], [], []>} : vector<128x128xbf16>, vector<128x128xbf16>, vector<128x128xf32> -> vector<128x128xf32>
    %c0_177 = arith.constant 0 : index
    %c0_178 = arith.constant 0 : index
    %415 = vector.load %arg10[%c0_177, %c0_178] : memref<1x128xf32, #tpu.memory_space<vmem>>, vector<1x128xf32>
    %416 = vector.broadcast %415 : vector<1x128xf32> to vector<128x128xf32>
    %417 = arith.addf %414, %416 : vector<128x128xf32>
    %418 = vector.shape_cast %417 : vector<128x128xf32> to vector<8x16x128xf32>
    %c0_179 = arith.constant 0 : index
    %c0_180 = arith.constant 0 : index
    %c0_181 = arith.constant 0 : index
    %419 = vector.load %arg21[%c0_179, %c0_180, %c0_181] : memref<8x16x128xf32, #tpu.memory_space<vmem>>, vector<8x16x128xf32>
    tpu.vector_store %arg21[%c0_179, %c0_180, %c0_181], %418 {strides = array<i32>} : memref<8x16x128xf32, #tpu.memory_space<vmem>>, vector<8x16x128xf32>,
    %cst_182 = arith.constant 0.000000e+00 : f32
    %420 = vector.broadcast %cst_182 : f32 to vector<16x128xf32>
    %c0_183 = arith.constant 0 : index
    %c0_184 = arith.constant 0 : index
    %c0_185 = arith.constant 0 : index
    %421 = vector.load %arg19[%c0_183, %c0_184, %c0_185] : memref<6x16x128xf32, #tpu.memory_space<vmem>>, vector<1x16x128xf32>
    %422 = vector.shape_cast %421 : vector<1x16x128xf32> to vector<16x128xf32>
    %423 = vector.shape_cast %420 : vector<16x128xf32> to vector<1x16x128xf32>
    tpu.vector_store %arg19[%c0_183, %c0_184, %c0_185], %423 {strides = array<i32>} : memref<6x16x128xf32, #tpu.memory_space<vmem>>, vector<1x16x128xf32>,
    %c0_186 = arith.constant 0 : index
    %c0_187 = arith.constant 0 : index
    %c0_188 = arith.constant 0 : index
    %424 = vector.load %arg2[%c0_186, %c0_187, %c0_188] : memref<8x16x1xf32, #tpu.memory_space<vmem>>, vector<8x16x1xf32>
    %c0_189 = arith.constant 0 : index
    %c0_190 = arith.constant 0 : index
    %c0_191 = arith.constant 0 : index
    %425 = vector.load %arg1[%c0_189, %c0_190, %c0_191] : memref<5x16x128xbf16, #tpu.memory_space<vmem>>, vector<1x16x128xbf16>
    %426 = vector.shape_cast %425 : vector<1x16x128xbf16> to vector<16x128xbf16>
    %427 = arith.truncf %409 : vector<16x128xf32> to vector<16x128xbf16>
    %c0_192 = arith.constant 0 : index
    %c0_193 = arith.constant 0 : index
    %428 = vector.load %arg12[%c0_192, %c0_193] : memref<128x512xbf16, #tpu.memory_space<vmem>>, vector<128x512xbf16>
    %cst_194 = arith.constant dense<0.000000e+00> : vector<16x512xf32>
    %429 = tpu.matmul %427, %428, %cst_194 {dimension_numbers = #tpu.dot_dimension_numbers<[1], [0], [0], [1], [0, 0, 1, 1], [], []>} : vector<16x128xbf16>, vector<128x512xbf16>, vector<16x512xf32> -> vector<16x512xf32>
    %430 = vector.extract_strided_slice %429 {offsets = [0, 0], sizes = [16, 128], strides = [1, 1]} : vector<16x512xf32> to vector<16x128xf32>
    %431 = vector.extract_strided_slice %429 {offsets = [0, 128], sizes = [16, 384], strides = [1, 1]} : vector<16x512xf32> to vector<16x384xf32>
    %c0_195 = arith.constant 0 : index
    %c0_196 = arith.constant 0 : index
    %c0_197 = arith.constant 0 : index
    %432 = vector.load %arg21[%c0_195, %c0_196, %c0_197] : memref<8x16x128xf32, #tpu.memory_space<vmem>>, vector<8x16x128xf32>
    %433 = vector.shape_cast %430 : vector<16x128xf32> to vector<1x16x128xf32>
    %434 = vector.broadcast %433 : vector<1x16x128xf32> to vector<8x16x128xf32>
    %435 = arith.addf %432, %434 : vector<8x16x128xf32>
    %436 = math.tanh %435 : vector<8x16x128xf32>
    %c0_198 = arith.constant 0 : index
    %c0_199 = arith.constant 0 : index
    %437 = vector.load %arg11[%c0_198, %c0_199] : memref<1x128xf32, #tpu.memory_space<vmem>>, vector<1x128xf32>
    %438 = vector.shape_cast %437 : vector<1x128xf32> to vector<1x1x128xf32>
    %439 = vector.broadcast %438 : vector<1x1x128xf32> to vector<8x16x128xf32>
    %440 = arith.mulf %436, %439 : vector<8x16x128xf32>
    %cst_200 = arith.constant dense<0.000000e+00> : vector<8x16xf32>
    %441 = vector.multi_reduction <add>, %440, %cst_200 [2] : vector<8x16x128xf32> to vector<8x16xf32>
    %442 = vector.shape_cast %441 : vector<8x16xf32> to vector<8x16x1xf32>
    %cst_201 = arith.constant 0.000000e+00 : f32
    %443 = vector.broadcast %cst_201 : f32 to vector<8x16x1xf32>
    %444 = arith.cmpf ogt, %424, %443 : vector<8x16x1xf32>
    %cst_202 = arith.constant -1.000000e+10 : f32
    %445 = vector.broadcast %cst_202 : f32 to vector<8x16x1xf32>
    %446 = arith.select %444, %442, %445 : vector<8x16x1xi1>, vector<8x16x1xf32>
    %cst_203 = arith.constant dense<0xFF800000> : vector<16x1xf32>
    %447 = vector.multi_reduction <maximumf>, %446, %cst_203 [0] : vector<8x16x1xf32> to vector<16x1xf32>
    %448 = vector.shape_cast %447 : vector<16x1xf32> to vector<1x16x1xf32>
    %449 = vector.broadcast %448 : vector<1x16x1xf32> to vector<8x16x1xf32>
    %450 = arith.subf %446, %449 : vector<8x16x1xf32>
    %451 = math.exp %450 : vector<8x16x1xf32>
    %cst_204 = arith.constant dense<0.000000e+00> : vector<16x1xf32>
    %452 = vector.multi_reduction <add>, %451, %cst_204 [0] : vector<8x16x1xf32> to vector<16x1xf32>
    %453 = vector.shape_cast %452 : vector<16x1xf32> to vector<1x16x1xf32>
    %454 = tpu.reciprocal %453 {approx = true} : vector<1x16x1xf32> -> vector<1x16x1xf32>
    %455 = vector.broadcast %454 : vector<1x16x1xf32> to vector<8x16x1xf32>
    %456 = arith.mulf %451, %455 : vector<8x16x1xf32>
    %c0_205 = arith.constant 0 : index
    %c0_206 = arith.constant 0 : index
    %c0_207 = arith.constant 0 : index
    %457 = vector.load %arg20[%c0_205, %c0_206, %c0_207] : memref<8x16x128xf32, #tpu.memory_space<vmem>>, vector<8x16x128xf32>
    %458 = vector.broadcast %456 : vector<8x16x1xf32> to vector<8x16x128xf32>
    %459 = arith.mulf %458, %457 : vector<8x16x128xf32>
    %cst_208 = arith.constant dense<0.000000e+00> : vector<16x128xf32>
    %460 = vector.multi_reduction <add>, %459, %cst_208 [0] : vector<8x16x128xf32> to vector<16x128xf32>
    %461 = arith.truncf %460 : vector<16x128xf32> to vector<16x128xbf16>
    %c0_209 = arith.constant 0 : index
    %c0_210 = arith.constant 0 : index
    %c0_211 = arith.constant 0 : index
    %462 = vector.load %arg23[%c0_209, %c0_210, %c0_211] : memref<5x16x384xf32, #tpu.memory_space<vmem>>, vector<1x16x384xf32>
    %463 = vector.shape_cast %462 : vector<1x16x384xf32> to vector<16x384xf32>
    %c0_212 = arith.constant 0 : index
    %c0_213 = arith.constant 0 : index
    %464 = vector.load %arg14[%c0_212, %c0_213] : memref<128x384xbf16, #tpu.memory_space<vmem>>, vector<128x384xbf16>
    %cst_214 = arith.constant dense<0.000000e+00> : vector<16x384xf32>
    %465 = tpu.matmul %461, %464, %cst_214 {dimension_numbers = #tpu.dot_dimension_numbers<[1], [0], [0], [1], [0, 0, 1, 1], [], []>} : vector<16x128xbf16>, vector<128x384xbf16>, vector<16x384xf32> -> vector<16x384xf32>
    %466 = arith.addf %463, %465 : vector<16x384xf32>
    %467 = vector.extract_strided_slice %466 {offsets = [0, 0], sizes = [16, 128], strides = [1, 1]} : vector<16x384xf32> to vector<16x128xf32>
    %468 = vector.extract_strided_slice %431 {offsets = [0, 0], sizes = [16, 128], strides = [1, 1]} : vector<16x384xf32> to vector<16x128xf32>
    %469 = arith.addf %467, %468 : vector<16x128xf32>
    %470 = arith.negf %469 : vector<16x128xf32>
    %471 = math.exp %470 : vector<16x128xf32>
    %cst_215 = arith.constant 1.000000e+00 : f32
    %472 = vector.broadcast %cst_215 : f32 to vector<16x128xf32>
    %473 = arith.addf %472, %471 : vector<16x128xf32>
    %474 = arith.divf %472, %473 : vector<16x128xf32>
    %475 = vector.extract_strided_slice %466 {offsets = [0, 128], sizes = [16, 128], strides = [1, 1]} : vector<16x384xf32> to vector<16x128xf32>
    %476 = vector.extract_strided_slice %431 {offsets = [0, 128], sizes = [16, 128], strides = [1, 1]} : vector<16x384xf32> to vector<16x128xf32>
    %477 = arith.addf %475, %476 : vector<16x128xf32>
    %478 = arith.negf %477 : vector<16x128xf32>
    %479 = math.exp %478 : vector<16x128xf32>
    %cst_216 = arith.constant 1.000000e+00 : f32
    %480 = vector.broadcast %cst_216 : f32 to vector<16x128xf32>
    %481 = arith.addf %480, %479 : vector<16x128xf32>
    %482 = arith.divf %480, %481 : vector<16x128xf32>
    %483 = vector.extract_strided_slice %466 {offsets = [0, 256], sizes = [16, 128], strides = [1, 1]} : vector<16x384xf32> to vector<16x128xf32>
    %484 = vector.extract_strided_slice %431 {offsets = [0, 256], sizes = [16, 128], strides = [1, 1]} : vector<16x384xf32> to vector<16x128xf32>
    %c0_217 = arith.constant 0 : index
    %c0_218 = arith.constant 0 : index
    %485 = vector.load %arg16[%c0_217, %c0_218] : memref<1x128xf32, #tpu.memory_space<vmem>>, vector<1x128xf32>
    %486 = vector.broadcast %485 : vector<1x128xf32> to vector<16x128xf32>
    %487 = arith.addf %484, %486 : vector<16x128xf32>
    %488 = arith.mulf %474, %487 : vector<16x128xf32>
    %489 = arith.addf %483, %488 : vector<16x128xf32>
    %490 = math.tanh %489 : vector<16x128xf32>
    %cst_219 = arith.constant 1.000000e+00 : f32
    %491 = vector.broadcast %cst_219 : f32 to vector<16x128xf32>
    %492 = arith.subf %491, %482 : vector<16x128xf32>
    %493 = arith.mulf %492, %490 : vector<16x128xf32>
    %494 = arith.mulf %482, %409 : vector<16x128xf32>
    %495 = arith.addf %493, %494 : vector<16x128xf32>
    %496 = arith.truncf %495 : vector<16x128xf32> to vector<16x128xbf16>
    %497 = tpu.concatenate %496, %426, %461 in 1 : vector<16x128xbf16>, vector<16x128xbf16>, vector<16x128xbf16> -> vector<16x384xbf16>
    %c0_220 = arith.constant 0 : index
    %c0_221 = arith.constant 0 : index
    %498 = vector.load %arg17[%c0_220, %c0_221] : memref<384x128xbf16, #tpu.memory_space<vmem>>, vector<384x128xbf16>
    %cst_222 = arith.constant dense<0.000000e+00> : vector<16x128xf32>
    %499 = tpu.matmul %497, %498, %cst_222 {dimension_numbers = #tpu.dot_dimension_numbers<[1], [0], [0], [1], [0, 0, 1, 1], [], []>} : vector<16x384xbf16>, vector<384x128xbf16>, vector<16x128xf32> -> vector<16x128xf32>
    %c0_223 = arith.constant 0 : index
    %c0_224 = arith.constant 0 : index
    %500 = vector.load %arg18[%c0_223, %c0_224] : memref<1x128xf32, #tpu.memory_space<vmem>>, vector<1x128xf32>
    %501 = vector.broadcast %500 : vector<1x128xf32> to vector<16x128xf32>
    %502 = arith.addf %499, %501 : vector<16x128xf32>
    %c1_225 = arith.constant 1 : index
    %c0_226 = arith.constant 0 : index
    %c0_227 = arith.constant 0 : index
    %503 = vector.load %arg19[%c1_225, %c0_226, %c0_227] : memref<6x16x128xf32, #tpu.memory_space<vmem>>, vector<1x16x128xf32>
    %504 = vector.shape_cast %503 : vector<1x16x128xf32> to vector<16x128xf32>
    %505 = vector.shape_cast %502 : vector<16x128xf32> to vector<1x16x128xf32>
    tpu.vector_store %arg19[%c1_225, %c0_226, %c0_227], %505 {strides = array<i32>} : memref<6x16x128xf32, #tpu.memory_space<vmem>>, vector<1x16x128xf32>,
    %c1_228 = arith.constant 1 : index
    %c0_229 = arith.constant 0 : index
    %c0_230 = arith.constant 0 : index
    %506 = vector.load %arg1[%c1_228, %c0_229, %c0_230] : memref<5x16x128xbf16, #tpu.memory_space<vmem>>, vector<1x16x128xbf16>
    %507 = vector.shape_cast %506 : vector<1x16x128xbf16> to vector<16x128xbf16>
    %508 = arith.truncf %495 : vector<16x128xf32> to vector<16x128xbf16>
    %c0_231 = arith.constant 0 : index
    %c0_232 = arith.constant 0 : index
    %509 = vector.load %arg12[%c0_231, %c0_232] : memref<128x512xbf16, #tpu.memory_space<vmem>>, vector<128x512xbf16>
    %cst_233 = arith.constant dense<0.000000e+00> : vector<16x512xf32>
    %510 = tpu.matmul %508, %509, %cst_233 {dimension_numbers = #tpu.dot_dimension_numbers<[1], [0], [0], [1], [0, 0, 1, 1], [], []>} : vector<16x128xbf16>, vector<128x512xbf16>, vector<16x512xf32> -> vector<16x512xf32>
    %511 = vector.extract_strided_slice %510 {offsets = [0, 0], sizes = [16, 128], strides = [1, 1]} : vector<16x512xf32> to vector<16x128xf32>
    %512 = vector.extract_strided_slice %510 {offsets = [0, 128], sizes = [16, 384], strides = [1, 1]} : vector<16x512xf32> to vector<16x384xf32>
    %c0_234 = arith.constant 0 : index
    %c0_235 = arith.constant 0 : index
    %c0_236 = arith.constant 0 : index
    %513 = vector.load %arg21[%c0_234, %c0_235, %c0_236] : memref<8x16x128xf32, #tpu.memory_space<vmem>>, vector<8x16x128xf32>
    %514 = vector.shape_cast %511 : vector<16x128xf32> to vector<1x16x128xf32>
    %515 = vector.broadcast %514 : vector<1x16x128xf32> to vector<8x16x128xf32>
    %516 = arith.addf %513, %515 : vector<8x16x128xf32>
    %517 = math.tanh %516 : vector<8x16x128xf32>
    %c0_237 = arith.constant 0 : index
    %c0_238 = arith.constant 0 : index
    %518 = vector.load %arg11[%c0_237, %c0_238] : memref<1x128xf32, #tpu.memory_space<vmem>>, vector<1x128xf32>
    %519 = vector.shape_cast %518 : vector<1x128xf32> to vector<1x1x128xf32>
    %520 = vector.broadcast %519 : vector<1x1x128xf32> to vector<8x16x128xf32>
    %521 = arith.mulf %517, %520 : vector<8x16x128xf32>
    %cst_239 = arith.constant dense<0.000000e+00> : vector<8x16xf32>
    %522 = vector.multi_reduction <add>, %521, %cst_239 [2] : vector<8x16x128xf32> to vector<8x16xf32>
    %523 = vector.shape_cast %522 : vector<8x16xf32> to vector<8x16x1xf32>
    %cst_240 = arith.constant 0.000000e+00 : f32
    %524 = vector.broadcast %cst_240 : f32 to vector<8x16x1xf32>
    %525 = arith.cmpf ogt, %424, %524 : vector<8x16x1xf32>
    %cst_241 = arith.constant -1.000000e+10 : f32
    %526 = vector.broadcast %cst_241 : f32 to vector<8x16x1xf32>
    %527 = arith.select %525, %523, %526 : vector<8x16x1xi1>, vector<8x16x1xf32>
    %cst_242 = arith.constant dense<0xFF800000> : vector<16x1xf32>
    %528 = vector.multi_reduction <maximumf>, %527, %cst_242 [0] : vector<8x16x1xf32> to vector<16x1xf32>
    %529 = vector.shape_cast %528 : vector<16x1xf32> to vector<1x16x1xf32>
    %530 = vector.broadcast %529 : vector<1x16x1xf32> to vector<8x16x1xf32>
    %531 = arith.subf %527, %530 : vector<8x16x1xf32>
    %532 = math.exp %531 : vector<8x16x1xf32>
    %cst_243 = arith.constant dense<0.000000e+00> : vector<16x1xf32>
    %533 = vector.multi_reduction <add>, %532, %cst_243 [0] : vector<8x16x1xf32> to vector<16x1xf32>
    %534 = vector.shape_cast %533 : vector<16x1xf32> to vector<1x16x1xf32>
    %535 = tpu.reciprocal %534 {approx = true} : vector<1x16x1xf32> -> vector<1x16x1xf32>
    %536 = vector.broadcast %535 : vector<1x16x1xf32> to vector<8x16x1xf32>
    %537 = arith.mulf %532, %536 : vector<8x16x1xf32>
    %c0_244 = arith.constant 0 : index
    %c0_245 = arith.constant 0 : index
    %c0_246 = arith.constant 0 : index
    %538 = vector.load %arg20[%c0_244, %c0_245, %c0_246] : memref<8x16x128xf32, #tpu.memory_space<vmem>>, vector<8x16x128xf32>
    %539 = vector.broadcast %537 : vector<8x16x1xf32> to vector<8x16x128xf32>
    %540 = arith.mulf %539, %538 : vector<8x16x128xf32>
    %cst_247 = arith.constant dense<0.000000e+00> : vector<16x128xf32>
    %541 = vector.multi_reduction <add>, %540, %cst_247 [0] : vector<8x16x128xf32> to vector<16x128xf32>
    %542 = arith.truncf %541 : vector<16x128xf32> to vector<16x128xbf16>
    %c1_248 = arith.constant 1 : index
    %c0_249 = arith.constant 0 : index
    %c0_250 = arith.constant 0 : index
    %543 = vector.load %arg23[%c1_248, %c0_249, %c0_250] : memref<5x16x384xf32, #tpu.memory_space<vmem>>, vector<1x16x384xf32>
    %544 = vector.shape_cast %543 : vector<1x16x384xf32> to vector<16x384xf32>
    %c0_251 = arith.constant 0 : index
    %c0_252 = arith.constant 0 : index
    %545 = vector.load %arg14[%c0_251, %c0_252] : memref<128x384xbf16, #tpu.memory_space<vmem>>, vector<128x384xbf16>
    %cst_253 = arith.constant dense<0.000000e+00> : vector<16x384xf32>
    %546 = tpu.matmul %542, %545, %cst_253 {dimension_numbers = #tpu.dot_dimension_numbers<[1], [0], [0], [1], [0, 0, 1, 1], [], []>} : vector<16x128xbf16>, vector<128x384xbf16>, vector<16x384xf32> -> vector<16x384xf32>
    %547 = arith.addf %544, %546 : vector<16x384xf32>
    %548 = vector.extract_strided_slice %547 {offsets = [0, 0], sizes = [16, 128], strides = [1, 1]} : vector<16x384xf32> to vector<16x128xf32>
    %549 = vector.extract_strided_slice %512 {offsets = [0, 0], sizes = [16, 128], strides = [1, 1]} : vector<16x384xf32> to vector<16x128xf32>
    %550 = arith.addf %548, %549 : vector<16x128xf32>
    %551 = arith.negf %550 : vector<16x128xf32>
    %552 = math.exp %551 : vector<16x128xf32>
    %cst_254 = arith.constant 1.000000e+00 : f32
    %553 = vector.broadcast %cst_254 : f32 to vector<16x128xf32>
    %554 = arith.addf %553, %552 : vector<16x128xf32>
    %555 = arith.divf %553, %554 : vector<16x128xf32>
    %556 = vector.extract_strided_slice %547 {offsets = [0, 128], sizes = [16, 128], strides = [1, 1]} : vector<16x384xf32> to vector<16x128xf32>
    %557 = vector.extract_strided_slice %512 {offsets = [0, 128], sizes = [16, 128], strides = [1, 1]} : vector<16x384xf32> to vector<16x128xf32>
    %558 = arith.addf %556, %557 : vector<16x128xf32>
    %559 = arith.negf %558 : vector<16x128xf32>
    %560 = math.exp %559 : vector<16x128xf32>
    %cst_255 = arith.constant 1.000000e+00 : f32
    %561 = vector.broadcast %cst_255 : f32 to vector<16x128xf32>
    %562 = arith.addf %561, %560 : vector<16x128xf32>
    %563 = arith.divf %561, %562 : vector<16x128xf32>
    %564 = vector.extract_strided_slice %547 {offsets = [0, 256], sizes = [16, 128], strides = [1, 1]} : vector<16x384xf32> to vector<16x128xf32>
    %565 = vector.extract_strided_slice %512 {offsets = [0, 256], sizes = [16, 128], strides = [1, 1]} : vector<16x384xf32> to vector<16x128xf32>
    %c0_256 = arith.constant 0 : index
    %c0_257 = arith.constant 0 : index
    %566 = vector.load %arg16[%c0_256, %c0_257] : memref<1x128xf32, #tpu.memory_space<vmem>>, vector<1x128xf32>
    %567 = vector.broadcast %566 : vector<1x128xf32> to vector<16x128xf32>
    %568 = arith.addf %565, %567 : vector<16x128xf32>
    %569 = arith.mulf %555, %568 : vector<16x128xf32>
    %570 = arith.addf %564, %569 : vector<16x128xf32>
    %571 = math.tanh %570 : vector<16x128xf32>
    %cst_258 = arith.constant 1.000000e+00 : f32
    %572 = vector.broadcast %cst_258 : f32 to vector<16x128xf32>
    %573 = arith.subf %572, %563 : vector<16x128xf32>
    %574 = arith.mulf %573, %571 : vector<16x128xf32>
    %575 = arith.mulf %563, %495 : vector<16x128xf32>
    %576 = arith.addf %574, %575 : vector<16x128xf32>
    %577 = arith.truncf %576 : vector<16x128xf32> to vector<16x128xbf16>
    %578 = tpu.concatenate %577, %507, %542 in 1 : vector<16x128xbf16>, vector<16x128xbf16>, vector<16x128xbf16> -> vector<16x384xbf16>
    %c0_259 = arith.constant 0 : index
    %c0_260 = arith.constant 0 : index
    %579 = vector.load %arg17[%c0_259, %c0_260] : memref<384x128xbf16, #tpu.memory_space<vmem>>, vector<384x128xbf16>
    %cst_261 = arith.constant dense<0.000000e+00> : vector<16x128xf32>
    %580 = tpu.matmul %578, %579, %cst_261 {dimension_numbers = #tpu.dot_dimension_numbers<[1], [0], [0], [1], [0, 0, 1, 1], [], []>} : vector<16x384xbf16>, vector<384x128xbf16>, vector<16x128xf32> -> vector<16x128xf32>
    %c0_262 = arith.constant 0 : index
    %c0_263 = arith.constant 0 : index
    %581 = vector.load %arg18[%c0_262, %c0_263] : memref<1x128xf32, #tpu.memory_space<vmem>>, vector<1x128xf32>
    %582 = vector.broadcast %581 : vector<1x128xf32> to vector<16x128xf32>
    %583 = arith.addf %580, %582 : vector<16x128xf32>
    %c2_264 = arith.constant 2 : index
    %c0_265 = arith.constant 0 : index
    %c0_266 = arith.constant 0 : index
    %584 = vector.load %arg19[%c2_264, %c0_265, %c0_266] : memref<6x16x128xf32, #tpu.memory_space<vmem>>, vector<1x16x128xf32>
    %585 = vector.shape_cast %584 : vector<1x16x128xf32> to vector<16x128xf32>
    %586 = vector.shape_cast %583 : vector<16x128xf32> to vector<1x16x128xf32>
    tpu.vector_store %arg19[%c2_264, %c0_265, %c0_266], %586 {strides = array<i32>} : memref<6x16x128xf32, #tpu.memory_space<vmem>>, vector<1x16x128xf32>,
    %c2_267 = arith.constant 2 : index
    %c0_268 = arith.constant 0 : index
    %c0_269 = arith.constant 0 : index
    %587 = vector.load %arg1[%c2_267, %c0_268, %c0_269] : memref<5x16x128xbf16, #tpu.memory_space<vmem>>, vector<1x16x128xbf16>
    %588 = vector.shape_cast %587 : vector<1x16x128xbf16> to vector<16x128xbf16>
    %589 = arith.truncf %576 : vector<16x128xf32> to vector<16x128xbf16>
    %c0_270 = arith.constant 0 : index
    %c0_271 = arith.constant 0 : index
    %590 = vector.load %arg12[%c0_270, %c0_271] : memref<128x512xbf16, #tpu.memory_space<vmem>>, vector<128x512xbf16>
    %cst_272 = arith.constant dense<0.000000e+00> : vector<16x512xf32>
    %591 = tpu.matmul %589, %590, %cst_272 {dimension_numbers = #tpu.dot_dimension_numbers<[1], [0], [0], [1], [0, 0, 1, 1], [], []>} : vector<16x128xbf16>, vector<128x512xbf16>, vector<16x512xf32> -> vector<16x512xf32>
    %592 = vector.extract_strided_slice %591 {offsets = [0, 0], sizes = [16, 128], strides = [1, 1]} : vector<16x512xf32> to vector<16x128xf32>
    %593 = vector.extract_strided_slice %591 {offsets = [0, 128], sizes = [16, 384], strides = [1, 1]} : vector<16x512xf32> to vector<16x384xf32>
    %c0_273 = arith.constant 0 : index
    %c0_274 = arith.constant 0 : index
    %c0_275 = arith.constant 0 : index
    %594 = vector.load %arg21[%c0_273, %c0_274, %c0_275] : memref<8x16x128xf32, #tpu.memory_space<vmem>>, vector<8x16x128xf32>
    %595 = vector.shape_cast %592 : vector<16x128xf32> to vector<1x16x128xf32>
    %596 = vector.broadcast %595 : vector<1x16x128xf32> to vector<8x16x128xf32>
    %597 = arith.addf %594, %596 : vector<8x16x128xf32>
    %598 = math.tanh %597 : vector<8x16x128xf32>
    %c0_276 = arith.constant 0 : index
    %c0_277 = arith.constant 0 : index
    %599 = vector.load %arg11[%c0_276, %c0_277] : memref<1x128xf32, #tpu.memory_space<vmem>>, vector<1x128xf32>
    %600 = vector.shape_cast %599 : vector<1x128xf32> to vector<1x1x128xf32>
    %601 = vector.broadcast %600 : vector<1x1x128xf32> to vector<8x16x128xf32>
    %602 = arith.mulf %598, %601 : vector<8x16x128xf32>
    %cst_278 = arith.constant dense<0.000000e+00> : vector<8x16xf32>
    %603 = vector.multi_reduction <add>, %602, %cst_278 [2] : vector<8x16x128xf32> to vector<8x16xf32>
    %604 = vector.shape_cast %603 : vector<8x16xf32> to vector<8x16x1xf32>
    %cst_279 = arith.constant 0.000000e+00 : f32
    %605 = vector.broadcast %cst_279 : f32 to vector<8x16x1xf32>
    %606 = arith.cmpf ogt, %424, %605 : vector<8x16x1xf32>
    %cst_280 = arith.constant -1.000000e+10 : f32
    %607 = vector.broadcast %cst_280 : f32 to vector<8x16x1xf32>
    %608 = arith.select %606, %604, %607 : vector<8x16x1xi1>, vector<8x16x1xf32>
    %cst_281 = arith.constant dense<0xFF800000> : vector<16x1xf32>
    %609 = vector.multi_reduction <maximumf>, %608, %cst_281 [0] : vector<8x16x1xf32> to vector<16x1xf32>
    %610 = vector.shape_cast %609 : vector<16x1xf32> to vector<1x16x1xf32>
    %611 = vector.broadcast %610 : vector<1x16x1xf32> to vector<8x16x1xf32>
    %612 = arith.subf %608, %611 : vector<8x16x1xf32>
    %613 = math.exp %612 : vector<8x16x1xf32>
    %cst_282 = arith.constant dense<0.000000e+00> : vector<16x1xf32>
    %614 = vector.multi_reduction <add>, %613, %cst_282 [0] : vector<8x16x1xf32> to vector<16x1xf32>
    %615 = vector.shape_cast %614 : vector<16x1xf32> to vector<1x16x1xf32>
    %616 = tpu.reciprocal %615 {approx = true} : vector<1x16x1xf32> -> vector<1x16x1xf32>
    %617 = vector.broadcast %616 : vector<1x16x1xf32> to vector<8x16x1xf32>
    %618 = arith.mulf %613, %617 : vector<8x16x1xf32>
    %c0_283 = arith.constant 0 : index
    %c0_284 = arith.constant 0 : index
    %c0_285 = arith.constant 0 : index
    %619 = vector.load %arg20[%c0_283, %c0_284, %c0_285] : memref<8x16x128xf32, #tpu.memory_space<vmem>>, vector<8x16x128xf32>
    %620 = vector.broadcast %618 : vector<8x16x1xf32> to vector<8x16x128xf32>
    %621 = arith.mulf %620, %619 : vector<8x16x128xf32>
    %cst_286 = arith.constant dense<0.000000e+00> : vector<16x128xf32>
    %622 = vector.multi_reduction <add>, %621, %cst_286 [0] : vector<8x16x128xf32> to vector<16x128xf32>
    %623 = arith.truncf %622 : vector<16x128xf32> to vector<16x128xbf16>
    %c2_287 = arith.constant 2 : index
    %c0_288 = arith.constant 0 : index
    %c0_289 = arith.constant 0 : index
    %624 = vector.load %arg23[%c2_287, %c0_288, %c0_289] : memref<5x16x384xf32, #tpu.memory_space<vmem>>, vector<1x16x384xf32>
    %625 = vector.shape_cast %624 : vector<1x16x384xf32> to vector<16x384xf32>
    %c0_290 = arith.constant 0 : index
    %c0_291 = arith.constant 0 : index
    %626 = vector.load %arg14[%c0_290, %c0_291] : memref<128x384xbf16, #tpu.memory_space<vmem>>, vector<128x384xbf16>
    %cst_292 = arith.constant dense<0.000000e+00> : vector<16x384xf32>
    %627 = tpu.matmul %623, %626, %cst_292 {dimension_numbers = #tpu.dot_dimension_numbers<[1], [0], [0], [1], [0, 0, 1, 1], [], []>} : vector<16x128xbf16>, vector<128x384xbf16>, vector<16x384xf32> -> vector<16x384xf32>
    %628 = arith.addf %625, %627 : vector<16x384xf32>
    %629 = vector.extract_strided_slice %628 {offsets = [0, 0], sizes = [16, 128], strides = [1, 1]} : vector<16x384xf32> to vector<16x128xf32>
    %630 = vector.extract_strided_slice %593 {offsets = [0, 0], sizes = [16, 128], strides = [1, 1]} : vector<16x384xf32> to vector<16x128xf32>
    %631 = arith.addf %629, %630 : vector<16x128xf32>
    %632 = arith.negf %631 : vector<16x128xf32>
    %633 = math.exp %632 : vector<16x128xf32>
    %cst_293 = arith.constant 1.000000e+00 : f32
    %634 = vector.broadcast %cst_293 : f32 to vector<16x128xf32>
    %635 = arith.addf %634, %633 : vector<16x128xf32>
    %636 = arith.divf %634, %635 : vector<16x128xf32>
    %637 = vector.extract_strided_slice %628 {offsets = [0, 128], sizes = [16, 128], strides = [1, 1]} : vector<16x384xf32> to vector<16x128xf32>
    %638 = vector.extract_strided_slice %593 {offsets = [0, 128], sizes = [16, 128], strides = [1, 1]} : vector<16x384xf32> to vector<16x128xf32>
    %639 = arith.addf %637, %638 : vector<16x128xf32>
    %640 = arith.negf %639 : vector<16x128xf32>
    %641 = math.exp %640 : vector<16x128xf32>
    %cst_294 = arith.constant 1.000000e+00 : f32
    %642 = vector.broadcast %cst_294 : f32 to vector<16x128xf32>
    %643 = arith.addf %642, %641 : vector<16x128xf32>
    %644 = arith.divf %642, %643 : vector<16x128xf32>
    %645 = vector.extract_strided_slice %628 {offsets = [0, 256], sizes = [16, 128], strides = [1, 1]} : vector<16x384xf32> to vector<16x128xf32>
    %646 = vector.extract_strided_slice %593 {offsets = [0, 256], sizes = [16, 128], strides = [1, 1]} : vector<16x384xf32> to vector<16x128xf32>
    %c0_295 = arith.constant 0 : index
    %c0_296 = arith.constant 0 : index
    %647 = vector.load %arg16[%c0_295, %c0_296] : memref<1x128xf32, #tpu.memory_space<vmem>>, vector<1x128xf32>
    %648 = vector.broadcast %647 : vector<1x128xf32> to vector<16x128xf32>
    %649 = arith.addf %646, %648 : vector<16x128xf32>
    %650 = arith.mulf %636, %649 : vector<16x128xf32>
    %651 = arith.addf %645, %650 : vector<16x128xf32>
    %652 = math.tanh %651 : vector<16x128xf32>
    %cst_297 = arith.constant 1.000000e+00 : f32
    %653 = vector.broadcast %cst_297 : f32 to vector<16x128xf32>
    %654 = arith.subf %653, %644 : vector<16x128xf32>
    %655 = arith.mulf %654, %652 : vector<16x128xf32>
    %656 = arith.mulf %644, %576 : vector<16x128xf32>
    %657 = arith.addf %655, %656 : vector<16x128xf32>
    %658 = arith.truncf %657 : vector<16x128xf32> to vector<16x128xbf16>
    %659 = tpu.concatenate %658, %588, %623 in 1 : vector<16x128xbf16>, vector<16x128xbf16>, vector<16x128xbf16> -> vector<16x384xbf16>
    %c0_298 = arith.constant 0 : index
    %c0_299 = arith.constant 0 : index
    %660 = vector.load %arg17[%c0_298, %c0_299] : memref<384x128xbf16, #tpu.memory_space<vmem>>, vector<384x128xbf16>
    %cst_300 = arith.constant dense<0.000000e+00> : vector<16x128xf32>
    %661 = tpu.matmul %659, %660, %cst_300 {dimension_numbers = #tpu.dot_dimension_numbers<[1], [0], [0], [1], [0, 0, 1, 1], [], []>} : vector<16x384xbf16>, vector<384x128xbf16>, vector<16x128xf32> -> vector<16x128xf32>
    %c0_301 = arith.constant 0 : index
    %c0_302 = arith.constant 0 : index
    %662 = vector.load %arg18[%c0_301, %c0_302] : memref<1x128xf32, #tpu.memory_space<vmem>>, vector<1x128xf32>
    %663 = vector.broadcast %662 : vector<1x128xf32> to vector<16x128xf32>
    %664 = arith.addf %661, %663 : vector<16x128xf32>
    %c3_303 = arith.constant 3 : index
    %c0_304 = arith.constant 0 : index
    %c0_305 = arith.constant 0 : index
    %665 = vector.load %arg19[%c3_303, %c0_304, %c0_305] : memref<6x16x128xf32, #tpu.memory_space<vmem>>, vector<1x16x128xf32>
    %666 = vector.shape_cast %665 : vector<1x16x128xf32> to vector<16x128xf32>
    %667 = vector.shape_cast %664 : vector<16x128xf32> to vector<1x16x128xf32>
    tpu.vector_store %arg19[%c3_303, %c0_304, %c0_305], %667 {strides = array<i32>} : memref<6x16x128xf32, #tpu.memory_space<vmem>>, vector<1x16x128xf32>,
    %c3_306 = arith.constant 3 : index
    %c0_307 = arith.constant 0 : index
    %c0_308 = arith.constant 0 : index
    %668 = vector.load %arg1[%c3_306, %c0_307, %c0_308] : memref<5x16x128xbf16, #tpu.memory_space<vmem>>, vector<1x16x128xbf16>
    %669 = vector.shape_cast %668 : vector<1x16x128xbf16> to vector<16x128xbf16>
    %670 = arith.truncf %657 : vector<16x128xf32> to vector<16x128xbf16>
    %c0_309 = arith.constant 0 : index
    %c0_310 = arith.constant 0 : index
    %671 = vector.load %arg12[%c0_309, %c0_310] : memref<128x512xbf16, #tpu.memory_space<vmem>>, vector<128x512xbf16>
    %cst_311 = arith.constant dense<0.000000e+00> : vector<16x512xf32>
    %672 = tpu.matmul %670, %671, %cst_311 {dimension_numbers = #tpu.dot_dimension_numbers<[1], [0], [0], [1], [0, 0, 1, 1], [], []>} : vector<16x128xbf16>, vector<128x512xbf16>, vector<16x512xf32> -> vector<16x512xf32>
    %673 = vector.extract_strided_slice %672 {offsets = [0, 0], sizes = [16, 128], strides = [1, 1]} : vector<16x512xf32> to vector<16x128xf32>
    %674 = vector.extract_strided_slice %672 {offsets = [0, 128], sizes = [16, 384], strides = [1, 1]} : vector<16x512xf32> to vector<16x384xf32>
    %c0_312 = arith.constant 0 : index
    %c0_313 = arith.constant 0 : index
    %c0_314 = arith.constant 0 : index
    %675 = vector.load %arg21[%c0_312, %c0_313, %c0_314] : memref<8x16x128xf32, #tpu.memory_space<vmem>>, vector<8x16x128xf32>
    %676 = vector.shape_cast %673 : vector<16x128xf32> to vector<1x16x128xf32>
    %677 = vector.broadcast %676 : vector<1x16x128xf32> to vector<8x16x128xf32>
    %678 = arith.addf %675, %677 : vector<8x16x128xf32>
    %679 = math.tanh %678 : vector<8x16x128xf32>
    %c0_315 = arith.constant 0 : index
    %c0_316 = arith.constant 0 : index
    %680 = vector.load %arg11[%c0_315, %c0_316] : memref<1x128xf32, #tpu.memory_space<vmem>>, vector<1x128xf32>
    %681 = vector.shape_cast %680 : vector<1x128xf32> to vector<1x1x128xf32>
    %682 = vector.broadcast %681 : vector<1x1x128xf32> to vector<8x16x128xf32>
    %683 = arith.mulf %679, %682 : vector<8x16x128xf32>
    %cst_317 = arith.constant dense<0.000000e+00> : vector<8x16xf32>
    %684 = vector.multi_reduction <add>, %683, %cst_317 [2] : vector<8x16x128xf32> to vector<8x16xf32>
    %685 = vector.shape_cast %684 : vector<8x16xf32> to vector<8x16x1xf32>
    %cst_318 = arith.constant 0.000000e+00 : f32
    %686 = vector.broadcast %cst_318 : f32 to vector<8x16x1xf32>
    %687 = arith.cmpf ogt, %424, %686 : vector<8x16x1xf32>
    %cst_319 = arith.constant -1.000000e+10 : f32
    %688 = vector.broadcast %cst_319 : f32 to vector<8x16x1xf32>
    %689 = arith.select %687, %685, %688 : vector<8x16x1xi1>, vector<8x16x1xf32>
    %cst_320 = arith.constant dense<0xFF800000> : vector<16x1xf32>
    %690 = vector.multi_reduction <maximumf>, %689, %cst_320 [0] : vector<8x16x1xf32> to vector<16x1xf32>
    %691 = vector.shape_cast %690 : vector<16x1xf32> to vector<1x16x1xf32>
    %692 = vector.broadcast %691 : vector<1x16x1xf32> to vector<8x16x1xf32>
    %693 = arith.subf %689, %692 : vector<8x16x1xf32>
    %694 = math.exp %693 : vector<8x16x1xf32>
    %cst_321 = arith.constant dense<0.000000e+00> : vector<16x1xf32>
    %695 = vector.multi_reduction <add>, %694, %cst_321 [0] : vector<8x16x1xf32> to vector<16x1xf32>
    %696 = vector.shape_cast %695 : vector<16x1xf32> to vector<1x16x1xf32>
    %697 = tpu.reciprocal %696 {approx = true} : vector<1x16x1xf32> -> vector<1x16x1xf32>
    %698 = vector.broadcast %697 : vector<1x16x1xf32> to vector<8x16x1xf32>
    %699 = arith.mulf %694, %698 : vector<8x16x1xf32>
    %c0_322 = arith.constant 0 : index
    %c0_323 = arith.constant 0 : index
    %c0_324 = arith.constant 0 : index
    %700 = vector.load %arg20[%c0_322, %c0_323, %c0_324] : memref<8x16x128xf32, #tpu.memory_space<vmem>>, vector<8x16x128xf32>
    %701 = vector.broadcast %699 : vector<8x16x1xf32> to vector<8x16x128xf32>
    %702 = arith.mulf %701, %700 : vector<8x16x128xf32>
    %cst_325 = arith.constant dense<0.000000e+00> : vector<16x128xf32>
    %703 = vector.multi_reduction <add>, %702, %cst_325 [0] : vector<8x16x128xf32> to vector<16x128xf32>
    %704 = arith.truncf %703 : vector<16x128xf32> to vector<16x128xbf16>
    %c3_326 = arith.constant 3 : index
    %c0_327 = arith.constant 0 : index
    %c0_328 = arith.constant 0 : index
    %705 = vector.load %arg23[%c3_326, %c0_327, %c0_328] : memref<5x16x384xf32, #tpu.memory_space<vmem>>, vector<1x16x384xf32>
    %706 = vector.shape_cast %705 : vector<1x16x384xf32> to vector<16x384xf32>
    %c0_329 = arith.constant 0 : index
    %c0_330 = arith.constant 0 : index
    %707 = vector.load %arg14[%c0_329, %c0_330] : memref<128x384xbf16, #tpu.memory_space<vmem>>, vector<128x384xbf16>
    %cst_331 = arith.constant dense<0.000000e+00> : vector<16x384xf32>
    %708 = tpu.matmul %704, %707, %cst_331 {dimension_numbers = #tpu.dot_dimension_numbers<[1], [0], [0], [1], [0, 0, 1, 1], [], []>} : vector<16x128xbf16>, vector<128x384xbf16>, vector<16x384xf32> -> vector<16x384xf32>
    %709 = arith.addf %706, %708 : vector<16x384xf32>
    %710 = vector.extract_strided_slice %709 {offsets = [0, 0], sizes = [16, 128], strides = [1, 1]} : vector<16x384xf32> to vector<16x128xf32>
    %711 = vector.extract_strided_slice %674 {offsets = [0, 0], sizes = [16, 128], strides = [1, 1]} : vector<16x384xf32> to vector<16x128xf32>
    %712 = arith.addf %710, %711 : vector<16x128xf32>
    %713 = arith.negf %712 : vector<16x128xf32>
    %714 = math.exp %713 : vector<16x128xf32>
    %cst_332 = arith.constant 1.000000e+00 : f32
    %715 = vector.broadcast %cst_332 : f32 to vector<16x128xf32>
    %716 = arith.addf %715, %714 : vector<16x128xf32>
    %717 = arith.divf %715, %716 : vector<16x128xf32>
    %718 = vector.extract_strided_slice %709 {offsets = [0, 128], sizes = [16, 128], strides = [1, 1]} : vector<16x384xf32> to vector<16x128xf32>
    %719 = vector.extract_strided_slice %674 {offsets = [0, 128], sizes = [16, 128], strides = [1, 1]} : vector<16x384xf32> to vector<16x128xf32>
    %720 = arith.addf %718, %719 : vector<16x128xf32>
    %721 = arith.negf %720 : vector<16x128xf32>
    %722 = math.exp %721 : vector<16x128xf32>
    %cst_333 = arith.constant 1.000000e+00 : f32
    %723 = vector.broadcast %cst_333 : f32 to vector<16x128xf32>
    %724 = arith.addf %723, %722 : vector<16x128xf32>
    %725 = arith.divf %723, %724 : vector<16x128xf32>
    %726 = vector.extract_strided_slice %709 {offsets = [0, 256], sizes = [16, 128], strides = [1, 1]} : vector<16x384xf32> to vector<16x128xf32>
    %727 = vector.extract_strided_slice %674 {offsets = [0, 256], sizes = [16, 128], strides = [1, 1]} : vector<16x384xf32> to vector<16x128xf32>
    %c0_334 = arith.constant 0 : index
    %c0_335 = arith.constant 0 : index
    %728 = vector.load %arg16[%c0_334, %c0_335] : memref<1x128xf32, #tpu.memory_space<vmem>>, vector<1x128xf32>
    %729 = vector.broadcast %728 : vector<1x128xf32> to vector<16x128xf32>
    %730 = arith.addf %727, %729 : vector<16x128xf32>
    %731 = arith.mulf %717, %730 : vector<16x128xf32>
    %732 = arith.addf %726, %731 : vector<16x128xf32>
    %733 = math.tanh %732 : vector<16x128xf32>
    %cst_336 = arith.constant 1.000000e+00 : f32
    %734 = vector.broadcast %cst_336 : f32 to vector<16x128xf32>
    %735 = arith.subf %734, %725 : vector<16x128xf32>
    %736 = arith.mulf %735, %733 : vector<16x128xf32>
    %737 = arith.mulf %725, %657 : vector<16x128xf32>
    %738 = arith.addf %736, %737 : vector<16x128xf32>
    %739 = arith.truncf %738 : vector<16x128xf32> to vector<16x128xbf16>
    %740 = tpu.concatenate %739, %669, %704 in 1 : vector<16x128xbf16>, vector<16x128xbf16>, vector<16x128xbf16> -> vector<16x384xbf16>
    %c0_337 = arith.constant 0 : index
    %c0_338 = arith.constant 0 : index
    %741 = vector.load %arg17[%c0_337, %c0_338] : memref<384x128xbf16, #tpu.memory_space<vmem>>, vector<384x128xbf16>
    %cst_339 = arith.constant dense<0.000000e+00> : vector<16x128xf32>
    %742 = tpu.matmul %740, %741, %cst_339 {dimension_numbers = #tpu.dot_dimension_numbers<[1], [0], [0], [1], [0, 0, 1, 1], [], []>} : vector<16x384xbf16>, vector<384x128xbf16>, vector<16x128xf32> -> vector<16x128xf32>
    %c0_340 = arith.constant 0 : index
    %c0_341 = arith.constant 0 : index
    %743 = vector.load %arg18[%c0_340, %c0_341] : memref<1x128xf32, #tpu.memory_space<vmem>>, vector<1x128xf32>
    %744 = vector.broadcast %743 : vector<1x128xf32> to vector<16x128xf32>
    %745 = arith.addf %742, %744 : vector<16x128xf32>
    %c4_342 = arith.constant 4 : index
    %c0_343 = arith.constant 0 : index
    %c0_344 = arith.constant 0 : index
    %746 = vector.load %arg19[%c4_342, %c0_343, %c0_344] : memref<6x16x128xf32, #tpu.memory_space<vmem>>, vector<1x16x128xf32>
    %747 = vector.shape_cast %746 : vector<1x16x128xf32> to vector<16x128xf32>
    %748 = vector.shape_cast %745 : vector<16x128xf32> to vector<1x16x128xf32>
    tpu.vector_store %arg19[%c4_342, %c0_343, %c0_344], %748 {strides = array<i32>} : memref<6x16x128xf32, #tpu.memory_space<vmem>>, vector<1x16x128xf32>,
    %c4_345 = arith.constant 4 : index
    %c0_346 = arith.constant 0 : index
    %c0_347 = arith.constant 0 : index
    %749 = vector.load %arg1[%c4_345, %c0_346, %c0_347] : memref<5x16x128xbf16, #tpu.memory_space<vmem>>, vector<1x16x128xbf16>
    %750 = vector.shape_cast %749 : vector<1x16x128xbf16> to vector<16x128xbf16>
    %751 = arith.truncf %738 : vector<16x128xf32> to vector<16x128xbf16>
    %c0_348 = arith.constant 0 : index
    %c0_349 = arith.constant 0 : index
    %752 = vector.load %arg12[%c0_348, %c0_349] : memref<128x512xbf16, #tpu.memory_space<vmem>>, vector<128x512xbf16>
    %cst_350 = arith.constant dense<0.000000e+00> : vector<16x512xf32>
    %753 = tpu.matmul %751, %752, %cst_350 {dimension_numbers = #tpu.dot_dimension_numbers<[1], [0], [0], [1], [0, 0, 1, 1], [], []>} : vector<16x128xbf16>, vector<128x512xbf16>, vector<16x512xf32> -> vector<16x512xf32>
    %754 = vector.extract_strided_slice %753 {offsets = [0, 0], sizes = [16, 128], strides = [1, 1]} : vector<16x512xf32> to vector<16x128xf32>
    %755 = vector.extract_strided_slice %753 {offsets = [0, 128], sizes = [16, 384], strides = [1, 1]} : vector<16x512xf32> to vector<16x384xf32>
    %c0_351 = arith.constant 0 : index
    %c0_352 = arith.constant 0 : index
    %c0_353 = arith.constant 0 : index
    %756 = vector.load %arg21[%c0_351, %c0_352, %c0_353] : memref<8x16x128xf32, #tpu.memory_space<vmem>>, vector<8x16x128xf32>
    %757 = vector.shape_cast %754 : vector<16x128xf32> to vector<1x16x128xf32>
    %758 = vector.broadcast %757 : vector<1x16x128xf32> to vector<8x16x128xf32>
    %759 = arith.addf %756, %758 : vector<8x16x128xf32>
    %760 = math.tanh %759 : vector<8x16x128xf32>
    %c0_354 = arith.constant 0 : index
    %c0_355 = arith.constant 0 : index
    %761 = vector.load %arg11[%c0_354, %c0_355] : memref<1x128xf32, #tpu.memory_space<vmem>>, vector<1x128xf32>
    %762 = vector.shape_cast %761 : vector<1x128xf32> to vector<1x1x128xf32>
    %763 = vector.broadcast %762 : vector<1x1x128xf32> to vector<8x16x128xf32>
    %764 = arith.mulf %760, %763 : vector<8x16x128xf32>
    %cst_356 = arith.constant dense<0.000000e+00> : vector<8x16xf32>
    %765 = vector.multi_reduction <add>, %764, %cst_356 [2] : vector<8x16x128xf32> to vector<8x16xf32>
    %766 = vector.shape_cast %765 : vector<8x16xf32> to vector<8x16x1xf32>
    %cst_357 = arith.constant 0.000000e+00 : f32
    %767 = vector.broadcast %cst_357 : f32 to vector<8x16x1xf32>
    %768 = arith.cmpf ogt, %424, %767 : vector<8x16x1xf32>
    %cst_358 = arith.constant -1.000000e+10 : f32
    %769 = vector.broadcast %cst_358 : f32 to vector<8x16x1xf32>
    %770 = arith.select %768, %766, %769 : vector<8x16x1xi1>, vector<8x16x1xf32>
    %cst_359 = arith.constant dense<0xFF800000> : vector<16x1xf32>
    %771 = vector.multi_reduction <maximumf>, %770, %cst_359 [0] : vector<8x16x1xf32> to vector<16x1xf32>
    %772 = vector.shape_cast %771 : vector<16x1xf32> to vector<1x16x1xf32>
    %773 = vector.broadcast %772 : vector<1x16x1xf32> to vector<8x16x1xf32>
    %774 = arith.subf %770, %773 : vector<8x16x1xf32>
    %775 = math.exp %774 : vector<8x16x1xf32>
    %cst_360 = arith.constant dense<0.000000e+00> : vector<16x1xf32>
    %776 = vector.multi_reduction <add>, %775, %cst_360 [0] : vector<8x16x1xf32> to vector<16x1xf32>
    %777 = vector.shape_cast %776 : vector<16x1xf32> to vector<1x16x1xf32>
    %778 = tpu.reciprocal %777 {approx = true} : vector<1x16x1xf32> -> vector<1x16x1xf32>
    %779 = vector.broadcast %778 : vector<1x16x1xf32> to vector<8x16x1xf32>
    %780 = arith.mulf %775, %779 : vector<8x16x1xf32>
    %c0_361 = arith.constant 0 : index
    %c0_362 = arith.constant 0 : index
    %c0_363 = arith.constant 0 : index
    %781 = vector.load %arg20[%c0_361, %c0_362, %c0_363] : memref<8x16x128xf32, #tpu.memory_space<vmem>>, vector<8x16x128xf32>
    %782 = vector.broadcast %780 : vector<8x16x1xf32> to vector<8x16x128xf32>
    %783 = arith.mulf %782, %781 : vector<8x16x128xf32>
    %cst_364 = arith.constant dense<0.000000e+00> : vector<16x128xf32>
    %784 = vector.multi_reduction <add>, %783, %cst_364 [0] : vector<8x16x128xf32> to vector<16x128xf32>
    %785 = arith.truncf %784 : vector<16x128xf32> to vector<16x128xbf16>
    %c4_365 = arith.constant 4 : index
    %c0_366 = arith.constant 0 : index
    %c0_367 = arith.constant 0 : index
    %786 = vector.load %arg23[%c4_365, %c0_366, %c0_367] : memref<5x16x384xf32, #tpu.memory_space<vmem>>, vector<1x16x384xf32>
    %787 = vector.shape_cast %786 : vector<1x16x384xf32> to vector<16x384xf32>
    %c0_368 = arith.constant 0 : index
    %c0_369 = arith.constant 0 : index
    %788 = vector.load %arg14[%c0_368, %c0_369] : memref<128x384xbf16, #tpu.memory_space<vmem>>, vector<128x384xbf16>
    %cst_370 = arith.constant dense<0.000000e+00> : vector<16x384xf32>
    %789 = tpu.matmul %785, %788, %cst_370 {dimension_numbers = #tpu.dot_dimension_numbers<[1], [0], [0], [1], [0, 0, 1, 1], [], []>} : vector<16x128xbf16>, vector<128x384xbf16>, vector<16x384xf32> -> vector<16x384xf32>
    %790 = arith.addf %787, %789 : vector<16x384xf32>
    %791 = vector.extract_strided_slice %790 {offsets = [0, 0], sizes = [16, 128], strides = [1, 1]} : vector<16x384xf32> to vector<16x128xf32>
    %792 = vector.extract_strided_slice %755 {offsets = [0, 0], sizes = [16, 128], strides = [1, 1]} : vector<16x384xf32> to vector<16x128xf32>
    %793 = arith.addf %791, %792 : vector<16x128xf32>
    %794 = arith.negf %793 : vector<16x128xf32>
    %795 = math.exp %794 : vector<16x128xf32>
    %cst_371 = arith.constant 1.000000e+00 : f32
    %796 = vector.broadcast %cst_371 : f32 to vector<16x128xf32>
    %797 = arith.addf %796, %795 : vector<16x128xf32>
    %798 = arith.divf %796, %797 : vector<16x128xf32>
    %799 = vector.extract_strided_slice %790 {offsets = [0, 128], sizes = [16, 128], strides = [1, 1]} : vector<16x384xf32> to vector<16x128xf32>
    %800 = vector.extract_strided_slice %755 {offsets = [0, 128], sizes = [16, 128], strides = [1, 1]} : vector<16x384xf32> to vector<16x128xf32>
    %801 = arith.addf %799, %800 : vector<16x128xf32>
    %802 = arith.negf %801 : vector<16x128xf32>
    %803 = math.exp %802 : vector<16x128xf32>
    %cst_372 = arith.constant 1.000000e+00 : f32
    %804 = vector.broadcast %cst_372 : f32 to vector<16x128xf32>
    %805 = arith.addf %804, %803 : vector<16x128xf32>
    %806 = arith.divf %804, %805 : vector<16x128xf32>
    %807 = vector.extract_strided_slice %790 {offsets = [0, 256], sizes = [16, 128], strides = [1, 1]} : vector<16x384xf32> to vector<16x128xf32>
    %808 = vector.extract_strided_slice %755 {offsets = [0, 256], sizes = [16, 128], strides = [1, 1]} : vector<16x384xf32> to vector<16x128xf32>
    %c0_373 = arith.constant 0 : index
    %c0_374 = arith.constant 0 : index
    %809 = vector.load %arg16[%c0_373, %c0_374] : memref<1x128xf32, #tpu.memory_space<vmem>>, vector<1x128xf32>
    %810 = vector.broadcast %809 : vector<1x128xf32> to vector<16x128xf32>
    %811 = arith.addf %808, %810 : vector<16x128xf32>
    %812 = arith.mulf %798, %811 : vector<16x128xf32>
    %813 = arith.addf %807, %812 : vector<16x128xf32>
    %814 = math.tanh %813 : vector<16x128xf32>
    %cst_375 = arith.constant 1.000000e+00 : f32
    %815 = vector.broadcast %cst_375 : f32 to vector<16x128xf32>
    %816 = arith.subf %815, %806 : vector<16x128xf32>
    %817 = arith.mulf %816, %814 : vector<16x128xf32>
    %818 = arith.mulf %806, %738 : vector<16x128xf32>
    %819 = arith.addf %817, %818 : vector<16x128xf32>
    %820 = arith.truncf %819 : vector<16x128xf32> to vector<16x128xbf16>
    %821 = tpu.concatenate %820, %750, %785 in 1 : vector<16x128xbf16>, vector<16x128xbf16>, vector<16x128xbf16> -> vector<16x384xbf16>
    %c0_376 = arith.constant 0 : index
    %c0_377 = arith.constant 0 : index
    %822 = vector.load %arg17[%c0_376, %c0_377] : memref<384x128xbf16, #tpu.memory_space<vmem>>, vector<384x128xbf16>
    %cst_378 = arith.constant dense<0.000000e+00> : vector<16x128xf32>
    %823 = tpu.matmul %821, %822, %cst_378 {dimension_numbers = #tpu.dot_dimension_numbers<[1], [0], [0], [1], [0, 0, 1, 1], [], []>} : vector<16x384xbf16>, vector<384x128xbf16>, vector<16x128xf32> -> vector<16x128xf32>
    %c0_379 = arith.constant 0 : index
    %c0_380 = arith.constant 0 : index
    %824 = vector.load %arg18[%c0_379, %c0_380] : memref<1x128xf32, #tpu.memory_space<vmem>>, vector<1x128xf32>
    %825 = vector.broadcast %824 : vector<1x128xf32> to vector<16x128xf32>
    %826 = arith.addf %823, %825 : vector<16x128xf32>
    %c5_381 = arith.constant 5 : index
    %c0_382 = arith.constant 0 : index
    %c0_383 = arith.constant 0 : index
    %827 = vector.load %arg19[%c5_381, %c0_382, %c0_383] : memref<6x16x128xf32, #tpu.memory_space<vmem>>, vector<1x16x128xf32>
    %828 = vector.shape_cast %827 : vector<1x16x128xf32> to vector<16x128xf32>
    %829 = vector.shape_cast %826 : vector<16x128xf32> to vector<1x16x128xf32>
    tpu.vector_store %arg19[%c5_381, %c0_382, %c0_383], %829 {strides = array<i32>} : memref<6x16x128xf32, #tpu.memory_space<vmem>>, vector<1x16x128xf32>,
    return
  }
}

</mosaic_0001>

<bundles_post_ra>
// kernel: seq2seq_forward.1
= control target key start
LH: loop header
LB: loop body
LE: loop exit
PB: predicated region body
PF: predicated region fallthrough
CT: control target
= control target key end

     0   :  { %s16564_s0 = inlined_call_operand.vmem [shape: bf16[8,16,128], index: 0, kind: input, shape index: {}]   ;;  %s16565_s1 = inlined_call_operand.vmem [shape: bf16[5,16,128], index: 1, kind: input, shape index: {}]   ;;  %s16566_s2 = inlined_call_operand.vmem [shape: f32[8,16,1], index: 2, kind: input, shape index: {}]   ;;  %s16567_s3 = inlined_call_operand.vmem [shape: bf16[128,384], index: 3, kind: input, shape index: {}]   ;;  %s16568_s4 = inlined_call_operand.hbm [shape: bf16[128,384], index: 4, kind: input, shape index: {}]   ;;  %s16569_s5 = inlined_call_operand.vmem [shape: f32[1,384], index: 5, kind: input, shape index: {}]   ;;  %s16570_s6 = inlined_call_operand.vmem [shape: f32[1,128], index: 6, kind: input, shape index: {}]   ;;  %s16571_s7 = inlined_call_operand.vmem [shape: bf16[128,128], index: 7, kind: input, shape index: {}]   ;;  %s16572_s8 = inlined_call_operand.vmem [shape: f32[1,128], index: 8, kind: input, shape index: {}]   ;;  %s16573_s9 = inlined_call_operand.hbm [shape: bf16[128,128], index: 9, kind: input, shape index: {}]   ;;  %s16574_s10 = inlined_call_operand.vmem [shape: f32[1,128], index: 10, kind: input, shape index: {}]   ;;  %s16575_s11 = inlined_call_operand.vmem [shape: f32[1,128], index: 11, kind: input, shape index: {}]   ;;  %s16576_s12 = inlined_call_operand.vmem [shape: bf16[128,512], index: 12, kind: input, shape index: {}]   ;;  %s16577_s13 = inlined_call_operand.hbm [shape: bf16[128,384], index: 13, kind: input, shape index: {}]   ;;  %s16578_s14 = inlined_call_operand.hbm [shape: bf16[128,384], index: 14, kind: input, shape index: {}]   ;;  %s16579_s15 = inlined_call_operand.vmem [shape: f32[1,384], index: 15, kind: input, shape index: {}]   ;;  %s16580_s16 = inlined_call_operand.vmem [shape: f32[1,128], index: 16, kind: input, shape index: {}]   ;;  %s16581_s17 = inlined_call_operand.hbm [shape: bf16[384,128], index: 17, kind: input, shape index: {}]   ;;  %s16582_s18 = inlined_call_operand.vmem [shape: f32[1,128], index: 18, kind: input, shape index: {}]   ;;  %s16583_s19 = inlined_call_operand.vmem [shape: f32[6,16,128], index: 19, kind: output, shape index: {}]  }
   0x1   :  { %16680 = sst [smem:[#allocation83_spill]] %s16564_s0 }
   0x2   :  { %16681 = sst [smem:[#allocation84_spill]] %s16565_s1 }
   0x3   :  { %16682 = sst [smem:[#allocation85_spill]] %s16566_s2 }
   0x4   :  { %16683 = sst [smem:[#allocation86_spill]] %s16567_s3 }
   0x5   :  { %24 = vsyncpa [#allocation7], 0 }
   0x6   :  { %25 = vsyncpa [#allocation9], 0 }
   0x7   :  { %26 = vsyncpa [#allocation12], 0  ;;  %s13356_s0 = smov [#allocation8]  }
   0x8   :  { %s60_s30 = sshll.u32 %s13356_s0, 4  ;;  %s61_s30 = int_to_ptr.vmem [resolvable:$true] %s60_s30 }
   0x9   :  { %s13258_s20 = scalar_lea.vmem %s61_s30, 1024  ;;  %p13263_p1 = scmp.lt.s32.totalorder %s61_s30, %s61_s30 }
   0xa   :  { %p13259_p0 = scmp.ne.s32.totalorder %s61_s30, %s13258_s20  ;;  %p13264_p2 = scmp.lt.s32.totalorder %s13258_s20, %s13258_s20 }
   0xc   :  { %p13265_p3 = por %p13264_p2, %p13263_p1 }
   0xe   :  { %p13266_p4 = pnand %p13265_p3, %p13259_p0 }
  0x10   :  { %13269 = shalt.err (!%p13266_p4)
}
  0x11   :  { %s13357_s21 = smov 64   ;;  %s13358_s1 = smov 4  }
  0x12   :  { %66 = dma.hbm_to_vmem [thread:$0]  %s16573_s9, 1024, %s61_s30, [#allocation9], %s13357_s21, %s13357_s21, %s13358_s1  }
  0x13   :  { %s13359_s23 = smov [#allocation11]   ;;  %s13360_s25 = smov [#allocation6]  }
  0x14   :  { %s90_s24 = sshll.u32 %s13359_s23, 4  ;;  %s40_s3 = sshll.u32 %s13360_s25, 4  ;;  %s91_s24 = int_to_ptr.vmem [resolvable:$true] %s90_s24  ;;  %s41_s3 = int_to_ptr.vmem [resolvable:$true] %s40_s3 }
  0x15   :  { %s13278_s26 = scalar_lea.vmem %s91_s24, 3072  ;;  %p13283_p6 = scmp.lt.s32.totalorder %s91_s24, %s91_s24 }
  0x16   :  { %p13279_p5 = scmp.ne.s32.totalorder %s91_s24, %s13278_s26  ;;  %p13284_p7 = scmp.lt.s32.totalorder %s13278_s26, %s13278_s26 }
  0x18   :  { %p13285_p8 = por %p13284_p7, %p13283_p6 }
  0x1a   :  { %p13286_p9 = pnand %p13285_p8, %p13279_p5 }
  0x1c   :  { %13289 = shalt.err (!%p13286_p9)
}
  0x1d   :  { %s13361_s27 = smov 192   ;;  %s13362_s28 = smov 12  }
  0x1e   :  { %96 = dma.hbm_to_vmem [thread:$0]  %s16578_s14, 3072, %s91_s24, [#allocation12], %s13361_s27, %s13361_s27, %s13362_s28  }
  0x1f   :  { %s13298_s9 = scalar_lea.vmem %s41_s3, 3072  ;;  %p13303_p11 = scmp.lt.s32.totalorder %s41_s3, %s41_s3 }
  0x20   :  { %p13299_p10 = scmp.ne.s32.totalorder %s41_s3, %s13298_s9  ;;  %p13304_p12 = scmp.lt.s32.totalorder %s13298_s9, %s13298_s9 }
  0x22   :  { %p13305_p13 = por %p13304_p12, %p13303_p11 }
  0x24   :  { %p13306_p0 = pnand %p13305_p13, %p13299_p10 }
  0x26   :  { %13309 = shalt.err (!%p13306_p0)
}
  0x27   :  { %46 = dma.hbm_to_vmem [thread:$0]  %s16568_s4, 3072, %s41_s3, [#allocation7], %s13361_s27, %s13361_s27, %s13362_s28  }
  0x28   :  { %s13363_s22 = smov [#allocation10]   ;;  %s13364_s23 = smov [#allocation13]  }
  0x29   :  { %s78_s2 = sshll.u32 %s13363_s22, 4  ;;  %s106_s25 = sshll.u32 %s13364_s23, 4  ;;  %s79_s2 = int_to_ptr.vmem [resolvable:$true] %s78_s2  ;;  %s107_s25 = int_to_ptr.vmem [resolvable:$true] %s106_s25 }
  0x2a   :  { %s13318_s26 = scalar_lea.vmem %s79_s2, 3072  ;;  %p13323_p2 = scmp.lt.s32.totalorder %s79_s2, %s79_s2 }
  0x2b   :  { %p13319_p1 = scmp.ne.s32.totalorder %s79_s2, %s13318_s26  ;;  %p13324_p3 = scmp.lt.s32.totalorder %s13318_s26, %s13318_s26 }
  0x2d   :  { %p13325_p4 = por %p13324_p3, %p13323_p2 }
  0x2f   :  { %p13326_p5 = pnand %p13325_p4, %p13319_p1 }
  0x31   :  { %13329 = shalt.err (!%p13326_p5)
}
  0x32   :  { %84 = dma.hbm_to_vmem [thread:$0]  %s16577_s13, 3072, %s79_s2, [#allocation9], %s13361_s27, %s13361_s27, %s13362_s28  }
  0x33   :  { %s13338_s29 = scalar_lea.vmem %s107_s25, 3072  ;;  %p13343_p7 = scmp.lt.s32.totalorder %s107_s25, %s107_s25 }
  0x34   :  { %p13339_p6 = scmp.ne.s32.totalorder %s107_s25, %s13338_s29  ;;  %p13344_p8 = scmp.lt.s32.totalorder %s13338_s29, %s13338_s29 }
  0x36   :  { %p13345_p9 = por %p13344_p8, %p13343_p7 }
  0x38   :  { %p13346_p10 = pnand %p13345_p9, %p13339_p6 }
  0x3a   :  { %13349 = shalt.err (!%p13346_p10)
}
  0x3b   :  { %112 = dma.hbm_to_vmem [thread:$0]  %s16581_s17, 3072, %s107_s25, [#allocation12], %s13357_s21, %s13357_s21, %s13358_s1  }
  0x3c   :  { %13350 = dma.done.wait [#allocation7], 3072  }
  0x3d   :  { %13351 = vsyncadd [#allocation7], 4294964224 }
  0x3e   :  { %13352 = dma.done.wait [#allocation9], 4096  }
  0x3f   :  { %13353 = vsyncadd [#allocation9], 4294963200 }
  0x40   :  { %13354 = dma.done.wait [#allocation12], 6144  }
  0x41   :  { %13355 = vsyncadd [#allocation12], 4294961152  ;;  %v13365_v0 = vmov 0.0   ;;  %v16588_v1 = vmov 0   ;;  %s16684_s1 = sld [smem:[#allocation86_spill]]  ;;  %vm16600_vm12 = vmmov 0  }
  0x42   :  { %3950 = vst [vmem:[%s16583_s19] sm:$0xff] %v13365_v0  ;;  %3951 = vst [vmem:[%s16583_s19 + $0x8] sm:$0xff] %v13365_v0  ;;  %404 = vmatprep.mubr.bf16.mxu0 %v16588_v1  ;;  %11883 = vset.pattern.permute.xlu1 %v16588_v1  ;;  %s16685_s28 = sld [smem:[#allocation83_spill]]  ;;  %v11920_v27 = vld [vmem:[#allocation10 + $0xac] ss:$12 sps:$4 sm:$0xff]   ;;  %v11918_v29 = vld [vmem:[#allocation10 + $0xa8] ss:$12 sps:$4 sm:$0xff]  }
  0x43   :  { %11882 = vset.pattern.permute.xlu0 %v16588_v1  ;;  %v11921_v30 = vld [vmem:[#allocation10 + $0xb0] ss:$12 sps:$4 sm:$0xff]   ;;  %v11924_v31 = vld [vmem:[#allocation10 + $0x94] ss:$12 sps:$4 sm:$0xff]   ;;  %v11930_v34 = vld [vmem:[#allocation10 + $0x98] ss:$12 sps:$4 sm:$0xff]  }
  0x44   :  { %v11922_v33 = vld [vmem:[#allocation10 + $0x90] ss:$12 sps:$4 sm:$0xff]   ;;  %v11927_v37 = vld [vmem:[#allocation10 + $0x78] ss:$12 sps:$4 sm:$0xff]   ;;  %v11939_v40 = vld [vmem:[#allocation10 + $0x80] ss:$12 sps:$4 sm:$0xff]  }
  0x45   :  { %v11929_v35 = vld [vmem:[#allocation10 + $0x7c] ss:$12 sps:$4 sm:$0xff]   ;;  %v11933_v38 = vld [vmem:[#allocation10 + $0x64] ss:$12 sps:$4 sm:$0xff]   ;;  %v11931_v41 = vld [vmem:[#allocation10 + $0x60] ss:$12 sps:$4 sm:$0xff]  }
  0x46   :  { %v11938_v43 = vld [vmem:[#allocation10 + $0x4c] ss:$12 sps:$4 sm:$0xff]   ;;  %v11948_v44 = vld [vmem:[#allocation10 + $0x68] ss:$12 sps:$4 sm:$0xff]   ;;  %v11956_v48 = vld [vmem:[#allocation10 + $0x50] ss:$12 sps:$4 sm:$0xff]  }
  0x47   :  { %v11884_v2 = vld [vmem:[%s16684_s1 + $0xac] ss:$12 sps:$4 sm:$0xff]   ;;  %v11886_v3 = vld [vmem:[%s16684_s1 + $0xb0] ss:$12 sps:$4 sm:$0xff]   ;;  %v11887_v4 = vld [vmem:[%s16684_s1 + $0xa8] ss:$12 sps:$4 sm:$0xff]  }
  0x48   :  { %372 = vmatprep.subr.bf16.mxu0 %v11884_v2  ;;  %11390 = vmatprep.subr.bf16.mxu1 %v11886_v3  ;;  %v11888_v5 = vld [vmem:[%s16684_s1 + $0x94] ss:$12 sps:$4 sm:$0xff]   ;;  %v11890_v6 = vld [vmem:[%s16684_s1 + $0x98] ss:$12 sps:$4 sm:$0xff]   ;;  %v11891_v7 = vld [vmem:[%s16684_s1 + $0x90] ss:$12 sps:$4 sm:$0xff]  }
  0x49   :  { %373 = vmatpush1.bf16.msra.mxu0 %v11887_v4  ;;  %11391 = vmatpush3.bf16.msra.mxu1 %v11886_v3  ;;  %v11892_v8 = vld [vmem:[%s16684_s1 + $0x7c] ss:$12 sps:$4 sm:$0xff]   ;;  %v11894_v9 = vld [vmem:[%s16684_s1 + $0x80] ss:$12 sps:$4 sm:$0xff]   ;;  %v11895_v10 = vld [vmem:[%s16684_s1 + $0x78] ss:$12 sps:$4 sm:$0xff]  }
  0x4a   :  { %374 = vmatprep.subr.bf16.mxu0 %v11888_v5  ;;  %11392 = vmatprep.subr.bf16.mxu1 %v11890_v6  ;;  %v11896_v11 = vld [vmem:[%s16684_s1 + $0x64] ss:$12 sps:$4 sm:$0xff]   ;;  %v11898_v12 = vld [vmem:[%s16684_s1 + $0x68] ss:$12 sps:$4 sm:$0xff]   ;;  %v11899_v13 = vld [vmem:[%s16684_s1 + $0x60] ss:$12 sps:$4 sm:$0xff]  }
  0x4b   :  { %v11900_v14 = vld [vmem:[%s16684_s1 + $0x4c] ss:$12 sps:$4 sm:$0xff]   ;;  %v11902_v15 = vld [vmem:[%s16684_s1 + $0x50] ss:$12 sps:$4 sm:$0xff]   ;;  %v11903_v16 = vld [vmem:[%s16684_s1 + $0x48] ss:$12 sps:$4 sm:$0xff]  }
  0x4c   :  { %v11904_v17 = vld [vmem:[%s16684_s1 + $0x34] ss:$12 sps:$4 sm:$0xff]   ;;  %v11906_v18 = vld [vmem:[%s16684_s1 + $0x38] ss:$12 sps:$4 sm:$0xff]   ;;  %v11907_v20 = vld [vmem:[%s16684_s1 + $0x30] ss:$12 sps:$4 sm:$0xff]  }
  0x4d   :  { %375 = vmatpush1.bf16.msra.mxu0 %v11891_v7  ;;  %11393 = vmatpush3.bf16.msra.mxu1 %v11890_v6  ;;  %v11916_v19 = vld [vmem:[%s16685_s28] sm:$0xff]   ;;  %v11908_v21 = vld [vmem:[%s16684_s1 + $0x1c] ss:$12 sps:$4 sm:$0xff]   ;;  %v11925_v32 = vld [vmem:[%s16685_s28 + $0x10] sm:$0xff]   ;;  %s16686_s26 = sld [smem:[#allocation84_spill]] }
  0x4e   :  { %376 = vmatprep.subr.bf16.mxu0 %v11892_v8  ;;  %11394 = vmatprep.subr.bf16.mxu1 %v11894_v9  ;;  %v11910_v22 = vld [vmem:[%s16684_s1 + $0x20] ss:$12 sps:$4 sm:$0xff]   ;;  %v11911_v23 = vld [vmem:[%s16684_s1 + $0x18] ss:$12 sps:$4 sm:$0xff]   ;;  %v11914_v25 = vld [vmem:[%s16684_s1 + $0x8] ss:$12 sps:$4 sm:$0xff]  }
  0x4f   :  { %11406 = vmatprep.mubr.bf16.mxu1 %v11916_v19  ;;  %v11912_v24 = vld [vmem:[%s16684_s1 + $0x4] ss:$12 sps:$4 sm:$0xff]   ;;  %v11915_v26 = vld [vmem:[%s16684_s1] ss:$12 sps:$4 sm:$0xff]   ;;  %v11926_v36 = vld [vmem:[%s16685_s28 + $0x18] sm:$0xff]   ;;  %s16687_s29 = sld [smem:[#allocation85_spill]] }
  0x50   :  { %v11917_v28 = vld [vmem:[%s16685_s28 + $0x8] sm:$0xff]   ;;  %v11934_v39 = vld [vmem:[%s16685_s28 + $0x20] sm:$0xff]   ;;  %v13601_v47 = vld [vmem:[%s16685_s28 + $0x30] sm:$0xff]  }
  0x51   :  { %377 = vmatpush1.bf16.msra.mxu0 %v11895_v10  ;;  %11395 = vmatpush3.bf16.msra.mxu1 %v11894_v9  ;;  %v13595_v42 = vld [vmem:[%s16685_s28 + $0x28] sm:$0xff]   ;;  %v11942_v46 = vld [vmem:[#allocation10 + $0x34] ss:$12 sps:$4 sm:$0xff]   ;;  %v11940_v49 = vld [vmem:[#allocation10 + $0x30] ss:$12 sps:$4 sm:$0xff]  }
  0x52   :  { %378 = vmatprep.subr.bf16.mxu0 %v11896_v11  ;;  %11396 = vmatprep.subr.bf16.mxu1 %v11898_v12  ;;  %v11936_v45 = vld [vmem:[#allocation10 + $0x48] ss:$12 sps:$4 sm:$0xff]   ;;  %v13610_v51 = vld [vmem:[%s16685_s28 + $0x38] sm:$0xff]   ;;  %v11951_v53 = vld [vmem:[#allocation10 + $0x4] ss:$12 sps:$4 sm:$0xff]  }
  0x53   :  { %v11947_v50 = vld [vmem:[#allocation10 + $0x1c] ss:$12 sps:$4 sm:$0xff]   ;;  %v11945_v52 = vld [vmem:[#allocation10 + $0x18] ss:$12 sps:$4 sm:$0xff]   ;;  %v11949_v55 = vld [vmem:[#allocation10] ss:$12 sps:$4 sm:$0xff]  }
  0x54   :  { %v11961_v54 = vld [vmem:[#allocation10 + $0x38] ss:$12 sps:$4 sm:$0xff]   ;;  %v11969_v57 = vld [vmem:[#allocation10 + $0x20] ss:$12 sps:$4 sm:$0xff]   ;;  %v13624_v59 = vld [vmem:[#allocation6 + $0xa8] ss:$12 sps:$4 sm:$0xff]  }
  0x55   :  { %379 = vmatpush1.bf16.msra.mxu0 %v11899_v13  ;;  %11397 = vmatpush3.bf16.msra.mxu1 %v11898_v12  ;;  %v13616_v56 = vld [vmem:[#allocation6 + $0xac] ss:$12 sps:$4 sm:$0xff]   ;;  %v13621_v58 = vld [vmem:[%s16686_s26] sm:$0xff]   ;;  %v13629_v61 = vld [vmem:[#allocation6 + $0x90] ss:$12 sps:$4 sm:$0xff]  }
  0x56   :  { %380 = vmatprep.subr.bf16.mxu0 %v11900_v14  ;;  %11398 = vmatprep.subr.bf16.mxu1 %v11902_v15  ;;  %v13627_v60 = vld [vmem:[#allocation6 + $0x94] ss:$12 sps:$4 sm:$0xff]   ;;  %v13634_v63 = vld [vmem:[#allocation6 + $0x7c] ss:$12 sps:$4 sm:$0xff]   ;;  %v13665_v11 = vld [vmem:[#allocation6 + $0x78] ss:$12 sps:$4 sm:$0xff]  }
  0x57   :  { %v11974_v62 = vld [vmem:[#allocation10 + $0x8] ss:$12 sps:$4 sm:$0xff]   ;;  %v1334_v3 = vld [vmem:[%s16687_s29] sm:$0xff]  ;;  %v10377_v4 = vld [vmem:[%s16687_s29 + $0x18] sm:$0xff] }
  0x58   :  { %v10376_v2 = vld [vmem:[%s16687_s29 + $0x10] sm:$0xff]  ;;  %vm1336_vm1 = vcmp.gt.f32.partialorder %v1334_v3, 0.0  ;;  %v1335_v5 = vld [vmem:[%s16687_s29 + $0x8] sm:$0xff]  ;;  %v10407_v7 = vld [vmem:[%s16687_s29 + $0x20] sm:$0xff]  ;;  %vm1659_vm2 = vcmp.gt.f32.partialorder %v10377_v4, 0.0 }
  0x59   :  { %381 = vmatpush1.bf16.msra.mxu0 %v11903_v16  ;;  %11399 = vmatpush3.bf16.msra.mxu1 %v11902_v15  ;;  %vm1658_vm0 = vcmp.gt.f32.partialorder %v10376_v2, 0.0  ;;  %v10408_v6 = vld [vmem:[%s16687_s29 + $0x28] sm:$0xff]  ;;  %v1338_v10 = vsel %vm1336_vm1, 1, %v16588_v1  ;;  %vm1337_vm3 = vcmp.gt.f32.partialorder %v1335_v5, 0.0  ;;  %vm1983_vm5 = vcmp.gt.f32.partialorder %v10407_v7, 0.0  ;;  %v10439_v12 = vld [vmem:[%s16687_s29 + $0x38] sm:$0xff] }
  0x5a   :  { %382 = vmatprep.subr.bf16.mxu0 %v11904_v17  ;;  %11400 = vmatprep.subr.bf16.mxu1 %v11906_v18  ;;  %v13660_v8 = vld [vmem:[%s16686_s26 + $0x8] sm:$0xff]   ;;  %v1660_v9 = vsel %vm1658_vm0, 1, %v16588_v1  ;;  %vm1984_vm4 = vcmp.gt.f32.partialorder %v10408_v6, 0.0  ;;  %v13672_v13 = vld [vmem:[#allocation6 + $0x64] ss:$12 sps:$4 sm:$0xff]   ;;  %v1661_v16 = vsel %vm1659_vm2, 1, %v16588_v1 }
  0x5b   :  { %1663 = vperm.xlu1 %11883, %v1660_v9   ;;  %v10438_v14 = vld [vmem:[%s16687_s29 + $0x30] sm:$0xff]  ;;  %v13677_v15 = vld [vmem:[#allocation6 + $0x60] ss:$12 sps:$4 sm:$0xff]   ;;  %1341 = vperm.xlu0 %11882, %v1338_v10   ;;  %vm2309_vm6 = vcmp.gt.f32.partialorder %v10439_v12, 0.0  ;;  %v11998_v2 = vld [vmem:[#allocation6 + $0x38] ss:$12 sps:$4 sm:$0xff]  }
  0x5c   :  { %v13682_v17 = vld [vmem:[#allocation6 + $0x4c] ss:$12 sps:$4 sm:$0xff]   ;;  %vm2308_vm7 = vcmp.gt.f32.partialorder %v10438_v14, 0.0  ;;  %v179_v3 = vld [vmem:[%s16569_s5] sm:$0x7] }
  0x5d   :  { %383 = vmatpush1.bf16.msra.mxu0 %v11907_v20  ;;  %11401 = vmatpush3.bf16.msra.mxu1 %v11906_v18  ;;  %v1339_v18 = vsel %vm1337_vm3, 1, %v16588_v1  ;;  %v1985_v20 = vsel %vm1983_vm5, 1, %v16588_v1  ;;  %v11999_v5 = vld [vmem:[#allocation6 + $0x20] ss:$12 sps:$4 sm:$0xff]   ;;  %v12000_v7 = vld [vmem:[#allocation6 + $0x8] ss:$12 sps:$4 sm:$0xff]  }
  0x5e   :  { %384 = vmatprep.subr.bf16.mxu0 %v11908_v21  ;;  %11402 = vmatprep.subr.bf16.mxu1 %v11910_v22  ;;  %v13694_v21 = vld [vmem:[%s16686_s26 + $0x10] sm:$0xff]  }
  0x5f   :  { %1666 = vperm.xlu1 %11883, %v1661_v16   ;;  %1344 = vperm.xlu0 %11882, %v1339_v18  }
  0x61   :  { %385 = vmatpush1.bf16.msra.mxu0 %v11911_v23  ;;  %11403 = vmatpush3.bf16.msra.mxu1 %v11910_v22  ;;  %v10470_v22 = vld [vmem:[%s16687_s29 + $0x48] sm:$0xff] }
  0x62   :  { %386 = vmatprep.subr.bf16.mxu0 %v11912_v24  ;;  %11404 = vmatprep.subr.bf16.mxu1 %v11914_v25  ;;  %v13699_v23 = vld [vmem:[#allocation6 + $0x48] ss:$12 sps:$4 sm:$0xff]   ;;  %v10469_v24 = vld [vmem:[%s16687_s29 + $0x40] sm:$0xff]  ;;  %vm2634_vm8 = vcmp.gt.f32.partialorder %v10470_v22, 0.0 }
  0x63   :  { %1988 = vperm.xlu0 %11882, %v1985_v20   ;;  %vm2633_vm9 = vcmp.gt.f32.partialorder %v10469_v24, 0.0 }
  0x65   :  { %387 = vmatpush1.bf16.msra.mxu0 %v11915_v26  ;;  %11405 = vmatpush3.bf16.msra.mxu1 %v11914_v25  ;;  %v13704_v25 = vld [vmem:[#allocation6 + $0x34] ss:$12 sps:$4 sm:$0xff]   ;;  %v10501_v26 = vld [vmem:[%s16687_s29 + $0x58] sm:$0xff] }
  0x66   :  { %847 = vmatprep.subr.bf16.mxu1 %v11920_v27  ;;  %11422 = vmatprep.subr.bf16.mxu0 %v13365_v0  ;;  %v2311_v27 = vsel %vm2309_vm6, 1, %v16588_v1  ;;  %vm2959_vm10 = vcmp.gt.f32.partialorder %v10501_v26, 0.0 }
  0x68   :  { %405 = vmatmul.mubr.bf16.vlgmr.msra.gmra.mxu0 %v11916_v19  ;;  %11407 = vmatmul.mubr.bf16.vlgmr.msra.gmra.mxu1 %v11917_v28  ;;  %v1986_v19 = vsel %vm1984_vm4, 1, %v16588_v1 }
  0x69   :  { %848 = vmatpush1.bf16.msra.mxu1 %v11918_v29  ;;  %11423 = vmatpush3.bf16.msra.mxu0 %v11921_v30  ;;  %v2310_v29 = vsel %vm2308_vm7, 1, %v16588_v1  ;;  %v10500_v30 = vld [vmem:[%s16687_s29 + $0x50] sm:$0xff] }
  0x6a   :  { %849 = vmatprep.subr.bf16.mxu1 %v11924_v31  ;;  %414 = vmatprep.mubr.bf16.mxu0 %v16588_v1  ;;  %v13722_v31 = vld [vmem:[#allocation6 + $0x1c] ss:$12 sps:$4 sm:$0xff]   ;;  %vm2958_vm11 = vcmp.gt.f32.partialorder %v10500_v30, 0.0 }
  0x6b   :  { %11410 = vmatprep.mubr.bf16.mxu1 %v11925_v32  ;;  %11424 = vmatprep.subr.bf16.mxu0 %v13365_v0 }
  0x6c   :  { %1991 = vperm.xlu1 %11883, %v1986_v19   ;;  %2313 = vperm.xlu0 %11882, %v2310_v29  }
  0x6d   :  { %850 = vmatpush1.bf16.msra.mxu1 %v11922_v33  ;;  %11425 = vmatpush3.bf16.msra.mxu0 %v11930_v34  ;;  %v2636_v33 = vsel %vm2634_vm8, 1, %v16588_v1  ;;  %v2635_v34 = vsel %vm2633_vm9, 1, %v16588_v1 }
  0x6e   :  { %851 = vmatprep.subr.bf16.mxu1 %v11929_v35  ;;  %11426 = vmatprep.subr.bf16.mxu0 %v13365_v0  ;;  %v13735_v35 = vld [vmem:[#allocation6 + $0x18] ss:$12 sps:$4 sm:$0xff]  }
  0x70   :  { %415 = vmatmul.mubr.bf16.gmra.mxu0 %v11917_v28  ;;  %11411 = vmatmul.mubr.bf16.gmra.mxu1 %v11926_v36  ;;  %v13713_v28 = vld [vmem:[#allocation6 + $0x30] ss:$12 sps:$4 sm:$0xff]  }
  0x71   :  { %852 = vmatpush1.bf16.msra.mxu1 %v11927_v37  ;;  %424 = vmatprep.mubr.bf16.mxu0 %v16588_v1  ;;  %v2961_v37 = vsel %vm2959_vm10, 1, %v16588_v1 }
  0x72   :  { %853 = vmatprep.subr.bf16.mxu1 %v11933_v38  ;;  %11414 = vmatprep.mubr.bf16.mxu1 %v11934_v39  ;;  %v2960_v38 = vsel %vm2958_vm11, 1, %v16588_v1 }
  0x73   :  { %11427 = vmatpush3.bf16.msra.mxu0 %v11939_v40  ;;  %2316 = vperm.xlu1 %11883, %v2311_v27   ;;  %v13754_v40 = vld [vmem:[%s16686_s26 + $0x20] sm:$0xff]  }
  0x74   :  { %11428 = vmatprep.subr.bf16.mxu0 %v13365_v0  ;;  %2638 = vperm.xlu0 %11882, %v2635_v34  }
  0x75   :  { %854 = vmatpush1.bf16.msra.mxu1 %v11931_v41  ;;  %v11982_v41 = vld [vmem:[#allocation6 + $0xb0] ss:$12 sps:$4 sm:$0xff]  }
  0x76   :  { %855 = vmatprep.subr.bf16.mxu1 %v11938_v43  ;;  %v10531_v43 = vld [vmem:[%s16687_s29 + $0x60] sm:$0xff] }
  0x77   :  { %11429 = vmatpush3.bf16.msra.mxu0 %v11948_v44  ;;  %2641 = vperm.xlu1 %11883, %v2636_v33   ;;  %v11986_v44 = vld [vmem:[#allocation6 + $0x98] ss:$12 sps:$4 sm:$0xff]   ;;  %vm3283_vm14 = vcmp.gt.f32.partialorder %v10531_v43, 0.0 }
  0x78   :  { %425 = vmatmul.mubr.bf16.gmra.mxu0 %v11925_v32  ;;  %11415 = vmatmul.mubr.bf16.gmra.mxu1 %v13595_v42  ;;  %v13730_v32 = vld [vmem:[%s16686_s26 + $0x18] sm:$0xff]  }
  0x79   :  { %856 = vmatpush1.bf16.msra.mxu1 %v11936_v45  ;;  %434 = vmatprep.mubr.bf16.mxu0 %v16588_v1 }
  0x7a   :  { %857 = vmatprep.subr.bf16.mxu1 %v11942_v46  ;;  %11418 = vmatprep.mubr.bf16.mxu1 %v13601_v47  ;;  %v3285_v46 = vsel %vm3283_vm14, 1, %v16588_v1 }
  0x7b   :  { %11430 = vmatprep.subr.bf16.mxu0 %v13365_v0  ;;  %2966 = vperm.xlu1 %11883, %v2961_v37  }
  0x7c   :  { %11431 = vmatpush3.bf16.msra.mxu0 %v11956_v48  ;;  %2963 = vperm.xlu0 %11882, %v2960_v38   ;;  %v10562_v48 = vld [vmem:[%s16687_s29 + $0x70] sm:$0xff] }
  0x7d   :  { %858 = vmatpush1.bf16.msra.mxu1 %v11940_v49  ;;  %11432 = vmatprep.subr.bf16.mxu0 %v13365_v0  ;;  %v11987_v49 = vld [vmem:[#allocation6 + $0x80] ss:$12 sps:$4 sm:$0xff]   ;;  %vm3608_vm0 = vcmp.gt.f32.partialorder %v10562_v48, 0.0 }
  0x7e   :  { %859 = vmatprep.subr.bf16.mxu1 %v11947_v50 }
  0x80   :  { %435 = vmatmul.mubr.bf16.gmra.mxu0 %v11926_v36  ;;  %11419 = vmatmul.mubr.bf16.gmra.mxu1 %v13610_v51  ;;  %v13738_v36 = vld [vmem:[#allocation6 + $0x4] ss:$12 sps:$4 sm:$0xff]  }
  0x81   :  { %860 = vmatpush1.bf16.msra.mxu1 %v11945_v52  ;;  %444 = vmatprep.mubr.bf16.mxu0 %v16588_v1  ;;  %v11988_v52 = vld [vmem:[#allocation6 + $0x68] ss:$12 sps:$4 sm:$0xff]  }
  0x82   :  { %861 = vmatprep.subr.bf16.mxu1 %v11951_v53  ;;  %879 = vmatprep.mubr.bf16.mxu1 %v16588_v1  ;;  %v11989_v53 = vld [vmem:[#allocation6 + $0x50] ss:$12 sps:$4 sm:$0xff]  }
  0x83   :  { %11433 = vmatpush3.bf16.msra.mxu0 %v11961_v54  ;;  %3288 = vperm.xlu0 %11882, %v3285_v46   ;;  %v11990_v54 = vld [vmem:[#allocation6 + $0x38] ss:$12 sps:$4 sm:$0xff]  }
  0x84   :  { %11434 = vmatprep.subr.bf16.mxu0 %v13365_v0 }
  0x85   :  { %862 = vmatpush1.bf16.msra.mxu1 %v11949_v55  ;;  %v13797_v55 = vld [vmem:[%s16583_s19] sm:$0xff] }
  0x86   :  { %1199 = vmatprep.subr.bf16.mxu1 %v13616_v56 }
  0x87   :  { %11435 = vmatpush3.bf16.msra.mxu0 %v11969_v57  ;;  %v11993_v57 = vld [vmem:[#allocation6 + $0xb0] ss:$12 sps:$4 sm:$0xff]  }
  0x88   :  { %445 = vmatmul.mubr.bf16.gmra.mxu0 %v11934_v39  ;;  %880 = vmatmul.mubr.bf16.vlgmr.msra.gmra.mxu1 %v13621_v58  ;;  %v13745_v39 = vld [vmem:[#allocation6] ss:$12 sps:$4 sm:$0xff]  }
  0x89   :  { %1200 = vmatpush1.bf16.msra.mxu1 %v13624_v59  ;;  %454 = vmatprep.mubr.bf16.mxu0 %v16588_v1 }
  0x8a   :  { %1201 = vmatprep.subr.bf16.mxu1 %v13627_v60  ;;  %889 = vmatprep.mubr.bf16.mxu1 %v16588_v1 }
  0x8b   :  { %11436 = vmatprep.subr.bf16.mxu0 %v13365_v0 }
  0x8c   :  { %11437 = vmatpush3.bf16.msra.mxu0 %v11974_v62  ;;  %v11997_v62 = vld [vmem:[#allocation6 + $0x50] ss:$12 sps:$4 sm:$0xff]  }
  0x8d   :  { %1202 = vmatpush1.bf16.msra.mxu1 %v13629_v61  ;;  %11458 = vmatprep.subr.bf16.mxu0 %v13365_v0 }
  0x8e   :  { %1203 = vmatprep.subr.bf16.mxu1 %v13634_v63 }
  0x90   :  { %455 = vmatmul.mubr.bf16.gmra.mxu0 %v13595_v42  ;;  %890 = vmatmul.mubr.bf16.gmra.mxu1 %v13660_v8  ;;  %v10532_v42 = vld [vmem:[%s16687_s29 + $0x68] sm:$0xff] }
  0x91   :  { %1204 = vmatpush1.bf16.msra.mxu1 %v13665_v11  ;;  %464 = vmatprep.mubr.bf16.mxu0 %v16588_v1  ;;  %vm3284_vm13 = vcmp.gt.f32.partialorder %v10532_v42, 0.0 }
  0x92   :  { %899 = vmatprep.mubr.bf16.mxu1 %v16588_v1  ;;  %1205 = vmatprep.subr.bf16.mxu1 %v13672_v13  ;;  %v3286_v45 = vsel %vm3284_vm13, 1, %v16588_v1 }
  0x93   :  { %3291 = vperm.xlu1 %11883, %v3286_v45  }
  0x95   :  { %1206 = vmatpush1.bf16.msra.mxu1 %v13677_v15 }
  0x96   :  { %1207 = vmatprep.subr.bf16.mxu1 %v13682_v17 }
  0x98   :  { %465 = vmatmul.mubr.bf16.gmra.mxu0 %v13601_v47  ;;  %900 = vmatmul.mubr.bf16.gmra.mxu1 %v13694_v21  ;;  %v10563_v47 = vld [vmem:[%s16687_s29 + $0x78] sm:$0xff] }
  0x99   :  { %1208 = vmatpush1.bf16.msra.mxu1 %v13699_v23  ;;  %474 = vmatprep.mubr.bf16.mxu0 %v16588_v1  ;;  %vm3609_vm15 = vcmp.gt.f32.partialorder %v10563_v47, 0.0 }
  0x9a   :  { %909 = vmatprep.mubr.bf16.mxu1 %v16588_v1  ;;  %1209 = vmatprep.subr.bf16.mxu1 %v13704_v25  ;;  %v3611_v50 = vsel %vm3609_vm15, 1, %v16588_v1 }
  0x9b   :  { %3616 = vperm.xlu1 %11883, %v3611_v50  }
  0x9d   :  { %1210 = vmatpush1.bf16.msra.mxu1 %v13713_v28 }
  0x9e   :  { %1211 = vmatprep.subr.bf16.mxu1 %v13722_v31 }
  0xa0   :  { %475 = vmatmul.mubr.bf16.gmra.mxu0 %v13610_v51  ;;  %910 = vmatmul.mubr.bf16.gmra.mxu1 %v13730_v32  ;;  %v3610_v51 = vsel %vm3608_vm0, 1, %v16588_v1 }
  0xa1   :  { %919 = vmatprep.mubr.bf16.mxu1 %v16588_v1  ;;  %11438 = vmatprep.mubr.msk.bf16.mxu0 %vm16600_vm12, %v13365_v0 }
  0xa2   :  { %1212 = vmatpush1.bf16.msra.mxu1 %v13735_v35  ;;  %3613 = vperm.xlu0 %11882, %v3610_v51  }
  0xa3   :  { %1213 = vmatprep.subr.bf16.mxu1 %v13738_v36 }
  0xa6   :  { %1214 = vmatpush1.bf16.msra.mxu1 %v13745_v39 }
  0xa7   :  { %1520 = vmatprep.subr.bf16.mxu1 %v13616_v56  ;;  %v11992_v56 = vld [vmem:[#allocation6 + $0x8] ss:$12 sps:$4 sm:$0xff]  }
  0xa8   :  { %920 = vmatmul.mubr.bf16.gmra.mxu1 %v13754_v40  ;;  %11439 = vmatmul.mubr.bf16.vlgmr.msra.gmra.mxu0 %v13621_v58  ;;  %v11994_v58 = vld [vmem:[#allocation6 + $0x98] ss:$12 sps:$4 sm:$0xff]  }
  0xa9   :  { %11459 = vmatpush3.bf16.msra.mxu0 %v11982_v41  ;;  %11442 = vmatprep.mubr.msk.bf16.mxu0 %vm16600_vm12, %v13365_v0 }
  0xaa   :  { %11460 = vmatprep.subr.bf16.mxu0 %v13365_v0  ;;  %1231 = vmatprep.mubr.bf16.mxu1 %v16588_v1 }
  0xad   :  { %11461 = vmatpush3.bf16.msra.mxu0 %v11986_v44 }
  0xae   :  { %11462 = vmatprep.subr.bf16.mxu0 %v13365_v0 }
  0xb0   :  { %11443 = vmatmul.mubr.bf16.gmra.mxu0 %v13660_v8  ;;  %1232 = vmatmul.mubr.bf16.vlgmr.msra.gmra.mxu1 %v16588_v1 }
  0xb1   :  { %11463 = vmatpush3.bf16.msra.mxu0 %v11987_v49  ;;  %11446 = vmatprep.mubr.msk.bf16.mxu0 %vm16600_vm12, %v13365_v0 }
  0xb2   :  { %11464 = vmatprep.subr.bf16.mxu0 %v13365_v0  ;;  %1521 = vmatpush1.bf16.msra.mxu1 %v13624_v59  ;;  %v11995_v59 = vld [vmem:[#allocation6 + $0x80] ss:$12 sps:$4 sm:$0xff]  }
  0xb3   :  { %1522 = vmatprep.subr.bf16.mxu1 %v13627_v60  ;;  %1552 = vmatprep.mubr.bf16.mxu1 %v16588_v1  ;;  %v181_v60 = vlaneseq }
  0xb5   :  { %11465 = vmatpush3.bf16.msra.mxu0 %v11988_v52  ;;  %v13914_v52 = vld [vmem:[%s16579_s15] sm:$0x7] }
  0xb6   :  { %11466 = vmatprep.subr.bf16.mxu0 %v13365_v0  ;;  %1523 = vmatpush1.bf16.msra.mxu1 %v13629_v61  ;;  %v11991_v0 = vld [vmem:[#allocation6 + $0x20] ss:$12 sps:$4 sm:$0xff]   ;;  %v11996_v61 = vld [vmem:[#allocation6 + $0x68] ss:$12 sps:$4 sm:$0xff]  }
  0xb7   :  { %1524 = vmatprep.subr.bf16.mxu1 %v13634_v63  ;;  %v13828_v63 = vshrl.u32 %v181_v60, 7 }
  0xb8   :  { %11447 = vmatmul.mubr.bf16.gmra.mxu0 %v13694_v21 }
  0xb9   :  { %11467 = vmatpush3.bf16.msra.mxu0 %v11989_v53  ;;  %11450 = vmatprep.mubr.msk.bf16.mxu0 %vm16600_vm12, %v13797_v55  ;;  %v16590_v4 = vsub.s32 2, %v13828_v63  ;;  %v187_v16 = vsub.s32 1, %v13828_v63 }
  0xba   :  { %11468 = vmatprep.subr.bf16.mxu0 %v13797_v55  ;;  %1525 = vmatpush1.bf16.msra.mxu1 %v13665_v11 }
  0xbb   :  { %1526 = vmatprep.subr.bf16.mxu1 %v13672_v13  ;;  %v13838_v6 = vrot.slane %v179_v3, %v16590_v4  ;;  %v183_v13 = vsub.s32 0, %v13828_v63 }
  0xbd   :  { %11469 = vmatpush3.bf16.msra.mxu0 %v11990_v54  ;;  %v13863_v20 = vrot.slane %v179_v3, %v183_v13 }
  0xbe   :  { %11470 = vmatprep.subr.bf16.mxu0 %v13797_v55  ;;  %1527 = vmatpush1.bf16.msra.mxu1 %v13677_v15 }
  0xbf   :  { %1528 = vmatprep.subr.bf16.mxu1 %v13682_v17 }
  0xc0   :  { %11451 = vmatmul.mubr.bf16.gmra.mxu0 %v13730_v32 }
  0xc1   :  { %11454 = vmatprep.mubr.msk.bf16.mxu0 %vm16600_vm12, %v13797_v55  ;;  %11471 = vmatpush3.bf16.msra.mxu0 %v11991_v0 }
  0xc2   :  { %11472 = vmatprep.subr.bf16.mxu0 %v13797_v55  ;;  %1529 = vmatpush1.bf16.msra.mxu1 %v13699_v23  ;;  %v13865_v23 = vrot.slane %v179_v3, %v187_v16 }
  0xc3   :  { %1530 = vmatprep.subr.bf16.mxu1 %v13704_v25 }
  0xc5   :  { %11473 = vmatpush3.bf16.msra.mxu0 %v11992_v56 }
  0xc6   :  { %11478 = vmatprep.subr.bf16.mxu0 %v13797_v55  ;;  %1531 = vmatpush1.bf16.msra.mxu1 %v13713_v28 }
  0xc7   :  { %1532 = vmatprep.subr.bf16.mxu1 %v13722_v31 }
  0xc8   :  { %11455 = vmatmul.mubr.bf16.gmra.mxu0 %v13754_v40 }
  0xc9   :  { %11474 = vmatprep.mubr.msk.bf16.mxu0 %vm16600_vm12, %v13797_v55 }
  0xca   :  { %1533 = vmatpush1.bf16.msra.mxu1 %v13735_v35 }
  0xcb   :  { %1534 = vmatprep.subr.bf16.mxu1 %v13738_v36 }
  0xce   :  { %1535 = vmatpush1.bf16.msra.mxu1 %v13745_v39 }
  0xd0   :  { %11475 = vmatmul.mubr.bf16.vlgmr.msra.gmra.mxu0 %v16588_v1 }
  0xd1   :  { %11494 = vmatprep.mubr.msk.bf16.mxu0 %vm16600_vm12, %v13797_v55  ;;  %11479 = vmatpush3.bf16.msra.mxu0 %v11993_v57 }
  0xd2   :  { %11480 = vmatprep.subr.bf16.mxu0 %v13797_v55 }
  0xd5   :  { %11481 = vmatpush3.bf16.msra.mxu0 %v11994_v58 }
  0xd6   :  { %11482 = vmatprep.subr.bf16.mxu0 %v13797_v55 }
  0xd9   :  { %11483 = vmatpush3.bf16.msra.mxu0 %v11995_v59 }
  0xda   :  { %11484 = vmatprep.subr.bf16.mxu0 %v13797_v55 }
  0xdd   :  { %11485 = vmatpush3.bf16.msra.mxu0 %v11996_v61 }
  0xde   :  { %11486 = vmatprep.subr.bf16.mxu0 %v13797_v55 }
  0xe1   :  { %11487 = vmatpush3.bf16.msra.mxu0 %v11997_v62  ;;  %v13935_v62 = vrot.slane %v13914_v52, %v183_v13 }
  0xe2   :  { %11488 = vmatprep.subr.bf16.mxu0 %v13797_v55 }
  0xe5   :  { %11489 = vmatpush3.bf16.msra.mxu0 %v11998_v2 }
  0xe6   :  { %11490 = vmatprep.subr.bf16.mxu0 %v13797_v55 }
  0xe9   :  { %11491 = vmatpush3.bf16.msra.mxu0 %v11999_v5  ;;  %v13942_v5 = vrot.slane %v13914_v52, %v187_v16 }
  0xea   :  { %11492 = vmatprep.subr.bf16.mxu0 %v13797_v55 }
  0xeb   :  { %16695 = vst [vmem:[#allocation24_spill] sm:$0xff] %v13942_v5 }
  0xed   :  { %11493 = vmatpush3.bf16.msra.mxu0 %v12000_v7 }
  0xee   :  { %11498 = vmatprep.subr.bf16.mxu0 %v13797_v55 }
 0x128   :  { %v13841_v8 = vpop.f32.mrf.mxu0  ;;  %v11408_v9 = vpop.f32.mrf.mxu1 }
 0x129   :  { %v13844_v10 = vadd.f32 %v11408_v9, %v13838_v6 }
 0x12a   :  { %v13847_v11 = vpop.f32.mrf.mxu0  ;;  %v13849_v12 = vpop.f32.mrf.mxu1 }
 0x12c   :  { %v13852_v14 = vpop.f32.mrf.mxu0  ;;  %v11409_v15 = vpop.f32.mrf.mxu1 }
 0x12d   :  { %v13856_v17 = vadd.f32 %v11409_v15, %v13838_v6 }
 0x12e   :  { %v13859_v18 = vpop.f32.mrf.mxu0  ;;  %v13861_v19 = vpop.f32.mrf.mxu1 }
 0x130   :  { %v416_v21 = vpop.f32.mrf.mxu0  ;;  %v11412_v22 = vpop.f32.mrf.mxu1 }
 0x131   :  { %v13868_v24 = vadd.f32 %v416_v21, %v13863_v20  ;;  %v13871_v25 = vadd.f32 %v11412_v22, %v13838_v6 }
 0x132   :  { %v418_v26 = vpop.f32.mrf.mxu0  ;;  %v535_v27 = vpop.f32.mrf.mxu1 }
 0x133   :  { %v13874_v28 = vadd.f32 %v418_v26, %v13865_v23  ;;  %v13877_v29 = vadd.f32 %v535_v27, %v13838_v6 }
 0x134   :  { %v420_v30 = vpop.f32.mrf.mxu0  ;;  %v11413_v31 = vpop.f32.mrf.mxu1 }
 0x135   :  { %v13880_v32 = vadd.f32 %v420_v30, %v13863_v20  ;;  %v13883_v33 = vadd.f32 %v11413_v31, %v13838_v6 }
 0x136   :  { %v13885_v34 = vpop.f32.mrf.mxu0  ;;  %v13887_v35 = vpop.f32.mrf.mxu1 }
 0x138   :  { %v426_v36 = vpop.f32.mrf.mxu0  ;;  %v11416_v37 = vpop.f32.mrf.mxu1 }
 0x139   :  { %v13890_v38 = vadd.f32 %v426_v36, %v13863_v20  ;;  %v13893_v39 = vadd.f32 %v11416_v37, %v13838_v6 }
 0x13a   :  { %v428_v40 = vpop.f32.mrf.mxu0  ;;  %v551_v41 = vpop.f32.mrf.mxu1 }
 0x13b   :  { %16688 = vst [vmem:[#allocation17_spill] sm:$0xff] %v13893_v39  ;;  %v13896_v42 = vadd.f32 %v428_v40, %v13865_v23  ;;  %v13899_v43 = vadd.f32 %v551_v41, %v13838_v6 }
 0x13c   :  { %v430_v44 = vpop.f32.mrf.mxu0  ;;  %v11417_v45 = vpop.f32.mrf.mxu1 }
 0x13d   :  { %v13902_v46 = vadd.f32 %v430_v44, %v13863_v20  ;;  %v13905_v47 = vadd.f32 %v11417_v45, %v13838_v6 }
 0x13e   :  { %v13907_v48 = vpop.f32.mrf.mxu0  ;;  %v13909_v49 = vpop.f32.mrf.mxu1 }
 0x13f   :  { %16689 = vst [vmem:[#allocation18_spill] sm:$0xff] %v13905_v47  ;;  %16690 = vst [vmem:[#allocation19_spill] sm:$0xff] %v13909_v49 }
 0x140   :  { %v436_v50 = vpop.f32.mrf.mxu0  ;;  %v11420_v51 = vpop.f32.mrf.mxu1 }
 0x141   :  { %v13917_v53 = vadd.f32 %v436_v50, %v13863_v20  ;;  %v13920_v54 = vadd.f32 %v11420_v51, %v13838_v6 }
 0x142   :  { %v438_v55 = vpop.f32.mrf.mxu0  ;;  %v567_v0 = vpop.f32.mrf.mxu1 }
 0x143   :  { %16691 = vst [vmem:[#allocation20_spill] sm:$0xff] %v13920_v54  ;;  %v13923_v56 = vadd.f32 %v438_v55, %v13865_v23  ;;  %v13926_v57 = vadd.f32 %v567_v0, %v13838_v6 }
 0x144   :  { %v440_v58 = vpop.f32.mrf.mxu0  ;;  %v11421_v59 = vpop.f32.mrf.mxu1 }
 0x145   :  { %16692 = vst [vmem:[#allocation21_spill] sm:$0xff] %v13926_v57  ;;  %v13929_v60 = vadd.f32 %v440_v58, %v13863_v20  ;;  %v13932_v61 = vadd.f32 %v11421_v59, %v13838_v6 }
 0x146   :  { %v13937_v2 = vpop.f32.mrf.mxu0  ;;  %v13939_v3 = vpop.f32.mrf.mxu1 }
 0x147   :  { %16693 = vst [vmem:[#allocation22_spill] sm:$0xff] %v13932_v61  ;;  %16694 = vst [vmem:[#allocation23_spill] sm:$0xff] %v13939_v3 }
 0x148   :  { %v446_v7 = vpop.f32.mrf.mxu0  ;;  %v881_v9 = vpop.f32.mrf.mxu1 }
 0x149   :  { %v13945_v15 = vadd.f32 %v446_v7, %v13863_v20  ;;  %v13948_v21 = vadd.f32 %v881_v9, %v13935_v62 }
 0x14a   :  { %v448_v22 = vpop.f32.mrf.mxu0  ;;  %v883_v26 = vpop.f32.mrf.mxu1 }
 0x14b   :  { %16696 = vst [vmem:[#allocation25_spill] sm:$0xff] %v13948_v21  ;;  %v13951_v13 = vadd.f32 %v448_v22, %v13865_v23  ;;  %v13954_v27 = vadd.f32 %v883_v26, %v13942_v5 }
 0x14c   :  { %v450_v30 = vpop.f32.mrf.mxu0  ;;  %v885_v31 = vpop.f32.mrf.mxu1 }
 0x14d   :  { %16697 = vst [vmem:[#allocation26_spill] sm:$0xff] %v13954_v27  ;;  %v13957_v16 = vadd.f32 %v450_v30, %v13863_v20  ;;  %v13960_v36 = vadd.f32 %v885_v31, %v13935_v62 }
 0x14e   :  { %v13962_v37 = vpop.f32.mrf.mxu0  ;;  %v13964_v40 = vpop.f32.mrf.mxu1 }
 0x14f   :  { %16698 = vst [vmem:[#allocation27_spill] sm:$0xff] %v13960_v36  ;;  %16699 = vst [vmem:[#allocation28_spill] sm:$0xff] %v13964_v40 }
 0x150   :  { %v456_v41 = vpop.f32.mrf.mxu0  ;;  %v891_v44 = vpop.f32.mrf.mxu1 }
 0x151   :  { %v13967_v45 = vadd.f32 %v456_v41, %v13863_v20  ;;  %v13970_v50 = vadd.f32 %v891_v44, %v13935_v62 }
 0x152   :  { %v458_v51 = vpop.f32.mrf.mxu0  ;;  %v893_v55 = vpop.f32.mrf.mxu1 }
 0x153   :  { %16700 = vst [vmem:[#allocation29_spill] sm:$0xff] %v13967_v45  ;;  %16701 = vst [vmem:[#allocation30_spill] sm:$0xff] %v13970_v50  ;;  %v13973_v0 = vadd.f32 %v458_v51, %v13865_v23  ;;  %v13976_v58 = vadd.f32 %v893_v55, %v13942_v5 }
 0x154   :  { %v460_v59 = vpop.f32.mrf.mxu0  ;;  %v895_v7 = vpop.f32.mrf.mxu1 }
 0x155   :  { %16702 = vst [vmem:[#allocation31_spill] sm:$0xff] %v13973_v0  ;;  %16703 = vst [vmem:[#allocation32_spill] sm:$0xff] %v13976_v58  ;;  %v13979_v9 = vadd.f32 %v460_v59, %v13863_v20  ;;  %v13982_v22 = vadd.f32 %v895_v7, %v13935_v62 }
 0x156   :  { %v13984_v26 = vpop.f32.mrf.mxu0  ;;  %v897_v30 = vpop.f32.mrf.mxu1 }
 0x157   :  { %16704 = vst [vmem:[#allocation33_spill] sm:$0xff] %v13979_v9  ;;  %16705 = vst [vmem:[#allocation34_spill] sm:$0xff] %v13982_v22  ;;  %v13987_v31 = vadd.f32 %v897_v30, %v13942_v5  ;;  %v423_v9 = vadd.f32 %v13885_v34, %v13865_v23 }
 0x158   :  { %16706 = vst [vmem:[#allocation35_spill] sm:$0xff] %v13984_v26  ;;  %v466_v41 = vpop.f32.mrf.mxu0  ;;  %v901_v44 = vpop.f32.mrf.mxu1 }
 0x159   :  { %16707 = vst [vmem:[#allocation36_spill] sm:$0xff] %v13987_v31  ;;  %v13990_v51 = vadd.f32 %v466_v41, %v13863_v20  ;;  %v13993_v55 = vadd.f32 %v901_v44, %v13935_v62 }
 0x15a   :  { %v468_v1 = vpop.f32.mrf.mxu0  ;;  %v903_v59 = vpop.f32.mrf.mxu1 }
 0x15b   :  { %16708 = vst [vmem:[#allocation37_spill] sm:$0xff] %v13990_v51  ;;  %16709 = vst [vmem:[#allocation38_spill] sm:$0xff] %v13993_v55  ;;  %v13996_v4 = vadd.f32 %v468_v1, %v13865_v23  ;;  %v13999_v7 = vadd.f32 %v903_v59, %v13942_v5 }
 0x15c   :  { %v470_v22 = vpop.f32.mrf.mxu0  ;;  %v905_v58 = vpop.f32.mrf.mxu1 }
 0x15d   :  { %16710 = vst [vmem:[#allocation39_spill] sm:$0xff] %v13996_v4  ;;  %16711 = vst [vmem:[#allocation40_spill] sm:$0xff] %v13999_v7  ;;  %v14002_v30 = vadd.f32 %v470_v22, %v13863_v20  ;;  %v14005_v31 = vadd.f32 %v905_v58, %v13935_v62 }
 0x15e   :  { %v14007_v41 = vpop.f32.mrf.mxu0  ;;  %v907_v44 = vpop.f32.mrf.mxu1 }
 0x15f   :  { %16712 = vst [vmem:[#allocation41_spill] sm:$0xff] %v14002_v30  ;;  %16713 = vst [vmem:[#allocation42_spill] sm:$0xff] %v14005_v31  ;;  %v14010_v55 = vadd.f32 %v907_v44, %v13942_v5 }
 0x160   :  { %16714 = vst [vmem:[#allocation43_spill] sm:$0xff] %v14007_v41  ;;  %v476_v50 = vpop.f32.mrf.mxu0  ;;  %v911_v1 = vpop.f32.mrf.mxu1 }
 0x161   :  { %16715 = vst [vmem:[#allocation44_spill] sm:$0xff] %v14010_v55  ;;  %v14013_v40 = vadd.f32 %v476_v50, %v13863_v20  ;;  %v14016_v59 = vadd.f32 %v911_v1, %v13935_v62  ;;  %v16722_v50 = vsub.s32 2, %v13828_v63 }
 0x162   :  { %v478_v7 = vpop.f32.mrf.mxu0  ;;  %v913_v22 = vpop.f32.mrf.mxu1 }
 0x163   :  { %16716 = vst [vmem:[#allocation45_spill] sm:$0xff] %v14013_v40  ;;  %16717 = vst [vmem:[#allocation46_spill] sm:$0xff] %v14016_v59  ;;  %v14019_v36 = vadd.f32 %v478_v7, %v13865_v23  ;;  %v14022_v58 = vadd.f32 %v913_v22, %v13942_v5  ;;  %v14033_v1 = vrot.slane %v13914_v52, %v16722_v50  ;;  %v12028_v40 = vld [vmem:[#allocation6 + $0x20] ss:$12 sps:$4 sm:$0xff]  }
 0x164   :  { %v480_v31 = vpop.f32.mrf.mxu0  ;;  %v915_v27 = vpop.f32.mrf.mxu1 }
 0x165   :  { %16718 = vst [vmem:[#allocation47_spill] sm:$0xff] %v14019_v36  ;;  %16719 = vst [vmem:[#allocation48_spill] sm:$0xff] %v14022_v58  ;;  %v14025_v44 = vadd.f32 %v480_v31, %v13863_v20  ;;  %v14028_v55 = vadd.f32 %v915_v27, %v13935_v62  ;;  %v12024_v36 = vld [vmem:[#allocation6 + $0x38] ss:$12 sps:$4 sm:$0xff]  }
 0x166   :  { %v14035_v59 = vpop.f32.mrf.mxu0  ;;  %v917_v7 = vpop.f32.mrf.mxu1 }
 0x167   :  { %16720 = vst [vmem:[#allocation49_spill] sm:$0xff] %v14025_v44  ;;  %16721 = vst [vmem:[#allocation50_spill] sm:$0xff] %v14028_v55  ;;  %v14038_v21 = vadd.f32 %v917_v7, %v13942_v5  ;;  %v14180_v44 = vld [vmem:[#allocation6 + $0x18] ss:$12 sps:$4 sm:$0xff]  }
 0x168   :  { %16723 = vst [vmem:[#allocation51_spill] sm:$0xff] %v14035_v59  ;;  %v921_v22 = vpop.f32.mrf.mxu1  ;;  %v964_v58 = vpop.f32.mrf.mxu0 }
 0x169   :  { %16724 = vst [vmem:[#allocation52_spill] sm:$0xff] %v14038_v21  ;;  %v14041_v61 = vadd.f32 %v921_v22, %v13935_v62  ;;  %v14044_v31 = vadd.f32 %v964_v58, %v14033_v1  ;;  %v407_v22 = vadd.f32 %v13841_v8, %v13863_v20  ;;  %v413_v8 = vadd.f32 %v13859_v18, %v13865_v23 }
 0x16a   :  { %v923_v27 = vpop.f32.mrf.mxu1  ;;  %v11440_v55 = vpop.f32.mrf.mxu0 }
 0x16b   :  { %16725 = vst [vmem:[#allocation53_spill] sm:$0xff] %v14041_v61  ;;  %16726 = vst [vmem:[#allocation54_spill] sm:$0xff] %v14044_v31  ;;  %v14047_v63 = vadd.f32 %v923_v27, %v13942_v5  ;;  %v409_v27 = vadd.f32 %v13847_v11, %v13865_v23 }
 0x16c   :  { %v925_v52 = vpop.f32.mrf.mxu1  ;;  %v967_v50 = vpop.f32.mrf.mxu0 }
 0x16d   :  { %16727 = vst [vmem:[#allocation55_spill] sm:$0xff] %v14047_v63  ;;  %v14050_v54 = vadd.f32 %v925_v52, %v13935_v62  ;;  %v14053_v7 = vadd.f32 %v967_v50, %v14033_v1 }
 0x16e   :  { %v927_v21 = vpop.f32.mrf.mxu1  ;;  %v11441_v59 = vpop.f32.mrf.mxu0 }
 0x16f   :  { %16728 = vst [vmem:[#allocation56_spill] sm:$0xff] %v14050_v54  ;;  %16729 = vst [vmem:[#allocation57_spill] sm:$0xff] %v14053_v7  ;;  %v14058_v58 = vadd.f32 %v927_v21, %v13942_v5  ;;  %v411_v59 = vadd.f32 %v13852_v14, %v13863_v20 }
 0x170   :  { %v972_v55 = vpop.f32.mrf.mxu0  ;;  %v1233_v61 = vpop.f32.mrf.mxu1 }
 0x171   :  { %16730 = vst [vmem:[#allocation58_spill] sm:$0xff] %v14058_v58  ;;  %v14063_v63 = vadd.f32 %v972_v55, %v14033_v1  ;;  %v1283_v62 = vadd.f32 %v1233_v61, %v407_v22 }
 0x172   :  { %v11444_v52 = vpop.f32.mrf.mxu0  ;;  %v1235_v50 = vpop.f32.mrf.mxu1 }
 0x173   :  { %16731 = vst [vmem:[#allocation59_spill] sm:$0xff] %v14063_v63  ;;  %v10336_v54 = vmul.f32 -1.442695, %v1283_v62  ;;  %v1297_v7 = vadd.f32 %v1235_v50, %v409_v27 }
 0x174   :  { %v975_v21 = vpop.f32.mrf.mxu0  ;;  %v1237_v58 = vpop.f32.mrf.mxu1 }
 0x175   :  { %12638 = vpow2.f32 %v10336_v54  ;;  %v10338_v31 = vmul.f32 -1.442695, %v1297_v7  ;;  %v14070_v11 = vadd.f32 %v975_v21, %v14033_v1  ;;  %v1284_v55 = vadd.f32 %v1237_v58, %v411_v59 }
 0x176   :  { %v11445_v63 = vpop.f32.mrf.mxu0  ;;  %v1239_v61 = vpop.f32.mrf.mxu1 }
 0x177   :  { %16732 = vst [vmem:[#allocation60_spill] sm:$0xff] %v14070_v11  ;;  %v10337_v22 = vmul.f32 -1.442695, %v1284_v55  ;;  %v1298_v52 = vadd.f32 %v1239_v61, %v413_v8  ;;  %12640 = vpow2.f32 %v10338_v31  ;;  %v14173_v11 = vld [vmem:[#allocation6 + $0x30] ss:$12 sps:$4 sm:$0xff]  }
 0x178   :  { %v980_v5 = vpop.f32.mrf.mxu0 }
 0x179   :  { %12642 = vpow2.f32 %v10337_v22  ;;  %v10339_v14 = vmul.f32 -1.442695, %v1298_v52  ;;  %v14073_v20 = vadd.f32 %v980_v5, %v14033_v1 }
 0x17a   :  { %v11448_v18 = vpop.f32.mrf.mxu0 }
 0x17b   :  { %16733 = vst [vmem:[#allocation61_spill] sm:$0xff] %v14073_v20  ;;  %12644 = vpow2.f32 %v10339_v14  ;;  %v12020_v20 = vld [vmem:[#allocation6 + $0x50] ss:$12 sps:$4 sm:$0xff]  }
 0x17c   :  { %v983_v27 = vpop.f32.mrf.mxu0 }
 0x17d   :  { %v14076_v54 = vadd.f32 %v983_v27, %v14033_v1 }
 0x17e   :  { %v11449_v7 = vpop.f32.mrf.mxu0 }
 0x17f   :  { %16734 = vst [vmem:[#allocation62_spill] sm:$0xff] %v14076_v54 }
 0x180   :  { %v988_v62 = vpop.f32.mrf.mxu0 }
 0x181   :  { %v14079_v63 = vadd.f32 %v988_v62, %v14033_v1 }
 0x182   :  { %v12639_v58 = vpop.eup %12638  ;;  %v11452_v50 = vpop.f32.mrf.mxu0 }
 0x183   :  { %16735 = vst [vmem:[#allocation63_spill] sm:$0xff] %v14079_v63  ;;  %v1291_v31 = vadd.f32 1.0, %v12639_v58  ;;  %v14090_v58 = vld [vmem:[%s16570_s6] ss:$0 sm:$0xff] }
 0x184   :  { %v991_v59 = vpop.f32.mrf.mxu0  ;;  %v12641_v8 = vpop.eup %12640 }
 0x185   :  { %12646 = vrcp.f32 %v1291_v31  ;;  %v14082_v5 = vadd.f32 %v991_v59, %v14033_v1  ;;  %v1305_v14 = vadd.f32 1.0, %v12641_v8 }
 0x186   :  { %v12643_v21 = vpop.eup %12642  ;;  %v11453_v55 = vpop.f32.mrf.mxu0 }
 0x187   :  { %16736 = vst [vmem:[#allocation64_spill] sm:$0xff] %v14082_v5  ;;  %v1292_v61 = vadd.f32 1.0, %v12643_v21 }
 0x188   :  { %v12645_v22 = vpop.eup %12644  ;;  %v996_v52 = vpop.f32.mrf.mxu0 }
 0x189   :  { %12648 = vrcp.f32 %v1292_v61  ;;  %v1306_v18 = vadd.f32 1.0, %v12645_v22  ;;  %v14085_v27 = vadd.f32 %v996_v52, %v14033_v1  ;;  %v520_v61 = vadd.f32 %v13849_v12, %v13838_v6 }
 0x18a   :  { %v11456_v7 = vpop.f32.mrf.mxu0  ;;  %12650 = vrcp.f32 %v1305_v14  ;;  %v14101_v14 = vpop.permute.xlu0 %1341 }
 0x18b   :  { %16737 = vst [vmem:[#allocation65_spill] sm:$0xff] %v14085_v27  ;;  %12652 = vrcp.f32 %v1306_v18  ;;  %vm1346_vm1 = vcmp.eq.s32.totalorder %v14101_v14, 1 }
 0x18c   :  { %v999_v62 = vpop.f32.mrf.mxu0 }
 0x18d   :  { %v14093_v50 = vadd.f32 %v999_v62, %v14033_v1  ;;  %v523_v1 = vadd.f32 %v13861_v19, %v13838_v6 }
 0x18e   :  { %v11457_v31 = vpop.f32.mrf.mxu0  ;;  %v14105_v54 = vpop.permute.xlu0 %1344 }
 0x18f   :  { %16738 = vst [vmem:[#allocation66_spill] sm:$0xff] %v14093_v50  ;;  %vm1347_vm2 = vcmp.eq.s32.totalorder %v14105_v54, 1 }
 0x190   :  { %v1276_v59 = vpop.f32.mrf.mxu0  ;;  %vm14119_vm3 = vmpackc.low %vm1347_vm2, %vm1346_vm1 }
 0x191   :  { %v1318_v21 = vadd.f32 %v14090_v58, %v1276_v59 }
 0x192   :  { %v12647_v8 = vpop.eup %12646  ;;  %v11476_v55 = vpop.f32.mrf.mxu0 }
 0x193   :  { %v1320_v22 = vmul.f32 %v12647_v8, %v1318_v21 }
 0x194   :  { %v1279_v52 = vpop.f32.mrf.mxu0 }
 0x195   :  { %v1322_v7 = vadd.f32 %v1320_v22, %v520_v61  ;;  %v1319_v27 = vadd.f32 %v14090_v58, %v1279_v52 }
 0x196   :  { %v12649_v5 = vpop.eup %12648  ;;  %v11477_v63 = vpop.f32.mrf.mxu0 }
 0x197   :  { %12654 = vtanh.f32 %v1322_v7  ;;  %v1321_v62 = vmul.f32 %v12649_v5, %v1319_v27  ;;  %v12651_v59 = vpop.eup %12650  ;;  %v16740_v27 = vmov 0  ;;  %v14133_v7 = vld [vmem:[%s16583_s19] sm:$0xff] }
 0x198   :  { %v12653_v55 = vpop.eup %12652  ;;  %v1326_v50 = vsub.f32 1.0, %v12651_v59  ;;  %v1330_v8 = vmul.f32 0.0, %v12651_v59  ;;  %v16741_v27 = vsel %vm14119_vm3, 4294967295, %v16740_v27  ;;  %v14143_v59 = vld [vmem:[#allocation6 + $0x94] ss:$12 sps:$4 sm:$0xff]  }
 0x199   :  { %v1323_v31 = vadd.f32 %v1321_v62, %v523_v1  ;;  %v1327_v61 = vsub.f32 1.0, %v12653_v55  ;;  %v1331_v52 = vmul.f32 0.0, %v12653_v55  ;;  %16742 = vst [vmem:[#allocation68_spill] sm:$0xff] %v16741_v27  ;;  %v14137_v1 = vld [vmem:[#allocation6 + $0xac] ss:$12 sps:$4 sm:$0xff]  }
 0x19a   :  { %v14139_v62 = vld [vmem:[#allocation6 + $0xa8] ss:$12 sps:$4 sm:$0xff]   ;;  %1845 = vmatprep.subr.bf16.mxu1 %v14137_v1  ;;  %v14146_v55 = vld [vmem:[#allocation6 + $0x90] ss:$12 sps:$4 sm:$0xff]   ;;  %v14187_v27 = vld [vmem:[#allocation6] ss:$12 sps:$4 sm:$0xff]  }
 0x19b   :  { %12656 = vtanh.f32 %v1323_v31  ;;  %v12004_v31 = vld [vmem:[#allocation6 + $0xb0] ss:$12 sps:$4 sm:$0xff]  }
 0x1a4   :  { %v12655_v12 = vpop.eup %12654 }
 0x1a5   :  { %v1328_v21 = vmul.f32 %v12655_v12, %v1326_v50  ;;  %v16743_v50 = vmov 0   ;;  %v12008_v12 = vld [vmem:[#allocation6 + $0x98] ss:$12 sps:$4 sm:$0xff]  }
 0x1a7   :  { %v14103_v22 = vadd.f32 %v1330_v8, %v1328_v21  ;;  %v14150_v21 = vld [vmem:[#allocation6 + $0x7c] ss:$12 sps:$4 sm:$0xff]   ;;  %v14153_v8 = vld [vmem:[#allocation6 + $0x78] ss:$12 sps:$4 sm:$0xff]  }
 0x1a8   :  { %v12657_v18 = vpop.eup %12656 }
 0x1a9   :  { %v1329_v63 = vmul.f32 %v12657_v18, %v1327_v61  ;;  %v12012_v61 = vld [vmem:[#allocation6 + $0x80] ss:$12 sps:$4 sm:$0xff]   ;;  %v14157_v18 = vld [vmem:[#allocation6 + $0x64] ss:$12 sps:$4 sm:$0xff]  }
 0x1ab   :  { %v14109_v19 = vadd.f32 %v1331_v52, %v1329_v63  ;;  %v14160_v63 = vld [vmem:[#allocation6 + $0x60] ss:$12 sps:$4 sm:$0xff]   ;;  %v12016_v52 = vld [vmem:[#allocation6 + $0x68] ss:$12 sps:$4 sm:$0xff]  }
 0x1ad   :  { %v14113_v5 = vpack.c.bf16 %v14109_v19, %v14103_v22 }
 0x1af   :  { %16739 = vst [vmem:[#allocation67_spill] sm:$0xff] %v14113_v5  ;;  %10367 = vmatmul.mubr.msk.bf16.vlgmr.msra.gmra.mxu1 %vm14119_vm3, %v14113_v5  ;;  %11495 = vmatmul.mubr.msk.bf16.vlgmr.msra.gmra.mxu0 %vm14119_vm3, %v14113_v5  ;;  %v12032_v5 = vld [vmem:[#allocation6 + $0x8] ss:$12 sps:$4 sm:$0xff]  }
 0x1b0   :  { %1877 = vmatprep.mubr.bf16.mxu1 %v16743_v50  ;;  %11514 = vmatprep.mubr.msk.bf16.mxu0 %vm16600_vm12, %v14133_v7 }
 0x1b1   :  { %1846 = vmatpush1.bf16.msra.mxu1 %v14139_v62  ;;  %11499 = vmatpush3.bf16.msra.mxu0 %v12004_v31  ;;  %v14163_v31 = vld [vmem:[#allocation6 + $0x4c] ss:$12 sps:$4 sm:$0xff]  }
 0x1b2   :  { %11500 = vmatprep.subr.bf16.mxu0 %v14133_v7  ;;  %1847 = vmatprep.subr.bf16.mxu1 %v14143_v59 }
 0x1b5   :  { %1848 = vmatpush1.bf16.msra.mxu1 %v14146_v55  ;;  %11501 = vmatpush3.bf16.msra.mxu0 %v12008_v12  ;;  %v14166_v12 = vld [vmem:[#allocation6 + $0x48] ss:$12 sps:$4 sm:$0xff]  }
 0x1b6   :  { %11502 = vmatprep.subr.bf16.mxu0 %v14133_v7  ;;  %1849 = vmatprep.subr.bf16.mxu1 %v14150_v21 }
 0x1b9   :  { %1850 = vmatpush1.bf16.msra.mxu1 %v14153_v8  ;;  %11503 = vmatpush3.bf16.msra.mxu0 %v12012_v61  ;;  %v14170_v61 = vld [vmem:[#allocation6 + $0x34] ss:$12 sps:$4 sm:$0xff]  }
 0x1ba   :  { %11504 = vmatprep.subr.bf16.mxu0 %v14133_v7  ;;  %1851 = vmatprep.subr.bf16.mxu1 %v14157_v18 }
 0x1bd   :  { %1852 = vmatpush1.bf16.msra.mxu1 %v14160_v63  ;;  %11505 = vmatpush3.bf16.msra.mxu0 %v12016_v52  ;;  %v14177_v52 = vld [vmem:[#allocation6 + $0x1c] ss:$12 sps:$4 sm:$0xff]  }
 0x1be   :  { %1853 = vmatprep.subr.bf16.mxu1 %v14163_v31  ;;  %11506 = vmatprep.subr.bf16.mxu0 %v14133_v7 }
 0x1c1   :  { %1854 = vmatpush1.bf16.msra.mxu1 %v14166_v12  ;;  %11507 = vmatpush3.bf16.msra.mxu0 %v12020_v20  ;;  %v14184_v20 = vld [vmem:[#allocation6 + $0x4] ss:$12 sps:$4 sm:$0xff]  }
 0x1c2   :  { %1855 = vmatprep.subr.bf16.mxu1 %v14170_v61  ;;  %11508 = vmatprep.subr.bf16.mxu0 %v14133_v7 }
 0x1c5   :  { %1856 = vmatpush1.bf16.msra.mxu1 %v14173_v11  ;;  %11509 = vmatpush3.bf16.msra.mxu0 %v12024_v36 }
 0x1c6   :  { %1857 = vmatprep.subr.bf16.mxu1 %v14177_v52  ;;  %11510 = vmatprep.subr.bf16.mxu0 %v14133_v7 }
 0x1c9   :  { %1858 = vmatpush1.bf16.msra.mxu1 %v14180_v44  ;;  %11511 = vmatpush3.bf16.msra.mxu0 %v12028_v40 }
 0x1ca   :  { %1859 = vmatprep.subr.bf16.mxu1 %v14184_v20  ;;  %11512 = vmatprep.subr.bf16.mxu0 %v14133_v7 }
 0x1cd   :  { %1860 = vmatpush1.bf16.msra.mxu1 %v14187_v27  ;;  %11513 = vmatpush3.bf16.msra.mxu0 %v12032_v5 }
 0x1ce   :  { %2170 = vmatprep.subr.bf16.mxu1 %v14137_v1  ;;  %11518 = vmatprep.subr.bf16.mxu0 %v14133_v7 }
 0x26f   :  { %v1554_v36 = vpop.f32.mrf.mxu1  ;;  %v1597_v3 = vpop.f32.mrf.mxu0 }
 0x270   :  { %v1604_v57 = vadd.f32 %v1554_v36, %v13868_v24 }
 0x271   :  { %v1556_v41 = vpop.f32.mrf.mxu1  ;;  %v11496_v40 = vpop.f32.mrf.mxu0 }
 0x272   :  { %v10371_v4 = vmul.f32 -1.442695, %v1604_v57  ;;  %v1618_v26 = vadd.f32 %v1556_v41, %v13874_v28 }
 0x273   :  { %v1558_v30 = vpop.f32.mrf.mxu1  ;;  %v1600_v51 = vpop.f32.mrf.mxu0 }
 0x274   :  { %12658 = vpow2.f32 %v10371_v4  ;;  %v1605_v47 = vadd.f32 %v1558_v30, %v13880_v32  ;;  %v10373_v49 = vmul.f32 -1.442695, %v1618_v26 }
 0x275   :  { %v11497_v39 = vpop.f32.mrf.mxu0  ;;  %v1560_v0 = vpop.f32.mrf.mxu1 }
 0x276   :  { %v10372_v5 = vmul.f32 -1.442695, %v1605_v47  ;;  %v1619_v45 = vadd.f32 %v1560_v0, %v423_v9  ;;  %v1639_v47 = vadd.f32 %v14090_v58, %v1597_v3  ;;  %v14206_v3 = vsel %vm1346_vm1, %v14103_v22, 0.0 }
 0x278   :  { %12660 = vpow2.f32 %v10372_v5  ;;  %v10374_v24 = vmul.f32 -1.442695, %v1619_v45 }
 0x279   :  { %12662 = vpow2.f32 %v10373_v49  ;;  %v1640_v49 = vadd.f32 %v14090_v58, %v1600_v51 }
 0x27a   :  { %12664 = vpow2.f32 %v10374_v24 }
 0x281   :  { %v12659_v36 = vpop.eup %12658 }
 0x282   :  { %v1612_v57 = vadd.f32 1.0, %v12659_v36 }
 0x284   :  { %12666 = vrcp.f32 %v1612_v57 }
 0x285   :  { %v12661_v4 = vpop.eup %12660 }
 0x286   :  { %v1613_v40 = vadd.f32 1.0, %v12661_v4  ;;  %v12663_v32 = vpop.eup %12662  ;;  %v14208_v4 = vpop.permute.xlu1 %1663 }
 0x287   :  { %v12665_v39 = vpop.eup %12664  ;;  %v1626_v28 = vadd.f32 1.0, %v12663_v32  ;;  %vm1668_vm4 = vcmp.eq.s32.totalorder %v14208_v4, 1 }
 0x288   :  { %12668 = vrcp.f32 %v1613_v40  ;;  %v1627_v41 = vadd.f32 1.0, %v12665_v39 }
 0x289   :  { %12670 = vrcp.f32 %v1626_v28 }
 0x28a   :  { %12672 = vrcp.f32 %v1627_v41  ;;  %v14220_v14 = vpop.permute.xlu1 %1666 }
 0x28b   :  { %vm1669_vm5 = vcmp.eq.s32.totalorder %v14220_v14, 1 }
 0x28c   :  { %vm11043_vm1 = vmpackc.low %vm1669_vm5, %vm1668_vm4 }
 0x291   :  { %v12667_v30 = vpop.eup %12666 }
 0x292   :  { %v1641_v34 = vmul.f32 %v12667_v30, %v1639_v47 }
 0x294   :  { %v1643_v0 = vadd.f32 %v1641_v34, %v13844_v10  ;;  %v12033_v34 = vld [vmem:[#allocation6 + $0xb0] ss:$12 sps:$4 sm:$0xff]  }
 0x295   :  { %v12669_v45 = vpop.eup %12668 }
 0x296   :  { %12674 = vtanh.f32 %v1643_v0  ;;  %v1642_v9 = vmul.f32 %v12669_v45, %v1640_v49  ;;  %v12671_v5 = vpop.eup %12670  ;;  %v12034_v0 = vld [vmem:[#allocation6 + $0x98] ss:$12 sps:$4 sm:$0xff]   ;;  %v12035_v49 = vld [vmem:[#allocation6 + $0x80] ss:$12 sps:$4 sm:$0xff]   ;;  %v12036_v45 = vld [vmem:[#allocation6 + $0x68] ss:$12 sps:$4 sm:$0xff]  }
 0x297   :  { %v12673_v24 = vpop.eup %12672  ;;  %v1647_v36 = vsub.f32 1.0, %v12671_v5  ;;  %v1651_v51 = vmul.f32 %v12671_v5, %v14206_v3  ;;  %v12039_v5 = vld [vmem:[#allocation6 + $0x20] ss:$12 sps:$4 sm:$0xff]  }
 0x298   :  { %v1644_v26 = vadd.f32 %v1642_v9, %v13856_v17  ;;  %v1648_v40 = vsub.f32 1.0, %v12673_v24  ;;  %v14216_v17 = vsel %vm1347_vm2, %v14109_v19, 0.0  ;;  %v12037_v9 = vld [vmem:[#allocation6 + $0x50] ss:$12 sps:$4 sm:$0xff]  }
 0x299   :  { %v1652_v47 = vmul.f32 %v12673_v24, %v14216_v17  ;;  %v12040_v24 = vld [vmem:[#allocation6 + $0x8] ss:$12 sps:$4 sm:$0xff]  }
 0x29a   :  { %12676 = vtanh.f32 %v1644_v26  ;;  %v12038_v26 = vld [vmem:[#allocation6 + $0x38] ss:$12 sps:$4 sm:$0xff]  }
 0x2a3   :  { %v12675_v57 = vpop.eup %12674 }
 0x2a4   :  { %v1649_v10 = vmul.f32 %v12675_v57, %v1647_v36 }
 0x2a6   :  { %v14211_v32 = vadd.f32 %v1651_v51, %v1649_v10 }
 0x2a7   :  { %v12677_v39 = vpop.eup %12676 }
 0x2a8   :  { %v1650_v28 = vmul.f32 %v12677_v39, %v1648_v40  ;;  %v14229_v30 = vsel %vm1668_vm4, %v14211_v32, %v14206_v3 }
 0x2aa   :  { %v14222_v22 = vadd.f32 %v1652_v47, %v1650_v28 }
 0x2ac   :  { %v14235_v54 = vsel %vm1669_vm5, %v14222_v22, %v14216_v17  ;;  %v11044_v19 = vpack.c.bf16 %v14222_v22, %v14211_v32 }
 0x2ad   :  { %v1684_v41 = vpack.c.bf16 %v14235_v54, %v14229_v30 }
 0x2af   :  { %1878 = vmatmul.mubr.bf16.vlgmr.msra.gmra.mxu1 %v1684_v41  ;;  %11515 = vmatmul.mubr.bf16.vlgmr.msra.gmra.mxu0 %v1684_v41 }
 0x2b0   :  { %2171 = vmatpush1.bf16.msra.mxu1 %v14139_v62  ;;  %2202 = vmatprep.mubr.bf16.mxu1 %v16743_v50 }
 0x2b1   :  { %2172 = vmatprep.subr.bf16.mxu1 %v14143_v59  ;;  %11534 = vmatprep.mubr.msk.bf16.mxu0 %vm16600_vm12, %v14133_v7 }
 0x2b2   :  { %11519 = vmatpush3.bf16.msra.mxu0 %v12033_v34 }
 0x2b3   :  { %11520 = vmatprep.subr.bf16.mxu0 %v14133_v7 }
 0x2b4   :  { %2173 = vmatpush1.bf16.msra.mxu1 %v14146_v55 }
 0x2b5   :  { %2174 = vmatprep.subr.bf16.mxu1 %v14150_v21 }
 0x2b6   :  { %11521 = vmatpush3.bf16.msra.mxu0 %v12034_v0 }
 0x2b7   :  { %11522 = vmatprep.subr.bf16.mxu0 %v14133_v7 }
 0x2b8   :  { %2175 = vmatpush1.bf16.msra.mxu1 %v14153_v8 }
 0x2b9   :  { %2176 = vmatprep.subr.bf16.mxu1 %v14157_v18 }
 0x2ba   :  { %11523 = vmatpush3.bf16.msra.mxu0 %v12035_v49 }
 0x2bb   :  { %11524 = vmatprep.subr.bf16.mxu0 %v14133_v7 }
 0x2bc   :  { %2177 = vmatpush1.bf16.msra.mxu1 %v14160_v63 }
 0x2bd   :  { %2178 = vmatprep.subr.bf16.mxu1 %v14163_v31 }
 0x2be   :  { %11525 = vmatpush3.bf16.msra.mxu0 %v12036_v45 }
 0x2bf   :  { %11526 = vmatprep.subr.bf16.mxu0 %v14133_v7 }
 0x2c0   :  { %2179 = vmatpush1.bf16.msra.mxu1 %v14166_v12 }
 0x2c1   :  { %2180 = vmatprep.subr.bf16.mxu1 %v14170_v61 }
 0x2c2   :  { %11527 = vmatpush3.bf16.msra.mxu0 %v12037_v9  ;;  %v433_v9 = vadd.f32 %v13907_v48, %v13865_v23 }
 0x2c3   :  { %11528 = vmatprep.subr.bf16.mxu0 %v14133_v7 }
 0x2c4   :  { %2181 = vmatpush1.bf16.msra.mxu1 %v14173_v11 }
 0x2c5   :  { %2182 = vmatprep.subr.bf16.mxu1 %v14177_v52 }
 0x2c6   :  { %11529 = vmatpush3.bf16.msra.mxu0 %v12038_v26 }
 0x2c7   :  { %11530 = vmatprep.subr.bf16.mxu0 %v14133_v7 }
 0x2c8   :  { %2183 = vmatpush1.bf16.msra.mxu1 %v14180_v44 }
 0x2c9   :  { %2184 = vmatprep.subr.bf16.mxu1 %v14184_v20 }
 0x2ca   :  { %11531 = vmatpush3.bf16.msra.mxu0 %v12039_v5 }
 0x2cb   :  { %11532 = vmatprep.subr.bf16.mxu0 %v14133_v7 }
 0x2cc   :  { %2185 = vmatpush1.bf16.msra.mxu1 %v14187_v27 }
 0x2cd   :  { %2495 = vmatprep.subr.bf16.mxu1 %v14137_v1 }
 0x2ce   :  { %11533 = vmatpush3.bf16.msra.mxu0 %v12040_v24 }
 0x2cf   :  { %11538 = vmatprep.subr.bf16.mxu0 %v14133_v7 }
 0x36f   :  { %v1879_v36 = vpop.f32.mrf.mxu1  ;;  %v1922_v57 = vpop.f32.mrf.mxu0 }
 0x370   :  { %v1929_v10 = vadd.f32 %v1879_v36, %v13890_v38 }
 0x371   :  { %v1881_v51 = vpop.f32.mrf.mxu1  ;;  %v11516_v40 = vpop.f32.mrf.mxu0 }
 0x372   :  { %v10402_v39 = vmul.f32 -1.442695, %v1929_v10  ;;  %v1943_v0 = vadd.f32 %v1881_v51, %v13896_v42  ;;  %v1964_v51 = vadd.f32 %v14090_v58, %v1922_v57 }
 0x373   :  { %v1883_v28 = vpop.f32.mrf.mxu1  ;;  %v1925_v47 = vpop.f32.mrf.mxu0 }
 0x374   :  { %12678 = vpow2.f32 %v10402_v39  ;;  %v1930_v41 = vadd.f32 %v1883_v28, %v13902_v46  ;;  %v10404_v5 = vmul.f32 -1.442695, %v1943_v0  ;;  %v1965_v0 = vadd.f32 %v14090_v58, %v1925_v47 }
 0x375   :  { %v11517_v34 = vpop.f32.mrf.mxu0  ;;  %v1885_v45 = vpop.f32.mrf.mxu1 }
 0x376   :  { %v10403_v49 = vmul.f32 -1.442695, %v1930_v41  ;;  %v1944_v26 = vadd.f32 %v1885_v45, %v433_v9  ;;  %v539_v45 = vadd.f32 %v13887_v35, %v13838_v6  ;;  %v14284_v35 = vpop.permute.xlu0 %1988 }
 0x377   :  { %vm1993_vm7 = vcmp.eq.s32.totalorder %v14284_v35, 1 }
 0x378   :  { %12680 = vpow2.f32 %v10403_v49  ;;  %v10405_v38 = vmul.f32 -1.442695, %v1944_v26 }
 0x379   :  { %12682 = vpow2.f32 %v10404_v5 }
 0x37a   :  { %12684 = vpow2.f32 %v10405_v38 }
 0x381   :  { %v12679_v24 = vpop.eup %12678 }
 0x382   :  { %v1937_v36 = vadd.f32 1.0, %v12679_v24 }
 0x384   :  { %12686 = vrcp.f32 %v1937_v36 }
 0x385   :  { %v12681_v10 = vpop.eup %12680 }
 0x386   :  { %v1938_v40 = vadd.f32 1.0, %v12681_v10  ;;  %v12683_v46 = vpop.eup %12682 }
 0x387   :  { %v12685_v39 = vpop.eup %12684  ;;  %v1951_v42 = vadd.f32 1.0, %v12683_v46 }
 0x388   :  { %12688 = vrcp.f32 %v1938_v40  ;;  %v1952_v41 = vadd.f32 1.0, %v12685_v39 }
 0x389   :  { %12690 = vrcp.f32 %v1951_v42  ;;  %v14282_v42 = vpop.permute.xlu1 %1991 }
 0x38a   :  { %12692 = vrcp.f32 %v1952_v41  ;;  %vm1994_vm6 = vcmp.eq.s32.totalorder %v14282_v42, 1 }
 0x38b   :  { %vm11046_vm2 = vmpackc.low %vm1994_vm6, %vm1993_vm7 }
 0x391   :  { %v12687_v28 = vpop.eup %12686 }
 0x392   :  { %v1966_v48 = vmul.f32 %v12687_v28, %v1964_v51 }
 0x394   :  { %v1968_v34 = vadd.f32 %v1966_v48, %v13877_v29 }
 0x395   :  { %v12689_v49 = vpop.eup %12688 }
 0x396   :  { %12694 = vtanh.f32 %v1968_v34  ;;  %v1967_v9 = vmul.f32 %v12689_v49, %v1965_v0  ;;  %v12691_v5 = vpop.eup %12690  ;;  %v12043_v0 = vld [vmem:[#allocation6 + $0x80] ss:$12 sps:$4 sm:$0xff]   ;;  %v12044_v49 = vld [vmem:[#allocation6 + $0x68] ss:$12 sps:$4 sm:$0xff]  }
 0x397   :  { %v12693_v38 = vpop.eup %12692  ;;  %v1972_v57 = vsub.f32 1.0, %v12691_v5  ;;  %v1976_v10 = vmul.f32 %v12691_v5, %v14229_v30 }
 0x398   :  { %v1969_v26 = vadd.f32 %v1967_v9, %v539_v45  ;;  %v1973_v40 = vsub.f32 1.0, %v12693_v38  ;;  %v1977_v39 = vmul.f32 %v12693_v38, %v14235_v54  ;;  %v12045_v45 = vld [vmem:[#allocation6 + $0x50] ss:$12 sps:$4 sm:$0xff]   ;;  %v12046_v9 = vld [vmem:[#allocation6 + $0x38] ss:$12 sps:$4 sm:$0xff]  }
 0x39a   :  { %12696 = vtanh.f32 %v1969_v26  ;;  %v12048_v26 = vld [vmem:[#allocation6 + $0x8] ss:$12 sps:$4 sm:$0xff]  }
 0x3a3   :  { %v12695_v24 = vpop.eup %12694 }
 0x3a4   :  { %v1974_v36 = vmul.f32 %v12695_v24, %v1972_v57 }
 0x3a6   :  { %v14279_v29 = vadd.f32 %v1976_v10, %v1974_v36 }
 0x3a7   :  { %v12697_v47 = vpop.eup %12696 }
 0x3a8   :  { %v1975_v46 = vmul.f32 %v12697_v47, %v1973_v40  ;;  %v14294_v28 = vsel %vm1993_vm7, %v14279_v29, %v14229_v30  ;;  %v12041_v30 = vld [vmem:[#allocation6 + $0xb0] ss:$12 sps:$4 sm:$0xff]   ;;  %v15197_v4 = vsel %vm1993_vm7, %v14279_v29, 0.0 }
 0x3aa   :  { %v14286_v51 = vadd.f32 %v1977_v39, %v1975_v46 }
 0x3ac   :  { %v14300_v41 = vsel %vm1994_vm6, %v14286_v51, %v14235_v54  ;;  %v11047_v48 = vpack.c.bf16 %v14286_v51, %v14279_v29  ;;  %v12042_v54 = vld [vmem:[#allocation6 + $0x98] ss:$12 sps:$4 sm:$0xff]  }
 0x3ad   :  { %v2009_v34 = vpack.c.bf16 %v14300_v41, %v14294_v28 }
 0x3af   :  { %2203 = vmatmul.mubr.bf16.vlgmr.msra.gmra.mxu1 %v2009_v34  ;;  %11535 = vmatmul.mubr.bf16.vlgmr.msra.gmra.mxu0 %v2009_v34 }
 0x3b0   :  { %2496 = vmatpush1.bf16.msra.mxu1 %v14139_v62  ;;  %2527 = vmatprep.mubr.bf16.mxu1 %v16743_v50 }
 0x3b1   :  { %2497 = vmatprep.subr.bf16.mxu1 %v14143_v59  ;;  %11554 = vmatprep.mubr.msk.bf16.mxu0 %vm16600_vm12, %v14133_v7 }
 0x3b2   :  { %11539 = vmatpush3.bf16.msra.mxu0 %v12041_v30 }
 0x3b3   :  { %11540 = vmatprep.subr.bf16.mxu0 %v14133_v7 }
 0x3b4   :  { %2498 = vmatpush1.bf16.msra.mxu1 %v14146_v55 }
 0x3b5   :  { %2499 = vmatprep.subr.bf16.mxu1 %v14150_v21 }
 0x3b6   :  { %11541 = vmatpush3.bf16.msra.mxu0 %v12042_v54 }
 0x3b7   :  { %11542 = vmatprep.subr.bf16.mxu0 %v14133_v7 }
 0x3b8   :  { %2500 = vmatpush1.bf16.msra.mxu1 %v14153_v8 }
 0x3b9   :  { %2501 = vmatprep.subr.bf16.mxu1 %v14157_v18 }
 0x3ba   :  { %11543 = vmatpush3.bf16.msra.mxu0 %v12043_v0  ;;  %v443_v0 = vadd.f32 %v13937_v2, %v13865_v23 }
 0x3bb   :  { %11544 = vmatprep.subr.bf16.mxu0 %v14133_v7 }
 0x3bc   :  { %2502 = vmatpush1.bf16.msra.mxu1 %v14160_v63 }
 0x3bd   :  { %2503 = vmatprep.subr.bf16.mxu1 %v14163_v31 }
 0x3be   :  { %11545 = vmatpush3.bf16.msra.mxu0 %v12044_v49 }
 0x3bf   :  { %11546 = vmatprep.subr.bf16.mxu0 %v14133_v7 }
 0x3c0   :  { %2504 = vmatpush1.bf16.msra.mxu1 %v14166_v12 }
 0x3c1   :  { %2505 = vmatprep.subr.bf16.mxu1 %v14170_v61 }
 0x3c2   :  { %11547 = vmatpush3.bf16.msra.mxu0 %v12045_v45 }
 0x3c3   :  { %11548 = vmatprep.subr.bf16.mxu0 %v14133_v7 }
 0x3c4   :  { %2506 = vmatpush1.bf16.msra.mxu1 %v14173_v11 }
 0x3c5   :  { %2507 = vmatprep.subr.bf16.mxu1 %v14177_v52 }
 0x3c6   :  { %11549 = vmatpush3.bf16.msra.mxu0 %v12046_v9 }
 0x3c7   :  { %11550 = vmatprep.subr.bf16.mxu0 %v14133_v7 }
 0x3c8   :  { %2508 = vmatpush1.bf16.msra.mxu1 %v14180_v44 }
 0x3c9   :  { %2509 = vmatprep.subr.bf16.mxu1 %v14184_v20 }
 0x3cc   :  { %2510 = vmatpush1.bf16.msra.mxu1 %v14187_v27 }
 0x3cd   :  { %2820 = vmatprep.subr.bf16.mxu1 %v14137_v1  ;;  %v12047_v1 = vld [vmem:[#allocation6 + $0x20] ss:$12 sps:$4 sm:$0xff]  }
 0x3ce   :  { %11551 = vmatpush3.bf16.msra.mxu0 %v12047_v1 }
 0x3cf   :  { %11552 = vmatprep.subr.bf16.mxu0 %v14133_v7 }
 0x3d2   :  { %11553 = vmatpush3.bf16.msra.mxu0 %v12048_v26 }
 0x3d3   :  { %11558 = vmatprep.subr.bf16.mxu0 %v14133_v7 }
 0x46f   :  { %v2204_v5 = vpop.f32.mrf.mxu1  ;;  %v2247_v38 = vpop.f32.mrf.mxu0 }
 0x470   :  { %v2254_v57 = vadd.f32 %v2204_v5, %v13917_v53 }
 0x471   :  { %v2206_v24 = vpop.f32.mrf.mxu1  ;;  %v11536_v36 = vpop.f32.mrf.mxu0 }
 0x472   :  { %v10433_v10 = vmul.f32 -1.442695, %v2254_v57  ;;  %v2268_v34 = vadd.f32 %v2206_v24, %v13923_v56  ;;  %v2289_v24 = vadd.f32 %v14090_v58, %v2247_v38 }
 0x473   :  { %v2208_v40 = vpop.f32.mrf.mxu1  ;;  %v2250_v47 = vpop.f32.mrf.mxu0 }
 0x474   :  { %12698 = vpow2.f32 %v10433_v10  ;;  %v2255_v46 = vadd.f32 %v2208_v40, %v13929_v60  ;;  %v10435_v45 = vmul.f32 -1.442695, %v2268_v34 }
 0x475   :  { %v11537_v39 = vpop.f32.mrf.mxu0  ;;  %v2210_v54 = vpop.f32.mrf.mxu1 }
 0x476   :  { %v10434_v30 = vmul.f32 -1.442695, %v2255_v46  ;;  %v2269_v49 = vadd.f32 %v2210_v54, %v443_v0  ;;  %v2290_v46 = vadd.f32 %v14090_v58, %v2250_v47  ;;  %v14346_v47 = vpop.permute.xlu1 %2316 }
 0x477   :  { %vm2319_vm8 = vcmp.eq.s32.totalorder %v14346_v47, 1 }
 0x478   :  { %12700 = vpow2.f32 %v10434_v30  ;;  %v10436_v53 = vmul.f32 -1.442695, %v2269_v49 }
 0x479   :  { %12702 = vpow2.f32 %v10435_v45 }
 0x47a   :  { %12704 = vpow2.f32 %v10436_v53 }
 0x481   :  { %v12699_v9 = vpop.eup %12698 }
 0x482   :  { %v2262_v1 = vadd.f32 1.0, %v12699_v9 }
 0x484   :  { %12706 = vrcp.f32 %v2262_v1 }
 0x485   :  { %v12701_v26 = vpop.eup %12700 }
 0x486   :  { %v2263_v5 = vadd.f32 1.0, %v12701_v26  ;;  %v12703_v60 = vpop.eup %12702 }
 0x487   :  { %v12705_v57 = vpop.eup %12704  ;;  %v2276_v56 = vadd.f32 1.0, %v12703_v60 }
 0x488   :  { %12708 = vrcp.f32 %v2263_v5  ;;  %v2277_v10 = vadd.f32 1.0, %v12705_v57  ;;  %v14348_v5 = vpop.permute.xlu0 %2313 }
 0x489   :  { %12710 = vrcp.f32 %v2276_v56  ;;  %vm2318_vm9 = vcmp.eq.s32.totalorder %v14348_v5, 1 }
 0x48a   :  { %12712 = vrcp.f32 %v2277_v10 }
 0x491   :  { %v12707_v36 = vpop.eup %12706 }
 0x492   :  { %v2291_v2 = vmul.f32 %v12707_v36, %v2289_v24 }
 0x494   :  { %v2293_v40 = vadd.f32 %v2291_v2, %v13871_v25 }
 0x495   :  { %v12709_v39 = vpop.eup %12708 }
 0x496   :  { %12714 = vtanh.f32 %v2293_v40  ;;  %v2292_v34 = vmul.f32 %v12709_v39, %v2290_v46  ;;  %v12711_v54 = vpop.eup %12710  ;;  %v453_v46 = vadd.f32 %v13962_v37, %v13865_v23 }
 0x497   :  { %v12713_v0 = vpop.eup %12712  ;;  %v2297_v49 = vsub.f32 1.0, %v12711_v54  ;;  %v2301_v53 = vmul.f32 %v12711_v54, %v14294_v28 }
 0x498   :  { %v2294_v30 = vadd.f32 %v2292_v34, %v13883_v33  ;;  %v2298_v9 = vsub.f32 1.0, %v12713_v0  ;;  %v2302_v58 = vmul.f32 %v12713_v0, %v14300_v41 }
 0x49a   :  { %12716 = vtanh.f32 %v2294_v30 }
 0x4a3   :  { %v12715_v45 = vpop.eup %12714 }
 0x4a4   :  { %v2299_v38 = vmul.f32 %v12715_v45, %v2297_v49 }
 0x4a6   :  { %v14343_v1 = vadd.f32 %v2301_v53, %v2299_v38 }
 0x4a7   :  { %v12717_v25 = vpop.eup %12716 }
 0x4a8   :  { %v2300_v26 = vmul.f32 %v12717_v25, %v2298_v9  ;;  %v14358_v60 = vsel %vm2318_vm9, %v14343_v1, %v14294_v28 }
 0x4aa   :  { %v14350_v33 = vadd.f32 %v2302_v58, %v2300_v26 }
 0x4ac   :  { %v14364_v57 = vsel %vm2319_vm8, %v14350_v33, %v14300_v41  ;;  %v11050_v56 = vpack.c.bf16 %v14350_v33, %v14343_v1  ;;  %v15214_v29 = vsel %vm2319_vm8, %v14350_v33, 0.0 }
 0x4ad   :  { %v2334_v24 = vpack.c.bf16 %v14364_v57, %v14358_v60 }
 0x4af   :  { %2528 = vmatmul.mubr.bf16.vlgmr.msra.gmra.mxu1 %v2334_v24  ;;  %11555 = vmatmul.mubr.bf16.vlgmr.msra.gmra.mxu0 %v2334_v24 }
 0x4b0   :  { %2821 = vmatpush1.bf16.msra.mxu1 %v14139_v62  ;;  %2852 = vmatprep.mubr.bf16.mxu1 %v16743_v50  ;;  %v12049_v62 = vld [vmem:[#allocation6 + $0xb0] ss:$12 sps:$4 sm:$0xff]  }
 0x4b1   :  { %2822 = vmatprep.subr.bf16.mxu1 %v14143_v59  ;;  %11574 = vmatprep.mubr.msk.bf16.mxu0 %vm16600_vm12, %v14133_v7  ;;  %v12050_v59 = vld [vmem:[#allocation6 + $0x98] ss:$12 sps:$4 sm:$0xff]  }
 0x4b2   :  { %11559 = vmatpush3.bf16.msra.mxu0 %v12049_v62  ;;  %v16744_v62 = vld [vmem:[#allocation19_spill] sm:$0xff] }
 0x4b3   :  { %11560 = vmatprep.subr.bf16.mxu0 %v14133_v7 }
 0x4b4   :  { %2823 = vmatpush1.bf16.msra.mxu1 %v14146_v55  ;;  %v12051_v55 = vld [vmem:[#allocation6 + $0x80] ss:$12 sps:$4 sm:$0xff]  }
 0x4b5   :  { %2824 = vmatprep.subr.bf16.mxu1 %v14150_v21  ;;  %v12053_v21 = vld [vmem:[#allocation6 + $0x50] ss:$12 sps:$4 sm:$0xff]  }
 0x4b6   :  { %11561 = vmatpush3.bf16.msra.mxu0 %v12050_v59  ;;  %v555_v59 = vadd.f32 %v16744_v62, %v13838_v6  ;;  %v12084_v62 = vld [vmem:[#allocation6 + $0x20] ss:$12 sps:$4 sm:$0xff]  }
 0x4b7   :  { %11562 = vmatprep.subr.bf16.mxu0 %v14133_v7 }
 0x4b8   :  { %2825 = vmatpush1.bf16.msra.mxu1 %v14153_v8  ;;  %v12056_v8 = vld [vmem:[#allocation6 + $0x8] ss:$12 sps:$4 sm:$0xff]  }
 0x4b9   :  { %2826 = vmatprep.subr.bf16.mxu1 %v14157_v18 }
 0x4ba   :  { %11563 = vmatpush3.bf16.msra.mxu0 %v12051_v55 }
 0x4bb   :  { %11564 = vmatprep.subr.bf16.mxu0 %v14133_v7 }
 0x4bc   :  { %2827 = vmatpush1.bf16.msra.mxu1 %v14160_v63 }
 0x4bd   :  { %2828 = vmatprep.subr.bf16.mxu1 %v14163_v31 }
 0x4c0   :  { %2829 = vmatpush1.bf16.msra.mxu1 %v14166_v12 }
 0x4c1   :  { %2830 = vmatprep.subr.bf16.mxu1 %v14170_v61 }
 0x4c4   :  { %2831 = vmatpush1.bf16.msra.mxu1 %v14173_v11  ;;  %v12052_v11 = vld [vmem:[#allocation6 + $0x68] ss:$12 sps:$4 sm:$0xff]  }
 0x4c5   :  { %2832 = vmatprep.subr.bf16.mxu1 %v14177_v52  ;;  %11565 = vmatpush3.bf16.msra.mxu0 %v12052_v11 }
 0x4c6   :  { %11566 = vmatprep.subr.bf16.mxu0 %v14133_v7 }
 0x4c8   :  { %2833 = vmatpush1.bf16.msra.mxu1 %v14180_v44  ;;  %v12054_v44 = vld [vmem:[#allocation6 + $0x38] ss:$12 sps:$4 sm:$0xff]  }
 0x4c9   :  { %2834 = vmatprep.subr.bf16.mxu1 %v14184_v20  ;;  %11567 = vmatpush3.bf16.msra.mxu0 %v12053_v21 }
 0x4ca   :  { %11568 = vmatprep.subr.bf16.mxu0 %v14133_v7 }
 0x4cc   :  { %2835 = vmatpush1.bf16.msra.mxu1 %v14187_v27  ;;  %v12055_v27 = vld [vmem:[#allocation6 + $0x20] ss:$12 sps:$4 sm:$0xff]  }
 0x4cd   :  { %11569 = vmatpush3.bf16.msra.mxu0 %v12054_v44 }
 0x4ce   :  { %11570 = vmatprep.subr.bf16.mxu0 %v14133_v7 }
 0x4d1   :  { %11571 = vmatpush3.bf16.msra.mxu0 %v12055_v27 }
 0x4d2   :  { %11572 = vmatprep.subr.bf16.mxu0 %v14133_v7 }
 0x4d5   :  { %11573 = vmatpush3.bf16.msra.mxu0 %v12056_v8 }
 0x4d6   :  { %11578 = vmatprep.subr.bf16.mxu0 %v14133_v7 }
 0x56f   :  { %v2529_v18 = vpop.f32.mrf.mxu1  ;;  %v2572_v63 = vpop.f32.mrf.mxu0 }
 0x570   :  { %v2579_v31 = vadd.f32 %v2529_v18, %v13945_v15 }
 0x571   :  { %v2531_v12 = vpop.f32.mrf.mxu1  ;;  %v11556_v61 = vpop.f32.mrf.mxu0 }
 0x572   :  { %v10464_v52 = vmul.f32 -1.442695, %v2579_v31  ;;  %v2593_v10 = vadd.f32 %v2531_v12, %v13951_v13  ;;  %v14404_v13 = vld [vmem:[%s16570_s6] ss:$0 sm:$0xff] }
 0x573   :  { %v2533_v20 = vpop.f32.mrf.mxu1  ;;  %v2575_v28 = vpop.f32.mrf.mxu0  ;;  %v2614_v38 = vadd.f32 %v14404_v13, %v2572_v63 }
 0x574   :  { %12718 = vpow2.f32 %v10464_v52  ;;  %v2580_v41 = vadd.f32 %v2533_v20, %v13957_v16  ;;  %v10466_v34 = vmul.f32 -1.442695, %v2593_v10  ;;  %v2615_v58 = vadd.f32 %v14404_v13, %v2575_v28  ;;  %v14415_v20 = vpop.permute.xlu1 %2641  ;;  %v14417_v28 = vpop.permute.xlu0 %2638 }
 0x575   :  { %v11557_v36 = vpop.f32.mrf.mxu0  ;;  %v2535_v40 = vpop.f32.mrf.mxu1  ;;  %vm2644_vm10 = vcmp.eq.s32.totalorder %v14415_v20, 1  ;;  %vm2643_vm11 = vcmp.eq.s32.totalorder %v14417_v28, 1 }
 0x576   :  { %v10465_v2 = vmul.f32 -1.442695, %v2580_v41  ;;  %v2594_v39 = vadd.f32 %v2535_v40, %v453_v46  ;;  %v14442_v46 = vld [vmem:[#allocation6 + $0xa8] ss:$12 sps:$4 sm:$0xff]  }
 0x578   :  { %12720 = vpow2.f32 %v10465_v2  ;;  %v10467_v15 = vmul.f32 -1.442695, %v2594_v39  ;;  %v12060_v39 = vld [vmem:[#allocation6 + $0xb0] ss:$12 sps:$4 sm:$0xff]  }
 0x579   :  { %12722 = vpow2.f32 %v10466_v34  ;;  %v14448_v34 = vld [vmem:[#allocation6 + $0x90] ss:$12 sps:$4 sm:$0xff]  }
 0x57a   :  { %12724 = vpow2.f32 %v10467_v15  ;;  %v12064_v15 = vld [vmem:[#allocation6 + $0x98] ss:$12 sps:$4 sm:$0xff]  }
 0x581   :  { %v12719_v30 = vpop.eup %12718 }
 0x582   :  { %v2587_v54 = vadd.f32 1.0, %v12719_v30  ;;  %v14452_v30 = vld [vmem:[#allocation6 + $0x7c] ss:$12 sps:$4 sm:$0xff]  }
 0x584   :  { %12726 = vrcp.f32 %v2587_v54  ;;  %v14455_v54 = vld [vmem:[#allocation6 + $0x78] ss:$12 sps:$4 sm:$0xff]  }
 0x585   :  { %v12721_v0 = vpop.eup %12720 }
 0x586   :  { %v2588_v49 = vadd.f32 1.0, %v12721_v0  ;;  %v12723_v16 = vpop.eup %12722  ;;  %v12068_v0 = vld [vmem:[#allocation6 + $0x80] ss:$12 sps:$4 sm:$0xff]  }
 0x587   :  { %v12725_v45 = vpop.eup %12724  ;;  %v2601_v37 = vadd.f32 1.0, %v12723_v16  ;;  %v14462_v16 = vld [vmem:[#allocation6 + $0x60] ss:$12 sps:$4 sm:$0xff]  }
 0x588   :  { %12728 = vrcp.f32 %v2588_v49  ;;  %v2602_v9 = vadd.f32 1.0, %v12725_v45  ;;  %v14459_v49 = vld [vmem:[#allocation6 + $0x64] ss:$12 sps:$4 sm:$0xff]   ;;  %v12072_v45 = vld [vmem:[#allocation6 + $0x68] ss:$12 sps:$4 sm:$0xff]  }
 0x589   :  { %12730 = vrcp.f32 %v2601_v37  ;;  %v14465_v37 = vld [vmem:[#allocation6 + $0x4c] ss:$12 sps:$4 sm:$0xff]  }
 0x58a   :  { %12732 = vrcp.f32 %v2602_v9  ;;  %v14472_v9 = vld [vmem:[#allocation6 + $0x34] ss:$12 sps:$4 sm:$0xff]  }
 0x591   :  { %v12727_v53 = vpop.eup %12726 }
 0x592   :  { %v2616_v25 = vmul.f32 %v12727_v53, %v2614_v38  ;;  %v14468_v38 = vld [vmem:[#allocation6 + $0x48] ss:$12 sps:$4 sm:$0xff]   ;;  %v12076_v53 = vld [vmem:[#allocation6 + $0x50] ss:$12 sps:$4 sm:$0xff]  }
 0x594   :  { %v2618_v26 = vadd.f32 %v2616_v25, %v13899_v43  ;;  %v14475_v25 = vld [vmem:[#allocation6 + $0x30] ss:$12 sps:$4 sm:$0xff]  }
 0x595   :  { %v12729_v24 = vpop.eup %12728 }
 0x596   :  { %12734 = vtanh.f32 %v2618_v26  ;;  %v2617_v55 = vmul.f32 %v12729_v24, %v2615_v58  ;;  %v12731_v21 = vpop.eup %12730  ;;  %v12080_v26 = vld [vmem:[#allocation6 + $0x38] ss:$12 sps:$4 sm:$0xff]   ;;  %v14479_v58 = vld [vmem:[#allocation6 + $0x1c] ss:$12 sps:$4 sm:$0xff]  }
 0x597   :  { %v12733_v44 = vpop.eup %12732  ;;  %v2622_v27 = vsub.f32 1.0, %v12731_v21  ;;  %v2626_v63 = vmul.f32 %v12731_v21, %v14358_v60  ;;  %v14482_v24 = vld [vmem:[#allocation6 + $0x18] ss:$12 sps:$4 sm:$0xff]  }
 0x598   :  { %v2619_v11 = vadd.f32 %v2617_v55, %v555_v59  ;;  %v2623_v31 = vsub.f32 1.0, %v12733_v44  ;;  %v2627_v52 = vmul.f32 %v12733_v44, %v14364_v57  ;;  %v14486_v59 = vld [vmem:[#allocation6 + $0x4] ss:$12 sps:$4 sm:$0xff]   ;;  %v14489_v55 = vld [vmem:[#allocation6] ss:$12 sps:$4 sm:$0xff]  }
 0x59a   :  { %12736 = vtanh.f32 %v2619_v11  ;;  %v12088_v11 = vld [vmem:[#allocation6 + $0x8] ss:$12 sps:$4 sm:$0xff]  }
 0x5a3   :  { %v12735_v8 = vpop.eup %12734 }
 0x5a4   :  { %v2624_v18 = vmul.f32 %v12735_v8, %v2622_v27  ;;  %v16745_v27 = vld [vmem:[#allocation29_spill] sm:$0xff] }
 0x5a6   :  { %v14412_v43 = vadd.f32 %v2626_v63, %v2624_v18 }
 0x5a7   :  { %v12737_v12 = vpop.eup %12736 }
 0x5a8   :  { %v2625_v61 = vmul.f32 %v12737_v12, %v2623_v31  ;;  %v14427_v36 = vsel %vm2643_vm11, %v14412_v43, %v14358_v60  ;;  %v12059_v60 = vld [vmem:[#allocation6 + $0xac] ss:$12 sps:$4 sm:$0xff]   ;;  %v15227_v47 = vsel %vm2643_vm11, %v14412_v43, 0.0 }
 0x5a9   :  { %3145 = vmatprep.subr.bf16.mxu1 %v12059_v60 }
 0x5aa   :  { %v14419_v41 = vadd.f32 %v2627_v52, %v2625_v61  ;;  %v16746_v52 = vld [vmem:[#allocation33_spill] sm:$0xff] }
 0x5ac   :  { %v14433_v10 = vsel %vm2644_vm10, %v14419_v41, %v14364_v57  ;;  %v11053_v2 = vpack.c.bf16 %v14419_v41, %v14412_v43  ;;  %v14445_v57 = vld [vmem:[#allocation6 + $0x94] ss:$12 sps:$4 sm:$0xff]  }
 0x5ad   :  { %v2659_v40 = vpack.c.bf16 %v14433_v10, %v14427_v36 }
 0x5af   :  { %2853 = vmatmul.mubr.bf16.vlgmr.msra.gmra.mxu1 %v2659_v40  ;;  %11575 = vmatmul.mubr.bf16.vlgmr.msra.gmra.mxu0 %v2659_v40 }
 0x5b0   :  { %3177 = vmatprep.mubr.bf16.mxu1 %v16743_v50  ;;  %11594 = vmatprep.mubr.msk.bf16.mxu0 %vm16600_vm12, %v14133_v7 }
 0x5b1   :  { %3146 = vmatpush1.bf16.msra.mxu1 %v14442_v46  ;;  %11579 = vmatpush3.bf16.msra.mxu0 %v12060_v39 }
 0x5b2   :  { %11580 = vmatprep.subr.bf16.mxu0 %v14133_v7  ;;  %3147 = vmatprep.subr.bf16.mxu1 %v14445_v57 }
 0x5b5   :  { %3148 = vmatpush1.bf16.msra.mxu1 %v14448_v34  ;;  %11581 = vmatpush3.bf16.msra.mxu0 %v12064_v15  ;;  %v16747_v15 = vld [vmem:[#allocation31_spill] sm:$0xff] }
 0x5b6   :  { %11582 = vmatprep.subr.bf16.mxu0 %v14133_v7  ;;  %3149 = vmatprep.subr.bf16.mxu1 %v14452_v30 }
 0x5b9   :  { %3150 = vmatpush1.bf16.msra.mxu1 %v14455_v54  ;;  %11583 = vmatpush3.bf16.msra.mxu0 %v12068_v0 }
 0x5ba   :  { %11584 = vmatprep.subr.bf16.mxu0 %v14133_v7  ;;  %3151 = vmatprep.subr.bf16.mxu1 %v14459_v49 }
 0x5bd   :  { %3152 = vmatpush1.bf16.msra.mxu1 %v14462_v16  ;;  %11585 = vmatpush3.bf16.msra.mxu0 %v12072_v45 }
 0x5be   :  { %3153 = vmatprep.subr.bf16.mxu1 %v14465_v37  ;;  %11586 = vmatprep.subr.bf16.mxu0 %v14133_v7 }
 0x5c1   :  { %3154 = vmatpush1.bf16.msra.mxu1 %v14468_v38  ;;  %11587 = vmatpush3.bf16.msra.mxu0 %v12076_v53 }
 0x5c2   :  { %3155 = vmatprep.subr.bf16.mxu1 %v14472_v9  ;;  %11588 = vmatprep.subr.bf16.mxu0 %v14133_v7 }
 0x5c5   :  { %3156 = vmatpush1.bf16.msra.mxu1 %v14475_v25  ;;  %11589 = vmatpush3.bf16.msra.mxu0 %v12080_v26 }
 0x5c6   :  { %3157 = vmatprep.subr.bf16.mxu1 %v14479_v58  ;;  %11590 = vmatprep.subr.bf16.mxu0 %v14133_v7 }
 0x5c9   :  { %3158 = vmatpush1.bf16.msra.mxu1 %v14482_v24  ;;  %11591 = vmatpush3.bf16.msra.mxu0 %v12084_v62 }
 0x5ca   :  { %3159 = vmatprep.subr.bf16.mxu1 %v14486_v59  ;;  %11592 = vmatprep.subr.bf16.mxu0 %v14133_v7 }
 0x5cd   :  { %3160 = vmatpush1.bf16.msra.mxu1 %v14489_v55  ;;  %11593 = vmatpush3.bf16.msra.mxu0 %v12088_v11 }
 0x5ce   :  { %11598 = vmatprep.subr.bf16.mxu0 %v14133_v7  ;;  %3470 = vmatprep.subr.bf16.mxu1 %v12059_v60  ;;  %v16748_v7 = vld [vmem:[#allocation35_spill] sm:$0xff] }
 0x5cf   :  { %v463_v60 = vadd.f32 %v16748_v7, %v13865_v23 }
 0x66f   :  { %v2854_v21 = vpop.f32.mrf.mxu1  ;;  %v2897_v44 = vpop.f32.mrf.mxu0 }
 0x670   :  { %v2904_v8 = vadd.f32 %v2854_v21, %v16745_v27 }
 0x671   :  { %v2856_v18 = vpop.f32.mrf.mxu1  ;;  %v11576_v63 = vpop.f32.mrf.mxu0 }
 0x672   :  { %v10495_v31 = vmul.f32 -1.442695, %v2904_v8  ;;  %v2918_v0 = vadd.f32 %v2856_v18, %v16747_v15 }
 0x673   :  { %v2858_v12 = vpop.f32.mrf.mxu1  ;;  %v2900_v61 = vpop.f32.mrf.mxu0 }
 0x674   :  { %12738 = vpow2.f32 %v10495_v31  ;;  %v2905_v40 = vadd.f32 %v2858_v12, %v16746_v52  ;;  %v10497_v62 = vmul.f32 -1.442695, %v2918_v0  ;;  %v2939_v52 = vadd.f32 %v14404_v13, %v2897_v44 }
 0x675   :  { %v11577_v39 = vpop.f32.mrf.mxu0  ;;  %v2860_v53 = vpop.f32.mrf.mxu1 }
 0x676   :  { %v10496_v45 = vmul.f32 -1.442695, %v2905_v40  ;;  %v2919_v26 = vadd.f32 %v2860_v53, %v463_v60  ;;  %v2940_v53 = vadd.f32 %v14404_v13, %v2900_v61 }
 0x678   :  { %12740 = vpow2.f32 %v10496_v45  ;;  %v10498_v11 = vmul.f32 -1.442695, %v2919_v26  ;;  %v16749_v45 = vld [vmem:[#allocation17_spill] sm:$0xff]  ;;  %v16750_v26 = vld [vmem:[#allocation18_spill] sm:$0xff] }
 0x679   :  { %12742 = vpow2.f32 %v10497_v62 }
 0x67a   :  { %12744 = vpow2.f32 %v10498_v11 }
 0x681   :  { %v12739_v21 = vpop.eup %12738 }
 0x682   :  { %v2912_v27 = vadd.f32 1.0, %v12739_v21 }
 0x684   :  { %12746 = vrcp.f32 %v2912_v27 }
 0x685   :  { %v12741_v8 = vpop.eup %12740 }
 0x686   :  { %v2913_v63 = vadd.f32 1.0, %v12741_v8  ;;  %v12743_v31 = vpop.eup %12742 }
 0x687   :  { %v12745_v12 = vpop.eup %12744  ;;  %v2926_v18 = vadd.f32 1.0, %v12743_v31 }
 0x688   :  { %12748 = vrcp.f32 %v2913_v63  ;;  %v2927_v39 = vadd.f32 1.0, %v12745_v12 }
 0x689   :  { %12750 = vrcp.f32 %v2926_v18 }
 0x68a   :  { %12752 = vrcp.f32 %v2927_v39  ;;  %v14510_v39 = vpop.permute.xlu0 %2963 }
 0x68b   :  { %vm2968_vm14 = vcmp.eq.s32.totalorder %v14510_v39, 1 }
 0x691   :  { %v12747_v40 = vpop.eup %12746 }
 0x692   :  { %v2941_v15 = vmul.f32 %v12747_v40, %v2939_v52  ;;  %v14508_v40 = vpop.permute.xlu1 %2966 }
 0x693   :  { %vm16606_vm13 = vcmp.eq.s32.totalorder %v14508_v40, 1 }
 0x694   :  { %v2943_v0 = vadd.f32 %v2941_v15, %v16749_v45 }
 0x695   :  { %v12749_v7 = vpop.eup %12748 }
 0x696   :  { %12754 = vtanh.f32 %v2943_v0  ;;  %v2942_v60 = vmul.f32 %v12749_v7, %v2940_v53  ;;  %v12751_v11 = vpop.eup %12750 }
 0x697   :  { %v12753_v21 = vpop.eup %12752  ;;  %v2947_v27 = vsub.f32 1.0, %v12751_v11  ;;  %v2951_v63 = vmul.f32 %v12751_v11, %v14427_v36 }
 0x698   :  { %v2944_v62 = vadd.f32 %v2942_v60, %v16750_v26  ;;  %v2948_v31 = vsub.f32 1.0, %v12753_v21  ;;  %v2952_v61 = vmul.f32 %v12753_v21, %v14433_v10 }
 0x69a   :  { %12756 = vtanh.f32 %v2944_v62  ;;  %v16752_v62 = vld [vmem:[#allocation41_spill] sm:$0xff] }
 0x6a3   :  { %v12755_v8 = vpop.eup %12754 }
 0x6a4   :  { %v2949_v44 = vmul.f32 %v12755_v8, %v2947_v27  ;;  %v16753_v27 = vld [vmem:[#allocation39_spill] sm:$0xff] }
 0x6a6   :  { %v14505_v12 = vadd.f32 %v2951_v63, %v2949_v44 }
 0x6a7   :  { %v12757_v18 = vpop.eup %12756 }
 0x6a8   :  { %v2950_v52 = vmul.f32 %v12757_v18, %v2948_v31  ;;  %v14520_v45 = vsel %vm2968_vm14, %v14505_v12, %v14427_v36  ;;  %v14538_v36 = vld [vmem:[%s16583_s19] sm:$0xff]  ;;  %v16754_v31 = vld [vmem:[#allocation43_spill] sm:$0xff]  ;;  %v15232_v33 = vsel %vm2968_vm14, %v14505_v12, 0.0 }
 0x6a9   :  { %v473_v18 = vadd.f32 %v16754_v31, %v13865_v23 }
 0x6aa   :  { %v14512_v15 = vadd.f32 %v2952_v61, %v2950_v52 }
 0x6ac   :  { %v14526_v0 = vsel %vm16606_vm13, %v14512_v15, %v14433_v10  ;;  %v11056_v53 = vpack.c.bf16 %v14512_v15, %v14505_v12  ;;  %v12089_v10 = vld [vmem:[#allocation6 + $0xb0] ss:$12 sps:$4 sm:$0xff]  }
 0x6ad   :  { %v2984_v7 = vpack.c.bf16 %v14526_v0, %v14520_v45 }
 0x6af   :  { %3178 = vmatmul.mubr.bf16.vlgmr.msra.gmra.mxu1 %v2984_v7  ;;  %11595 = vmatmul.mubr.bf16.vlgmr.msra.gmra.mxu0 %v2984_v7 }
 0x6b0   :  { %3471 = vmatpush1.bf16.msra.mxu1 %v14442_v46  ;;  %3502 = vmatprep.mubr.bf16.mxu1 %v16743_v50  ;;  %v12090_v46 = vld [vmem:[#allocation6 + $0x98] ss:$12 sps:$4 sm:$0xff]  }
 0x6b1   :  { %3472 = vmatprep.subr.bf16.mxu1 %v14445_v57  ;;  %11614 = vmatprep.mubr.msk.bf16.mxu0 %vm16600_vm12, %v14538_v36  ;;  %v12091_v57 = vld [vmem:[#allocation6 + $0x80] ss:$12 sps:$4 sm:$0xff]  }
 0x6b2   :  { %11599 = vmatpush3.bf16.msra.mxu0 %v12089_v10 }
 0x6b3   :  { %11600 = vmatprep.subr.bf16.mxu0 %v14538_v36 }
 0x6b4   :  { %3473 = vmatpush1.bf16.msra.mxu1 %v14448_v34  ;;  %v12092_v34 = vld [vmem:[#allocation6 + $0x68] ss:$12 sps:$4 sm:$0xff]  }
 0x6b5   :  { %3474 = vmatprep.subr.bf16.mxu1 %v14452_v30  ;;  %v12093_v30 = vld [vmem:[#allocation6 + $0x50] ss:$12 sps:$4 sm:$0xff]  }
 0x6b6   :  { %11601 = vmatpush3.bf16.msra.mxu0 %v12090_v46 }
 0x6b7   :  { %11602 = vmatprep.subr.bf16.mxu0 %v14538_v36 }
 0x6b8   :  { %3475 = vmatpush1.bf16.msra.mxu1 %v14455_v54  ;;  %v12094_v54 = vld [vmem:[#allocation6 + $0x38] ss:$12 sps:$4 sm:$0xff]  }
 0x6b9   :  { %3476 = vmatprep.subr.bf16.mxu1 %v14459_v49  ;;  %v12095_v49 = vld [vmem:[#allocation6 + $0x20] ss:$12 sps:$4 sm:$0xff]  }
 0x6ba   :  { %11603 = vmatpush3.bf16.msra.mxu0 %v12091_v57 }
 0x6bb   :  { %11604 = vmatprep.subr.bf16.mxu0 %v14538_v36 }
 0x6bc   :  { %3477 = vmatpush1.bf16.msra.mxu1 %v14462_v16  ;;  %v12096_v16 = vld [vmem:[#allocation6 + $0x8] ss:$12 sps:$4 sm:$0xff]  }
 0x6bd   :  { %3478 = vmatprep.subr.bf16.mxu1 %v14465_v37  ;;  %v14563_v37 = vld [vmem:[#allocation8 + $0x38] sm:$0xff]  }
 0x6be   :  { %11605 = vmatpush3.bf16.msra.mxu0 %v12092_v34 }
 0x6bf   :  { %11606 = vmatprep.subr.bf16.mxu0 %v14538_v36 }
 0x6c0   :  { %3479 = vmatpush1.bf16.msra.mxu1 %v14468_v38 }
 0x6c1   :  { %3480 = vmatprep.subr.bf16.mxu1 %v14472_v9 }
 0x6c2   :  { %11607 = vmatpush3.bf16.msra.mxu0 %v12093_v30 }
 0x6c3   :  { %11608 = vmatprep.subr.bf16.mxu0 %v14538_v36 }
 0x6c4   :  { %3481 = vmatpush1.bf16.msra.mxu1 %v14475_v25  ;;  %v16751_v25 = vld [vmem:[#allocation37_spill] sm:$0xff] }
 0x6c5   :  { %3482 = vmatprep.subr.bf16.mxu1 %v14479_v58 }
 0x6c6   :  { %11609 = vmatpush3.bf16.msra.mxu0 %v12094_v54 }
 0x6c7   :  { %11610 = vmatprep.subr.bf16.mxu0 %v14538_v36 }
 0x6c8   :  { %3483 = vmatpush1.bf16.msra.mxu1 %v14482_v24 }
 0x6c9   :  { %3484 = vmatprep.subr.bf16.mxu1 %v14486_v59 }
 0x6ca   :  { %11611 = vmatpush3.bf16.msra.mxu0 %v12095_v49 }
 0x6cb   :  { %11612 = vmatprep.subr.bf16.mxu0 %v14538_v36 }
 0x6cc   :  { %3485 = vmatpush1.bf16.msra.mxu1 %v14489_v55 }
 0x6cd   :  { %11618 = vmatprep.subr.bf16.mxu1 %v14538_v36 }
 0x6ce   :  { %11613 = vmatpush3.bf16.msra.mxu0 %v12096_v16 }
 0x6cf   :  { %11638 = vmatprep.subr.bf16.mxu0 %v14563_v37 }
 0x76f   :  { %v3179_v38 = vpop.f32.mrf.mxu1  ;;  %v3222_v9 = vpop.f32.mrf.mxu0 }
 0x770   :  { %v3229_v58 = vadd.f32 %v3179_v38, %v16751_v25  ;;  %v3264_v16 = vadd.f32 %v14404_v13, %v3222_v9 }
 0x771   :  { %v3181_v24 = vpop.f32.mrf.mxu1  ;;  %v11596_v59 = vpop.f32.mrf.mxu0 }
 0x772   :  { %v10526_v55 = vmul.f32 -1.442695, %v3229_v58  ;;  %v3243_v8 = vadd.f32 %v3181_v24, %v16753_v27  ;;  %v16755_v24 = vld [vmem:[#allocation21_spill] sm:$0xff] }
 0x773   :  { %v3183_v60 = vpop.f32.mrf.mxu1  ;;  %v3225_v26 = vpop.f32.mrf.mxu0 }
 0x774   :  { %12758 = vpow2.f32 %v10526_v55  ;;  %v3230_v11 = vadd.f32 %v3183_v60, %v16752_v62  ;;  %v10528_v61 = vmul.f32 -1.442695, %v3243_v8  ;;  %v3265_v55 = vadd.f32 %v14404_v13, %v3225_v26  ;;  %v16756_v62 = vld [vmem:[#allocation23_spill] sm:$0xff] }
 0x775   :  { %v11597_v21 = vpop.f32.mrf.mxu0  ;;  %v3185_v63 = vpop.f32.mrf.mxu1 }
 0x776   :  { %v10527_v44 = vmul.f32 -1.442695, %v3230_v11  ;;  %v3244_v52 = vadd.f32 %v3185_v63, %v473_v18  ;;  %v571_v11 = vadd.f32 %v16756_v62, %v13838_v6  ;;  %v14582_v6 = vpop.permute.xlu0 %3288  ;;  %v12112_v62 = vld [vmem:[%s16571_s7] sm:$0xff]  }
 0x777   :  { %vm16605_vm0 = vcmp.eq.s32.totalorder %v14582_v6, 1 }
 0x778   :  { %12760 = vpow2.f32 %v10527_v44  ;;  %v10529_v7 = vmul.f32 -1.442695, %v3244_v52 }
 0x779   :  { %12762 = vpow2.f32 %v10528_v61 }
 0x77a   :  { %12764 = vpow2.f32 %v10529_v7 }
 0x781   :  { %v12759_v10 = vpop.eup %12758 }
 0x782   :  { %v3237_v46 = vadd.f32 1.0, %v12759_v10 }
 0x784   :  { %12766 = vrcp.f32 %v3237_v46  ;;  %v14580_v46 = vpop.permute.xlu1 %3291 }
 0x785   :  { %v12761_v57 = vpop.eup %12760  ;;  %vm16604_vm15 = vcmp.eq.s32.totalorder %v14580_v46, 1 }
 0x786   :  { %v3238_v34 = vadd.f32 1.0, %v12761_v57  ;;  %v12763_v30 = vpop.eup %12762 }
 0x787   :  { %v12765_v54 = vpop.eup %12764  ;;  %v3251_v49 = vadd.f32 1.0, %v12763_v30 }
 0x788   :  { %12768 = vrcp.f32 %v3238_v34  ;;  %v3252_v25 = vadd.f32 1.0, %v12765_v54 }
 0x789   :  { %12770 = vrcp.f32 %v3251_v49 }
 0x78a   :  { %12772 = vrcp.f32 %v3252_v25  ;;  %v12099_v25 = vld [vmem:[#allocation8 + $0x28] sm:$0xff]  }
 0x791   :  { %v12767_v38 = vpop.eup %12766 }
 0x792   :  { %v3266_v58 = vmul.f32 %v12767_v38, %v3264_v16  ;;  %v12098_v16 = vld [vmem:[#allocation8 + $0x30] sm:$0xff]  }
 0x793   :  { %v16757_v38 = vld [vmem:[#allocation67_spill] sm:$0xff] }
 0x794   :  { %v3268_v59 = vadd.f32 %v3266_v58, %v16755_v24  ;;  %v12101_v58 = vld [vmem:[#allocation8 + $0x18] sm:$0xff]   ;;  %v12102_v24 = vld [vmem:[#allocation8 + $0x10] sm:$0xff]  }
 0x795   :  { %v12769_v60 = vpop.eup %12768 }
 0x796   :  { %12774 = vtanh.f32 %v3268_v59  ;;  %v3267_v21 = vmul.f32 %v12769_v60, %v3265_v55  ;;  %v12771_v8 = vpop.eup %12770  ;;  %v12104_v59 = vld [vmem:[#allocation8] sm:$0xff]   ;;  %v12110_v55 = vld [vmem:[%s16571_s7 + $0x10] sm:$0xff]   ;;  %v12111_v60 = vld [vmem:[%s16571_s7 + $0x8] sm:$0xff]  }
 0x797   :  { %v12773_v44 = vpop.eup %12772  ;;  %v3272_v9 = vsub.f32 1.0, %v12771_v8  ;;  %v3276_v18 = vmul.f32 %v12771_v8, %v14520_v45  ;;  %v12124_v8 = vld [vmem:[%s16576_s12 + $0xcc] ss:$16 sps:$4 sm:$0xff]  }
 0x798   :  { %v3269_v27 = vadd.f32 %v3267_v21, %v571_v11  ;;  %v3273_v52 = vsub.f32 1.0, %v12773_v44  ;;  %v3277_v10 = vmul.f32 %v12773_v44, %v14526_v0  ;;  %v12115_v11 = vld [vmem:[%s16576_s12 + $0xe4] ss:$16 sps:$4 sm:$0xff]   ;;  %v12116_v21 = vld [vmem:[%s16576_s12 + $0xe8] ss:$16 sps:$4 sm:$0xff]  }
 0x799   :  { %v12122_v44 = vld [vmem:[%s16576_s12 + $0xc8] ss:$16 sps:$4 sm:$0xff]  }
 0x79a   :  { %12776 = vtanh.f32 %v3269_v27  ;;  %v12118_v27 = vld [vmem:[%s16576_s12 + $0xec] ss:$16 sps:$4 sm:$0xff]  }
 0x7a3   :  { %v12775_v63 = vpop.eup %12774 }
 0x7a4   :  { %v3274_v31 = vmul.f32 %v12775_v63, %v3272_v9 }
 0x7a6   :  { %v14577_v61 = vadd.f32 %v3276_v18, %v3274_v31  ;;  %v16759_v31 = vld [vmem:[#allocation45_spill] sm:$0xff] }
 0x7a7   :  { %v12777_v26 = vpop.eup %12776 }
 0x7a8   :  { %v3275_v7 = vmul.f32 %v12777_v26, %v3273_v52  ;;  %v14592_v34 = vsel %vm16605_vm0, %v14577_v61, %v14520_v45  ;;  %v16761_v45 = vld [vmem:[#allocation47_spill] sm:$0xff] }
 0x7aa   :  { %v14584_v57 = vadd.f32 %v3277_v10, %v3275_v7 }
 0x7ac   :  { %v14598_v30 = vsel %vm16604_vm15, %v14584_v57, %v14526_v0  ;;  %v11059_v54 = vpack.c.bf16 %v14584_v57, %v14577_v61  ;;  %v12100_v0 = vld [vmem:[#allocation8 + $0x20] sm:$0xff]  }
 0x7ad   :  { %v3309_v49 = vpack.c.bf16 %v14598_v30, %v14592_v34 }
 0x7af   :  { %3503 = vmatmul.mubr.bf16.vlgmr.msra.gmra.mxu1 %v3309_v49  ;;  %11615 = vmatmul.mubr.bf16.vlgmr.msra.gmra.mxu0 %v3309_v49  ;;  %v16760_v49 = vld [vmem:[#allocation49_spill] sm:$0xff] }
 0x7b0   :  { %11639 = vmatpush3.bf16.msra.mxu0 %v14563_v37  ;;  %11654 = vmatprep.mubr.msk.bf16.mxu0 %vm14119_vm3, %v16757_v38  ;;  %v12103_v37 = vld [vmem:[#allocation8 + $0x8] sm:$0xff]   ;;  %vm11049_vm3 = vmpackc.low %vm2319_vm8, %vm2318_vm9 }
 0x7b1   :  { %11640 = vmatprep.subr.bf16.mxu0 %v12098_v16  ;;  %11634 = vmatprep.mubr.msk.bf16.mxu1 %vm16600_vm12, %v14538_v36 }
 0x7b4   :  { %11641 = vmatpush3.bf16.msra.mxu0 %v12098_v16 }
 0x7b5   :  { %11642 = vmatprep.subr.bf16.mxu0 %v12099_v25 }
 0x7b8   :  { %11643 = vmatpush3.bf16.msra.mxu0 %v12099_v25 }
 0x7b9   :  { %11644 = vmatprep.subr.bf16.mxu0 %v12100_v0 }
 0x7bc   :  { %11645 = vmatpush3.bf16.msra.mxu0 %v12100_v0 }
 0x7bd   :  { %11646 = vmatprep.subr.bf16.mxu0 %v12101_v58 }
 0x7c0   :  { %11647 = vmatpush3.bf16.msra.mxu0 %v12101_v58 }
 0x7c1   :  { %11648 = vmatprep.subr.bf16.mxu0 %v12102_v24 }
 0x7c4   :  { %11649 = vmatpush3.bf16.msra.mxu0 %v12102_v24  ;;  %v16762_v24 = vld [vmem:[#allocation51_spill] sm:$0xff] }
 0x7c5   :  { %11650 = vmatprep.subr.bf16.mxu0 %v12103_v37 }
 0x7c8   :  { %11651 = vmatpush3.bf16.msra.mxu0 %v12103_v37  ;;  %v483_v37 = vadd.f32 %v16762_v24, %v13865_v23  ;;  %v14707_v24 = vpop.permute.xlu1 %3616 }
 0x7c9   :  { %11652 = vmatprep.subr.bf16.mxu0 %v12104_v59  ;;  %vm16804_vm8 = vcmp.eq.s32.totalorder %v14707_v24, 1 }
 0x7cc   :  { %11653 = vmatpush3.bf16.msra.mxu0 %v12104_v59 }
 0x7cd   :  { %4206 = vmatprep.subr.bf16.mxu0 %v12118_v27 }
 0x7cf   :  { %11655 = vmatmul.mubr.msk.bf16.vlgmr.msra.gmra.mxu0 %vm11043_vm1, %v11044_v19  ;;  %vm11052_vm1 = vmpackc.low %vm2644_vm10, %vm2643_vm11  ;;  %v12105_v19 = vld [vmem:[%s16571_s7 + $0x38] sm:$0xff]  }
 0x7d0   :  { %11658 = vmatprep.mubr.msk.bf16.mxu0 %vm11046_vm2, %v11047_v48  ;;  %vm11055_vm2 = vmpackc.low %vm16606_vm13, %vm2968_vm14  ;;  %11619 = vmatpush3.bf16.msra.mxu1 %v12105_v19  ;;  %v12106_v48 = vld [vmem:[%s16571_s7 + $0x30] sm:$0xff]  }
 0x7d1   :  { %11620 = vmatprep.subr.bf16.mxu1 %v14538_v36  ;;  %4207 = vmatpush1.bf16.msra.mxu0 %v12116_v21 }
 0x7d2   :  { %4208 = vmatprep.subr.bf16.mxu0 %v12124_v8 }
 0x7d4   :  { %11621 = vmatpush3.bf16.msra.mxu1 %v12106_v48 }
 0x7d5   :  { %11622 = vmatprep.subr.bf16.mxu1 %v14538_v36  ;;  %4209 = vmatpush1.bf16.msra.mxu0 %v12122_v44  ;;  %v16763_v44 = vld [vmem:[#allocation20_spill] sm:$0xff] }
 0x7d7   :  { %11659 = vmatmul.mubr.msk.bf16.gmra.mxu0 %vm11049_vm3, %v11050_v56  ;;  %vm11058_vm3 = vmpackc.low %vm16604_vm15, %vm16605_vm0  ;;  %v12107_v56 = vld [vmem:[%s16571_s7 + $0x28] sm:$0xff]   ;;  %vm4384_vm15 = vcmask 7168  }
 0x7d8   :  { %11662 = vmatprep.mubr.msk.bf16.mxu0 %vm11052_vm1, %v11053_v2  ;;  %11623 = vmatpush3.bf16.msra.mxu1 %v12107_v56  ;;  %v12108_v2 = vld [vmem:[%s16571_s7 + $0x20] sm:$0xff]   ;;  %vm16602_vm1 = vcmp.eq.s32.totalorder %v14707_v24, 1  ;;  %v12195_v24 = vld [vmem:[#allocation13 + $0xa8] sm:$0xff]  }
 0x7d9   :  { %11624 = vmatprep.subr.bf16.mxu1 %v14538_v36 }
 0x7dc   :  { %11625 = vmatpush3.bf16.msra.mxu1 %v12108_v2 }
 0x7dd   :  { %11626 = vmatprep.subr.bf16.mxu1 %v14538_v36 }
 0x7df   :  { %11663 = vmatmul.mubr.msk.bf16.gmra.mxu0 %vm11055_vm2, %v11056_v53  ;;  %v12109_v53 = vld [vmem:[%s16571_s7 + $0x18] sm:$0xff]  }
 0x7e0   :  { %11666 = vmatprep.mubr.msk.bf16.mxu0 %vm11058_vm3, %v11059_v54  ;;  %11627 = vmatpush3.bf16.msra.mxu1 %v12109_v53 }
 0x7e1   :  { %11628 = vmatprep.subr.bf16.mxu1 %v14538_v36 }
 0x7e4   :  { %11629 = vmatpush3.bf16.msra.mxu1 %v12110_v55 }
 0x7e5   :  { %11630 = vmatprep.subr.bf16.mxu1 %v14538_v36 }
 0x7e8   :  { %11631 = vmatpush3.bf16.msra.mxu1 %v12111_v60 }
 0x7e9   :  { %11632 = vmatprep.subr.bf16.mxu1 %v14538_v36 }
 0x7ec   :  { %11633 = vmatpush3.bf16.msra.mxu1 %v12112_v62 }
 0x7ed   :  { %4163 = vmatprep.subr.bf16.mxu1 %v12115_v11 }
 0x86f   :  { %v3504_v9 = vpop.f32.mrf.mxu1  ;;  %v3547_v63 = vpop.f32.mrf.mxu0 }
 0x870   :  { %v3554_v18 = vadd.f32 %v3504_v9, %v16759_v31  ;;  %v3589_v21 = vadd.f32 %v14404_v13, %v3547_v63 }
 0x871   :  { %v3506_v52 = vpop.f32.mrf.mxu1  ;;  %v11616_v26 = vpop.f32.mrf.mxu0 }
 0x872   :  { %v10557_v7 = vmul.f32 -1.442695, %v3554_v18  ;;  %v3568_v25 = vadd.f32 %v3506_v52, %v16761_v45  ;;  %v16764_v26 = vld [vmem:[#allocation22_spill] sm:$0xff] }
 0x873   :  { %v3508_v10 = vpop.f32.mrf.mxu1  ;;  %v3550_v54 = vpop.f32.mrf.mxu0 }
 0x874   :  { %12778 = vpow2.f32 %v10557_v7  ;;  %v3555_v16 = vadd.f32 %v3508_v10, %v16760_v49  ;;  %v10559_v19 = vmul.f32 -1.442695, %v3568_v25  ;;  %v3590_v31 = vadd.f32 %v14404_v13, %v3550_v54  ;;  %v14709_v13 = vpop.permute.xlu0 %3613 }
 0x875   :  { %v11617_v38 = vpop.f32.mrf.mxu0  ;;  %v3510_v58 = vpop.f32.mrf.mxu1  ;;  %vm16603_vm2 = vcmp.eq.s32.totalorder %v14709_v13, 1  ;;  %vm16803_vm7 = vcmp.eq.s32.totalorder %v14709_v13, 1 }
 0x876   :  { %v10558_v0 = vmul.f32 -1.442695, %v3555_v16  ;;  %v3569_v59 = vadd.f32 %v3510_v58, %v483_v37  ;;  %vm11061_vm3 = vmpackc.low %vm16602_vm1, %vm16603_vm2 }
 0x878   :  { %12780 = vpow2.f32 %v10558_v0  ;;  %v10560_v48 = vmul.f32 -1.442695, %v3569_v59 }
 0x879   :  { %12782 = vpow2.f32 %v10559_v19 }
 0x87a   :  { %12784 = vpow2.f32 %v10560_v48 }
 0x881   :  { %v12779_v56 = vpop.eup %12778 }
 0x882   :  { %v3562_v2 = vadd.f32 1.0, %v12779_v56 }
 0x884   :  { %12786 = vrcp.f32 %v3562_v2  ;;  %v12113_v2 = vld [vmem:[%s16576_s12 + $0xe0] ss:$16 sps:$4 sm:$0xff]  }
 0x885   :  { %v12781_v53 = vpop.eup %12780 }
 0x886   :  { %v3563_v55 = vadd.f32 1.0, %v12781_v53  ;;  %v12783_v60 = vpop.eup %12782 }
 0x887   :  { %v12785_v62 = vpop.eup %12784  ;;  %v3576_v11 = vadd.f32 1.0, %v12783_v60  ;;  %v12130_v60 = vld [vmem:[%s16576_s12 + $0xac] ss:$16 sps:$4 sm:$0xff]  }
 0x888   :  { %12788 = vrcp.f32 %v3563_v55  ;;  %v3577_v8 = vadd.f32 1.0, %v12785_v62  ;;  %v12121_v55 = vld [vmem:[%s16576_s12 + $0xc4] ss:$16 sps:$4 sm:$0xff]   ;;  %v12125_v62 = vld [vmem:[%s16576_s12 + $0xa0] ss:$16 sps:$4 sm:$0xff]   ;;  %4210 = vmatprep.subr.bf16.mxu0 %v12130_v60 }
 0x889   :  { %12790 = vrcp.f32 %v3576_v11  ;;  %v12128_v11 = vld [vmem:[%s16576_s12 + $0xa8] ss:$16 sps:$4 sm:$0xff]  }
 0x88a   :  { %12792 = vrcp.f32 %v3577_v8  ;;  %4211 = vmatpush1.bf16.msra.mxu0 %v12128_v11  ;;  %v12131_v8 = vld [vmem:[%s16576_s12 + $0x80] ss:$16 sps:$4 sm:$0xff]  }
 0x891   :  { %v12787_v27 = vpop.eup %12786 }
 0x892   :  { %v3591_v23 = vmul.f32 %v12787_v27, %v3589_v21  ;;  %v12133_v21 = vld [vmem:[%s16576_s12 + $0x84] ss:$16 sps:$4 sm:$0xff]   ;;  %v12136_v27 = vld [vmem:[%s16576_s12 + $0x8c] ss:$16 sps:$4 sm:$0xff]  }
 0x893   :  { %4212 = vmatprep.subr.bf16.mxu0 %v12136_v27 }
 0x894   :  { %v3593_v9 = vadd.f32 %v3591_v23, %v16763_v44  ;;  %v12134_v23 = vld [vmem:[%s16576_s12 + $0x88] ss:$16 sps:$4 sm:$0xff]   ;;  %v12139_v44 = vld [vmem:[%s16576_s12 + $0x64] ss:$16 sps:$4 sm:$0xff]  }
 0x895   :  { %v12789_v18 = vpop.eup %12788  ;;  %4213 = vmatpush1.bf16.msra.mxu0 %v12134_v23 }
 0x896   :  { %12794 = vtanh.f32 %v3593_v9  ;;  %v3592_v52 = vmul.f32 %v12789_v18, %v3590_v31  ;;  %v12791_v10 = vpop.eup %12790  ;;  %v12142_v9 = vld [vmem:[%s16576_s12 + $0x6c] ss:$16 sps:$4 sm:$0xff]   ;;  %v12137_v31 = vld [vmem:[%s16576_s12 + $0x60] ss:$16 sps:$4 sm:$0xff]   ;;  %v12140_v18 = vld [vmem:[%s16576_s12 + $0x68] ss:$16 sps:$4 sm:$0xff]  }
 0x897   :  { %v12793_v49 = vpop.eup %12792  ;;  %v3597_v16 = vsub.f32 1.0, %v12791_v10  ;;  %v3601_v45 = vmul.f32 %v12791_v10, %v14592_v34  ;;  %4214 = vmatprep.subr.bf16.mxu0 %v12142_v9  ;;  %v12146_v10 = vld [vmem:[%s16576_s12 + $0x48] ss:$16 sps:$4 sm:$0xff]  }
 0x898   :  { %v3594_v7 = vadd.f32 %v3592_v52, %v16764_v26  ;;  %v3598_v25 = vsub.f32 1.0, %v12793_v49  ;;  %v3602_v37 = vmul.f32 %v12793_v49, %v14598_v30  ;;  %v12145_v52 = vld [vmem:[%s16576_s12 + $0x44] ss:$16 sps:$4 sm:$0xff]   ;;  %v12148_v26 = vld [vmem:[%s16576_s12 + $0x4c] ss:$16 sps:$4 sm:$0xff]  }
 0x899   :  { %4215 = vmatpush1.bf16.msra.mxu0 %v12140_v18  ;;  %v12151_v49 = vld [vmem:[%s16576_s12 + $0x24] ss:$16 sps:$4 sm:$0xff]  }
 0x89a   :  { %12796 = vtanh.f32 %v3594_v7  ;;  %v12143_v7 = vld [vmem:[%s16576_s12 + $0x40] ss:$16 sps:$4 sm:$0xff]   ;;  %4216 = vmatprep.subr.bf16.mxu0 %v12148_v26 }
 0x89d   :  { %4217 = vmatpush1.bf16.msra.mxu0 %v12146_v10 }
 0x8a3   :  { %v12795_v38 = vpop.eup %12794 }
 0x8a4   :  { %v3599_v63 = vmul.f32 %v12795_v38, %v3597_v16  ;;  %v12154_v16 = vld [vmem:[%s16576_s12 + $0x2c] ss:$16 sps:$4 sm:$0xff]   ;;  %v12149_v38 = vld [vmem:[%s16576_s12 + $0x20] ss:$16 sps:$4 sm:$0xff]  }
 0x8a5   :  { %4218 = vmatprep.subr.bf16.mxu0 %v12154_v16 }
 0x8a6   :  { %v14705_v0 = vadd.f32 %v3601_v45, %v3599_v63  ;;  %v12152_v63 = vld [vmem:[%s16576_s12 + $0x28] ss:$16 sps:$4 sm:$0xff]   ;;  %v12157_v45 = vld [vmem:[%s16576_s12 + $0x4] ss:$16 sps:$4 sm:$0xff]  }
 0x8a7   :  { %v12797_v58 = vpop.eup %12796  ;;  %4219 = vmatpush1.bf16.msra.mxu0 %v12152_v63 }
 0x8a8   :  { %v3600_v54 = vmul.f32 %v12797_v58, %v3598_v25  ;;  %v3625_v48 = vsel %vm16603_vm2, %v14705_v0, %v14592_v34  ;;  %v12119_v34 = vld [vmem:[%s16576_s12 + $0xc0] ss:$16 sps:$4 sm:$0xff]   ;;  %v12160_v25 = vld [vmem:[%s16576_s12 + $0xc] ss:$16 sps:$4 sm:$0xff]  }
 0x8a9   :  { %v12155_v58 = vld [vmem:[%s16576_s12] ss:$16 sps:$4 sm:$0xff]   ;;  %4220 = vmatprep.subr.bf16.mxu0 %v12160_v25 }
 0x8aa   :  { %v14714_v59 = vadd.f32 %v3602_v37, %v3600_v54  ;;  %v12158_v54 = vld [vmem:[%s16576_s12 + $0x8] ss:$16 sps:$4 sm:$0xff]   ;;  %v10564_v37 = vld [vmem:[%s16572_s8] ss:$0 sm:$0xff] }
 0x8ab   :  { %4221 = vmatpush1.bf16.msra.mxu0 %v12158_v54 }
 0x8ac   :  { %v11062_v19 = vpack.c.bf16 %v14714_v59, %v14705_v0  ;;  %v3626_v56 = vsel %vm16602_vm1, %v14714_v59, %v14598_v30  ;;  %v12127_v30 = vld [vmem:[%s16576_s12 + $0xa4] ss:$16 sps:$4 sm:$0xff]   ;;  %11670 = vmatprep.subr.bf16.mxu0 %v14538_v36 }
 0x8ad   :  { %v3627_v53 = vpack.c.bf16 %v3626_v56, %v3625_v48 }
 0x8ae   :  { %11667 = vmatmul.mubr.msk.bf16.gmra.mxu0 %vm11061_vm3, %v11062_v19 }
 0x8af   :  { %11635 = vmatmul.mubr.bf16.vlgmr.msra.gmra.mxu1 %v3627_v53  ;;  %4238 = vmatprep.mubr.bf16.mxu0 %v16743_v50 }
 0x8b0   :  { %4164 = vmatpush1.bf16.msra.mxu1 %v12113_v2  ;;  %4195 = vmatprep.mubr.bf16.mxu1 %v16743_v50 }
 0x8b1   :  { %4165 = vmatprep.subr.bf16.mxu1 %v12121_v55 }
 0x8b4   :  { %4166 = vmatpush1.bf16.msra.mxu1 %v12119_v34 }
 0x8b5   :  { %4167 = vmatprep.subr.bf16.mxu1 %v12127_v30 }
 0x8b8   :  { %4168 = vmatpush1.bf16.msra.mxu1 %v12125_v62  ;;  %v11656_v62 = vpop.f32.mrf.mxu0 }
 0x8b9   :  { %4169 = vmatprep.subr.bf16.mxu1 %v12133_v21 }
 0x8ba   :  { %v3871_v11 = vpop.f32.mrf.mxu0 }
 0x8bc   :  { %4170 = vmatpush1.bf16.msra.mxu1 %v12131_v8  ;;  %v11657_v21 = vpop.f32.mrf.mxu0 }
 0x8bd   :  { %4171 = vmatprep.subr.bf16.mxu1 %v12139_v44 }
 0x8be   :  { %v3874_v27 = vpop.f32.mrf.mxu0 }
 0x8c0   :  { %4172 = vmatpush1.bf16.msra.mxu1 %v12137_v31  ;;  %v11660_v8 = vpop.f32.mrf.mxu0 }
 0x8c1   :  { %4173 = vmatprep.subr.bf16.mxu1 %v12145_v52  ;;  %v14829_v52 = vld [vmem:[%s16574_s10] ss:$0 sm:$0xff] }
 0x8c2   :  { %v3887_v23 = vpop.f32.mrf.mxu0 }
 0x8c3   :  { %v14838_v10 = vadd.f32 %v14829_v52, %v3887_v23 }
 0x8c4   :  { %4174 = vmatpush1.bf16.msra.mxu1 %v12143_v7  ;;  %v11661_v44 = vpop.f32.mrf.mxu0  ;;  %v14832_v7 = vadd.f32 %v14829_v52, %v3871_v11 }
 0x8c5   :  { %4175 = vmatprep.subr.bf16.mxu1 %v12151_v49  ;;  %16769 = vst [vmem:[#allocation35_spill] sm:$0xff] %v14838_v10  ;;  %v14841_v49 = vadd.f32 %v11656_v62, %v14829_v52  ;;  %v14873_v23 = vadd.f32 %v11661_v44, %v14829_v52 }
 0x8c6   :  { %v3890_v9 = vpop.f32.mrf.mxu0  ;;  %16767 = vst [vmem:[#allocation33_spill] sm:$0xff] %v14832_v7 }
 0x8c7   :  { %16770 = vst [vmem:[#allocation17_spill] sm:$0xff] %v14841_v49  ;;  %16777 = vst [vmem:[#allocation23_spill] sm:$0xff] %v14873_v23 }
 0x8c8   :  { %4176 = vmatpush1.bf16.msra.mxu1 %v12149_v38  ;;  %v11664_v31 = vpop.f32.mrf.mxu0 }
 0x8c9   :  { %4177 = vmatprep.subr.bf16.mxu1 %v12157_v45 }
 0x8ca   :  { %v3903_v18 = vpop.f32.mrf.mxu0 }
 0x8cc   :  { %4178 = vmatpush1.bf16.msra.mxu1 %v12155_v58  ;;  %v11665_v26 = vpop.f32.mrf.mxu0 }
 0x8ce   :  { %v3906_v25 = vpop.f32.mrf.mxu0 }
 0x96f   :  { %v3733_v19 = vpop.f32.mrf.mxu1 }
 0x970   :  { %v3734_v48 = vadd.f32 %v10564_v37, %v3733_v19  ;;  %v14853_v19 = vadd.f32 %v11657_v21, %v14829_v52 }
 0x971   :  { %v11636_v56 = vpop.f32.mrf.mxu1 }
 0x972   :  { %12798 = vtanh.f32 %v3734_v48  ;;  %16773 = vst [vmem:[#allocation41_spill] sm:$0xff] %v14853_v19  ;;  %v11668_v48 = vpop.f32.mrf.mxu0 }
 0x973   :  { %v3736_v2 = vpop.f32.mrf.mxu1 }
 0x974   :  { %v3737_v53 = vadd.f32 %v10564_v37, %v3736_v2  ;;  %v14850_v37 = vadd.f32 %v14829_v52, %v3903_v18  ;;  %v3919_v62 = vpop.f32.mrf.mxu0 }
 0x975   :  { %v11637_v55 = vpop.f32.mrf.mxu1 }
 0x976   :  { %12800 = vtanh.f32 %v3737_v53  ;;  %16772 = vst [vmem:[#allocation37_spill] sm:$0xff] %v14850_v37  ;;  %v14861_v55 = vadd.f32 %v11664_v31, %v14829_v52 }
 0x978   :  { %16774 = vst [vmem:[#allocation39_spill] sm:$0xff] %v14861_v55 }
 0x97f   :  { %v14817_v34 = vpop.eup %12798 }
 0x980   :  { %16765 = vst [vmem:[#allocation19_spill] sm:$0xff] %v14817_v34 }
 0x983   :  { %v14819_v30 = vpop.eup %12800 }
 0x984   :  { %16766 = vst [vmem:[#allocation29_spill] sm:$0xff] %v14819_v30  ;;  %v3970_v60 = vpack.c.bf16 %v14819_v30, %v14817_v34  ;;  %v15061_v30 = vld [vmem:[%s16687_s29 + $0x68] sm:$0xff] }
 0x985   :  { %16798 = vst [vmem:[#allocation81_spill] sm:$0xff] %v15061_v30 }
 0x986   :  { %4196 = vmatmul.mubr.bf16.vlgmr.msra.gmra.mxu1 %v3970_v60  ;;  %4239 = vmatmul.mubr.bf16.vlgmr.msra.gmra.mxu0 %v3970_v60  ;;  %v14864_v60 = vadd.f32 %v14829_v52, %v3890_v9  ;;  %v14879_v9 = vld [vmem:[%s16575_s11] ss:$0 sm:$0xff] }
 0x987   :  { %4836 = vmatprep.mubr.bf16.mxu1 %v16743_v50  ;;  %11686 = vmatprep.mubr.msk.bf16.mxu0 %vm16600_vm12, %v14538_v36  ;;  %v14835_v36 = vadd.f32 %v11660_v8, %v14829_v52  ;;  %v14870_v8 = vadd.f32 %v14829_v52, %v3919_v62 }
 0x988   :  { %16775 = vst [vmem:[#allocation43_spill] sm:$0xff] %v14864_v60 }
 0x989   :  { %16768 = vst [vmem:[#allocation31_spill] sm:$0xff] %v14835_v36  ;;  %16776 = vst [vmem:[#allocation21_spill] sm:$0xff] %v14870_v8 }
 0xa46   :  { %v4197_v16 = vpop.f32.mrf.mxu1 }
 0xa47   :  { %v4269_v38 = vadd.f32 %v4197_v16, %v14838_v10  ;;  %v4265_v63 = vadd.f32 %v4197_v16, %v14832_v7  ;;  %v4271_v45 = vadd.f32 %v4197_v16, %v14835_v36  ;;  %v4267_v54 = vadd.f32 %v4197_v16, %v14841_v49  ;;  %v15048_v49 = vld [vmem:[%s16687_s29 + $0x58] sm:$0xff] }
 0xa48   :  { %v14846_v58 = vpop.f32.mrf.mxu1  ;;  %v4273_v2 = vadd.f32 %v4197_v16, %v14850_v37  ;;  %v4275_v11 = vadd.f32 %v4197_v16, %v14861_v55  ;;  %v4277_v31 = vadd.f32 %v4197_v16, %v14870_v8  ;;  %v15034_v55 = vld [vmem:[%s16687_s29 + $0x18] sm:$0xff]  ;;  %v15043_v37 = vld [vmem:[%s16687_s29 + $0x48] sm:$0xff]  ;;  %16797 = vst [vmem:[#allocation80_spill] sm:$0xff] %v15048_v49 }
 0xa49   :  { %16771 = vst [vmem:[#allocation18_spill] sm:$0xff] %v14846_v58  ;;  %12802 = vtanh.f32 %v4269_v38  ;;  %v14884_v38 = vadd.f32 %v14829_v52, %v3874_v27  ;;  %16795 = vst [vmem:[#allocation78_spill] sm:$0xff] %v15034_v55 }
 0xa4a   :  { %v14855_v56 = vpop.f32.mrf.mxu1  ;;  %12804 = vtanh.f32 %v4265_v63  ;;  %16796 = vst [vmem:[#allocation79_spill] sm:$0xff] %v15043_v37 }
 0xa4b   :  { %12806 = vtanh.f32 %v4271_v45  ;;  %v4268_v53 = vadd.f32 %v14855_v56, %v14853_v19  ;;  %v4270_v21 = vadd.f32 %v14855_v56, %v14864_v60  ;;  %v4272_v18 = vadd.f32 %v14855_v56, %v14873_v23  ;;  %16778 = vst [vmem:[#allocation67_spill] sm:$0xff] %v14884_v38 }
 0xa4c   :  { %12808 = vtanh.f32 %v4267_v54  ;;  %v14887_v45 = vadd.f32 %v14829_v52, %v3906_v25  ;;  %v11669_v54 = vpop.f32.mrf.mxu0  ;;  %v14896_v23 = vadd.f32 %v11668_v48, %v14829_v52  ;;  %v14899_v25 = vadd.f32 %v11665_v26, %v14829_v52 }
 0xa4d   :  { %12810 = vtanh.f32 %v4273_v2 }
 0xa4e   :  { %12812 = vtanh.f32 %v4268_v53  ;;  %16779 = vst [vmem:[#allocation68_spill] sm:$0xff] %v14887_v45  ;;  %v4266_v53 = vadd.f32 %v14855_v56, %v14884_v38  ;;  %v4274_v27 = vadd.f32 %v14855_v56, %v14887_v45  ;;  %16780 = vst [vmem:[#allocation45_spill] sm:$0xff] %v14896_v23  ;;  %v4279_v38 = vadd.f32 %v4197_v16, %v14896_v23  ;;  %v15026_v23 = vld [vmem:[%s16687_s29 + $0x38] sm:$0xff] }
 0xa4f   :  { %12814 = vtanh.f32 %v4275_v11  ;;  %16781 = vst [vmem:[#allocation49_spill] sm:$0xff] %v14899_v25  ;;  %v4276_v45 = vadd.f32 %v14855_v56, %v14899_v25  ;;  %16794 = vst [vmem:[#allocation77_spill] sm:$0xff] %v15026_v23 }
 0xa50   :  { %12816 = vtanh.f32 %v4270_v21 }
 0xa51   :  { %12818 = vtanh.f32 %v4277_v31  ;;  %v3922_v31 = vpop.f32.mrf.mxu0 }
 0xa52   :  { %12820 = vtanh.f32 %v4272_v18 }
 0xa53   :  { %12822 = vtanh.f32 %v4266_v53 }
 0xa54   :  { %12824 = vtanh.f32 %v4274_v27  ;;  %v14914_v27 = vadd.f32 %v11669_v54, %v14829_v52 }
 0xa55   :  { %12826 = vtanh.f32 %v4279_v38 }
 0xa56   :  { %v12803_v63 = vpop.eup %12802  ;;  %12828 = vtanh.f32 %v4276_v45  ;;  %16783 = vst [vmem:[#allocation51_spill] sm:$0xff] %v14914_v27  ;;  %v4280_v38 = vadd.f32 %v14855_v56, %v14914_v27 }
 0xa57   :  { %v12805_v44 = vpop.eup %12804  ;;  %v4308_v2 = vmul.f32 %v12803_v63, %v14879_v9 }
 0xa58   :  { %v12807_v62 = vpop.eup %12806  ;;  %v4304_v11 = vmul.f32 %v12805_v44, %v14879_v9 }
 0xa59   :  { %v12809_v21 = vpop.eup %12808  ;;  %4328 = vadd.xlane.f32.xlu1 %v4308_v2  ;;  %v4310_v63 = vmul.f32 %v12807_v62, %v14879_v9  ;;  %v14907_v2 = vadd.f32 %v14829_v52, %v3922_v31 }
 0xa5a   :  { %4320 = vadd.xlane.f32.xlu0 %v4304_v11  ;;  %v12811_v44 = vpop.eup %12810  ;;  %v4306_v18 = vmul.f32 %v12809_v21, %v14879_v9 }
 0xa5b   :  { %v12813_v48 = vpop.eup %12812  ;;  %16782 = vst [vmem:[#allocation47_spill] sm:$0xff] %v14907_v2  ;;  %v4312_v26 = vmul.f32 %v12811_v44, %v14879_v9  ;;  %v4278_v16 = vadd.f32 %v14855_v56, %v14907_v2 }
 0xa5c   :  { %v12815_v62 = vpop.eup %12814  ;;  %v4307_v53 = vmul.f32 %v12813_v48, %v14879_v9 }
 0xa5d   :  { %4332 = vadd.xlane.f32.xlu1 %v4310_v63  ;;  %v12817_v11 = vpop.eup %12816  ;;  %v4314_v21 = vmul.f32 %v12815_v62, %v14879_v9  ;;  %12830 = vtanh.f32 %v4278_v16 }
 0xa5e   :  { %4324 = vadd.xlane.f32.xlu0 %v4306_v18  ;;  %v12819_v31 = vpop.eup %12818  ;;  %v4309_v63 = vmul.f32 %v12817_v11, %v14879_v9  ;;  %12832 = vtanh.f32 %v4280_v38 }
 0xa5f   :  { %v12821_v44 = vpop.eup %12820  ;;  %v4316_v45 = vmul.f32 %v12819_v31, %v14879_v9 }
 0xa60   :  { %v12823_v18 = vpop.eup %12822  ;;  %v4311_v48 = vmul.f32 %v12821_v44, %v14879_v9 }
 0xa61   :  { %4336 = vadd.xlane.f32.xlu1 %v4312_v26  ;;  %v12825_v52 = vpop.eup %12824  ;;  %v4305_v54 = vmul.f32 %v12823_v18, %v14879_v9 }
 0xa62   :  { %4326 = vadd.xlane.f32.xlu0 %v4307_v53  ;;  %v12827_v26 = vpop.eup %12826  ;;  %v4313_v62 = vmul.f32 %v12825_v52, %v14879_v9 }
 0xa63   :  { %v12829_v53 = vpop.eup %12828  ;;  %v4318_v56 = vmul.f32 %v12827_v26, %v14879_v9  ;;  %v14938_v26 = vld [vmem:[%s16687_s29] sm:$0xff] }
 0xa64   :  { %v4315_v16 = vmul.f32 %v12829_v53, %v14879_v9  ;;  %16785 = vst [vmem:[#allocation22_spill] sm:$0xff] %v14938_v26  ;;  %vm16655_vm12 = vcmp.gt.f32.partialorder %v14938_v26, 0.0 }
 0xa65   :  { %4340 = vadd.xlane.f32.xlu1 %v4314_v21 }
 0xa66   :  { %4330 = vadd.xlane.f32.xlu0 %v4309_v63 }
 0xa69   :  { %4344 = vadd.xlane.f32.xlu1 %v4316_v45 }
 0xa6a   :  { %4334 = vadd.xlane.f32.xlu0 %v4311_v48  ;;  %v12831_v11 = vpop.eup %12830 }
 0xa6b   :  { %v4317_v21 = vmul.f32 %v12831_v11, %v14879_v9  ;;  %v12833_v31 = vpop.eup %12832 }
 0xa6c   :  { %v4319_v63 = vmul.f32 %v12833_v31, %v14879_v9  ;;  %v14943_v9 = vld [vmem:[%s16687_s29 + $0x30] sm:$0xff] }
 0xa6d   :  { %4322 = vadd.xlane.f32.xlu1 %v4305_v54  ;;  %v14933_v54 = vld [vmem:[%s16687_s29 + $0x20] sm:$0xff]  ;;  %16786 = vst [vmem:[#allocation69_spill] sm:$0xff] %v14943_v9  ;;  %vm16648_vm1 = vcmp.gt.f32.partialorder %v14943_v9, 0.0 }
 0xa6e   :  { %4338 = vadd.xlane.f32.xlu0 %v4313_v62  ;;  %16784 = vst [vmem:[#allocation20_spill] sm:$0xff] %v14933_v54  ;;  %v14948_v62 = vld [vmem:[%s16687_s29 + $0x10] sm:$0xff]  ;;  %vm16615_vm3 = vcmp.gt.f32.partialorder %v14933_v54, 0.0 }
 0xa6f   :  { %16787 = vst [vmem:[#allocation70_spill] sm:$0xff] %v14948_v62  ;;  %vm16647_vm2 = vcmp.gt.f32.partialorder %v14948_v62, 0.0 }
 0xa71   :  { %4348 = vadd.xlane.f32.xlu1 %v4318_v56  ;;  %v14954_v56 = vld [vmem:[%s16687_s29 + $0x40] sm:$0xff] }
 0xa72   :  { %4342 = vadd.xlane.f32.xlu0 %v4315_v16  ;;  %16788 = vst [vmem:[#allocation71_spill] sm:$0xff] %v14954_v56  ;;  %v14959_v16 = vld [vmem:[%s16687_s29 + $0x50] sm:$0xff]  ;;  %vm16640_vm0 = vcmp.gt.f32.partialorder %v14954_v56, 0.0 }
 0xa73   :  { %16789 = vst [vmem:[#allocation72_spill] sm:$0xff] %v14959_v16  ;;  %vm16630_vm13 = vcmp.gt.f32.partialorder %v14959_v16, 0.0 }
 0xa76   :  { %4346 = vadd.xlane.f32.xlu0 %v4317_v21  ;;  %v14967_v21 = vld [vmem:[%s16687_s29 + $0x60] sm:$0xff] }
 0xa77   :  { %16790 = vst [vmem:[#allocation73_spill] sm:$0xff] %v14967_v21 }
 0xa7a   :  { %4350 = vadd.xlane.f32.xlu0 %v4319_v63 }
 0xae2   :  { %v4329_v38 = vpop.xlane.xlu1 %4328 }
 0xae3   :  { %v4321_v44 = vpop.xlane.xlu0 %4320  ;;  %v14971_v31 = vsel %vm16615_vm3, %v4329_v38, -1e+10  ;;  %vm16635_vm3 = vcmp.gt.f32.partialorder %v14967_v21, 0.0  ;;  %v14991_v38 = vld [vmem:[%s16687_s29 + $0x8] sm:$0xff] }
 0xae4   :  { %v14977_v27 = vsel %vm16655_vm12, %v4321_v44, -1e+10  ;;  %16791 = vst [vmem:[#allocation74_spill] sm:$0xff] %v14991_v38  ;;  %v4387_v62 = vsel %vm4384_vm15, %v14971_v31, -inf  ;;  %vm4361_vm12 = vcmp.gt.f32.partialorder %v15043_v37, 0.0 }
 0xae5   :  { %v4385_v9 = vsel %vm4384_vm15, %v14977_v27, -inf }
 0xae6   :  { %v4333_v45 = vpop.xlane.xlu1 %4332  ;;  %v4388_v21 = vmax.f32 %v4385_v9, %v4387_v62 }
 0xae7   :  { %v4325_v18 = vpop.xlane.xlu0 %4324  ;;  %v14981_v2 = vsel %vm16648_vm1, %v4333_v45, -1e+10  ;;  %vm4355_vm1 = vcmp.gt.f32.partialorder %v15034_v55, 0.0 }
 0xae8   :  { %v14985_v25 = vsel %vm16647_vm2, %v4325_v18, -1e+10  ;;  %v15004_v18 = vld [vmem:[%s16687_s29 + $0x70] sm:$0xff]  ;;  %v4389_v56 = vsel %vm4384_vm15, %v14981_v2, -inf  ;;  %vm4359_vm2 = vcmp.gt.f32.partialorder %v15026_v23, 0.0 }
 0xae9   :  { %16792 = vst [vmem:[#allocation75_spill] sm:$0xff] %v15004_v18 }
 0xaea   :  { %v4337_v48 = vpop.xlane.xlu1 %4336 }
 0xaeb   :  { %v14928_v52 = vpop.xlane.xlu0 %4326  ;;  %v14995_v44 = vsel %vm16640_vm0, %v4337_v48, -1e+10  ;;  %v4386_v48 = vsel %vm4384_vm15, %v14985_v25, -inf }
 0xaec   :  { %v4391_v60 = vsel %vm4384_vm15, %v14995_v44, -inf  ;;  %v4390_v19 = vmax.f32 %v4386_v48, %v4389_v56 }
 0xaed   :  { %v4392_v56 = vmax.f32 %v4388_v21, %v4391_v60 }
 0xaee   :  { %v4341_v53 = vpop.xlane.xlu1 %4340 }
 0xaef   :  { %v4331_v11 = vpop.xlane.xlu0 %4330  ;;  %v14999_v45 = vsel %vm16630_vm13, %v4341_v53, -1e+10  ;;  %v15017_v53 = vld [vmem:[%s16687_s29 + $0x28] sm:$0xff]  ;;  %vm16656_vm13 = vcmp.gt.f32.partialorder %v14991_v38, 0.0 }
 0xaf0   :  { %16793 = vst [vmem:[#allocation76_spill] sm:$0xff] %v15017_v53  ;;  %vm4357_vm0 = vcmp.gt.f32.partialorder %v15017_v53, 0.0 }
 0xaf1   :  { %v4373_v34 = vsel %vm4357_vm0, %v4331_v11, -1e+10  ;;  %v4371_v11 = vsel %vm4355_vm1, %v14928_v52, -1e+10 }
 0xaf2   :  { %v4345_v63 = vpop.xlane.xlu1 %4344 }
 0xaf3   :  { %v4335_v54 = vpop.xlane.xlu0 %4334  ;;  %v15021_v26 = vsel %vm16635_vm3, %v4345_v63, -1e+10  ;;  %v4393_v63 = vsel %vm4384_vm15, %v14999_v45, -inf  ;;  %vm16657_vm3 = vcmp.gt.f32.partialorder %v15004_v18, 0.0 }
 0xaf4   :  { %v4395_v36 = vsel %vm4384_vm15, %v15021_v26, -inf  ;;  %v4394_v48 = vmax.f32 %v4390_v19, %v4393_v63  ;;  %v15070_v19 = vsel %vm4359_vm2, %v4335_v54, -1e+10  ;;  %v15085_v54 = vld [vmem:[%s16687_s29 + $0x78] sm:$0xff] }
 0xaf5   :  { %16799 = vst [vmem:[#allocation82_spill] sm:$0xff] %v15085_v54 }
 0xaf6   :  { %v4323_v16 = vpop.xlane.xlu1 %4322 }
 0xaf7   :  { %v4339_v8 = vpop.xlane.xlu0 %4338  ;;  %v4369_v9 = vsel %vm16656_vm13, %v4323_v16, -1e+10  ;;  %vm16664_vm13 = vcmp.gt.f32.partialorder %v15048_v49, 0.0  ;;  %v4396_v16 = vmax.f32 %v4392_v56, %v4395_v36 }
 0xaf8   :  { %v4400_v21 = vsel %vm4384_vm15, %v4369_v9, -inf }
 0xafa   :  { %v4349_v62 = vpop.xlane.xlu1 %4348 }
 0xafb   :  { %v4343_v7 = vpop.xlane.xlu0 %4342  ;;  %v4382_v10 = vsel %vm16657_vm3, %v4349_v62, -1e+10  ;;  %vm4365_vm3 = vcmp.gt.f32.partialorder %v15061_v30, 0.0  ;;  %v4402_v62 = vsel %vm4384_vm15, %v4373_v34, -inf }
 0xafc   :  { %v4397_v60 = vsel %vm4384_vm15, %v4382_v10, -inf  ;;  %v15080_v53 = vsel %vm16664_vm13, %v4343_v7, -1e+10  ;;  %v4403_v52 = vmax.f32 %v4400_v21, %v4402_v62  ;;  %vm4367_vm13 = vcmp.gt.f32.partialorder %v15085_v54, 0.0 }
 0xafd   :  { %v4398_v63 = vmax.f32 %v4394_v48, %v4397_v60  ;;  %v4404_v48 = vsel %vm4384_vm15, %v15070_v19, -inf  ;;  %v4377_v60 = vsel %vm4361_vm12, %v4339_v8, -1e+10 }
 0xafe   :  { %v4406_v37 = vsel %vm4384_vm15, %v4377_v60, -inf }
 0xaff   :  { %v4399_v36 = vmax.f32 %v4396_v16, %v4398_v63  ;;  %v4347_v56 = vpop.xlane.xlu0 %4346  ;;  %v4401_v16 = vsel %vm4384_vm15, %v4371_v11, -inf  ;;  %v4408_v63 = vsel %vm4384_vm15, %v15080_v53, -inf }
 0xb00   :  { %v15095_v7 = vsel %vm4365_vm3, %v4347_v56, -1e+10  ;;  %v4405_v23 = vmax.f32 %v4401_v16, %v4404_v48 }
 0xb01   :  { %v4415_v55 = vsub.f32 %v14977_v27, %v4399_v36  ;;  %v4417_v49 = vsub.f32 %v14985_v25, %v4399_v36  ;;  %v4421_v27 = vsub.f32 %v14981_v2, %v4399_v36  ;;  %v4407_v25 = vmax.f32 %v4403_v52, %v4406_v37 }
 0xb02   :  { %v4410_v56 = vsel %vm4384_vm15, %v15095_v7, -inf  ;;  %v4409_v30 = vmax.f32 %v4405_v23, %v4408_v63  ;;  %v4419_v38 = vsub.f32 %v14971_v31, %v4399_v36  ;;  %v4425_v37 = vsub.f32 %v14999_v45, %v4399_v36 }
 0xb03   :  { %v4431_v8 = vmul.f32 1.442695, %v4415_v55  ;;  %v4435_v21 = vmul.f32 1.442695, %v4417_v49  ;;  %v4351_v62 = vpop.xlane.xlu0 %4350  ;;  %v4423_v55 = vsub.f32 %v14995_v44, %v4399_v36  ;;  %v4411_v49 = vmax.f32 %v4407_v25, %v4410_v56 }
 0xb04   :  { %v4383_v18 = vsel %vm4367_vm13, %v4351_v62, -1e+10  ;;  %v4443_v58 = vmul.f32 1.442695, %v4421_v27  ;;  %v4439_v52 = vmul.f32 1.442695, %v4419_v38  ;;  %v4427_v23 = vsub.f32 %v15021_v26, %v4399_v36 }
 0xb05   :  { %12834 = vpow2.f32 %v4431_v8  ;;  %v4412_v48 = vsel %vm4384_vm15, %v4383_v18, -inf  ;;  %v4447_v63 = vmul.f32 1.442695, %v4423_v55  ;;  %v4429_v54 = vsub.f32 %v4382_v10, %v4399_v36 }
 0xb06   :  { %12836 = vpow2.f32 %v4435_v21  ;;  %v4413_v16 = vmax.f32 %v4409_v30, %v4412_v48  ;;  %v4451_v62 = vmul.f32 1.442695, %v4425_v37  ;;  %v4455_v44 = vmul.f32 1.442695, %v4427_v23 }
 0xb07   :  { %12838 = vpow2.f32 %v4443_v58  ;;  %v4459_v25 = vmul.f32 1.442695, %v4429_v54 }
 0xb08   :  { %v4414_v2 = vmax.f32 %v4411_v49, %v4413_v16  ;;  %12840 = vpow2.f32 %v4439_v52 }
 0xb09   :  { %12842 = vpow2.f32 %v4447_v63 }
 0xb0a   :  { %v4416_v8 = vsub.f32 %v4369_v9, %v4414_v2  ;;  %v4420_v31 = vsub.f32 %v4373_v34, %v4414_v2  ;;  %v4418_v50 = vsub.f32 %v4371_v11, %v4414_v2  ;;  %v4422_v30 = vsub.f32 %v15070_v19, %v4414_v2 }
 0xb0b   :  { %12844 = vpow2.f32 %v4451_v62  ;;  %v4424_v38 = vsub.f32 %v4377_v60, %v4414_v2  ;;  %v4426_v34 = vsub.f32 %v15080_v53, %v4414_v2  ;;  %v4428_v11 = vsub.f32 %v15095_v7, %v4414_v2 }
 0xb0c   :  { %v4433_v21 = vmul.f32 1.442695, %v4416_v8  ;;  %v4441_v45 = vmul.f32 1.442695, %v4420_v31  ;;  %v4437_v26 = vmul.f32 1.442695, %v4418_v50  ;;  %v4430_v54 = vsub.f32 %v4383_v18, %v4414_v2 }
 0xb0d   :  { %v4445_v10 = vmul.f32 1.442695, %v4422_v30  ;;  %v4449_v36 = vmul.f32 1.442695, %v4424_v38  ;;  %v4453_v50 = vmul.f32 1.442695, %v4426_v34 }
 0xb0e   :  { %12846 = vpow2.f32 %v4433_v21  ;;  %v4457_v53 = vmul.f32 1.442695, %v4428_v11  ;;  %v4461_v16 = vmul.f32 1.442695, %v4430_v54 }
 0xb0f   :  { %12848 = vpow2.f32 %v4455_v44 }
 0xb10   :  { %12850 = vpow2.f32 %v4459_v25 }
 0xb11   :  { %12852 = vpow2.f32 %v4441_v45 }
 0xb12   :  { %v15113_v27 = vpop.eup %12834  ;;  %12854 = vpow2.f32 %v4437_v26 }
 0xb13   :  { %v15115_v9 = vpop.eup %12836  ;;  %v4463_v58 = vsel %vm4384_vm15, %v15113_v27, 0.0  ;;  %12856 = vpow2.f32 %v4445_v10 }
 0xb14   :  { %v4464_v19 = vsel %vm4384_vm15, %v15115_v9, 0.0  ;;  %v12839_v56 = vpop.eup %12838  ;;  %12858 = vpow2.f32 %v4449_v36 }
 0xb15   :  { %v4465_v60 = vadd.f32 %v4464_v19, %v4463_v58  ;;  %v12841_v48 = vpop.eup %12840  ;;  %12860 = vpow2.f32 %v4453_v50  ;;  %v4468_v52 = vsel %vm4384_vm15, %v12839_v56, 0.0 }
 0xb16   :  { %v4466_v55 = vsel %vm4384_vm15, %v12841_v48, 0.0  ;;  %v12843_v49 = vpop.eup %12842  ;;  %12862 = vpow2.f32 %v4457_v53 }
 0xb17   :  { %v4467_v37 = vadd.f32 %v4466_v55, %v4465_v60  ;;  %v4470_v2 = vsel %vm4384_vm15, %v12843_v49, 0.0  ;;  %12864 = vpow2.f32 %v4461_v16 }
 0xb18   :  { %v15125_v23 = vpop.eup %12844 }
 0xb19   :  { %v4469_v7 = vadd.f32 %v4468_v52, %v4467_v37  ;;  %v4472_v31 = vsel %vm4384_vm15, %v15125_v23, 0.0 }
 0xb1b   :  { %v12847_v18 = vpop.eup %12846  ;;  %v4471_v8 = vadd.f32 %v4470_v2, %v4469_v7 }
 0xb1c   :  { %v15128_v63 = vpop.eup %12848  ;;  %v4478_v25 = vsel %vm4384_vm15, %v12847_v18, 0.0 }
 0xb1d   :  { %v15130_v62 = vpop.eup %12850  ;;  %v4473_v44 = vadd.f32 %v4472_v31, %v4471_v8  ;;  %v4474_v45 = vsel %vm4384_vm15, %v15128_v63, 0.0 }
 0xb1e   :  { %v12853_v21 = vpop.eup %12852  ;;  %v4476_v10 = vsel %vm4384_vm15, %v15130_v62, 0.0 }
 0xb1f   :  { %v12855_v30 = vpop.eup %12854  ;;  %v4475_v38 = vadd.f32 %v4474_v45, %v4473_v44  ;;  %v4481_v11 = vsel %vm4384_vm15, %v12853_v21, 0.0 }
 0xb20   :  { %v4479_v26 = vsel %vm4384_vm15, %v12855_v30, 0.0  ;;  %v12857_v34 = vpop.eup %12856 }
 0xb21   :  { %v4480_v58 = vadd.f32 %v4479_v26, %v4478_v25  ;;  %v4477_v19 = vadd.f32 %v4476_v10, %v4475_v38  ;;  %v15141_v36 = vpop.eup %12858  ;;  %v4483_v50 = vsel %vm4384_vm15, %v12857_v34, 0.0 }
 0xb22   :  { %v15144_v60 = vpop.eup %12860  ;;  %v4485_v55 = vsel %vm4384_vm15, %v15141_v36, 0.0 }
 0xb23   :  { %v4482_v54 = vadd.f32 %v4481_v11, %v4480_v58  ;;  %12866 = vrcp.f32 %v4477_v19  ;;  %v15148_v16 = vpop.eup %12862  ;;  %v4487_v52 = vsel %vm4384_vm15, %v15144_v60, 0.0  ;;  %v12161_v19 = vld [vmem:[#allocation11 + $0xa8] ss:$12 sps:$4 sm:$0xff]   ;;  %v12163_v11 = vld [vmem:[#allocation11 + $0xac] ss:$12 sps:$4 sm:$0xff]  }
 0xb24   :  { %v15152_v7 = vpop.eup %12864  ;;  %v4489_v8 = vsel %vm4384_vm15, %v15148_v16, 0.0  ;;  %4804 = vmatprep.subr.bf16.mxu1 %v12163_v11 }
 0xb25   :  { %v4484_v53 = vadd.f32 %v4483_v50, %v4482_v54  ;;  %v4491_v44 = vsel %vm4384_vm15, %v15152_v7, 0.0  ;;  %v12164_v54 = vld [vmem:[#allocation11 + $0xb0] ss:$12 sps:$4 sm:$0xff]   ;;  %4805 = vmatpush1.bf16.msra.mxu1 %v12161_v19  ;;  %v12183_v19 = vld [vmem:[#allocation11 + $0x34] ss:$12 sps:$4 sm:$0xff]  }
 0xb26   :  { %11671 = vmatpush3.bf16.msra.mxu0 %v12164_v54  ;;  %v12188_v54 = vld [vmem:[#allocation11 + $0x20] ss:$12 sps:$4 sm:$0xff]  }
 0xb27   :  { %v4486_v37 = vadd.f32 %v4485_v55, %v4484_v53  ;;  %v12168_v53 = vld [vmem:[#allocation11 + $0x98] ss:$12 sps:$4 sm:$0xff]  }
 0xb29   :  { %v4488_v2 = vadd.f32 %v4487_v52, %v4486_v37  ;;  %v12169_v52 = vld [vmem:[#allocation11 + $0x78] ss:$12 sps:$4 sm:$0xff]  }
 0xb2b   :  { %v4490_v31 = vadd.f32 %v4489_v8, %v4488_v2  ;;  %v12171_v2 = vld [vmem:[#allocation11 + $0x7c] ss:$12 sps:$4 sm:$0xff]   ;;  %v12172_v8 = vld [vmem:[#allocation11 + $0x80] ss:$12 sps:$4 sm:$0xff]  }
 0xb2d   :  { %v4492_v25 = vadd.f32 %v4491_v44, %v4490_v31 }
 0xb2f   :  { %12868 = vrcp.f32 %v4492_v25  ;;  %v12176_v25 = vld [vmem:[#allocation11 + $0x68] ss:$12 sps:$4 sm:$0xff]  }
 0xb30   :  { %v12867_v45 = vpop.eup %12866 }
 0xb31   :  { %v4499_v38 = vmul.f32 %v12867_v45, %v12841_v48  ;;  %v4495_v26 = vmul.f32 %v12867_v45, %v15113_v27  ;;  %v4501_v10 = vmul.f32 %v12867_v45, %v12839_v56  ;;  %v4497_v58 = vmul.f32 %v12867_v45, %v15115_v9  ;;  %v15163_v48 = vld [vmem:[%s16583_s19] sm:$0xff]  ;;  %v12165_v56 = vld [vmem:[#allocation11 + $0x90] ss:$12 sps:$4 sm:$0xff]  }
 0xb32   :  { %v4503_v50 = vmul.f32 %v12867_v45, %v12843_v49  ;;  %11672 = vmatprep.subr.bf16.mxu0 %v15163_v48  ;;  %v12167_v9 = vld [vmem:[#allocation11 + $0x94] ss:$12 sps:$4 sm:$0xff]   ;;  %v4505_v31 = vmul.f32 %v12867_v45, %v15125_v23 }
 0xb33   :  { %4549 = vperm.xlu0 %11882, %v4499_v38   ;;  %4529 = vperm.xlu1 %11883, %v4495_v26   ;;  %v12177_v23 = vld [vmem:[#allocation11 + $0x48] ss:$12 sps:$4 sm:$0xff]   ;;  %v12179_v26 = vld [vmem:[#allocation11 + $0x4c] ss:$12 sps:$4 sm:$0xff]  }
 0xb34   :  { %4806 = vmatprep.subr.bf16.mxu1 %v12167_v9  ;;  %11673 = vmatpush3.bf16.msra.mxu0 %v12168_v53  ;;  %v12192_v9 = vld [vmem:[#allocation11 + $0x8] ss:$12 sps:$4 sm:$0xff]  }
 0xb35   :  { %4807 = vmatpush1.bf16.msra.mxu1 %v12165_v56  ;;  %11674 = vmatprep.subr.bf16.mxu0 %v15163_v48  ;;  %v12191_v56 = vld [vmem:[#allocation11 + $0x4] ss:$12 sps:$4 sm:$0xff]  }
 0xb36   :  { %4808 = vmatprep.subr.bf16.mxu1 %v12171_v2 }
 0xb37   :  { %4559 = vperm.xlu0 %11882, %v4501_v10   ;;  %4539 = vperm.xlu1 %11883, %v4497_v58   ;;  %v4509_v10 = vmul.f32 %v12867_v45, %v15130_v62  ;;  %v12181_v58 = vld [vmem:[#allocation11 + $0x30] ss:$12 sps:$4 sm:$0xff]   ;;  %v12185_v62 = vld [vmem:[#allocation11 + $0x18] ss:$12 sps:$4 sm:$0xff]  }
 0xb38   :  { %11675 = vmatpush3.bf16.msra.mxu0 %v12172_v8 }
 0xb39   :  { %4809 = vmatpush1.bf16.msra.mxu1 %v12169_v52  ;;  %11676 = vmatprep.subr.bf16.mxu0 %v15163_v48 }
 0xb3b   :  { %4569 = vperm.xlu0 %11882, %v4503_v50   ;;  %v12189_v50 = vld [vmem:[#allocation11] ss:$12 sps:$4 sm:$0xff]  }
 0xb3c   :  { %v12869_v27 = vpop.eup %12868  ;;  %11677 = vmatpush3.bf16.msra.mxu0 %v12176_v25 }
 0xb3d   :  { %v4498_v55 = vmul.f32 %v12869_v27, %v12855_v30  ;;  %v4496_v37 = vmul.f32 %v12869_v27, %v12847_v18  ;;  %v4500_v49 = vmul.f32 %v12869_v27, %v12853_v21  ;;  %v4502_v44 = vmul.f32 %v12869_v27, %v12857_v34  ;;  %v12173_v18 = vld [vmem:[#allocation11 + $0x60] ss:$12 sps:$4 sm:$0xff]   ;;  %v12175_v30 = vld [vmem:[#allocation11 + $0x64] ss:$12 sps:$4 sm:$0xff]   ;;  %11678 = vmatprep.subr.bf16.mxu0 %v15163_v48 }
 0xb3e   :  { %v4507_v21 = vmul.f32 %v12867_v45, %v15128_v63  ;;  %4810 = vmatprep.subr.bf16.mxu1 %v12175_v30  ;;  %v4504_v38 = vmul.f32 %v12869_v27, %v15141_v36  ;;  %v12180_v34 = vld [vmem:[#allocation11 + $0x50] ss:$12 sps:$4 sm:$0xff]   ;;  %v4506_v63 = vmul.f32 %v12869_v27, %v15144_v60  ;;  %v12184_v36 = vld [vmem:[#allocation11 + $0x38] ss:$12 sps:$4 sm:$0xff]   ;;  %v4508_v11 = vmul.f32 %v12869_v27, %v15148_v16 }
 0xb3f   :  { %4544 = vperm.xlu1 %11883, %v4498_v55   ;;  %4534 = vperm.xlu0 %11882, %v4496_v37   ;;  %v12187_v45 = vld [vmem:[#allocation11 + $0x1c] ss:$12 sps:$4 sm:$0xff]   ;;  %v4510_v60 = vmul.f32 %v12869_v27, %v15152_v7  ;;  %v15183_v7 = vsel %vm1668_vm4, %v14211_v32, 0.0  ;;  %vm16800_vm4 = vcmp.eq.s32.totalorder %v14508_v40, 1 }
 0xb40   :  { %4811 = vmatpush1.bf16.msra.mxu1 %v12173_v18  ;;  %11679 = vmatpush3.bf16.msra.mxu0 %v12180_v34  ;;  %v15191_v18 = vsel %vm1669_vm5, %v14222_v22, 0.0  ;;  %v15237_v20 = vsel %vm16800_vm4, %v14512_v15, 0.0  ;;  %vm16801_vm5 = vcmp.eq.s32.totalorder %v14582_v6, 1 }
 0xb41   :  { %4812 = vmatprep.subr.bf16.mxu1 %v12179_v26  ;;  %11680 = vmatprep.subr.bf16.mxu0 %v15163_v48  ;;  %v15203_v26 = vsel %vm1994_vm6, %v14286_v51, 0.0  ;;  %v15245_v43 = vsel %vm16801_vm5, %v14577_v61, 0.0  ;;  %vm16802_vm6 = vcmp.eq.s32.totalorder %v14580_v46, 1  ;;  %v15263_v46 = vsel %vm16804_vm8, %v14714_v59, 0.0  ;;  %v12196_v59 = vld [vmem:[#allocation13 + $0xa0] sm:$0xff]  }
 0xb42   :  { %v15250_v40 = vsel %vm16802_vm6, %v14584_v57, 0.0 }
 0xb43   :  { %4554 = vperm.xlu1 %11883, %v4500_v49   ;;  %4579 = vperm.xlu0 %11882, %v4505_v31  }
 0xb44   :  { %4813 = vmatpush1.bf16.msra.mxu1 %v12177_v23  ;;  %11681 = vmatpush3.bf16.msra.mxu0 %v12184_v36 }
 0xb45   :  { %4814 = vmatprep.subr.bf16.mxu1 %v12183_v19  ;;  %11682 = vmatprep.subr.bf16.mxu0 %v15163_v48 }
 0xb47   :  { %4564 = vperm.xlu1 %11883, %v4502_v44   ;;  %4589 = vperm.xlu0 %11882, %v4507_v21  }
 0xb48   :  { %4815 = vmatpush1.bf16.msra.mxu1 %v12181_v58  ;;  %11683 = vmatpush3.bf16.msra.mxu0 %v12188_v54  ;;  %v15221_v58 = vsel %vm2644_vm10, %v14419_v41, 0.0 }
 0xb49   :  { %4816 = vmatprep.subr.bf16.mxu1 %v12187_v45  ;;  %11684 = vmatprep.subr.bf16.mxu0 %v15163_v48 }
 0xb4b   :  { %4574 = vperm.xlu1 %11883, %v4504_v38   ;;  %4599 = vperm.xlu0 %11882, %v4509_v10   ;;  %v15209_v10 = vsel %vm2318_vm9, %v14343_v1, 0.0  ;;  %vm16805_vm9 = vmmov 0  }
 0xb4c   :  { %4817 = vmatpush1.bf16.msra.mxu1 %v12185_v62  ;;  %11685 = vmatpush3.bf16.msra.mxu0 %v12192_v9 }
 0xb4d   :  { %4818 = vmatprep.subr.bf16.mxu1 %v12191_v56  ;;  %11690 = vmatprep.subr.bf16.mxu0 %v15163_v48 }
 0xb4f   :  { %4584 = vperm.xlu1 %11883, %v4506_v63  }
 0xb50   :  { %4819 = vmatpush1.bf16.msra.mxu1 %v12189_v50 }
 0xb53   :  { %4594 = vperm.xlu1 %11883, %v4508_v11  }
 0xb57   :  { %4604 = vperm.xlu1 %11883, %v4510_v60   ;;  %v15257_v60 = vsel %vm16803_vm7, %v14705_v0, 0.0  ;;  %v12194_v0 = vld [vmem:[#allocation13 + $0xb0] sm:$0xff]  }
 0xbae   :  { %v4550_v16 = vpop.permute.xlu0 %4549  ;;  %v4530_v53 = vpop.permute.xlu1 %4529 }
 0xbaf   :  { %v4607_v31 = vmul.f32 %v4530_v53, %v14206_v3  ;;  %v4611_v32 = vmul.f32 %v4550_v16, %v15197_v4 }
 0xbb2   :  { %v4560_v55 = vpop.permute.xlu0 %4559  ;;  %v4540_v37 = vpop.permute.xlu1 %4539 }
 0xbb3   :  { %v4609_v8 = vmul.f32 %v4540_v37, %v15183_v7  ;;  %v4613_v63 = vmul.f32 %v4560_v55, %v15209_v10  ;;  %v12193_v37 = vld [vmem:[#allocation13 + $0xb8] sm:$0xff]  }
 0xbb5   :  { %v4623_v21 = vadd.f32 %v4609_v8, %v4607_v31  ;;  %v16806_v8 = vmov 0   ;;  %v12201_v31 = vld [vmem:[#allocation13 + $0x78] sm:$0xff]  }
 0xbb6   :  { %v4570_v49 = vpop.permute.xlu0 %4569  ;;  %11199 = vmatprep.subr.bf16.mxu1 %v12201_v31 }
 0xbb7   :  { %v4624_v22 = vadd.f32 %v4623_v21, %v4611_v32  ;;  %v4615_v41 = vmul.f32 %v4570_v49, %v15227_v47  ;;  %v12197_v49 = vld [vmem:[#allocation13 + $0x98] sm:$0xff]   ;;  %v12206_v21 = vld [vmem:[#allocation13 + $0x70] sm:$0xff]  }
 0xbb8   :  { %v12210_v32 = vld [vmem:[%s16576_s12 + $0xcc] ss:$16 sps:$4 sm:$0xff]  }
 0xbb9   :  { %v4625_v5 = vadd.f32 %v4624_v22, %v4613_v63  ;;  %v12212_v22 = vld [vmem:[#allocation13 + $0x28] sm:$0xff]   ;;  %v12216_v63 = vld [vmem:[#allocation13 + $0x60] sm:$0xff]  }
 0xbba   :  { %v4545_v52 = vpop.permute.xlu1 %4544  ;;  %v4535_v2 = vpop.permute.xlu0 %4534 }
 0xbbb   :  { %v4608_v44 = vmul.f32 %v4535_v2, %v14216_v17  ;;  %v4610_v38 = vmul.f32 %v4545_v52, %v15191_v18  ;;  %v4626_v39 = vadd.f32 %v4625_v5, %v4615_v41  ;;  %v12198_v52 = vld [vmem:[#allocation13 + $0x90] sm:$0xff]   ;;  %v12199_v2 = vld [vmem:[#allocation13 + $0x88] sm:$0xff]   ;;  %v12221_v5 = vld [vmem:[#allocation13 + $0x58] sm:$0xff]  }
 0xbbc   :  { %v12222_v41 = vld [vmem:[#allocation13 + $0x18] sm:$0xff]  }
 0xbbd   :  { %v4630_v23 = vadd.f32 %v4610_v38, %v4608_v44  ;;  %v12202_v44 = vld [vmem:[#allocation13 + $0x38] sm:$0xff]   ;;  %v12207_v38 = vld [vmem:[#allocation13 + $0x30] sm:$0xff]  }
 0xbbe   :  { %v4555_v27 = vpop.permute.xlu1 %4554  ;;  %v4580_v30 = vpop.permute.xlu0 %4579 }
 0xbbf   :  { %v4612_v34 = vmul.f32 %v4555_v27, %v15203_v26  ;;  %v4617_v36 = vmul.f32 %v4580_v30, %v15232_v33  ;;  %v12200_v27 = vld [vmem:[#allocation13 + $0x80] sm:$0xff]   ;;  %v12205_v30 = vld [vmem:[%s16576_s12 + $0xec] ss:$16 sps:$4 sm:$0xff]  }
 0xbc1   :  { %v4631_v42 = vadd.f32 %v4630_v23, %v4612_v34  ;;  %v4627_v61 = vadd.f32 %v4626_v39, %v4617_v36  ;;  %v12208_v23 = vld [vmem:[%s16576_s12 + $0xc8] ss:$16 sps:$4 sm:$0xff]   ;;  %v12215_v34 = vld [vmem:[%s16576_s12 + $0xac] ss:$16 sps:$4 sm:$0xff]  }
 0xbc2   :  { %v4565_v25 = vpop.permute.xlu1 %4564  ;;  %v4590_v35 = vpop.permute.xlu0 %4589  ;;  %v12223_v36 = vld [vmem:[%s16576_s12 + $0x68] ss:$16 sps:$4 sm:$0xff]  }
 0xbc3   :  { %v4614_v51 = vmul.f32 %v4565_v25, %v15214_v29  ;;  %v4619_v15 = vmul.f32 %v4590_v35, %v15245_v43  ;;  %v12203_v25 = vld [vmem:[%s16576_s12 + $0xe8] ss:$16 sps:$4 sm:$0xff]  }
 0xbc4   :  { %v12213_v35 = vld [vmem:[%s16576_s12 + $0xa8] ss:$16 sps:$4 sm:$0xff]  }
 0xbc5   :  { %v4632_v11 = vadd.f32 %v4631_v42, %v4614_v51  ;;  %v4628_v57 = vadd.f32 %v4627_v61, %v4619_v15  ;;  %v12217_v42 = vld [vmem:[#allocation13 + $0x20] sm:$0xff]   ;;  %v12218_v51 = vld [vmem:[%s16576_s12 + $0x88] ss:$16 sps:$4 sm:$0xff]  }
 0xbc6   :  { %v4575_v14 = vpop.permute.xlu1 %4574  ;;  %v4600_v28 = vpop.permute.xlu0 %4599  ;;  %v12228_v39 = vld [vmem:[%s16576_s12 + $0x48] ss:$16 sps:$4 sm:$0xff]  }
 0xbc7   :  { %v4616_v1 = vmul.f32 %v4575_v14, %v15221_v58  ;;  %v4621_v6 = vmul.f32 %v4600_v28, %v15257_v60  ;;  %v12211_v14 = vld [vmem:[#allocation13 + $0x68] sm:$0xff]   ;;  %v12241_v28 = vld [vmem:[%s16686_s26] sm:$0xff]  }
 0xbc8   :  { %v12231_v15 = vld [vmem:[#allocation13 + $0x48] sm:$0xff]  }
 0xbc9   :  { %v4633_v45 = vadd.f32 %v4632_v11, %v4616_v1  ;;  %v4629_v53 = vadd.f32 %v4628_v57, %v4621_v6  ;;  %v12225_v1 = vld [vmem:[%s16576_s12 + $0x6c] ss:$16 sps:$4 sm:$0xff]   ;;  %v12226_v11 = vld [vmem:[#allocation13 + $0x50] sm:$0xff]   ;;  %v12233_v61 = vld [vmem:[%s16576_s12 + $0x28] ss:$16 sps:$4 sm:$0xff]  }
 0xbca   :  { %v4585_v19 = vpop.permute.xlu1 %4584  ;;  %v12236_v6 = vld [vmem:[#allocation13 + $0x40] sm:$0xff]   ;;  %v12238_v57 = vld [vmem:[%s16576_s12 + $0x8] ss:$16 sps:$4 sm:$0xff]  }
 0xbcb   :  { %v4618_v62 = vmul.f32 %v4585_v19, %v15237_v20  ;;  %v12220_v19 = vld [vmem:[%s16576_s12 + $0x8c] ss:$16 sps:$4 sm:$0xff]  }
 0xbcd   :  { %v4634_v50 = vadd.f32 %v4633_v45, %v4618_v62  ;;  %v12230_v62 = vld [vmem:[%s16576_s12 + $0x4c] ss:$16 sps:$4 sm:$0xff]  }
 0xbce   :  { %v4595_v12 = vpop.permute.xlu1 %4594  ;;  %v12235_v45 = vld [vmem:[%s16576_s12 + $0x2c] ss:$16 sps:$4 sm:$0xff]  }
 0xbcf   :  { %v4620_v54 = vmul.f32 %v4595_v12, %v15250_v40  ;;  %v12227_v12 = vld [vmem:[#allocation13 + $0x10] sm:$0xff]  }
 0xbd1   :  { %v4635_v9 = vadd.f32 %v4634_v50, %v4620_v54  ;;  %v12232_v54 = vld [vmem:[#allocation13 + $0x8] sm:$0xff]  }
 0xbd2   :  { %v4605_v56 = vpop.permute.xlu1 %4604  ;;  %v12240_v50 = vld [vmem:[%s16576_s12 + $0xc] ss:$16 sps:$4 sm:$0xff]  }
 0xbd3   :  { %v4622_v16 = vmul.f32 %v4605_v56, %v15263_v46  ;;  %v12237_v56 = vld [vmem:[#allocation13] sm:$0xff]  }
 0xbd5   :  { %v4636_v55 = vadd.f32 %v4635_v9, %v4622_v16  ;;  %v12244_v9 = vld [vmem:[%s16576_s12 + $0xe4] ss:$16 sps:$4 sm:$0xff]   ;;  %v4240_v16 = vpop.f32.mrf.mxu0 }
 0xbd7   :  { %v4637_v13 = vpack.c.bf16 %v4636_v55, %v4629_v53  ;;  %v4242_v53 = vpop.f32.mrf.mxu0 }
 0xbd9   :  { %4837 = vmatmul.mubr.bf16.vlgmr.msra.gmra.mxu1 %v4637_v13  ;;  %11687 = vmatmul.mubr.bf16.vlgmr.msra.gmra.mxu0 %v4637_v13  ;;  %v4244_v55 = vpop.f32.mrf.mxu0 }
 0xbda   :  { %11691 = vmatpush3.bf16.msra.mxu0 %v12193_v37  ;;  %11706 = vmatprep.mubr.msk.bf16.mxu0 %vm16805_vm9, %v15163_v48  ;;  %v4203_v37 = vpop.f32.mrf.mxu1 }
 0xbdb   :  { %11692 = vmatprep.subr.bf16.mxu0 %v15163_v48  ;;  %11200 = vmatpush3.bf16.msra.mxu1 %v12202_v44 }
 0xbdc   :  { %11201 = vmatprep.subr.bf16.mxu1 %v12206_v21  ;;  %5183 = vmatprep.mubr.bf16.mxu1 %v12241_v28  ;;  %v16809_v21 = vld [vmem:[#allocation26_spill] sm:$0xff] }
 0xbde   :  { %11693 = vmatpush3.bf16.msra.mxu0 %v12194_v0 }
 0xbdf   :  { %11694 = vmatprep.subr.bf16.mxu0 %v15163_v48  ;;  %11202 = vmatpush3.bf16.msra.mxu1 %v12207_v38 }
 0xbe0   :  { %11203 = vmatprep.subr.bf16.mxu1 %v12211_v14  ;;  %v16811_v14 = vld [vmem:[#allocation24_spill] sm:$0xff] }
 0xbe2   :  { %11695 = vmatpush3.bf16.msra.mxu0 %v12195_v24 }
 0xbe3   :  { %11696 = vmatprep.subr.bf16.mxu0 %v15163_v48  ;;  %11204 = vmatpush3.bf16.msra.mxu1 %v12212_v22  ;;  %v16812_v22 = vld [vmem:[#allocation28_spill] sm:$0xff] }
 0xbe4   :  { %11205 = vmatprep.subr.bf16.mxu1 %v12216_v63 }
 0xbe6   :  { %11697 = vmatpush3.bf16.msra.mxu0 %v12196_v59  ;;  %v16807_v59 = vld [vmem:[#allocation25_spill] sm:$0xff] }
 0xbe7   :  { %11698 = vmatprep.subr.bf16.mxu0 %v15163_v48  ;;  %11206 = vmatpush3.bf16.msra.mxu1 %v12217_v42 }
 0xbe8   :  { %11207 = vmatprep.subr.bf16.mxu1 %v12221_v5 }
 0xbea   :  { %11699 = vmatpush3.bf16.msra.mxu0 %v12197_v49 }
 0xbeb   :  { %11700 = vmatprep.subr.bf16.mxu0 %v15163_v48  ;;  %11208 = vmatpush3.bf16.msra.mxu1 %v12222_v41 }
 0xbec   :  { %11209 = vmatprep.subr.bf16.mxu1 %v12226_v11 }
 0xbee   :  { %11701 = vmatpush3.bf16.msra.mxu0 %v12198_v52 }
 0xbef   :  { %11702 = vmatprep.subr.bf16.mxu0 %v15163_v48  ;;  %11210 = vmatpush3.bf16.msra.mxu1 %v12227_v12 }
 0xbf0   :  { %11211 = vmatprep.subr.bf16.mxu1 %v12231_v15  ;;  %v10643_v15 = vld [vmem:[%s16580_s16] ss:$0 sm:$0xff] }
 0xbf2   :  { %11703 = vmatpush3.bf16.msra.mxu0 %v12199_v2 }
 0xbf3   :  { %11704 = vmatprep.subr.bf16.mxu0 %v15163_v48  ;;  %11212 = vmatpush3.bf16.msra.mxu1 %v12232_v54 }
 0xbf4   :  { %11213 = vmatprep.subr.bf16.mxu1 %v12236_v6 }
 0xbf6   :  { %11705 = vmatpush3.bf16.msra.mxu0 %v12200_v27  ;;  %v16808_v27 = vld [vmem:[#allocation18_spill] sm:$0xff] }
 0xbf7   :  { %5474 = vmatprep.subr.bf16.mxu0 %v12205_v30  ;;  %11214 = vmatpush3.bf16.msra.mxu1 %v12237_v56 }
 0xbf8   :  { %5431 = vmatprep.subr.bf16.mxu1 %v12244_v9 }
 0xbf9   :  { %11707 = vmatmul.mubr.bf16.vlgmr.msra.gmra.mxu0 %v4637_v13  ;;  %v4246_v13 = vpop.f32.mrf.mxu0 }
 0xbfa   :  { %5506 = vmatprep.mubr.bf16.mxu0 %v16806_v8  ;;  %5475 = vmatpush1.bf16.msra.mxu0 %v12203_v25 }
 0xbfb   :  { %5476 = vmatprep.subr.bf16.mxu0 %v12210_v32  ;;  %v16810_v32 = vld [vmem:[#allocation27_spill] sm:$0xff] }
 0xbfe   :  { %5477 = vmatpush1.bf16.msra.mxu0 %v12208_v23 }
 0xbff   :  { %5478 = vmatprep.subr.bf16.mxu0 %v12215_v34  ;;  %v888_v34 = vadd.f32 %v16812_v22, %v16811_v14 }
 0xc02   :  { %5479 = vmatpush1.bf16.msra.mxu0 %v12213_v35 }
 0xc03   :  { %5480 = vmatprep.subr.bf16.mxu0 %v12220_v19 }
 0xc06   :  { %5481 = vmatpush1.bf16.msra.mxu0 %v12218_v51 }
 0xc07   :  { %5482 = vmatprep.subr.bf16.mxu0 %v12225_v1 }
 0xc0a   :  { %5483 = vmatpush1.bf16.msra.mxu0 %v12223_v36 }
 0xc0b   :  { %5484 = vmatprep.subr.bf16.mxu0 %v12230_v62 }
 0xc0e   :  { %5485 = vmatpush1.bf16.msra.mxu0 %v12228_v39 }
 0xc0f   :  { %5486 = vmatprep.subr.bf16.mxu0 %v12235_v45 }
 0xc12   :  { %5487 = vmatpush1.bf16.msra.mxu0 %v12233_v61 }
 0xc13   :  { %5488 = vmatprep.subr.bf16.mxu0 %v12240_v50  ;;  %v4929_v50 = vadd.f32 %v10643_v15, %v4242_v53 }
 0xc16   :  { %5489 = vmatpush1.bf16.msra.mxu0 %v12238_v57 }
 0xc17   :  { %11710 = vmatprep.subr.bf16.mxu0 %v15163_v48 }
 0xc99   :  { %v4838_v0 = vpop.f32.mrf.mxu1  ;;  %v4881_v24 = vpop.f32.mrf.mxu0 }
 0xc9a   :  { %v4888_v49 = vadd.f32 %v4838_v0, %v16807_v59  ;;  %v4930_v59 = vadd.f32 %v10643_v15, %v4246_v13  ;;  %v12260_v15 = vld [vmem:[%s16576_s12 + $0x20] ss:$16 sps:$4 sm:$0xff]  }
 0xc9b   :  { %v4840_v52 = vpop.f32.mrf.mxu1  ;;  %v11688_v2 = vpop.f32.mrf.mxu0 }
 0xc9c   :  { %v4894_v31 = vadd.f32 %v4888_v49, %v16808_v27  ;;  %v4889_v38 = vadd.f32 %v4840_v52, %v16809_v21  ;;  %v16814_v2 = vld [vmem:[#allocation57_spill] sm:$0xff] }
 0xc9d   :  { %v4842_v44 = vpop.f32.mrf.mxu1  ;;  %v4884_v30 = vpop.f32.mrf.mxu0 }
 0xc9e   :  { %v10639_v25 = vmul.f32 -1.442695, %v4894_v31  ;;  %v4891_v23 = vadd.f32 %v4842_v44, %v16810_v32  ;;  %v4908_v19 = vadd.f32 %v4889_v38, %v4240_v16  ;;  %v16813_v16 = vld [vmem:[#allocation54_spill] sm:$0xff]  ;;  %v4893_v27 = vadd.f32 %v4884_v30, %v16814_v2  ;;  %v12242_v30 = vld [vmem:[%s16576_s12 + $0xe0] ss:$16 sps:$4 sm:$0xff]  }
 0xc9f   :  { %v4844_v35 = vpop.f32.mrf.mxu1  ;;  %v11689_v63 = vpop.f32.mrf.mxu0 }
 0xca0   :  { %12870 = vpow2.f32 %v10639_v25  ;;  %v4895_v42 = vadd.f32 %v4891_v23, %v4203_v37  ;;  %v4892_v51 = vadd.f32 %v4844_v35, %v888_v34  ;;  %v10641_v41 = vmul.f32 -1.442695, %v4908_v19  ;;  %v16815_v23 = vld [vmem:[#allocation19_spill] sm:$0xff]  ;;  %v16816_v35 = vld [vmem:[#allocation29_spill] sm:$0xff] }
 0xca1   :  { %v12247_v19 = vld [vmem:[%s16576_s12 + $0xc4] ss:$16 sps:$4 sm:$0xff]  }
 0xca2   :  { %v10640_v5 = vmul.f32 -1.442695, %v4895_v42  ;;  %v4909_v1 = vadd.f32 %v4892_v51, %v4244_v55  ;;  %v4890_v55 = vadd.f32 %v4881_v24, %v16813_v16 }
 0xca4   :  { %12872 = vpow2.f32 %v10640_v5  ;;  %v10642_v36 = vmul.f32 -1.442695, %v4909_v1  ;;  %v12245_v5 = vld [vmem:[%s16576_s12 + $0xc0] ss:$16 sps:$4 sm:$0xff]   ;;  %v12250_v1 = vld [vmem:[%s16576_s12 + $0xa4] ss:$16 sps:$4 sm:$0xff]  }
 0xca5   :  { %12874 = vpow2.f32 %v10641_v41  ;;  %v12248_v41 = vld [vmem:[%s16576_s12 + $0xa0] ss:$16 sps:$4 sm:$0xff]  }
 0xca6   :  { %12876 = vpow2.f32 %v10642_v36  ;;  %v12253_v36 = vld [vmem:[%s16576_s12 + $0x84] ss:$16 sps:$4 sm:$0xff]  }
 0xcad   :  { %v12871_v11 = vpop.eup %12870 }
 0xcae   :  { %v4902_v62 = vadd.f32 1.0, %v12871_v11  ;;  %v12251_v11 = vld [vmem:[%s16576_s12 + $0x80] ss:$16 sps:$4 sm:$0xff]  }
 0xcb0   :  { %12878 = vrcp.f32 %v4902_v62  ;;  %v12254_v62 = vld [vmem:[%s16576_s12 + $0x60] ss:$16 sps:$4 sm:$0xff]  }
 0xcb1   :  { %v12873_v28 = vpop.eup %12872 }
 0xcb2   :  { %v4903_v12 = vadd.f32 1.0, %v12873_v28  ;;  %v12875_v39 = vpop.eup %12874  ;;  %v12259_v28 = vld [vmem:[%s16576_s12 + $0x44] ss:$16 sps:$4 sm:$0xff]  }
 0xcb3   :  { %v12877_v54 = vpop.eup %12876  ;;  %v4916_v61 = vadd.f32 1.0, %v12875_v39  ;;  %v12262_v39 = vld [vmem:[%s16576_s12 + $0x24] ss:$16 sps:$4 sm:$0xff]  }
 0xcb4   :  { %12880 = vrcp.f32 %v4903_v12  ;;  %v4917_v57 = vadd.f32 1.0, %v12877_v54  ;;  %v12257_v12 = vld [vmem:[%s16576_s12 + $0x40] ss:$16 sps:$4 sm:$0xff]   ;;  %v12265_v54 = vld [vmem:[%s16576_s12 + $0x4] ss:$16 sps:$4 sm:$0xff]  }
 0xcb5   :  { %12882 = vrcp.f32 %v4916_v61  ;;  %v12263_v61 = vld [vmem:[%s16576_s12] ss:$16 sps:$4 sm:$0xff]  }
 0xcb6   :  { %12884 = vrcp.f32 %v4917_v57 }
 0xcb9   :  { %v15340_v45 = vpop.f32.mrf.mxu0 }
 0xcbb   :  { %v11708_v6 = vpop.f32.mrf.mxu0 }
 0xcbd   :  { %v12879_v56 = vpop.eup %12878  ;;  %v15342_v9 = vpop.f32.mrf.mxu0 }
 0xcbe   :  { %v4931_v37 = vmul.f32 %v12879_v56, %v4929_v50  ;;  %v10645_v50 = vld [vmem:[%s16582_s18] ss:$0 sm:$0xff] }
 0xcbf   :  { %v11709_v0 = vpop.f32.mrf.mxu0 }
 0xcc0   :  { %v4933_v49 = vadd.f32 %v4931_v37, %v4890_v55 }
 0xcc1   :  { %v12881_v52 = vpop.eup %12880 }
 0xcc2   :  { %12886 = vtanh.f32 %v4933_v49  ;;  %v4932_v31 = vmul.f32 %v12881_v52, %v4930_v59  ;;  %v12883_v53 = vpop.eup %12882 }
 0xcc3   :  { %v12885_v25 = vpop.eup %12884  ;;  %v4937_v21 = vsub.f32 1.0, %v12883_v53  ;;  %v4941_v24 = vmul.f32 %v12883_v53, %v16815_v23 }
 0xcc4   :  { %v4934_v44 = vadd.f32 %v4932_v31, %v4893_v27  ;;  %v4938_v14 = vsub.f32 1.0, %v12885_v25  ;;  %v4942_v63 = vmul.f32 %v12885_v25, %v16816_v35  ;;  %v16817_v27 = vld [vmem:[#allocation35_spill] sm:$0xff] }
 0xcc5   :  { %v16819_v25 = vld [vmem:[#allocation31_spill] sm:$0xff] }
 0xcc6   :  { %12888 = vtanh.f32 %v4934_v44  ;;  %v16818_v44 = vld [vmem:[#allocation33_spill] sm:$0xff] }
 0xccf   :  { %v12887_v38 = vpop.eup %12886 }
 0xcd0   :  { %v4939_v32 = vmul.f32 %v12887_v38, %v4937_v21  ;;  %v16820_v38 = vld [vmem:[#allocation17_spill] sm:$0xff] }
 0xcd2   :  { %v15347_v22 = vadd.f32 %v4941_v24, %v4939_v32 }
 0xcd3   :  { %v12889_v13 = vpop.eup %12888 }
 0xcd4   :  { %v4940_v34 = vmul.f32 %v12889_v13, %v4938_v14  ;;  %v16822_v14 = vld [vmem:[#allocation41_spill] sm:$0xff] }
 0xcd6   :  { %v15350_v42 = vadd.f32 %v4942_v63, %v4940_v34  ;;  %v16823_v34 = vld [vmem:[#allocation39_spill] sm:$0xff] }
 0xcd7   :  { %v16824_v63 = vld [vmem:[#allocation43_spill] sm:$0xff] }
 0xcd8   :  { %v4945_v51 = vpack.c.bf16 %v15350_v42, %v15347_v22 }
 0xcda   :  { %5184 = vmatmul.mubr.bf16.vlgmr.msra.gmra.mxu1 %v4945_v51  ;;  %5507 = vmatmul.mubr.bf16.vlgmr.msra.gmra.mxu0 %v4945_v51 }
 0xcdb   :  { %5432 = vmatpush1.bf16.msra.mxu1 %v12242_v30  ;;  %5463 = vmatprep.mubr.bf16.mxu1 %v16806_v8 }
 0xcdc   :  { %5433 = vmatprep.subr.bf16.mxu1 %v12247_v19  ;;  %11726 = vmatprep.mubr.msk.bf16.mxu0 %vm16805_vm9, %v15163_v48  ;;  %v12256_v48 = vld [vmem:[%s16576_s12 + $0x64] ss:$16 sps:$4 sm:$0xff]  }
 0xcdf   :  { %5434 = vmatpush1.bf16.msra.mxu1 %v12245_v5  ;;  %v15428_v5 = vld [vmem:[%s16575_s11] ss:$0 sm:$0xff] }
 0xce0   :  { %5435 = vmatprep.subr.bf16.mxu1 %v12250_v1  ;;  %v16826_v1 = vld [vmem:[#allocation23_spill] sm:$0xff] }
 0xce3   :  { %5436 = vmatpush1.bf16.msra.mxu1 %v12248_v41 }
 0xce4   :  { %5437 = vmatprep.subr.bf16.mxu1 %v12253_v36 }
 0xce7   :  { %5438 = vmatpush1.bf16.msra.mxu1 %v12251_v11 }
 0xce8   :  { %5439 = vmatprep.subr.bf16.mxu1 %v12256_v48 }
 0xceb   :  { %5440 = vmatpush1.bf16.msra.mxu1 %v12254_v62  ;;  %v16827_v62 = vld [vmem:[#allocation67_spill] sm:$0xff] }
 0xcec   :  { %5441 = vmatprep.subr.bf16.mxu1 %v12259_v28 }
 0xcef   :  { %5442 = vmatpush1.bf16.msra.mxu1 %v12257_v12 }
 0xcf0   :  { %5443 = vmatprep.subr.bf16.mxu1 %v12262_v39 }
 0xcf3   :  { %5444 = vmatpush1.bf16.msra.mxu1 %v12260_v15  ;;  %v16828_v15 = vld [vmem:[#allocation68_spill] sm:$0xff] }
 0xcf4   :  { %5445 = vmatprep.subr.bf16.mxu1 %v12265_v54 }
 0xcf7   :  { %5446 = vmatpush1.bf16.msra.mxu1 %v12263_v61 }
 0xcfa   :  { %5464 = vmatmul.mubr.bf16.vlgmr.msra.gmra.mxu1 %v4945_v51  ;;  %v16825_v51 = vld [vmem:[#allocation21_spill] sm:$0xff] }
 0xcfb   :  { %6088 = vmatprep.mubr.bf16.mxu1 %v16806_v8 }
 0xd9a   :  { %v11215_v6 = vpop.f32.mrf.mxu1 }
 0xd9c   :  { %v11216_v56 = vpop.f32.mrf.mxu1 }
 0xd9d   :  { %v11217_v57 = vadd.f32 %v11216_v56, %v11215_v6 }
 0xd9e   :  { %v11218_v16 = vpop.f32.mrf.mxu1 }
 0xd9f   :  { %v5186_v55 = vadd.f32 %v11217_v57, %v10645_v50 }
 0xda0   :  { %v11219_v37 = vpop.f32.mrf.mxu1 }
 0xda1   :  { %v5227_v0 = vadd.f32 %v15340_v45, %v5186_v55  ;;  %v11220_v59 = vadd.f32 %v11219_v37, %v11218_v16  ;;  %v16830_v55 = vld [vmem:[#allocation49_spill] sm:$0xff] }
 0xda3   :  { %10670 = vst [vmem:[%s16583_s19 + $0x10] sm:$0xff] %v5227_v0  ;;  %v5189_v49 = vadd.f32 %v11220_v59, %v10645_v50  ;;  %v16829_v50 = vld [vmem:[#allocation45_spill] sm:$0xff] }
 0xda5   :  { %v5230_v52 = vadd.f32 %v15342_v9, %v5189_v49  ;;  %v16821_v9 = vld [vmem:[#allocation37_spill] sm:$0xff] }
 0xda7   :  { %10671 = vst [vmem:[%s16583_s19 + $0x18] sm:$0xff] %v5230_v52 }
 0xdba   :  { %v5465_v2 = vpop.f32.mrf.mxu1 }
 0xdbb   :  { %v5537_v31 = vadd.f32 %v5465_v2, %v16817_v27  ;;  %v5533_v53 = vadd.f32 %v5465_v2, %v16818_v44  ;;  %v5539_v21 = vadd.f32 %v5465_v2, %v16819_v25  ;;  %v5535_v32 = vadd.f32 %v5465_v2, %v16820_v38 }
 0xdbc   :  { %v15417_v45 = vpop.f32.mrf.mxu1  ;;  %v5541_v24 = vadd.f32 %v5465_v2, %v16821_v9  ;;  %v5543_v35 = vadd.f32 %v5465_v2, %v16823_v34  ;;  %v5545_v19 = vadd.f32 %v5465_v2, %v16825_v51  ;;  %v5547_v56 = vadd.f32 %v5465_v2, %v16829_v50 }
 0xdbd   :  { %12890 = vtanh.f32 %v5537_v31  ;;  %v16831_v31 = vld [vmem:[#allocation47_spill] sm:$0xff] }
 0xdbe   :  { %v5469_v23 = vpop.f32.mrf.mxu1  ;;  %12892 = vtanh.f32 %v5533_v53 }
 0xdbf   :  { %12894 = vtanh.f32 %v5539_v21  ;;  %v5536_v13 = vadd.f32 %v5469_v23, %v16822_v14  ;;  %v5538_v30 = vadd.f32 %v5469_v23, %v16824_v63  ;;  %v5540_v41 = vadd.f32 %v5469_v23, %v16826_v1 }
 0xdc0   :  { %12896 = vtanh.f32 %v5535_v32  ;;  %v5534_v28 = vadd.f32 %v5469_v23, %v16827_v62  ;;  %v5542_v54 = vadd.f32 %v5469_v23, %v16828_v15  ;;  %v5544_v37 = vadd.f32 %v5469_v23, %v16830_v55 }
 0xdc1   :  { %12898 = vtanh.f32 %v5541_v24  ;;  %v5546_v53 = vadd.f32 %v5469_v23, %v16831_v31 }
 0xdc2   :  { %12900 = vtanh.f32 %v5536_v13  ;;  %v16832_v13 = vld [vmem:[#allocation51_spill] sm:$0xff] }
 0xdc3   :  { %12902 = vtanh.f32 %v5543_v35  ;;  %v5548_v35 = vadd.f32 %v5469_v23, %v16832_v13 }
 0xdc4   :  { %12904 = vtanh.f32 %v5538_v30 }
 0xdc5   :  { %12906 = vtanh.f32 %v5545_v19 }
 0xdc6   :  { %12908 = vtanh.f32 %v5540_v41 }
 0xdc7   :  { %12910 = vtanh.f32 %v5534_v28 }
 0xdc8   :  { %12912 = vtanh.f32 %v5542_v54 }
 0xdc9   :  { %12914 = vtanh.f32 %v5547_v56 }
 0xdca   :  { %v12891_v36 = vpop.eup %12890  ;;  %12916 = vtanh.f32 %v5544_v37 }
 0xdcb   :  { %v12893_v11 = vpop.eup %12892  ;;  %v5576_v48 = vmul.f32 %v12891_v36, %v15428_v5  ;;  %12918 = vtanh.f32 %v5546_v53 }
 0xdcc   :  { %v12895_v12 = vpop.eup %12894  ;;  %v5572_v39 = vmul.f32 %v12893_v11, %v15428_v5  ;;  %12920 = vtanh.f32 %v5548_v35  ;;  %v16835_v35 = vld [vmem:[#allocation22_spill] sm:$0xff] }
 0xdcd   :  { %v12897_v61 = vpop.eup %12896  ;;  %5596 = vadd.xlane.f32.xlu1 %v5576_v48  ;;  %v5578_v6 = vmul.f32 %v12895_v12, %v15428_v5  ;;  %vm16836_vm11 = vcmp.gt.f32.partialorder %v16835_v35, 0.0 }
 0xdce   :  { %5588 = vadd.xlane.f32.xlu0 %v5572_v39  ;;  %v12899_v57 = vpop.eup %12898  ;;  %v5574_v16 = vmul.f32 %v12897_v61, %v15428_v5 }
 0xdcf   :  { %v12901_v0 = vpop.eup %12900  ;;  %v5580_v59 = vmul.f32 %v12899_v57, %v15428_v5 }
 0xdd0   :  { %v12903_v49 = vpop.eup %12902  ;;  %v5575_v52 = vmul.f32 %v12901_v0, %v15428_v5 }
 0xdd1   :  { %5600 = vadd.xlane.f32.xlu1 %v5578_v6  ;;  %v12905_v21 = vpop.eup %12904  ;;  %v5582_v2 = vmul.f32 %v12903_v49, %v15428_v5 }
 0xdd2   :  { %5592 = vadd.xlane.f32.xlu0 %v5574_v16  ;;  %v12907_v32 = vpop.eup %12906  ;;  %v5577_v24 = vmul.f32 %v12905_v21, %v15428_v5 }
 0xdd3   :  { %v12909_v30 = vpop.eup %12908  ;;  %v5584_v19 = vmul.f32 %v12907_v32, %v15428_v5 }
 0xdd4   :  { %v12911_v41 = vpop.eup %12910  ;;  %v5579_v36 = vmul.f32 %v12909_v30, %v15428_v5 }
 0xdd5   :  { %5604 = vadd.xlane.f32.xlu1 %v5580_v59  ;;  %v12913_v11 = vpop.eup %12912  ;;  %v5573_v48 = vmul.f32 %v12911_v41, %v15428_v5  ;;  %v16839_v41 = vld [vmem:[#allocation70_spill] sm:$0xff] }
 0xdd6   :  { %5594 = vadd.xlane.f32.xlu0 %v5575_v52  ;;  %v12915_v28 = vpop.eup %12914  ;;  %v5581_v12 = vmul.f32 %v12913_v11, %v15428_v5  ;;  %vm16840_vm4 = vcmp.gt.f32.partialorder %v16839_v41, 0.0 }
 0xdd7   :  { %v12917_v39 = vpop.eup %12916  ;;  %v5586_v23 = vmul.f32 %v12915_v28, %v15428_v5 }
 0xdd8   :  { %v5583_v54 = vmul.f32 %v12917_v39, %v15428_v5  ;;  %v12919_v61 = vpop.eup %12918 }
 0xdd9   :  { %5608 = vadd.xlane.f32.xlu1 %v5582_v2  ;;  %v5585_v6 = vmul.f32 %v12919_v61, %v15428_v5  ;;  %v12921_v56 = vpop.eup %12920  ;;  %v16833_v2 = vld [vmem:[#allocation20_spill] sm:$0xff] }
 0xdda   :  { %5598 = vadd.xlane.f32.xlu0 %v5577_v24  ;;  %v5587_v57 = vmul.f32 %v12921_v56, %v15428_v5  ;;  %vm16834_vm10 = vcmp.gt.f32.partialorder %v16833_v2, 0.0 }
 0xddd   :  { %5612 = vadd.xlane.f32.xlu1 %v5584_v19  ;;  %v16837_v19 = vld [vmem:[#allocation69_spill] sm:$0xff] }
 0xdde   :  { %5602 = vadd.xlane.f32.xlu0 %v5579_v36  ;;  %vm16838_vm14 = vcmp.gt.f32.partialorder %v16837_v19, 0.0 }
 0xde1   :  { %5590 = vadd.xlane.f32.xlu1 %v5573_v48  ;;  %v16841_v48 = vld [vmem:[#allocation71_spill] sm:$0xff] }
 0xde2   :  { %5606 = vadd.xlane.f32.xlu0 %v5581_v12  ;;  %vm16842_vm5 = vcmp.gt.f32.partialorder %v16841_v48, 0.0  ;;  %v16843_v12 = vld [vmem:[#allocation72_spill] sm:$0xff]  ;;  %v16847_v48 = vld [vmem:[#allocation74_spill] sm:$0xff] }
 0xde3   :  { %vm16844_vm6 = vcmp.gt.f32.partialorder %v16843_v12, 0.0  ;;  %vm16848_vm8 = vcmp.gt.f32.partialorder %v16847_v48, 0.0 }
 0xde5   :  { %5616 = vadd.xlane.f32.xlu1 %v5586_v23 }
 0xde6   :  { %5610 = vadd.xlane.f32.xlu0 %v5583_v54 }
 0xdea   :  { %5614 = vadd.xlane.f32.xlu0 %v5585_v6 }
 0xdee   :  { %5618 = vadd.xlane.f32.xlu0 %v5587_v57  ;;  %v16845_v57 = vld [vmem:[#allocation73_spill] sm:$0xff] }
 0xdef   :  { %vm16846_vm7 = vcmp.gt.f32.partialorder %v16845_v57, 0.0 }
 0xe56   :  { %v5597_v16 = vpop.xlane.xlu1 %5596 }
 0xe57   :  { %v5589_v37 = vpop.xlane.xlu0 %5588  ;;  %v15455_v32 = vsel %vm16834_vm10, %v5597_v16, -1e+10 }
 0xe58   :  { %v5620_v30 = vsel %vm16836_vm11, %v5589_v37, -1e+10  ;;  %v5638_v23 = vsel %vm4384_vm15, %v15455_v32, -inf }
 0xe59   :  { %v5636_v54 = vsel %vm4384_vm15, %v5620_v30, -inf }
 0xe5a   :  { %v5601_v0 = vpop.xlane.xlu1 %5600 }
 0xe5b   :  { %v5593_v59 = vpop.xlane.xlu0 %5592  ;;  %v5626_v5 = vsel %vm16838_vm14, %v5601_v0, -1e+10 }
 0xe5c   :  { %v5622_v36 = vsel %vm16840_vm4, %v5593_v59, -1e+10  ;;  %v5640_v61 = vsel %vm4384_vm15, %v5626_v5, -inf }
 0xe5d   :  { %v5637_v6 = vsel %vm4384_vm15, %v5622_v36, -inf }
 0xe5e   :  { %v5605_v49 = vpop.xlane.xlu1 %5604 }
 0xe5f   :  { %v5595_v52 = vpop.xlane.xlu0 %5594  ;;  %v5628_v28 = vsel %vm16842_vm5, %v5605_v49, -1e+10  ;;  %v5639_v49 = vmax.f32 %v5636_v54, %v5638_v23 }
 0xe60   :  { %v5642_v0 = vsel %vm4384_vm15, %v5628_v28, -inf }
 0xe61   :  { %v5643_v35 = vmax.f32 %v5639_v49, %v5642_v0  ;;  %v5623_v0 = vsel %vm4355_vm1, %v5595_v52, -1e+10  ;;  %v16854_v49 = vld [vmem:[#allocation80_spill] sm:$0xff] }
 0xe62   :  { %v5609_v53 = vpop.xlane.xlu1 %5608  ;;  %vm16855_vm11 = vcmp.gt.f32.partialorder %v16854_v49, 0.0  ;;  %v5652_v52 = vsel %vm4384_vm15, %v5623_v0, -inf }
 0xe63   :  { %v5599_v21 = vpop.xlane.xlu0 %5598  ;;  %v15467_v39 = vsel %vm16844_vm6, %v5609_v53, -1e+10  ;;  %v5641_v53 = vmax.f32 %v5637_v6, %v5640_v61 }
 0xe64   :  { %v5644_v59 = vsel %vm4384_vm15, %v15467_v39, -inf  ;;  %v5625_v55 = vsel %vm4357_vm0, %v5599_v21, -1e+10 }
 0xe65   :  { %v5645_v2 = vmax.f32 %v5641_v53, %v5644_v59  ;;  %v5653_v59 = vsel %vm4384_vm15, %v5625_v55, -inf }
 0xe66   :  { %v5613_v24 = vpop.xlane.xlu1 %5612 }
 0xe67   :  { %v5603_v11 = vpop.xlane.xlu0 %5602  ;;  %v15476_v16 = vsel %vm16846_vm7, %v5613_v24, -1e+10  ;;  %v16849_v24 = vld [vmem:[#allocation75_spill] sm:$0xff] }
 0xe68   :  { %v5646_v12 = vsel %vm4384_vm15, %v15476_v16, -inf  ;;  %vm16850_vm10 = vcmp.gt.f32.partialorder %v16849_v24, 0.0  ;;  %v5627_v61 = vsel %vm4359_vm2, %v5603_v11, -1e+10 }
 0xe69   :  { %v5647_v23 = vmax.f32 %v5643_v35, %v5646_v12  ;;  %v5655_v31 = vsel %vm4384_vm15, %v5627_v61, -inf }
 0xe6a   :  { %v5591_v56 = vpop.xlane.xlu1 %5590 }
 0xe6b   :  { %v5607_v37 = vpop.xlane.xlu0 %5606  ;;  %v5621_v41 = vsel %vm16848_vm8, %v5591_v56, -1e+10 }
 0xe6c   :  { %v5651_v6 = vsel %vm4384_vm15, %v5621_v41, -inf  ;;  %v5629_v12 = vsel %vm4361_vm12, %v5607_v37, -1e+10 }
 0xe6d   :  { %v5654_v11 = vmax.f32 %v5651_v6, %v5653_v59 }
 0xe6e   :  { %v5617_v19 = vpop.xlane.xlu1 %5616 }
 0xe6f   :  { %v5611_v57 = vpop.xlane.xlu0 %5610  ;;  %v5634_v13 = vsel %vm16850_vm10, %v5617_v19, -1e+10 }
 0xe70   :  { %v5648_v50 = vsel %vm4384_vm15, %v5634_v13, -inf  ;;  %v15498_v19 = vsel %vm16855_vm11, %v5611_v57, -1e+10  ;;  %v5656_v57 = vmax.f32 %v5652_v52, %v5655_v31 }
 0xe71   :  { %v5649_v48 = vmax.f32 %v5645_v2, %v5648_v50  ;;  %v5659_v49 = vsel %vm4384_vm15, %v15498_v19, -inf }
 0xe73   :  { %v5650_v53 = vmax.f32 %v5647_v23, %v5649_v48  ;;  %v5615_v21 = vpop.xlane.xlu0 %5614  ;;  %v5657_v48 = vsel %vm4384_vm15, %v5629_v12, -inf }
 0xe74   :  { %v5633_v2 = vsel %vm4365_vm3, %v5615_v21, -1e+10  ;;  %v5658_v35 = vmax.f32 %v5654_v11, %v5657_v48 }
 0xe75   :  { %v5666_v54 = vsub.f32 %v5620_v30, %v5650_v53  ;;  %v5668_v24 = vsub.f32 %v5622_v36, %v5650_v53  ;;  %v5672_v62 = vsub.f32 %v5626_v5, %v5650_v53  ;;  %v5661_v37 = vsel %vm4384_vm15, %v5633_v2, -inf }
 0xe76   :  { %v5660_v30 = vmax.f32 %v5656_v57, %v5659_v49  ;;  %v5670_v59 = vsub.f32 %v15455_v32, %v5650_v53  ;;  %v5674_v31 = vsub.f32 %v5628_v28, %v5650_v53  ;;  %v5662_v52 = vmax.f32 %v5658_v35, %v5661_v37 }
 0xe77   :  { %v5682_v23 = vmul.f32 1.442695, %v5666_v54  ;;  %v5686_v56 = vmul.f32 1.442695, %v5668_v24  ;;  %v5619_v15 = vpop.xlane.xlu0 %5618  ;;  %v5694_v54 = vmul.f32 1.442695, %v5672_v62  ;;  %v5676_v24 = vsub.f32 %v15467_v39, %v5650_v53 }
 0xe78   :  { %v5635_v6 = vsel %vm4367_vm13, %v5619_v15, -1e+10  ;;  %v5690_v11 = vmul.f32 1.442695, %v5670_v59  ;;  %v5678_v48 = vsub.f32 %v15476_v16, %v5650_v53  ;;  %v5698_v49 = vmul.f32 1.442695, %v5674_v31 }
 0xe79   :  { %12922 = vpow2.f32 %v5682_v23  ;;  %v5663_v21 = vsel %vm4384_vm15, %v5635_v6, -inf  ;;  %v5680_v23 = vsub.f32 %v5634_v13, %v5650_v53  ;;  %v5702_v15 = vmul.f32 1.442695, %v5676_v24 }
 0xe7a   :  { %12924 = vpow2.f32 %v5686_v56  ;;  %v5664_v50 = vmax.f32 %v5660_v30, %v5663_v21  ;;  %v5706_v28 = vmul.f32 1.442695, %v5678_v48 }
 0xe7b   :  { %12926 = vpow2.f32 %v5694_v54  ;;  %v5710_v35 = vmul.f32 1.442695, %v5680_v23 }
 0xe7c   :  { %v5665_v5 = vmax.f32 %v5662_v52, %v5664_v50  ;;  %12928 = vpow2.f32 %v5690_v11 }
 0xe7d   :  { %12930 = vpow2.f32 %v5698_v49 }
 0xe7e   :  { %v5667_v57 = vsub.f32 %v5621_v41, %v5665_v5  ;;  %v5671_v36 = vsub.f32 %v5625_v55, %v5665_v5  ;;  %v5669_v56 = vsub.f32 %v5623_v0, %v5665_v5  ;;  %v5673_v37 = vsub.f32 %v5627_v61, %v5665_v5 }
 0xe7f   :  { %12932 = vpow2.f32 %v5702_v15  ;;  %v5675_v50 = vsub.f32 %v5629_v12, %v5665_v5  ;;  %v5677_v55 = vsub.f32 %v15498_v19, %v5665_v5  ;;  %v5679_v0 = vsub.f32 %v5633_v2, %v5665_v5 }
 0xe80   :  { %v5684_v32 = vmul.f32 1.442695, %v5667_v57  ;;  %v5692_v62 = vmul.f32 1.442695, %v5671_v36  ;;  %v5688_v16 = vmul.f32 1.442695, %v5669_v56  ;;  %v5681_v12 = vsub.f32 %v5635_v6, %v5665_v5 }
 0xe81   :  { %v5696_v13 = vmul.f32 1.442695, %v5673_v37  ;;  %v5700_v53 = vmul.f32 1.442695, %v5675_v50  ;;  %v5704_v36 = vmul.f32 1.442695, %v5677_v55 }
 0xe82   :  { %12934 = vpow2.f32 %v5684_v32  ;;  %v5708_v52 = vmul.f32 1.442695, %v5679_v0  ;;  %v5712_v24 = vmul.f32 1.442695, %v5681_v12 }
 0xe83   :  { %12936 = vpow2.f32 %v5706_v28 }
 0xe84   :  { %12938 = vpow2.f32 %v5710_v35 }
 0xe85   :  { %12940 = vpow2.f32 %v5692_v62 }
 0xe86   :  { %v15516_v39 = vpop.eup %12922  ;;  %12942 = vpow2.f32 %v5688_v16 }
 0xe87   :  { %v15518_v30 = vpop.eup %12924  ;;  %v5714_v41 = vsel %vm4384_vm15, %v15516_v39, 0.0  ;;  %12944 = vpow2.f32 %v5696_v13 }
 0xe88   :  { %v5715_v61 = vsel %vm4384_vm15, %v15518_v30, 0.0  ;;  %v12927_v21 = vpop.eup %12926  ;;  %12946 = vpow2.f32 %v5700_v53 }
 0xe89   :  { %v5716_v59 = vadd.f32 %v5715_v61, %v5714_v41  ;;  %v12929_v31 = vpop.eup %12928  ;;  %12948 = vpow2.f32 %v5704_v36  ;;  %v5719_v48 = vsel %vm4384_vm15, %v12927_v21, 0.0 }
 0xe8a   :  { %v5717_v19 = vsel %vm4384_vm15, %v12929_v31, 0.0  ;;  %v12931_v54 = vpop.eup %12930  ;;  %12950 = vpow2.f32 %v5708_v52 }
 0xe8b   :  { %v5718_v11 = vadd.f32 %v5717_v19, %v5716_v59  ;;  %v5721_v5 = vsel %vm4384_vm15, %v12931_v54, 0.0  ;;  %12952 = vpow2.f32 %v5712_v24 }
 0xe8c   :  { %v15527_v49 = vpop.eup %12932 }
 0xe8d   :  { %v5720_v2 = vadd.f32 %v5719_v48, %v5718_v11  ;;  %v5723_v32 = vsel %vm4384_vm15, %v15527_v49, 0.0 }
 0xe8f   :  { %v12935_v6 = vpop.eup %12934  ;;  %v5722_v23 = vadd.f32 %v5721_v5, %v5720_v2 }
 0xe90   :  { %v15530_v57 = vpop.eup %12936  ;;  %v5729_v35 = vsel %vm4384_vm15, %v12935_v6, 0.0 }
 0xe91   :  { %v15532_v15 = vpop.eup %12938  ;;  %v5724_v28 = vadd.f32 %v5723_v32, %v5722_v23  ;;  %v5725_v62 = vsel %vm4384_vm15, %v15530_v57, 0.0 }
 0xe92   :  { %v12941_v56 = vpop.eup %12940  ;;  %v5727_v13 = vsel %vm4384_vm15, %v15532_v15, 0.0 }
 0xe93   :  { %v12943_v37 = vpop.eup %12942  ;;  %v5726_v50 = vadd.f32 %v5725_v62, %v5724_v28  ;;  %v5732_v0 = vsel %vm4384_vm15, %v12941_v56, 0.0 }
 0xe94   :  { %v5730_v16 = vsel %vm4384_vm15, %v12943_v37, 0.0  ;;  %v12945_v55 = vpop.eup %12944 }
 0xe95   :  { %v5731_v41 = vadd.f32 %v5730_v16, %v5729_v35  ;;  %v5728_v61 = vadd.f32 %v5727_v13, %v5726_v50  ;;  %v15543_v53 = vpop.eup %12946  ;;  %v5734_v36 = vsel %vm4384_vm15, %v12945_v55, 0.0 }
 0xe96   :  { %v15546_v59 = vpop.eup %12948  ;;  %v5736_v19 = vsel %vm4384_vm15, %v15543_v53, 0.0 }
 0xe97   :  { %v5733_v12 = vadd.f32 %v5732_v0, %v5731_v41  ;;  %12954 = vrcp.f32 %v5728_v61  ;;  %v15550_v24 = vpop.eup %12950  ;;  %v5738_v48 = vsel %vm4384_vm15, %v15546_v59, 0.0  ;;  %v12266_v61 = vld [vmem:[#allocation11 + $0xa8] ss:$12 sps:$4 sm:$0xff]   ;;  %v12268_v0 = vld [vmem:[#allocation11 + $0xac] ss:$12 sps:$4 sm:$0xff]  }
 0xe98   :  { %v15554_v2 = vpop.eup %12952  ;;  %v5740_v23 = vsel %vm4384_vm15, %v15550_v24, 0.0  ;;  %6056 = vmatprep.subr.bf16.mxu1 %v12268_v0 }
 0xe99   :  { %v5735_v52 = vadd.f32 %v5734_v36, %v5733_v12  ;;  %v5742_v28 = vsel %vm4384_vm15, %v15554_v2, 0.0  ;;  %v12269_v12 = vld [vmem:[#allocation11 + $0xb0] ss:$12 sps:$4 sm:$0xff]   ;;  %6057 = vmatpush1.bf16.msra.mxu1 %v12266_v61  ;;  %v12288_v61 = vld [vmem:[#allocation11 + $0x34] ss:$12 sps:$4 sm:$0xff]  }
 0xe9a   :  { %11711 = vmatpush3.bf16.msra.mxu0 %v12269_v12  ;;  %v12293_v12 = vld [vmem:[#allocation11 + $0x20] ss:$12 sps:$4 sm:$0xff]  }
 0xe9b   :  { %v5737_v11 = vadd.f32 %v5736_v19, %v5735_v52  ;;  %v12273_v52 = vld [vmem:[#allocation11 + $0x98] ss:$12 sps:$4 sm:$0xff]  }
 0xe9d   :  { %v5739_v5 = vadd.f32 %v5738_v48, %v5737_v11  ;;  %v12274_v48 = vld [vmem:[#allocation11 + $0x78] ss:$12 sps:$4 sm:$0xff]  }
 0xe9f   :  { %v5741_v32 = vadd.f32 %v5740_v23, %v5739_v5  ;;  %v12276_v5 = vld [vmem:[#allocation11 + $0x7c] ss:$12 sps:$4 sm:$0xff]   ;;  %v12277_v23 = vld [vmem:[#allocation11 + $0x80] ss:$12 sps:$4 sm:$0xff]  }
 0xea1   :  { %v5743_v35 = vadd.f32 %v5742_v28, %v5741_v32 }
 0xea3   :  { %12956 = vrcp.f32 %v5743_v35  ;;  %v12281_v35 = vld [vmem:[#allocation11 + $0x68] ss:$12 sps:$4 sm:$0xff]  }
 0xea4   :  { %v12955_v62 = vpop.eup %12954 }
 0xea5   :  { %v5750_v50 = vmul.f32 %v12955_v62, %v12929_v31  ;;  %v5746_v16 = vmul.f32 %v12955_v62, %v15516_v39  ;;  %v5752_v13 = vmul.f32 %v12955_v62, %v12927_v21  ;;  %v5748_v41 = vmul.f32 %v12955_v62, %v15518_v30  ;;  %v15565_v31 = vld [vmem:[%s16583_s19] sm:$0xff]  ;;  %v12270_v21 = vld [vmem:[#allocation11 + $0x90] ss:$12 sps:$4 sm:$0xff]  }
 0xea6   :  { %v5754_v36 = vmul.f32 %v12955_v62, %v12931_v54  ;;  %11712 = vmatprep.subr.bf16.mxu0 %v15565_v31  ;;  %v12272_v30 = vld [vmem:[#allocation11 + $0x94] ss:$12 sps:$4 sm:$0xff]   ;;  %v5756_v32 = vmul.f32 %v12955_v62, %v15527_v49 }
 0xea7   :  { %5800 = vperm.xlu0 %11882, %v5750_v50   ;;  %5780 = vperm.xlu1 %11883, %v5746_v16   ;;  %v12282_v49 = vld [vmem:[#allocation11 + $0x48] ss:$12 sps:$4 sm:$0xff]   ;;  %v12284_v16 = vld [vmem:[#allocation11 + $0x4c] ss:$12 sps:$4 sm:$0xff]  }
 0xea8   :  { %6058 = vmatprep.subr.bf16.mxu1 %v12272_v30  ;;  %11713 = vmatpush3.bf16.msra.mxu0 %v12273_v52  ;;  %v12297_v30 = vld [vmem:[#allocation11 + $0x8] ss:$12 sps:$4 sm:$0xff]  }
 0xea9   :  { %6059 = vmatpush1.bf16.msra.mxu1 %v12270_v21  ;;  %11714 = vmatprep.subr.bf16.mxu0 %v15565_v31  ;;  %v12296_v21 = vld [vmem:[#allocation11 + $0x4] ss:$12 sps:$4 sm:$0xff]  }
 0xeaa   :  { %6060 = vmatprep.subr.bf16.mxu1 %v12276_v5 }
 0xeab   :  { %5810 = vperm.xlu0 %11882, %v5752_v13   ;;  %5790 = vperm.xlu1 %11883, %v5748_v41   ;;  %v5760_v13 = vmul.f32 %v12955_v62, %v15532_v15  ;;  %v12286_v41 = vld [vmem:[#allocation11 + $0x30] ss:$12 sps:$4 sm:$0xff]   ;;  %v12290_v15 = vld [vmem:[#allocation11 + $0x18] ss:$12 sps:$4 sm:$0xff]  }
 0xeac   :  { %11715 = vmatpush3.bf16.msra.mxu0 %v12277_v23 }
 0xead   :  { %6061 = vmatpush1.bf16.msra.mxu1 %v12274_v48  ;;  %11716 = vmatprep.subr.bf16.mxu0 %v15565_v31 }
 0xeaf   :  { %5820 = vperm.xlu0 %11882, %v5754_v36   ;;  %v12294_v36 = vld [vmem:[#allocation11] ss:$12 sps:$4 sm:$0xff]  }
 0xeb0   :  { %v12957_v39 = vpop.eup %12956  ;;  %11717 = vmatpush3.bf16.msra.mxu0 %v12281_v35 }
 0xeb1   :  { %v5749_v19 = vmul.f32 %v12957_v39, %v12943_v37  ;;  %v5747_v11 = vmul.f32 %v12957_v39, %v12935_v6  ;;  %v5751_v54 = vmul.f32 %v12957_v39, %v12941_v56  ;;  %v5753_v28 = vmul.f32 %v12957_v39, %v12945_v55  ;;  %v12278_v6 = vld [vmem:[#allocation11 + $0x60] ss:$12 sps:$4 sm:$0xff]   ;;  %v12280_v37 = vld [vmem:[#allocation11 + $0x64] ss:$12 sps:$4 sm:$0xff]   ;;  %11718 = vmatprep.subr.bf16.mxu0 %v15565_v31 }
 0xeb2   :  { %v5758_v56 = vmul.f32 %v12955_v62, %v15530_v57  ;;  %6062 = vmatprep.subr.bf16.mxu1 %v12280_v37  ;;  %v5755_v50 = vmul.f32 %v12957_v39, %v15543_v53  ;;  %v12285_v55 = vld [vmem:[#allocation11 + $0x50] ss:$12 sps:$4 sm:$0xff]   ;;  %v5757_v57 = vmul.f32 %v12957_v39, %v15546_v59  ;;  %v12289_v53 = vld [vmem:[#allocation11 + $0x38] ss:$12 sps:$4 sm:$0xff]   ;;  %v5759_v0 = vmul.f32 %v12957_v39, %v15550_v24 }
 0xeb3   :  { %5795 = vperm.xlu1 %11883, %v5749_v19   ;;  %5785 = vperm.xlu0 %11882, %v5747_v11   ;;  %v12292_v62 = vld [vmem:[#allocation11 + $0x1c] ss:$12 sps:$4 sm:$0xff]   ;;  %v5761_v59 = vmul.f32 %v12957_v39, %v15554_v2 }
 0xeb4   :  { %6063 = vmatpush1.bf16.msra.mxu1 %v12278_v6  ;;  %11719 = vmatpush3.bf16.msra.mxu0 %v12285_v55 }
 0xeb5   :  { %6064 = vmatprep.subr.bf16.mxu1 %v12284_v16  ;;  %11720 = vmatprep.subr.bf16.mxu0 %v15565_v31 }
 0xeb7   :  { %5805 = vperm.xlu1 %11883, %v5751_v54   ;;  %5830 = vperm.xlu0 %11882, %v5756_v32  }
 0xeb8   :  { %6065 = vmatpush1.bf16.msra.mxu1 %v12282_v49  ;;  %11721 = vmatpush3.bf16.msra.mxu0 %v12289_v53 }
 0xeb9   :  { %6066 = vmatprep.subr.bf16.mxu1 %v12288_v61  ;;  %11722 = vmatprep.subr.bf16.mxu0 %v15565_v31 }
 0xebb   :  { %5815 = vperm.xlu1 %11883, %v5753_v28   ;;  %5840 = vperm.xlu0 %11882, %v5758_v56  }
 0xebc   :  { %6067 = vmatpush1.bf16.msra.mxu1 %v12286_v41  ;;  %11723 = vmatpush3.bf16.msra.mxu0 %v12293_v12 }
 0xebd   :  { %6068 = vmatprep.subr.bf16.mxu1 %v12292_v62  ;;  %11724 = vmatprep.subr.bf16.mxu0 %v15565_v31 }
 0xebf   :  { %5825 = vperm.xlu1 %11883, %v5755_v50   ;;  %5850 = vperm.xlu0 %11882, %v5760_v13  }
 0xec0   :  { %6069 = vmatpush1.bf16.msra.mxu1 %v12290_v15  ;;  %11725 = vmatpush3.bf16.msra.mxu0 %v12297_v30 }
 0xec1   :  { %6070 = vmatprep.subr.bf16.mxu1 %v12296_v21  ;;  %11730 = vmatprep.subr.bf16.mxu0 %v15565_v31 }
 0xec3   :  { %5835 = vperm.xlu1 %11883, %v5757_v57  }
 0xec4   :  { %6071 = vmatpush1.bf16.msra.mxu1 %v12294_v36 }
 0xec7   :  { %5845 = vperm.xlu1 %11883, %v5759_v0  }
 0xecb   :  { %5855 = vperm.xlu1 %11883, %v5761_v59  }
 0xf22   :  { %v5801_v24 = vpop.permute.xlu0 %5800  ;;  %v5781_v52 = vpop.permute.xlu1 %5780 }
 0xf23   :  { %v5858_v23 = vmul.f32 %v5781_v52, %v14206_v3  ;;  %v5862_v56 = vmul.f32 %v5801_v24, %v15197_v4 }
 0xf26   :  { %v5811_v19 = vpop.permute.xlu0 %5810  ;;  %v5791_v11 = vpop.permute.xlu1 %5790 }
 0xf27   :  { %v5860_v39 = vmul.f32 %v5791_v11, %v15183_v7  ;;  %v5864_v57 = vmul.f32 %v5811_v19, %v15209_v10 }
 0xf29   :  { %v5874_v37 = vadd.f32 %v5860_v39, %v5858_v23 }
 0xf2a   :  { %v5821_v54 = vpop.permute.xlu0 %5820 }
 0xf2b   :  { %v5875_v16 = vadd.f32 %v5874_v37, %v5862_v56  ;;  %v5866_v62 = vmul.f32 %v5821_v54, %v15227_v47  ;;  %v12298_v37 = vld [vmem:[#allocation13 + $0xb8] sm:$0xff]   ;;  %v12299_v56 = vld [vmem:[#allocation13 + $0xb0] sm:$0xff]  }
 0xf2d   :  { %v5876_v0 = vadd.f32 %v5875_v16, %v5864_v57  ;;  %v12302_v16 = vld [vmem:[#allocation13 + $0x98] sm:$0xff]   ;;  %v12305_v57 = vld [vmem:[#allocation13 + $0x80] sm:$0xff]  }
 0xf2e   :  { %v5796_v48 = vpop.permute.xlu1 %5795  ;;  %v5786_v5 = vpop.permute.xlu0 %5785 }
 0xf2f   :  { %v5859_v32 = vmul.f32 %v5786_v5, %v14216_v17  ;;  %v5861_v35 = vmul.f32 %v5796_v48, %v15191_v18  ;;  %v5877_v24 = vadd.f32 %v5876_v0, %v5866_v62  ;;  %v12308_v0 = vld [vmem:[%s16576_s12 + $0xe8] ss:$16 sps:$4 sm:$0xff]   ;;  %v12312_v62 = vld [vmem:[#allocation13 + $0x30] sm:$0xff]  }
 0xf31   :  { %v5881_v50 = vadd.f32 %v5861_v35, %v5859_v32 }
 0xf32   :  { %v5806_v2 = vpop.permute.xlu1 %5805  ;;  %v5831_v28 = vpop.permute.xlu0 %5830 }
 0xf33   :  { %v5863_v55 = vmul.f32 %v5806_v2, %v15203_v26  ;;  %v5868_v12 = vmul.f32 %v5831_v28, %v15232_v33 }
 0xf35   :  { %v5882_v41 = vadd.f32 %v5881_v50, %v5863_v55  ;;  %v5878_v48 = vadd.f32 %v5877_v24, %v5868_v12  ;;  %v12300_v50 = vld [vmem:[#allocation13 + $0xa8] sm:$0xff]   ;;  %v12303_v55 = vld [vmem:[#allocation13 + $0x90] sm:$0xff]  }
 0xf36   :  { %v5816_v6 = vpop.permute.xlu1 %5815  ;;  %v5841_v13 = vpop.permute.xlu0 %5840  ;;  %v12315_v12 = vld [vmem:[%s16576_s12 + $0xcc] ss:$16 sps:$4 sm:$0xff]   ;;  %v12318_v24 = vld [vmem:[%s16576_s12 + $0xa8] ss:$16 sps:$4 sm:$0xff]  }
 0xf37   :  { %v5865_v61 = vmul.f32 %v5816_v6, %v15214_v29  ;;  %v5870_v52 = vmul.f32 %v5841_v13, %v15245_v43  ;;  %v12304_v13 = vld [vmem:[#allocation13 + $0x88] sm:$0xff]  }
 0xf39   :  { %v5883_v59 = vadd.f32 %v5882_v41, %v5865_v61  ;;  %v5879_v23 = vadd.f32 %v5878_v48, %v5870_v52  ;;  %v12306_v41 = vld [vmem:[#allocation13 + $0x78] sm:$0xff]   ;;  %v12321_v52 = vld [vmem:[#allocation13 + $0x60] sm:$0xff]  }
 0xf3a   :  { %v5826_v49 = vpop.permute.xlu1 %5825  ;;  %v5851_v21 = vpop.permute.xlu0 %5850  ;;  %v12307_v61 = vld [vmem:[#allocation13 + $0x38] sm:$0xff]   ;;  %11239 = vmatprep.subr.bf16.mxu1 %v12306_v41  ;;  %v12349_v41 = vld [vmem:[%s16576_s12 + $0xe4] ss:$16 sps:$4 sm:$0xff]  }
 0xf3b   :  { %v5867_v15 = vmul.f32 %v5826_v49, %v15221_v58  ;;  %v5872_v5 = vmul.f32 %v5851_v21, %v15257_v60  ;;  %v12301_v49 = vld [vmem:[#allocation13 + $0xa0] sm:$0xff]   ;;  %v12317_v21 = vld [vmem:[#allocation13 + $0x28] sm:$0xff]  }
 0xf3c   :  { %v12325_v48 = vld [vmem:[%s16576_s12 + $0x8c] ss:$16 sps:$4 sm:$0xff]  }
 0xf3d   :  { %v5884_v19 = vadd.f32 %v5883_v59, %v5867_v15  ;;  %v5880_v28 = vadd.f32 %v5879_v23, %v5872_v5  ;;  %v12311_v15 = vld [vmem:[#allocation13 + $0x70] sm:$0xff]   ;;  %v12313_v59 = vld [vmem:[%s16576_s12 + $0xc8] ss:$16 sps:$4 sm:$0xff]  }
 0xf3e   :  { %v5836_v53 = vpop.permute.xlu1 %5835  ;;  %v12326_v5 = vld [vmem:[#allocation13 + $0x58] sm:$0xff]  }
 0xf3f   :  { %v5869_v36 = vmul.f32 %v5836_v53, %v15237_v20  ;;  %v12310_v53 = vld [vmem:[%s16576_s12 + $0xec] ss:$16 sps:$4 sm:$0xff]   ;;  %v12328_v23 = vld [vmem:[%s16576_s12 + $0x68] ss:$16 sps:$4 sm:$0xff]  }
 0xf41   :  { %v5885_v2 = vadd.f32 %v5884_v19, %v5869_v36  ;;  %v12316_v36 = vld [vmem:[#allocation13 + $0x68] sm:$0xff]   ;;  %v12322_v19 = vld [vmem:[#allocation13 + $0x20] sm:$0xff]  }
 0xf42   :  { %v5846_v30 = vpop.permute.xlu1 %5845 }
 0xf43   :  { %v5871_v11 = vmul.f32 %v5846_v30, %v15250_v40  ;;  %v12320_v30 = vld [vmem:[%s16576_s12 + $0xac] ss:$16 sps:$4 sm:$0xff]  }
 0xf45   :  { %v5886_v54 = vadd.f32 %v5885_v2, %v5871_v11  ;;  %v12323_v11 = vld [vmem:[%s16576_s12 + $0x88] ss:$16 sps:$4 sm:$0xff]   ;;  %v12330_v2 = vld [vmem:[%s16576_s12 + $0x6c] ss:$16 sps:$4 sm:$0xff]  }
 0xf46   :  { %v5856_v39 = vpop.permute.xlu1 %5855 }
 0xf47   :  { %v5873_v32 = vmul.f32 %v5856_v39, %v15263_v46  ;;  %v12327_v39 = vld [vmem:[#allocation13 + $0x18] sm:$0xff]  }
 0xf49   :  { %v5887_v6 = vadd.f32 %v5886_v54, %v5873_v32  ;;  %v12331_v54 = vld [vmem:[#allocation13 + $0x50] sm:$0xff]   ;;  %v12335_v32 = vld [vmem:[%s16576_s12 + $0x4c] ss:$16 sps:$4 sm:$0xff]  }
 0xf4b   :  { %v5888_v35 = vpack.c.bf16 %v5887_v6, %v5880_v28  ;;  %v12346_v28 = vld [vmem:[%s16686_s26 + $0x8] sm:$0xff]   ;;  %v12332_v6 = vld [vmem:[#allocation13 + $0x10] sm:$0xff]  }
 0xf4d   :  { %6089 = vmatmul.mubr.bf16.vlgmr.msra.gmra.mxu1 %v5888_v35  ;;  %11727 = vmatmul.mubr.bf16.vlgmr.msra.gmra.mxu0 %v5888_v35 }
 0xf4e   :  { %11731 = vmatpush3.bf16.msra.mxu0 %v12298_v37  ;;  %11746 = vmatprep.mubr.msk.bf16.mxu0 %vm16805_vm9, %v15565_v31  ;;  %v12333_v37 = vld [vmem:[%s16576_s12 + $0x48] ss:$16 sps:$4 sm:$0xff]  }
 0xf4f   :  { %11732 = vmatprep.subr.bf16.mxu0 %v15565_v31  ;;  %11240 = vmatpush3.bf16.msra.mxu1 %v12307_v61  ;;  %v5508_v61 = vpop.f32.mrf.mxu0 }
 0xf50   :  { %11241 = vmatprep.subr.bf16.mxu1 %v12311_v15  ;;  %6435 = vmatprep.mubr.bf16.mxu1 %v12346_v28 }
 0xf52   :  { %11733 = vmatpush3.bf16.msra.mxu0 %v12299_v56  ;;  %v12340_v56 = vld [vmem:[%s16576_s12 + $0x2c] ss:$16 sps:$4 sm:$0xff]  }
 0xf53   :  { %11734 = vmatprep.subr.bf16.mxu0 %v15565_v31  ;;  %11242 = vmatpush3.bf16.msra.mxu1 %v12312_v62  ;;  %v5471_v62 = vpop.f32.mrf.mxu1 }
 0xf54   :  { %11243 = vmatprep.subr.bf16.mxu1 %v12316_v36  ;;  %v16859_v36 = vld [vmem:[#allocation30_spill] sm:$0xff] }
 0xf56   :  { %11735 = vmatpush3.bf16.msra.mxu0 %v12300_v50  ;;  %v12337_v50 = vld [vmem:[#allocation13 + $0x8] sm:$0xff]  }
 0xf57   :  { %11736 = vmatprep.subr.bf16.mxu0 %v15565_v31  ;;  %11244 = vmatpush3.bf16.msra.mxu1 %v12317_v21 }
 0xf58   :  { %11245 = vmatprep.subr.bf16.mxu1 %v12321_v52 }
 0xf5a   :  { %11737 = vmatpush3.bf16.msra.mxu0 %v12301_v49  ;;  %v12338_v49 = vld [vmem:[%s16576_s12 + $0x28] ss:$16 sps:$4 sm:$0xff]  }
 0xf5b   :  { %11738 = vmatprep.subr.bf16.mxu0 %v15565_v31  ;;  %11246 = vmatpush3.bf16.msra.mxu1 %v12322_v19 }
 0xf5c   :  { %11247 = vmatprep.subr.bf16.mxu1 %v12326_v5  ;;  %v16860_v5 = vld [vmem:[#allocation32_spill] sm:$0xff] }
 0xf5e   :  { %11739 = vmatpush3.bf16.msra.mxu0 %v12302_v16  ;;  %v12341_v16 = vld [vmem:[#allocation13 + $0x40] sm:$0xff]  }
 0xf5f   :  { %11740 = vmatprep.subr.bf16.mxu0 %v15565_v31  ;;  %11248 = vmatpush3.bf16.msra.mxu1 %v12327_v39  ;;  %v16861_v39 = vld [vmem:[#allocation34_spill] sm:$0xff] }
 0xf60   :  { %11249 = vmatprep.subr.bf16.mxu1 %v12331_v54 }
 0xf62   :  { %11741 = vmatpush3.bf16.msra.mxu0 %v12303_v55  ;;  %v12345_v55 = vld [vmem:[%s16576_s12 + $0xc] ss:$16 sps:$4 sm:$0xff]  }
 0xf63   :  { %11742 = vmatprep.subr.bf16.mxu0 %v15565_v31  ;;  %11250 = vmatpush3.bf16.msra.mxu1 %v12332_v6  ;;  %v16862_v6 = vld [vmem:[#allocation36_spill] sm:$0xff] }
 0xf66   :  { %11743 = vmatpush3.bf16.msra.mxu0 %v12304_v13  ;;  %v12342_v13 = vld [vmem:[#allocation13] sm:$0xff]  }
 0xf67   :  { %11744 = vmatprep.subr.bf16.mxu0 %v15565_v31 }
 0xf6a   :  { %11745 = vmatpush3.bf16.msra.mxu0 %v12305_v57  ;;  %v12343_v57 = vld [vmem:[%s16576_s12 + $0x8] ss:$16 sps:$4 sm:$0xff]  }
 0xf6b   :  { %6726 = vmatprep.subr.bf16.mxu0 %v12310_v53  ;;  %v5510_v53 = vpop.f32.mrf.mxu0 }
 0xf6d   :  { %11747 = vmatmul.mubr.bf16.vlgmr.msra.gmra.mxu0 %v5888_v35  ;;  %v12336_v35 = vld [vmem:[#allocation13 + $0x48] sm:$0xff]  }
 0xf6e   :  { %6758 = vmatprep.mubr.bf16.mxu0 %v16806_v8  ;;  %6727 = vmatpush1.bf16.msra.mxu0 %v12308_v0  ;;  %v5512_v0 = vpop.f32.mrf.mxu0 }
 0xf6f   :  { %6728 = vmatprep.subr.bf16.mxu0 %v12315_v12  ;;  %11251 = vmatprep.subr.bf16.mxu1 %v12336_v35 }
 0xf70   :  { %11252 = vmatpush3.bf16.msra.mxu1 %v12337_v50  ;;  %v5514_v15 = vpop.f32.mrf.mxu0 }
 0xf71   :  { %11253 = vmatprep.subr.bf16.mxu1 %v12341_v16 }
 0xf72   :  { %6729 = vmatpush1.bf16.msra.mxu0 %v12313_v59 }
 0xf73   :  { %6730 = vmatprep.subr.bf16.mxu0 %v12320_v30 }
 0xf74   :  { %11254 = vmatpush3.bf16.msra.mxu1 %v12342_v13 }
 0xf75   :  { %6683 = vmatprep.subr.bf16.mxu1 %v12349_v41 }
 0xf76   :  { %6731 = vmatpush1.bf16.msra.mxu0 %v12318_v24 }
 0xf77   :  { %6732 = vmatprep.subr.bf16.mxu0 %v12325_v48 }
 0xf7a   :  { %6733 = vmatpush1.bf16.msra.mxu0 %v12323_v11 }
 0xf7b   :  { %6734 = vmatprep.subr.bf16.mxu0 %v12330_v2 }
 0xf7e   :  { %6735 = vmatpush1.bf16.msra.mxu0 %v12328_v23 }
 0xf7f   :  { %6736 = vmatprep.subr.bf16.mxu0 %v12335_v32 }
 0xf82   :  { %6737 = vmatpush1.bf16.msra.mxu0 %v12333_v37 }
 0xf83   :  { %6738 = vmatprep.subr.bf16.mxu0 %v12340_v56 }
 0xf86   :  { %6739 = vmatpush1.bf16.msra.mxu0 %v12338_v49 }
 0xf87   :  { %6740 = vmatprep.subr.bf16.mxu0 %v12345_v55 }
 0xf8a   :  { %6741 = vmatpush1.bf16.msra.mxu0 %v12343_v57 }
 0xf8b   :  { %11750 = vmatprep.subr.bf16.mxu0 %v15565_v31 }
0x100d   :  { %v6090_v12 = vpop.f32.mrf.mxu1  ;;  %v6133_v59 = vpop.f32.mrf.mxu0 }
0x100e   :  { %v6140_v21 = vadd.f32 %v6090_v12, %v16859_v36 }
0x100f   :  { %v6092_v30 = vpop.f32.mrf.mxu1  ;;  %v11728_v24 = vpop.f32.mrf.mxu0 }
0x1010   :  { %v6146_v52 = vadd.f32 %v6140_v21, %v15417_v45  ;;  %v6141_v2 = vadd.f32 %v6092_v30, %v16860_v5 }
0x1011   :  { %v6094_v19 = vpop.f32.mrf.mxu1  ;;  %v6136_v11 = vpop.f32.mrf.mxu0 }
0x1012   :  { %v10731_v48 = vmul.f32 -1.442695, %v6146_v52  ;;  %v6143_v23 = vadd.f32 %v6094_v19, %v16861_v39  ;;  %v6160_v35 = vadd.f32 %v6141_v2, %v5508_v61  ;;  %v16863_v19 = vld [vmem:[#allocation59_spill] sm:$0xff] }
0x1013   :  { %v6096_v54 = vpop.f32.mrf.mxu1  ;;  %v11729_v32 = vpop.f32.mrf.mxu0 }
0x1014   :  { %12958 = vpow2.f32 %v10731_v48  ;;  %v6147_v28 = vadd.f32 %v6143_v23, %v5471_v62  ;;  %v6144_v37 = vadd.f32 %v6096_v54, %v16862_v6  ;;  %v10733_v49 = vmul.f32 -1.442695, %v6160_v35  ;;  %v10735_v62 = vld [vmem:[%s16580_s16] ss:$0 sm:$0xff]  ;;  %v16864_v32 = vld [vmem:[#allocation60_spill] sm:$0xff] }
0x1015   :  { %v6181_v21 = vadd.f32 %v10735_v62, %v5510_v53  ;;  %v6142_v48 = vadd.f32 %v6133_v59, %v16863_v19  ;;  %v6182_v39 = vadd.f32 %v10735_v62, %v5514_v15  ;;  %v12355_v62 = vld [vmem:[%s16576_s12 + $0xa4] ss:$16 sps:$4 sm:$0xff]  }
0x1016   :  { %v10732_v56 = vmul.f32 -1.442695, %v6147_v28  ;;  %v6161_v50 = vadd.f32 %v6144_v37, %v5512_v0  ;;  %v6145_v28 = vadd.f32 %v6136_v11, %v16864_v32  ;;  %v12347_v11 = vld [vmem:[%s16576_s12 + $0xe0] ss:$16 sps:$4 sm:$0xff]   ;;  %v12367_v19 = vld [vmem:[%s16576_s12 + $0x24] ss:$16 sps:$4 sm:$0xff]  }
0x1018   :  { %12960 = vpow2.f32 %v10732_v56  ;;  %v10734_v16 = vmul.f32 -1.442695, %v6161_v50 }
0x1019   :  { %12962 = vpow2.f32 %v10733_v49 }
0x101a   :  { %12964 = vpow2.f32 %v10734_v16 }
0x1021   :  { %v12959_v45 = vpop.eup %12958 }
0x1022   :  { %v6154_v55 = vadd.f32 1.0, %v12959_v45 }
0x1024   :  { %12966 = vrcp.f32 %v6154_v55 }
0x1025   :  { %v12961_v13 = vpop.eup %12960 }
0x1026   :  { %v6155_v57 = vadd.f32 1.0, %v12961_v13  ;;  %v12963_v41 = vpop.eup %12962 }
0x1027   :  { %v12965_v61 = vpop.eup %12964  ;;  %v6168_v36 = vadd.f32 1.0, %v12963_v41 }
0x1028   :  { %12968 = vrcp.f32 %v6155_v57  ;;  %v6169_v24 = vadd.f32 1.0, %v12965_v61  ;;  %v12353_v61 = vld [vmem:[%s16576_s12 + $0xa0] ss:$16 sps:$4 sm:$0xff]  }
0x1029   :  { %12970 = vrcp.f32 %v6168_v36  ;;  %v12358_v36 = vld [vmem:[%s16576_s12 + $0x84] ss:$16 sps:$4 sm:$0xff]  }
0x102a   :  { %12972 = vrcp.f32 %v6169_v24  ;;  %v12362_v24 = vld [vmem:[%s16576_s12 + $0x40] ss:$16 sps:$4 sm:$0xff]  }
0x102d   :  { %v15671_v12 = vpop.f32.mrf.mxu0 }
0x102f   :  { %v11748_v0 = vpop.f32.mrf.mxu0 }
0x1030   :  { %v12356_v0 = vld [vmem:[%s16576_s12 + $0x80] ss:$16 sps:$4 sm:$0xff]  }
0x1031   :  { %v12967_v30 = vpop.eup %12966  ;;  %v15673_v52 = vpop.f32.mrf.mxu0 }
0x1032   :  { %v6183_v5 = vmul.f32 %v12967_v30, %v6181_v21  ;;  %v12359_v21 = vld [vmem:[%s16576_s12 + $0x60] ss:$16 sps:$4 sm:$0xff]   ;;  %v12364_v30 = vld [vmem:[%s16576_s12 + $0x44] ss:$16 sps:$4 sm:$0xff]  }
0x1033   :  { %v11749_v2 = vpop.f32.mrf.mxu0 }
0x1034   :  { %v6185_v23 = vadd.f32 %v6183_v5, %v6142_v48  ;;  %v12365_v48 = vld [vmem:[%s16576_s12 + $0x20] ss:$16 sps:$4 sm:$0xff]   ;;  %v12370_v5 = vld [vmem:[%s16576_s12 + $0x4] ss:$16 sps:$4 sm:$0xff]  }
0x1035   :  { %v12969_v54 = vpop.eup %12968  ;;  %v12368_v2 = vld [vmem:[%s16576_s12] ss:$16 sps:$4 sm:$0xff]  }
0x1036   :  { %12974 = vtanh.f32 %v6185_v23  ;;  %v6184_v6 = vmul.f32 %v12969_v54, %v6182_v39  ;;  %v12971_v53 = vpop.eup %12970  ;;  %v10737_v23 = vld [vmem:[%s16582_s18] ss:$0 sm:$0xff] }
0x1037   :  { %v12973_v35 = vpop.eup %12972  ;;  %v6189_v56 = vsub.f32 1.0, %v12971_v53  ;;  %v6193_v59 = vmul.f32 %v12971_v53, %v15347_v22  ;;  %v12352_v22 = vld [vmem:[%s16576_s12 + $0xc4] ss:$16 sps:$4 sm:$0xff]  }
0x1038   :  { %v6186_v37 = vadd.f32 %v6184_v6, %v6145_v28  ;;  %v6190_v16 = vsub.f32 1.0, %v12973_v35  ;;  %v6194_v13 = vmul.f32 %v12973_v35, %v15350_v42  ;;  %v12350_v42 = vld [vmem:[%s16576_s12 + $0xc0] ss:$16 sps:$4 sm:$0xff]  }
0x103a   :  { %12976 = vtanh.f32 %v6186_v37 }
0x1043   :  { %v12975_v50 = vpop.eup %12974 }
0x1044   :  { %v6191_v49 = vmul.f32 %v12975_v50, %v6189_v56 }
0x1046   :  { %v15678_v45 = vadd.f32 %v6193_v59, %v6191_v49 }
0x1047   :  { %v12977_v15 = vpop.eup %12976 }
0x1048   :  { %v6192_v55 = vmul.f32 %v12977_v15, %v6190_v16 }
0x104a   :  { %v15681_v57 = vadd.f32 %v6194_v13, %v6192_v55 }
0x104c   :  { %v6197_v41 = vpack.c.bf16 %v15681_v57, %v15678_v45 }
0x104e   :  { %6436 = vmatmul.mubr.bf16.vlgmr.msra.gmra.mxu1 %v6197_v41  ;;  %6759 = vmatmul.mubr.bf16.vlgmr.msra.gmra.mxu0 %v6197_v41 }
0x104f   :  { %6684 = vmatpush1.bf16.msra.mxu1 %v12347_v11  ;;  %6715 = vmatprep.mubr.bf16.mxu1 %v16806_v8 }
0x1050   :  { %6685 = vmatprep.subr.bf16.mxu1 %v12352_v22  ;;  %11766 = vmatprep.mubr.msk.bf16.mxu0 %vm16805_vm9, %v15565_v31  ;;  %v12361_v31 = vld [vmem:[%s16576_s12 + $0x64] ss:$16 sps:$4 sm:$0xff]  }
0x1053   :  { %6686 = vmatpush1.bf16.msra.mxu1 %v12350_v42 }
0x1054   :  { %6687 = vmatprep.subr.bf16.mxu1 %v12355_v62  ;;  %v15759_v62 = vld [vmem:[%s16575_s11] ss:$0 sm:$0xff] }
0x1057   :  { %6688 = vmatpush1.bf16.msra.mxu1 %v12353_v61 }
0x1058   :  { %6689 = vmatprep.subr.bf16.mxu1 %v12358_v36 }
0x105b   :  { %6690 = vmatpush1.bf16.msra.mxu1 %v12356_v0 }
0x105c   :  { %6691 = vmatprep.subr.bf16.mxu1 %v12361_v31 }
0x105f   :  { %6692 = vmatpush1.bf16.msra.mxu1 %v12359_v21  ;;  %v16865_v21 = vld [vmem:[#allocation67_spill] sm:$0xff] }
0x1060   :  { %6693 = vmatprep.subr.bf16.mxu1 %v12364_v30 }
0x1063   :  { %6694 = vmatpush1.bf16.msra.mxu1 %v12362_v24 }
0x1064   :  { %6695 = vmatprep.subr.bf16.mxu1 %v12367_v19 }
0x1067   :  { %6696 = vmatpush1.bf16.msra.mxu1 %v12365_v48  ;;  %v16866_v48 = vld [vmem:[#allocation68_spill] sm:$0xff] }
0x1068   :  { %6697 = vmatprep.subr.bf16.mxu1 %v12370_v5 }
0x106b   :  { %6698 = vmatpush1.bf16.msra.mxu1 %v12368_v2 }
0x106e   :  { %6716 = vmatmul.mubr.bf16.vlgmr.msra.gmra.mxu1 %v6197_v41 }
0x106f   :  { %7340 = vmatprep.mubr.bf16.mxu1 %v16806_v8 }
0x110e   :  { %v11255_v39 = vpop.f32.mrf.mxu1 }
0x1110   :  { %v11256_v54 = vpop.f32.mrf.mxu1 }
0x1111   :  { %v11257_v32 = vadd.f32 %v11256_v54, %v11255_v39 }
0x1112   :  { %v11258_v28 = vpop.f32.mrf.mxu1 }
0x1113   :  { %v6438_v6 = vadd.f32 %v11257_v32, %v10737_v23 }
0x1114   :  { %v11259_v37 = vpop.f32.mrf.mxu1 }
0x1115   :  { %v6479_v53 = vadd.f32 %v15671_v12, %v6438_v6  ;;  %v11260_v35 = vadd.f32 %v11259_v37, %v11258_v28  ;;  %v16868_v6 = vld [vmem:[#allocation49_spill] sm:$0xff] }
0x1117   :  { %10762 = vst [vmem:[%s16583_s19 + $0x20] sm:$0xff] %v6479_v53  ;;  %v6441_v56 = vadd.f32 %v11260_v35, %v10737_v23  ;;  %v16867_v23 = vld [vmem:[#allocation45_spill] sm:$0xff] }
0x1119   :  { %v6482_v50 = vadd.f32 %v15673_v52, %v6441_v56 }
0x111b   :  { %10763 = vst [vmem:[%s16583_s19 + $0x28] sm:$0xff] %v6482_v50 }
0x112e   :  { %v6717_v49 = vpop.f32.mrf.mxu1 }
0x112f   :  { %v6789_v59 = vadd.f32 %v6717_v49, %v16817_v27  ;;  %v6785_v16 = vadd.f32 %v6717_v49, %v16818_v44  ;;  %v6791_v15 = vadd.f32 %v6717_v49, %v16819_v25  ;;  %v6787_v55 = vadd.f32 %v6717_v49, %v16820_v38 }
0x1130   :  { %v15748_v12 = vpop.f32.mrf.mxu1  ;;  %v6793_v52 = vadd.f32 %v6717_v49, %v16821_v9  ;;  %v6795_v41 = vadd.f32 %v6717_v49, %v16823_v34  ;;  %v6797_v42 = vadd.f32 %v6717_v49, %v16825_v51  ;;  %v6799_v54 = vadd.f32 %v6717_v49, %v16867_v23 }
0x1131   :  { %12978 = vtanh.f32 %v6789_v59  ;;  %v16869_v59 = vld [vmem:[#allocation47_spill] sm:$0xff] }
0x1132   :  { %v6721_v13 = vpop.f32.mrf.mxu1  ;;  %12980 = vtanh.f32 %v6785_v16 }
0x1133   :  { %12982 = vtanh.f32 %v6791_v15  ;;  %v6788_v11 = vadd.f32 %v6721_v13, %v16822_v14  ;;  %v6790_v22 = vadd.f32 %v6721_v13, %v16824_v63  ;;  %v6792_v61 = vadd.f32 %v6721_v13, %v16826_v1 }
0x1134   :  { %12984 = vtanh.f32 %v6787_v55  ;;  %v6786_v30 = vadd.f32 %v6721_v13, %v16865_v21  ;;  %v6794_v5 = vadd.f32 %v6721_v13, %v16866_v48  ;;  %v6796_v37 = vadd.f32 %v6721_v13, %v16868_v6 }
0x1135   :  { %12986 = vtanh.f32 %v6793_v52  ;;  %v6798_v16 = vadd.f32 %v6721_v13, %v16869_v59  ;;  %v16887_v59 = vld [vmem:[#allocation75_spill] sm:$0xff] }
0x1136   :  { %12988 = vtanh.f32 %v6788_v11  ;;  %v16870_v11 = vld [vmem:[#allocation51_spill] sm:$0xff] }
0x1137   :  { %12990 = vtanh.f32 %v6795_v41  ;;  %v6800_v41 = vadd.f32 %v6721_v13, %v16870_v11 }
0x1138   :  { %12992 = vtanh.f32 %v6790_v22 }
0x1139   :  { %12994 = vtanh.f32 %v6797_v42 }
0x113a   :  { %12996 = vtanh.f32 %v6792_v61 }
0x113b   :  { %12998 = vtanh.f32 %v6786_v30 }
0x113c   :  { %13000 = vtanh.f32 %v6794_v5 }
0x113d   :  { %13002 = vtanh.f32 %v6799_v54 }
0x113e   :  { %v12979_v36 = vpop.eup %12978  ;;  %13004 = vtanh.f32 %v6796_v37 }
0x113f   :  { %v12981_v0 = vpop.eup %12980  ;;  %v6828_v31 = vmul.f32 %v12979_v36, %v15759_v62  ;;  %13006 = vtanh.f32 %v6798_v16 }
0x1140   :  { %v12983_v24 = vpop.eup %12982  ;;  %v6824_v19 = vmul.f32 %v12981_v0, %v15759_v62  ;;  %13008 = vtanh.f32 %v6800_v41  ;;  %v16873_v41 = vld [vmem:[#allocation22_spill] sm:$0xff] }
0x1141   :  { %v12985_v2 = vpop.eup %12984  ;;  %6848 = vadd.xlane.f32.xlu1 %v6828_v31  ;;  %v6830_v39 = vmul.f32 %v12983_v24, %v15759_v62  ;;  %vm16874_vm4 = vcmp.gt.f32.partialorder %v16873_v41, 0.0 }
0x1142   :  { %6840 = vadd.xlane.f32.xlu0 %v6824_v19  ;;  %v12987_v32 = vpop.eup %12986  ;;  %v6826_v28 = vmul.f32 %v12985_v2, %v15759_v62 }
0x1143   :  { %v12989_v53 = vpop.eup %12988  ;;  %v6832_v35 = vmul.f32 %v12987_v32, %v15759_v62 }
0x1144   :  { %v12991_v56 = vpop.eup %12990  ;;  %v6827_v50 = vmul.f32 %v12989_v53, %v15759_v62 }
0x1145   :  { %6852 = vadd.xlane.f32.xlu1 %v6830_v39  ;;  %v12993_v15 = vpop.eup %12992  ;;  %v6834_v49 = vmul.f32 %v12991_v56, %v15759_v62 }
0x1146   :  { %6844 = vadd.xlane.f32.xlu0 %v6826_v28  ;;  %v12995_v55 = vpop.eup %12994  ;;  %v6829_v52 = vmul.f32 %v12993_v15, %v15759_v62 }
0x1147   :  { %v12997_v22 = vpop.eup %12996  ;;  %v6836_v42 = vmul.f32 %v12995_v55, %v15759_v62 }
0x1148   :  { %v12999_v61 = vpop.eup %12998  ;;  %v6831_v36 = vmul.f32 %v12997_v22, %v15759_v62 }
0x1149   :  { %6856 = vadd.xlane.f32.xlu1 %v6832_v35  ;;  %v13001_v0 = vpop.eup %13000  ;;  %v6825_v31 = vmul.f32 %v12999_v61, %v15759_v62 }
0x114a   :  { %6846 = vadd.xlane.f32.xlu0 %v6827_v50  ;;  %v13003_v30 = vpop.eup %13002  ;;  %v6833_v24 = vmul.f32 %v13001_v0, %v15759_v62 }
0x114b   :  { %v13005_v19 = vpop.eup %13004  ;;  %v6838_v13 = vmul.f32 %v13003_v30, %v15759_v62 }
0x114c   :  { %v6835_v5 = vmul.f32 %v13005_v19, %v15759_v62  ;;  %v13007_v2 = vpop.eup %13006 }
0x114d   :  { %6860 = vadd.xlane.f32.xlu1 %v6834_v49  ;;  %v6837_v39 = vmul.f32 %v13007_v2, %v15759_v62  ;;  %v13009_v54 = vpop.eup %13008  ;;  %v16871_v49 = vld [vmem:[#allocation20_spill] sm:$0xff] }
0x114e   :  { %6850 = vadd.xlane.f32.xlu0 %v6829_v52  ;;  %v6839_v32 = vmul.f32 %v13009_v54, %v15759_v62  ;;  %vm16872_vm14 = vcmp.gt.f32.partialorder %v16871_v49, 0.0  ;;  %v16877_v62 = vld [vmem:[#allocation70_spill] sm:$0xff] }
0x114f   :  { %vm16878_vm6 = vcmp.gt.f32.partialorder %v16877_v62, 0.0 }
0x1151   :  { %6864 = vadd.xlane.f32.xlu1 %v6836_v42  ;;  %v16875_v42 = vld [vmem:[#allocation69_spill] sm:$0xff] }
0x1152   :  { %6854 = vadd.xlane.f32.xlu0 %v6831_v36  ;;  %vm16876_vm5 = vcmp.gt.f32.partialorder %v16875_v42, 0.0 }
0x1155   :  { %6842 = vadd.xlane.f32.xlu1 %v6825_v31  ;;  %v16879_v31 = vld [vmem:[#allocation71_spill] sm:$0xff] }
0x1156   :  { %6858 = vadd.xlane.f32.xlu0 %v6833_v24  ;;  %vm16880_vm7 = vcmp.gt.f32.partialorder %v16879_v31, 0.0  ;;  %v16881_v24 = vld [vmem:[#allocation72_spill] sm:$0xff]  ;;  %v16885_v31 = vld [vmem:[#allocation74_spill] sm:$0xff] }
0x1157   :  { %vm16882_vm8 = vcmp.gt.f32.partialorder %v16881_v24, 0.0  ;;  %vm16886_vm11 = vcmp.gt.f32.partialorder %v16885_v31, 0.0 }
0x1159   :  { %6868 = vadd.xlane.f32.xlu1 %v6838_v13 }
0x115a   :  { %6862 = vadd.xlane.f32.xlu0 %v6835_v5 }
0x115e   :  { %6866 = vadd.xlane.f32.xlu0 %v6837_v39 }
0x1162   :  { %6870 = vadd.xlane.f32.xlu0 %v6839_v32  ;;  %v16883_v32 = vld [vmem:[#allocation73_spill] sm:$0xff] }
0x1163   :  { %vm16884_vm10 = vcmp.gt.f32.partialorder %v16883_v32, 0.0 }
0x11ca   :  { %v6849_v28 = vpop.xlane.xlu1 %6848 }
0x11cb   :  { %v6841_v37 = vpop.xlane.xlu0 %6840  ;;  %v6876_v55 = vsel %vm16872_vm14, %v6849_v28, -1e+10  ;;  %vm16888_vm14 = vcmp.gt.f32.partialorder %v16887_v59, 0.0 }
0x11cc   :  { %v6872_v22 = vsel %vm16874_vm4, %v6841_v37, -1e+10  ;;  %v6890_v13 = vsel %vm4384_vm15, %v6876_v55, -inf }
0x11cd   :  { %v6888_v5 = vsel %vm4384_vm15, %v6872_v22, -inf }
0x11ce   :  { %v6853_v53 = vpop.xlane.xlu1 %6852 }
0x11cf   :  { %v6845_v35 = vpop.xlane.xlu0 %6844  ;;  %v6878_v61 = vsel %vm16876_vm5, %v6853_v53, -1e+10 }
0x11d0   :  { %v6874_v36 = vsel %vm16878_vm6, %v6845_v35, -1e+10  ;;  %v6892_v2 = vsel %vm4384_vm15, %v6878_v61, -inf }
0x11d1   :  { %v6889_v39 = vsel %vm4384_vm15, %v6874_v36, -inf }
0x11d2   :  { %v6857_v56 = vpop.xlane.xlu1 %6856  ;;  %v6893_v24 = vmax.f32 %v6889_v39, %v6892_v2 }
0x11d3   :  { %v6847_v50 = vpop.xlane.xlu0 %6846  ;;  %v6880_v30 = vsel %vm16880_vm7, %v6857_v56, -1e+10  ;;  %v6891_v56 = vmax.f32 %v6888_v5, %v6890_v13 }
0x11d4   :  { %v6894_v53 = vsel %vm4384_vm15, %v6880_v30, -inf }
0x11d5   :  { %v6895_v41 = vmax.f32 %v6891_v56, %v6894_v53  ;;  %v6875_v53 = vsel %vm4355_vm1, %v6847_v50, -1e+10 }
0x11d6   :  { %v6861_v16 = vpop.xlane.xlu1 %6860  ;;  %v6904_v50 = vsel %vm4384_vm15, %v6875_v53, -inf }
0x11d7   :  { %v6851_v15 = vpop.xlane.xlu0 %6850  ;;  %v6882_v19 = vsel %vm16882_vm8, %v6861_v16, -1e+10 }
0x11d8   :  { %v6896_v35 = vsel %vm4384_vm15, %v6882_v19, -inf  ;;  %v6877_v6 = vsel %vm4357_vm0, %v6851_v15, -1e+10 }
0x11d9   :  { %v6897_v49 = vmax.f32 %v6893_v24, %v6896_v35  ;;  %v6905_v24 = vsel %vm4384_vm15, %v6877_v6, -inf  ;;  %v16892_v35 = vld [vmem:[#allocation80_spill] sm:$0xff] }
0x11da   :  { %v6865_v52 = vpop.xlane.xlu1 %6864  ;;  %vm16893_vm4 = vcmp.gt.f32.partialorder %v16892_v35, 0.0 }
0x11db   :  { %v6855_v0 = vpop.xlane.xlu0 %6854  ;;  %v6884_v28 = vsel %vm16884_vm10, %v6865_v52, -1e+10 }
0x11dc   :  { %v6898_v16 = vsel %vm4384_vm15, %v6884_v28, -inf  ;;  %v6879_v5 = vsel %vm4359_vm2, %v6855_v0, -1e+10 }
0x11dd   :  { %v6899_v48 = vmax.f32 %v6895_v41, %v6898_v16  ;;  %v6907_v52 = vsel %vm4384_vm15, %v6879_v5, -inf }
0x11de   :  { %v6843_v54 = vpop.xlane.xlu1 %6842 }
0x11df   :  { %v6859_v37 = vpop.xlane.xlu0 %6858  ;;  %v6873_v62 = vsel %vm16886_vm11, %v6843_v54, -1e+10 }
0x11e0   :  { %v6903_v2 = vsel %vm4384_vm15, %v6873_v62, -inf  ;;  %v6881_v16 = vsel %vm4361_vm12, %v6859_v37, -1e+10 }
0x11e1   :  { %v6906_v0 = vmax.f32 %v6903_v2, %v6905_v24  ;;  %v6909_v37 = vsel %vm4384_vm15, %v6881_v16, -inf }
0x11e2   :  { %v6869_v42 = vpop.xlane.xlu1 %6868 }
0x11e3   :  { %v6863_v11 = vpop.xlane.xlu0 %6862  ;;  %v6886_v32 = vsel %vm16888_vm14, %v6869_v42, -1e+10 }
0x11e4   :  { %v6900_v23 = vsel %vm4384_vm15, %v6886_v32, -inf  ;;  %v15820_v42 = vsel %vm16893_vm4, %v6863_v11, -1e+10 }
0x11e5   :  { %v6901_v39 = vmax.f32 %v6897_v49, %v6900_v23  ;;  %v6911_v54 = vsel %vm4384_vm15, %v15820_v42, -inf }
0x11e7   :  { %v6902_v56 = vmax.f32 %v6899_v48, %v6901_v39  ;;  %v6867_v15 = vpop.xlane.xlu0 %6866  ;;  %v6908_v39 = vmax.f32 %v6904_v50, %v6907_v52 }
0x11e8   :  { %v6885_v48 = vsel %vm4365_vm3, %v6867_v15, -1e+10 }
0x11e9   :  { %v6918_v13 = vsub.f32 %v6872_v22, %v6902_v56  ;;  %v6920_v59 = vsub.f32 %v6874_v36, %v6902_v56  ;;  %v6922_v23 = vsub.f32 %v6876_v55, %v6902_v56  ;;  %v6924_v49 = vsub.f32 %v6878_v61, %v6902_v56 }
0x11ea   :  { %v6926_v35 = vsub.f32 %v6880_v30, %v6902_v56  ;;  %v6928_v22 = vsub.f32 %v6882_v19, %v6902_v56  ;;  %v6912_v55 = vmax.f32 %v6908_v39, %v6911_v54  ;;  %v6910_v61 = vmax.f32 %v6906_v0, %v6909_v37 }
0x11eb   :  { %v6934_v31 = vmul.f32 1.442695, %v6918_v13  ;;  %v6938_v21 = vmul.f32 1.442695, %v6920_v59  ;;  %v6942_v1 = vmul.f32 1.442695, %v6922_v23  ;;  %v6871_v41 = vpop.xlane.xlu0 %6870  ;;  %v6930_v24 = vsub.f32 %v6884_v28, %v6902_v56 }
0x11ec   :  { %v6946_v36 = vmul.f32 1.442695, %v6924_v49  ;;  %v6913_v2 = vsel %vm4384_vm15, %v6885_v48, -inf  ;;  %v6950_v30 = vmul.f32 1.442695, %v6926_v35  ;;  %v6932_v52 = vsub.f32 %v6886_v32, %v6902_v56 }
0x11ed   :  { %13010 = vpow2.f32 %v6934_v31  ;;  %v6887_v15 = vsel %vm4367_vm13, %v6871_v41, -1e+10  ;;  %v6954_v13 = vmul.f32 1.442695, %v6928_v22  ;;  %v6914_v23 = vmax.f32 %v6910_v61, %v6913_v2 }
0x11ee   :  { %13012 = vpow2.f32 %v6938_v21  ;;  %v6915_v59 = vsel %vm4384_vm15, %v6887_v15, -inf  ;;  %v6958_v54 = vmul.f32 1.442695, %v6930_v24  ;;  %v6962_v0 = vmul.f32 1.442695, %v6932_v52 }
0x11ef   :  { %13014 = vpow2.f32 %v6942_v1  ;;  %v6916_v19 = vmax.f32 %v6912_v55, %v6915_v59 }
0x11f0   :  { %13016 = vpow2.f32 %v6946_v36 }
0x11f1   :  { %13018 = vpow2.f32 %v6950_v30  ;;  %v6917_v31 = vmax.f32 %v6914_v23, %v6916_v19 }
0x11f2   :  { %13020 = vpow2.f32 %v6954_v13 }
0x11f3   :  { %v6919_v49 = vsub.f32 %v6873_v62, %v6917_v31  ;;  %v6921_v28 = vsub.f32 %v6875_v53, %v6917_v31  ;;  %v6923_v21 = vsub.f32 %v6877_v6, %v6917_v31  ;;  %v6925_v35 = vsub.f32 %v6879_v5, %v6917_v31 }
0x11f4   :  { %v6927_v50 = vsub.f32 %v6881_v16, %v6917_v31  ;;  %13022 = vpow2.f32 %v6958_v54  ;;  %v6929_v56 = vsub.f32 %v15820_v42, %v6917_v31  ;;  %v6931_v37 = vsub.f32 %v6885_v48, %v6917_v31 }
0x11f5   :  { %v6936_v41 = vmul.f32 1.442695, %v6919_v49  ;;  %v6940_v32 = vmul.f32 1.442695, %v6921_v28  ;;  %v6944_v1 = vmul.f32 1.442695, %v6923_v21  ;;  %13024 = vpow2.f32 %v6962_v0 }
0x11f6   :  { %v6948_v39 = vmul.f32 1.442695, %v6925_v35  ;;  %v6952_v22 = vmul.f32 1.442695, %v6927_v50  ;;  %v6933_v6 = vsub.f32 %v6887_v15, %v6917_v31  ;;  %v6956_v5 = vmul.f32 1.442695, %v6929_v56 }
0x11f7   :  { %13026 = vpow2.f32 %v6936_v41  ;;  %v6960_v42 = vmul.f32 1.442695, %v6931_v37 }
0x11f8   :  { %13028 = vpow2.f32 %v6940_v32  ;;  %v6964_v52 = vmul.f32 1.442695, %v6933_v6 }
0x11f9   :  { %13030 = vpow2.f32 %v6944_v1 }
0x11fa   :  { %v13011_v36 = vpop.eup %13010  ;;  %13032 = vpow2.f32 %v6948_v39 }
0x11fb   :  { %v13013_v55 = vpop.eup %13012  ;;  %v6966_v62 = vsel %vm4384_vm15, %v13011_v36, 0.0  ;;  %13034 = vpow2.f32 %v6952_v22 }
0x11fc   :  { %v13015_v53 = vpop.eup %13014  ;;  %v6967_v16 = vsel %vm4384_vm15, %v13013_v55, 0.0  ;;  %13036 = vpow2.f32 %v6956_v5 }
0x11fd   :  { %v13017_v61 = vpop.eup %13016  ;;  %v6968_v2 = vadd.f32 %v6967_v16, %v6966_v62  ;;  %v6969_v24 = vsel %vm4384_vm15, %v13015_v53, 0.0  ;;  %13038 = vpow2.f32 %v6960_v42 }
0x11fe   :  { %v13019_v48 = vpop.eup %13018  ;;  %v6971_v59 = vsel %vm4384_vm15, %v13017_v61, 0.0  ;;  %13040 = vpow2.f32 %v6964_v52 }
0x11ff   :  { %v6970_v30 = vadd.f32 %v6969_v24, %v6968_v2  ;;  %v15840_v13 = vpop.eup %13020  ;;  %v6973_v23 = vsel %vm4384_vm15, %v13019_v48, 0.0 }
0x1200   :  { %v6975_v0 = vsel %vm4384_vm15, %v15840_v13, 0.0 }
0x1201   :  { %v6972_v15 = vadd.f32 %v6971_v59, %v6970_v30  ;;  %v15843_v19 = vpop.eup %13022 }
0x1202   :  { %v15845_v31 = vpop.eup %13024  ;;  %v6977_v35 = vsel %vm4384_vm15, %v15843_v19, 0.0 }
0x1203   :  { %v6974_v54 = vadd.f32 %v6973_v23, %v6972_v15  ;;  %v6979_v39 = vsel %vm4384_vm15, %v15845_v31, 0.0 }
0x1204   :  { %v13027_v49 = vpop.eup %13026 }
0x1205   :  { %v6976_v28 = vadd.f32 %v6975_v0, %v6974_v54  ;;  %v13029_v21 = vpop.eup %13028  ;;  %v6981_v50 = vsel %vm4384_vm15, %v13027_v49, 0.0 }
0x1206   :  { %v13031_v41 = vpop.eup %13030  ;;  %v6982_v1 = vsel %vm4384_vm15, %v13029_v21, 0.0 }
0x1207   :  { %v6978_v32 = vadd.f32 %v6977_v35, %v6976_v28  ;;  %v13033_v56 = vpop.eup %13032  ;;  %v6983_v37 = vadd.f32 %v6982_v1, %v6981_v50  ;;  %v6984_v62 = vsel %vm4384_vm15, %v13031_v41, 0.0 }
0x1208   :  { %v15856_v6 = vpop.eup %13034  ;;  %v6986_v16 = vsel %vm4384_vm15, %v13033_v56, 0.0 }
0x1209   :  { %v6980_v22 = vadd.f32 %v6979_v39, %v6978_v32  ;;  %v6985_v5 = vadd.f32 %v6984_v62, %v6983_v37  ;;  %v15859_v2 = vpop.eup %13036  ;;  %v6988_v24 = vsel %vm4384_vm15, %v15856_v6, 0.0  ;;  %v12373_v62 = vld [vmem:[#allocation11 + $0xac] ss:$12 sps:$4 sm:$0xff]  }
0x120a   :  { %v15863_v30 = vpop.eup %13038  ;;  %v6990_v59 = vsel %vm4384_vm15, %v15859_v2, 0.0  ;;  %7308 = vmatprep.subr.bf16.mxu1 %v12373_v62 }
0x120b   :  { %13042 = vrcp.f32 %v6980_v22  ;;  %v6987_v42 = vadd.f32 %v6986_v16, %v6985_v5  ;;  %v15867_v15 = vpop.eup %13040  ;;  %v6992_v54 = vsel %vm4384_vm15, %v15863_v30, 0.0  ;;  %v12371_v22 = vld [vmem:[#allocation11 + $0xa8] ss:$12 sps:$4 sm:$0xff]   ;;  %v12374_v5 = vld [vmem:[#allocation11 + $0xb0] ss:$12 sps:$4 sm:$0xff]  }
0x120c   :  { %v6994_v28 = vsel %vm4384_vm15, %v15867_v15, 0.0  ;;  %11751 = vmatpush3.bf16.msra.mxu0 %v12374_v5  ;;  %7309 = vmatpush1.bf16.msra.mxu1 %v12371_v22  ;;  %v12393_v22 = vld [vmem:[#allocation11 + $0x34] ss:$12 sps:$4 sm:$0xff]  }
0x120d   :  { %v6989_v52 = vadd.f32 %v6988_v24, %v6987_v42  ;;  %v15876_v42 = vld [vmem:[%s16583_s19] sm:$0xff] }
0x120e   :  { %11752 = vmatprep.subr.bf16.mxu0 %v15876_v42  ;;  %v12398_v5 = vld [vmem:[#allocation11 + $0x20] ss:$12 sps:$4 sm:$0xff]  }
0x120f   :  { %v6991_v23 = vadd.f32 %v6990_v59, %v6989_v52  ;;  %v12379_v59 = vld [vmem:[#allocation11 + $0x78] ss:$12 sps:$4 sm:$0xff]  }
0x1211   :  { %v6993_v0 = vadd.f32 %v6992_v54, %v6991_v23  ;;  %v12381_v23 = vld [vmem:[#allocation11 + $0x7c] ss:$12 sps:$4 sm:$0xff]   ;;  %v12382_v54 = vld [vmem:[#allocation11 + $0x80] ss:$12 sps:$4 sm:$0xff]  }
0x1213   :  { %v6995_v35 = vadd.f32 %v6994_v28, %v6993_v0 }
0x1215   :  { %13044 = vrcp.f32 %v6995_v35  ;;  %v12386_v35 = vld [vmem:[#allocation11 + $0x68] ss:$12 sps:$4 sm:$0xff]  }
0x1218   :  { %v13043_v50 = vpop.eup %13042 }
0x1219   :  { %v7002_v32 = vmul.f32 %v13043_v50, %v13015_v53  ;;  %v6998_v1 = vmul.f32 %v13043_v50, %v13011_v36  ;;  %v7004_v39 = vmul.f32 %v13043_v50, %v13017_v61  ;;  %v7000_v37 = vmul.f32 %v13043_v50, %v13013_v55  ;;  %v12375_v53 = vld [vmem:[#allocation11 + $0x90] ss:$12 sps:$4 sm:$0xff]   ;;  %v12377_v55 = vld [vmem:[#allocation11 + $0x94] ss:$12 sps:$4 sm:$0xff]   ;;  %v12378_v61 = vld [vmem:[#allocation11 + $0x98] ss:$12 sps:$4 sm:$0xff]  }
0x121a   :  { %v7006_v16 = vmul.f32 %v13043_v50, %v13019_v48  ;;  %7310 = vmatprep.subr.bf16.mxu1 %v12377_v55  ;;  %11753 = vmatpush3.bf16.msra.mxu0 %v12378_v61  ;;  %v7008_v0 = vmul.f32 %v13043_v50, %v15840_v13  ;;  %v12387_v13 = vld [vmem:[#allocation11 + $0x48] ss:$12 sps:$4 sm:$0xff]  }
0x121b   :  { %7052 = vperm.xlu0 %11882, %v7002_v32   ;;  %7032 = vperm.xlu1 %11883, %v6998_v1   ;;  %v12389_v1 = vld [vmem:[#allocation11 + $0x4c] ss:$12 sps:$4 sm:$0xff]   ;;  %v12402_v55 = vld [vmem:[#allocation11 + $0x8] ss:$12 sps:$4 sm:$0xff]  }
0x121c   :  { %7311 = vmatpush1.bf16.msra.mxu1 %v12375_v53  ;;  %11754 = vmatprep.subr.bf16.mxu0 %v15876_v42  ;;  %v12401_v53 = vld [vmem:[#allocation11 + $0x4] ss:$12 sps:$4 sm:$0xff]  }
0x121d   :  { %7312 = vmatprep.subr.bf16.mxu1 %v12381_v23 }
0x121e   :  { %11755 = vmatpush3.bf16.msra.mxu0 %v12382_v54 }
0x121f   :  { %7062 = vperm.xlu0 %11882, %v7004_v39   ;;  %7042 = vperm.xlu1 %11883, %v7000_v37   ;;  %v7012_v39 = vmul.f32 %v13043_v50, %v15845_v31  ;;  %v12391_v37 = vld [vmem:[#allocation11 + $0x30] ss:$12 sps:$4 sm:$0xff]   ;;  %v12395_v31 = vld [vmem:[#allocation11 + $0x18] ss:$12 sps:$4 sm:$0xff]  }
0x1220   :  { %7313 = vmatpush1.bf16.msra.mxu1 %v12379_v59  ;;  %11756 = vmatprep.subr.bf16.mxu0 %v15876_v42 }
0x1222   :  { %v13045_v36 = vpop.eup %13044  ;;  %11757 = vmatpush3.bf16.msra.mxu0 %v12386_v35 }
0x1223   :  { %7072 = vperm.xlu0 %11882, %v7006_v16   ;;  %v7001_v24 = vmul.f32 %v13045_v36, %v13029_v21  ;;  %v6999_v52 = vmul.f32 %v13045_v36, %v13027_v49  ;;  %v7003_v48 = vmul.f32 %v13045_v36, %v13031_v41  ;;  %v7005_v28 = vmul.f32 %v13045_v36, %v13033_v56  ;;  %v12383_v49 = vld [vmem:[#allocation11 + $0x60] ss:$12 sps:$4 sm:$0xff]   ;;  %v12385_v21 = vld [vmem:[#allocation11 + $0x64] ss:$12 sps:$4 sm:$0xff]  }
0x1224   :  { %v7010_v41 = vmul.f32 %v13043_v50, %v15843_v19  ;;  %7314 = vmatprep.subr.bf16.mxu1 %v12385_v21  ;;  %v7007_v32 = vmul.f32 %v13045_v36, %v15856_v6  ;;  %11758 = vmatprep.subr.bf16.mxu0 %v15876_v42  ;;  %v12390_v56 = vld [vmem:[#allocation11 + $0x50] ss:$12 sps:$4 sm:$0xff]   ;;  %v7009_v19 = vmul.f32 %v13045_v36, %v15859_v2  ;;  %v12394_v6 = vld [vmem:[#allocation11 + $0x38] ss:$12 sps:$4 sm:$0xff]   ;;  %v12399_v16 = vld [vmem:[#allocation11] ss:$12 sps:$4 sm:$0xff]  }
0x1225   :  { %7047 = vperm.xlu1 %11883, %v7001_v24   ;;  %7315 = vmatpush1.bf16.msra.mxu1 %v12383_v49  ;;  %v7011_v62 = vmul.f32 %v13045_v36, %v15863_v30  ;;  %v12397_v50 = vld [vmem:[#allocation11 + $0x1c] ss:$12 sps:$4 sm:$0xff]   ;;  %v7013_v2 = vmul.f32 %v13045_v36, %v15867_v15 }
0x1226   :  { %7316 = vmatprep.subr.bf16.mxu1 %v12389_v1  ;;  %11759 = vmatpush3.bf16.msra.mxu0 %v12390_v56 }
0x1227   :  { %7037 = vperm.xlu0 %11882, %v6999_v52   ;;  %11760 = vmatprep.subr.bf16.mxu0 %v15876_v42 }
0x1229   :  { %7057 = vperm.xlu1 %11883, %v7003_v48   ;;  %7317 = vmatpush1.bf16.msra.mxu1 %v12387_v13 }
0x122a   :  { %7318 = vmatprep.subr.bf16.mxu1 %v12393_v22  ;;  %11761 = vmatpush3.bf16.msra.mxu0 %v12394_v6 }
0x122b   :  { %7082 = vperm.xlu0 %11882, %v7008_v0   ;;  %11762 = vmatprep.subr.bf16.mxu0 %v15876_v42 }
0x122d   :  { %7067 = vperm.xlu1 %11883, %v7005_v28   ;;  %7319 = vmatpush1.bf16.msra.mxu1 %v12391_v37 }
0x122e   :  { %7320 = vmatprep.subr.bf16.mxu1 %v12397_v50  ;;  %11763 = vmatpush3.bf16.msra.mxu0 %v12398_v5 }
0x122f   :  { %7092 = vperm.xlu0 %11882, %v7010_v41   ;;  %11764 = vmatprep.subr.bf16.mxu0 %v15876_v42 }
0x1231   :  { %7077 = vperm.xlu1 %11883, %v7007_v32   ;;  %7321 = vmatpush1.bf16.msra.mxu1 %v12395_v31 }
0x1232   :  { %7322 = vmatprep.subr.bf16.mxu1 %v12401_v53  ;;  %11765 = vmatpush3.bf16.msra.mxu0 %v12402_v55 }
0x1233   :  { %7102 = vperm.xlu0 %11882, %v7012_v39   ;;  %11770 = vmatprep.subr.bf16.mxu0 %v15876_v42 }
0x1235   :  { %7087 = vperm.xlu1 %11883, %v7009_v19   ;;  %7323 = vmatpush1.bf16.msra.mxu1 %v12399_v16 }
0x1239   :  { %7097 = vperm.xlu1 %11883, %v7011_v62  }
0x123d   :  { %7107 = vperm.xlu1 %11883, %v7013_v2  }
0x1296   :  { %v7053_v30 = vpop.permute.xlu0 %7052  ;;  %v7033_v61 = vpop.permute.xlu1 %7032 }
0x1297   :  { %v7110_v54 = vmul.f32 %v7033_v61, %v14206_v3  ;;  %v7114_v41 = vmul.f32 %v7053_v30, %v15197_v4 }
0x129a   :  { %v7063_v24 = vpop.permute.xlu0 %7062  ;;  %v7043_v52 = vpop.permute.xlu1 %7042 }
0x129b   :  { %v7112_v36 = vmul.f32 %v7043_v52, %v15183_v7  ;;  %v7116_v19 = vmul.f32 %v7063_v24, %v15209_v10 }
0x129d   :  { %v7126_v21 = vadd.f32 %v7112_v36, %v7110_v54 }
0x129e   :  { %v7073_v48 = vpop.permute.xlu0 %7072 }
0x129f   :  { %v7127_v1 = vadd.f32 %v7126_v21, %v7114_v41  ;;  %v7118_v50 = vmul.f32 %v7073_v48, %v15227_v47  ;;  %v12403_v21 = vld [vmem:[#allocation13 + $0xb8] sm:$0xff]   ;;  %v12404_v41 = vld [vmem:[#allocation13 + $0xb0] sm:$0xff]  }
0x12a0   :  { %v7048_v59 = vpop.permute.xlu1 %7047 }
0x12a1   :  { %v7113_v35 = vmul.f32 %v7048_v59, %v15191_v18  ;;  %v7128_v62 = vadd.f32 %v7127_v1, %v7116_v19  ;;  %v12407_v1 = vld [vmem:[#allocation13 + $0x98] sm:$0xff]   ;;  %v12410_v19 = vld [vmem:[#allocation13 + $0x80] sm:$0xff]  }
0x12a2   :  { %v7038_v23 = vpop.permute.xlu0 %7037 }
0x12a3   :  { %v7111_v0 = vmul.f32 %v7038_v23, %v14216_v17  ;;  %v7129_v30 = vadd.f32 %v7128_v62, %v7118_v50  ;;  %v12413_v62 = vld [vmem:[%s16576_s12 + $0xe8] ss:$16 sps:$4 sm:$0xff]   ;;  %v12417_v50 = vld [vmem:[#allocation13 + $0x30] sm:$0xff]  }
0x12a4   :  { %v7058_v15 = vpop.permute.xlu1 %7057 }
0x12a5   :  { %v7133_v32 = vadd.f32 %v7113_v35, %v7111_v0  ;;  %v7115_v56 = vmul.f32 %v7058_v15, %v15203_v26 }
0x12a6   :  { %v7083_v28 = vpop.permute.xlu0 %7082 }
0x12a7   :  { %v7134_v37 = vadd.f32 %v7133_v32, %v7115_v56  ;;  %v7120_v5 = vmul.f32 %v7083_v28, %v15232_v33  ;;  %v12405_v32 = vld [vmem:[#allocation13 + $0xa8] sm:$0xff]   ;;  %v12408_v56 = vld [vmem:[#allocation13 + $0x90] sm:$0xff]  }
0x12a8   :  { %v7068_v49 = vpop.permute.xlu1 %7067 }
0x12a9   :  { %v7117_v22 = vmul.f32 %v7068_v49, %v15214_v29  ;;  %v7130_v59 = vadd.f32 %v7129_v30, %v7120_v5  ;;  %v12420_v5 = vld [vmem:[%s16576_s12 + $0xcc] ss:$16 sps:$4 sm:$0xff]   ;;  %v12423_v30 = vld [vmem:[%s16576_s12 + $0xa8] ss:$16 sps:$4 sm:$0xff]  }
0x12aa   :  { %v7093_v39 = vpop.permute.xlu0 %7092 }
0x12ab   :  { %v7135_v2 = vadd.f32 %v7134_v37, %v7117_v22  ;;  %v7122_v61 = vmul.f32 %v7093_v39, %v15245_v43  ;;  %v12409_v39 = vld [vmem:[#allocation13 + $0x88] sm:$0xff]   ;;  %v12411_v37 = vld [vmem:[#allocation13 + $0x78] sm:$0xff]  }
0x12ac   :  { %v7078_v13 = vpop.permute.xlu1 %7077  ;;  %v12412_v22 = vld [vmem:[#allocation13 + $0x38] sm:$0xff]   ;;  %11279 = vmatprep.subr.bf16.mxu1 %v12411_v37  ;;  %v12454_v37 = vld [vmem:[%s16576_s12 + $0xe4] ss:$16 sps:$4 sm:$0xff]  }
0x12ad   :  { %v7119_v31 = vmul.f32 %v7078_v13, %v15221_v58  ;;  %v7131_v54 = vadd.f32 %v7130_v59, %v7122_v61  ;;  %v12406_v13 = vld [vmem:[#allocation13 + $0xa0] sm:$0xff]   ;;  %v12428_v59 = vld [vmem:[%s16576_s12 + $0x88] ss:$16 sps:$4 sm:$0xff]  }
0x12ae   :  { %v7103_v53 = vpop.permute.xlu0 %7102  ;;  %v12426_v61 = vld [vmem:[#allocation13 + $0x60] sm:$0xff]  }
0x12af   :  { %v7136_v24 = vadd.f32 %v7135_v2, %v7119_v31  ;;  %v7124_v23 = vmul.f32 %v7103_v53, %v15257_v60  ;;  %v12416_v31 = vld [vmem:[#allocation13 + $0x70] sm:$0xff]   ;;  %v12418_v2 = vld [vmem:[%s16576_s12 + $0xc8] ss:$16 sps:$4 sm:$0xff]  }
0x12b0   :  { %v7088_v6 = vpop.permute.xlu1 %7087  ;;  %v12422_v53 = vld [vmem:[#allocation13 + $0x28] sm:$0xff]  }
0x12b1   :  { %v7121_v16 = vmul.f32 %v7088_v6, %v15237_v20  ;;  %v7132_v28 = vadd.f32 %v7131_v54, %v7124_v23  ;;  %v12415_v6 = vld [vmem:[%s16576_s12 + $0xec] ss:$16 sps:$4 sm:$0xff]  }
0x12b2   :  { %v12431_v23 = vld [vmem:[#allocation13 + $0x58] sm:$0xff]  }
0x12b3   :  { %v7137_v15 = vadd.f32 %v7136_v24, %v7121_v16  ;;  %v12421_v16 = vld [vmem:[#allocation13 + $0x68] sm:$0xff]   ;;  %v12432_v54 = vld [vmem:[#allocation13 + $0x18] sm:$0xff]  }
0x12b4   :  { %v7098_v55 = vpop.permute.xlu1 %7097  ;;  %v12430_v24 = vld [vmem:[%s16576_s12 + $0x8c] ss:$16 sps:$4 sm:$0xff]  }
0x12b5   :  { %v7123_v52 = vmul.f32 %v7098_v55, %v15250_v40  ;;  %v12425_v55 = vld [vmem:[%s16576_s12 + $0xac] ss:$16 sps:$4 sm:$0xff]  }
0x12b7   :  { %v7138_v48 = vadd.f32 %v7137_v15, %v7123_v52  ;;  %v12427_v52 = vld [vmem:[#allocation13 + $0x20] sm:$0xff]   ;;  %v12435_v15 = vld [vmem:[%s16576_s12 + $0x6c] ss:$16 sps:$4 sm:$0xff]  }
0x12b8   :  { %v7108_v36 = vpop.permute.xlu1 %7107 }
0x12b9   :  { %v7125_v0 = vmul.f32 %v7108_v36, %v15263_v46  ;;  %v12451_v36 = vld [vmem:[%s16686_s26 + $0x10] sm:$0xff]  }
0x12bb   :  { %v7139_v49 = vadd.f32 %v7138_v48, %v7125_v0  ;;  %v12433_v48 = vld [vmem:[%s16576_s12 + $0x68] ss:$16 sps:$4 sm:$0xff]   ;;  %v12436_v0 = vld [vmem:[#allocation13 + $0x50] sm:$0xff]  }
0x12bd   :  { %v7140_v35 = vpack.c.bf16 %v7139_v49, %v7132_v28  ;;  %v12440_v28 = vld [vmem:[%s16576_s12 + $0x4c] ss:$16 sps:$4 sm:$0xff]   ;;  %v12437_v49 = vld [vmem:[#allocation13 + $0x10] sm:$0xff]  }
0x12bf   :  { %7341 = vmatmul.mubr.bf16.vlgmr.msra.gmra.mxu1 %v7140_v35  ;;  %11767 = vmatmul.mubr.bf16.vlgmr.msra.gmra.mxu0 %v7140_v35 }
0x12c0   :  { %11771 = vmatpush3.bf16.msra.mxu0 %v12403_v21  ;;  %11786 = vmatprep.mubr.msk.bf16.mxu0 %vm16805_vm9, %v15876_v42  ;;  %v12438_v21 = vld [vmem:[%s16576_s12 + $0x48] ss:$16 sps:$4 sm:$0xff]  }
0x12c1   :  { %11772 = vmatprep.subr.bf16.mxu0 %v15876_v42  ;;  %11280 = vmatpush3.bf16.msra.mxu1 %v12412_v22  ;;  %v6760_v22 = vpop.f32.mrf.mxu0 }
0x12c2   :  { %11281 = vmatprep.subr.bf16.mxu1 %v12416_v31  ;;  %7687 = vmatprep.mubr.bf16.mxu1 %v12451_v36  ;;  %v16899_v36 = vld [vmem:[#allocation42_spill] sm:$0xff] }
0x12c4   :  { %11773 = vmatpush3.bf16.msra.mxu0 %v12404_v41  ;;  %v12445_v41 = vld [vmem:[%s16576_s12 + $0x2c] ss:$16 sps:$4 sm:$0xff]  }
0x12c5   :  { %11774 = vmatprep.subr.bf16.mxu0 %v15876_v42  ;;  %11282 = vmatpush3.bf16.msra.mxu1 %v12417_v50  ;;  %v6723_v50 = vpop.f32.mrf.mxu1 }
0x12c6   :  { %11283 = vmatprep.subr.bf16.mxu1 %v12421_v16  ;;  %v16897_v16 = vld [vmem:[#allocation38_spill] sm:$0xff] }
0x12c8   :  { %11775 = vmatpush3.bf16.msra.mxu0 %v12405_v32  ;;  %v12442_v32 = vld [vmem:[#allocation13 + $0x8] sm:$0xff]  }
0x12c9   :  { %11776 = vmatprep.subr.bf16.mxu0 %v15876_v42  ;;  %11284 = vmatpush3.bf16.msra.mxu1 %v12422_v53 }
0x12ca   :  { %11285 = vmatprep.subr.bf16.mxu1 %v12426_v61 }
0x12cc   :  { %11777 = vmatpush3.bf16.msra.mxu0 %v12406_v13  ;;  %v12443_v13 = vld [vmem:[%s16576_s12 + $0x28] ss:$16 sps:$4 sm:$0xff]  }
0x12cd   :  { %11778 = vmatprep.subr.bf16.mxu0 %v15876_v42  ;;  %11286 = vmatpush3.bf16.msra.mxu1 %v12427_v52 }
0x12ce   :  { %11287 = vmatprep.subr.bf16.mxu1 %v12431_v23  ;;  %v16898_v23 = vld [vmem:[#allocation40_spill] sm:$0xff] }
0x12d0   :  { %11779 = vmatpush3.bf16.msra.mxu0 %v12407_v1  ;;  %v12446_v1 = vld [vmem:[#allocation13 + $0x40] sm:$0xff]  }
0x12d1   :  { %11780 = vmatprep.subr.bf16.mxu0 %v15876_v42  ;;  %11288 = vmatpush3.bf16.msra.mxu1 %v12432_v54 }
0x12d2   :  { %11289 = vmatprep.subr.bf16.mxu1 %v12436_v0 }
0x12d4   :  { %11781 = vmatpush3.bf16.msra.mxu0 %v12408_v56  ;;  %v12450_v56 = vld [vmem:[%s16576_s12 + $0xc] ss:$16 sps:$4 sm:$0xff]  }
0x12d5   :  { %11782 = vmatprep.subr.bf16.mxu0 %v15876_v42  ;;  %11290 = vmatpush3.bf16.msra.mxu1 %v12437_v49  ;;  %v16900_v49 = vld [vmem:[#allocation44_spill] sm:$0xff] }
0x12d8   :  { %11783 = vmatpush3.bf16.msra.mxu0 %v12409_v39  ;;  %v12447_v39 = vld [vmem:[#allocation13] sm:$0xff]  }
0x12d9   :  { %11784 = vmatprep.subr.bf16.mxu0 %v15876_v42 }
0x12dc   :  { %11785 = vmatpush3.bf16.msra.mxu0 %v12410_v19  ;;  %v12448_v19 = vld [vmem:[%s16576_s12 + $0x8] ss:$16 sps:$4 sm:$0xff]  }
0x12dd   :  { %7978 = vmatprep.subr.bf16.mxu0 %v12415_v6  ;;  %v6762_v6 = vpop.f32.mrf.mxu0 }
0x12df   :  { %11787 = vmatmul.mubr.bf16.vlgmr.msra.gmra.mxu0 %v7140_v35  ;;  %v12441_v35 = vld [vmem:[#allocation13 + $0x48] sm:$0xff]  }
0x12e0   :  { %8010 = vmatprep.mubr.bf16.mxu0 %v16806_v8  ;;  %7979 = vmatpush1.bf16.msra.mxu0 %v12413_v62  ;;  %v6764_v62 = vpop.f32.mrf.mxu0 }
0x12e1   :  { %7980 = vmatprep.subr.bf16.mxu0 %v12420_v5  ;;  %11291 = vmatprep.subr.bf16.mxu1 %v12441_v35 }
0x12e2   :  { %11292 = vmatpush3.bf16.msra.mxu1 %v12442_v32  ;;  %v6766_v31 = vpop.f32.mrf.mxu0 }
0x12e3   :  { %11293 = vmatprep.subr.bf16.mxu1 %v12446_v1 }
0x12e4   :  { %7981 = vmatpush1.bf16.msra.mxu0 %v12418_v2 }
0x12e5   :  { %7982 = vmatprep.subr.bf16.mxu0 %v12425_v55 }
0x12e6   :  { %11294 = vmatpush3.bf16.msra.mxu1 %v12447_v39 }
0x12e7   :  { %7935 = vmatprep.subr.bf16.mxu1 %v12454_v37 }
0x12e8   :  { %7983 = vmatpush1.bf16.msra.mxu0 %v12423_v30 }
0x12e9   :  { %7984 = vmatprep.subr.bf16.mxu0 %v12430_v24 }
0x12ec   :  { %7985 = vmatpush1.bf16.msra.mxu0 %v12428_v59 }
0x12ed   :  { %7986 = vmatprep.subr.bf16.mxu0 %v12435_v15 }
0x12f0   :  { %7987 = vmatpush1.bf16.msra.mxu0 %v12433_v48 }
0x12f1   :  { %7988 = vmatprep.subr.bf16.mxu0 %v12440_v28 }
0x12f4   :  { %7989 = vmatpush1.bf16.msra.mxu0 %v12438_v21 }
0x12f5   :  { %7990 = vmatprep.subr.bf16.mxu0 %v12445_v41 }
0x12f8   :  { %7991 = vmatpush1.bf16.msra.mxu0 %v12443_v13 }
0x12f9   :  { %7992 = vmatprep.subr.bf16.mxu0 %v12450_v56 }
0x12fc   :  { %7993 = vmatpush1.bf16.msra.mxu0 %v12448_v19 }
0x12fd   :  { %11790 = vmatprep.subr.bf16.mxu0 %v15876_v42 }
0x137f   :  { %v7342_v5 = vpop.f32.mrf.mxu1  ;;  %v7385_v2 = vpop.f32.mrf.mxu0 }
0x1380   :  { %v7392_v53 = vadd.f32 %v7342_v5, %v16897_v16 }
0x1381   :  { %v7344_v55 = vpop.f32.mrf.mxu1  ;;  %v11768_v30 = vpop.f32.mrf.mxu0 }
0x1382   :  { %v7398_v61 = vadd.f32 %v7392_v53, %v15748_v12  ;;  %v7393_v15 = vadd.f32 %v7344_v55, %v16898_v23 }
0x1383   :  { %v7346_v24 = vpop.f32.mrf.mxu1  ;;  %v7388_v52 = vpop.f32.mrf.mxu0 }
0x1384   :  { %v10823_v59 = vmul.f32 -1.442695, %v7398_v61  ;;  %v7395_v54 = vadd.f32 %v7346_v24, %v16899_v36  ;;  %v7412_v35 = vadd.f32 %v7393_v15, %v6760_v22  ;;  %v16901_v24 = vld [vmem:[#allocation61_spill] sm:$0xff] }
0x1385   :  { %v7348_v48 = vpop.f32.mrf.mxu1  ;;  %v11769_v0 = vpop.f32.mrf.mxu0 }
0x1386   :  { %13046 = vpow2.f32 %v10823_v59  ;;  %v7399_v28 = vadd.f32 %v7395_v54, %v6723_v50  ;;  %v7396_v21 = vadd.f32 %v7348_v48, %v16900_v49  ;;  %v10825_v13 = vmul.f32 -1.442695, %v7412_v35  ;;  %v10827_v50 = vld [vmem:[%s16580_s16] ss:$0 sm:$0xff]  ;;  %v16902_v0 = vld [vmem:[#allocation62_spill] sm:$0xff] }
0x1387   :  { %v7433_v53 = vadd.f32 %v10827_v50, %v6762_v6  ;;  %v7394_v59 = vadd.f32 %v7385_v2, %v16901_v24  ;;  %v7434_v36 = vadd.f32 %v10827_v50, %v6766_v31  ;;  %v12460_v50 = vld [vmem:[%s16576_s12 + $0xa4] ss:$16 sps:$4 sm:$0xff]  }
0x1388   :  { %v10824_v41 = vmul.f32 -1.442695, %v7399_v28  ;;  %v7413_v32 = vadd.f32 %v7396_v21, %v6764_v62  ;;  %v7397_v28 = vadd.f32 %v7388_v52, %v16902_v0  ;;  %v12452_v52 = vld [vmem:[%s16576_s12 + $0xe0] ss:$16 sps:$4 sm:$0xff]   ;;  %v12472_v24 = vld [vmem:[%s16576_s12 + $0x24] ss:$16 sps:$4 sm:$0xff]  }
0x138a   :  { %13048 = vpow2.f32 %v10824_v41  ;;  %v10826_v1 = vmul.f32 -1.442695, %v7413_v32 }
0x138b   :  { %13050 = vpow2.f32 %v10825_v13 }
0x138c   :  { %13052 = vpow2.f32 %v10826_v1 }
0x1393   :  { %v13047_v12 = vpop.eup %13046 }
0x1394   :  { %v7406_v56 = vadd.f32 1.0, %v13047_v12 }
0x1396   :  { %13054 = vrcp.f32 %v7406_v56 }
0x1397   :  { %v13049_v39 = vpop.eup %13048 }
0x1398   :  { %v7407_v19 = vadd.f32 1.0, %v13049_v39  ;;  %v13051_v37 = vpop.eup %13050 }
0x1399   :  { %v13053_v22 = vpop.eup %13052  ;;  %v7420_v16 = vadd.f32 1.0, %v13051_v37 }
0x139a   :  { %13056 = vrcp.f32 %v7407_v19  ;;  %v7421_v30 = vadd.f32 1.0, %v13053_v22  ;;  %v12458_v22 = vld [vmem:[%s16576_s12 + $0xa0] ss:$16 sps:$4 sm:$0xff]  }
0x139b   :  { %13058 = vrcp.f32 %v7420_v16  ;;  %v12463_v16 = vld [vmem:[%s16576_s12 + $0x84] ss:$16 sps:$4 sm:$0xff]  }
0x139c   :  { %13060 = vrcp.f32 %v7421_v30  ;;  %v12467_v30 = vld [vmem:[%s16576_s12 + $0x40] ss:$16 sps:$4 sm:$0xff]  }
0x139f   :  { %v15982_v5 = vpop.f32.mrf.mxu0 }
0x13a1   :  { %v11788_v62 = vpop.f32.mrf.mxu0 }
0x13a2   :  { %v12461_v62 = vld [vmem:[%s16576_s12 + $0x80] ss:$16 sps:$4 sm:$0xff]  }
0x13a3   :  { %v13055_v55 = vpop.eup %13054  ;;  %v15984_v61 = vpop.f32.mrf.mxu0 }
0x13a4   :  { %v7435_v23 = vmul.f32 %v13055_v55, %v7433_v53  ;;  %v12464_v53 = vld [vmem:[%s16576_s12 + $0x60] ss:$16 sps:$4 sm:$0xff]   ;;  %v12469_v55 = vld [vmem:[%s16576_s12 + $0x44] ss:$16 sps:$4 sm:$0xff]  }
0x13a5   :  { %v11789_v15 = vpop.f32.mrf.mxu0 }
0x13a6   :  { %v7437_v54 = vadd.f32 %v7435_v23, %v7394_v59  ;;  %v12470_v59 = vld [vmem:[%s16576_s12 + $0x20] ss:$16 sps:$4 sm:$0xff]   ;;  %v12475_v23 = vld [vmem:[%s16576_s12 + $0x4] ss:$16 sps:$4 sm:$0xff]  }
0x13a7   :  { %v13057_v48 = vpop.eup %13056  ;;  %v12473_v15 = vld [vmem:[%s16576_s12] ss:$16 sps:$4 sm:$0xff]  }
0x13a8   :  { %13062 = vtanh.f32 %v7437_v54  ;;  %v7436_v49 = vmul.f32 %v13057_v48, %v7434_v36  ;;  %v13059_v6 = vpop.eup %13058  ;;  %v10829_v54 = vld [vmem:[%s16582_s18] ss:$0 sm:$0xff] }
0x13a9   :  { %v13061_v35 = vpop.eup %13060  ;;  %v7441_v41 = vsub.f32 1.0, %v13059_v6  ;;  %v7445_v2 = vmul.f32 %v13059_v6, %v15678_v45  ;;  %v12457_v45 = vld [vmem:[%s16576_s12 + $0xc4] ss:$16 sps:$4 sm:$0xff]  }
0x13aa   :  { %v7438_v21 = vadd.f32 %v7436_v49, %v7397_v28  ;;  %v7442_v1 = vsub.f32 1.0, %v13061_v35  ;;  %v7446_v39 = vmul.f32 %v13061_v35, %v15681_v57  ;;  %v12455_v57 = vld [vmem:[%s16576_s12 + $0xc0] ss:$16 sps:$4 sm:$0xff]  }
0x13ac   :  { %13064 = vtanh.f32 %v7438_v21 }
0x13b5   :  { %v13063_v32 = vpop.eup %13062 }
0x13b6   :  { %v7443_v13 = vmul.f32 %v13063_v32, %v7441_v41 }
0x13b8   :  { %v15989_v12 = vadd.f32 %v7445_v2, %v7443_v13 }
0x13b9   :  { %v13065_v31 = vpop.eup %13064 }
0x13ba   :  { %v7444_v56 = vmul.f32 %v13065_v31, %v7442_v1 }
0x13bc   :  { %v15992_v19 = vadd.f32 %v7446_v39, %v7444_v56 }
0x13be   :  { %v7449_v37 = vpack.c.bf16 %v15992_v19, %v15989_v12 }
0x13c0   :  { %7688 = vmatmul.mubr.bf16.vlgmr.msra.gmra.mxu1 %v7449_v37  ;;  %8011 = vmatmul.mubr.bf16.vlgmr.msra.gmra.mxu0 %v7449_v37 }
0x13c1   :  { %7936 = vmatpush1.bf16.msra.mxu1 %v12452_v52  ;;  %7967 = vmatprep.mubr.bf16.mxu1 %v16806_v8 }
0x13c2   :  { %7937 = vmatprep.subr.bf16.mxu1 %v12457_v45  ;;  %11806 = vmatprep.mubr.msk.bf16.mxu0 %vm16805_vm9, %v15876_v42  ;;  %v12466_v42 = vld [vmem:[%s16576_s12 + $0x64] ss:$16 sps:$4 sm:$0xff]  }
0x13c5   :  { %7938 = vmatpush1.bf16.msra.mxu1 %v12455_v57  ;;  %v16903_v57 = vld [vmem:[#allocation21_spill] sm:$0xff] }
0x13c6   :  { %7939 = vmatprep.subr.bf16.mxu1 %v12460_v50 }
0x13c9   :  { %7940 = vmatpush1.bf16.msra.mxu1 %v12458_v22  ;;  %v16070_v22 = vld [vmem:[%s16575_s11] ss:$0 sm:$0xff] }
0x13ca   :  { %7941 = vmatprep.subr.bf16.mxu1 %v12463_v16  ;;  %v16904_v16 = vld [vmem:[#allocation23_spill] sm:$0xff] }
0x13cd   :  { %7942 = vmatpush1.bf16.msra.mxu1 %v12461_v62 }
0x13ce   :  { %7943 = vmatprep.subr.bf16.mxu1 %v12466_v42 }
0x13d1   :  { %7944 = vmatpush1.bf16.msra.mxu1 %v12464_v53 }
0x13d2   :  { %7945 = vmatprep.subr.bf16.mxu1 %v12469_v55 }
0x13d5   :  { %7946 = vmatpush1.bf16.msra.mxu1 %v12467_v30  ;;  %v16905_v30 = vld [vmem:[#allocation67_spill] sm:$0xff] }
0x13d6   :  { %7947 = vmatprep.subr.bf16.mxu1 %v12472_v24 }
0x13d9   :  { %7948 = vmatpush1.bf16.msra.mxu1 %v12470_v59 }
0x13da   :  { %7949 = vmatprep.subr.bf16.mxu1 %v12475_v23 }
0x13dd   :  { %7950 = vmatpush1.bf16.msra.mxu1 %v12473_v15  ;;  %v16906_v15 = vld [vmem:[#allocation68_spill] sm:$0xff] }
0x13e0   :  { %7968 = vmatmul.mubr.bf16.vlgmr.msra.gmra.mxu1 %v7449_v37 }
0x13e1   :  { %8592 = vmatprep.mubr.bf16.mxu1 %v16806_v8 }
0x1480   :  { %v11295_v36 = vpop.f32.mrf.mxu1 }
0x1482   :  { %v11296_v48 = vpop.f32.mrf.mxu1 }
0x1483   :  { %v11297_v0 = vadd.f32 %v11296_v48, %v11295_v36 }
0x1484   :  { %v11298_v28 = vpop.f32.mrf.mxu1 }
0x1485   :  { %v7690_v49 = vadd.f32 %v11297_v0, %v10829_v54  ;;  %v16907_v0 = vld [vmem:[#allocation45_spill] sm:$0xff] }
0x1486   :  { %v11299_v21 = vpop.f32.mrf.mxu1 }
0x1487   :  { %v7731_v6 = vadd.f32 %v15982_v5, %v7690_v49  ;;  %v11300_v35 = vadd.f32 %v11299_v21, %v11298_v28 }
0x1489   :  { %10854 = vst [vmem:[%s16583_s19 + $0x30] sm:$0xff] %v7731_v6  ;;  %v7693_v41 = vadd.f32 %v11300_v35, %v10829_v54  ;;  %v16908_v6 = vld [vmem:[#allocation49_spill] sm:$0xff] }
0x148b   :  { %v7734_v32 = vadd.f32 %v15984_v61, %v7693_v41 }
0x148d   :  { %10855 = vst [vmem:[%s16583_s19 + $0x38] sm:$0xff] %v7734_v32 }
0x14a0   :  { %v7969_v13 = vpop.f32.mrf.mxu1 }
0x14a1   :  { %v8041_v2 = vadd.f32 %v7969_v13, %v16817_v27  ;;  %v8037_v1 = vadd.f32 %v7969_v13, %v16818_v44  ;;  %v8043_v31 = vadd.f32 %v7969_v13, %v16819_v25  ;;  %v8039_v56 = vadd.f32 %v7969_v13, %v16820_v38 }
0x14a2   :  { %v16059_v5 = vpop.f32.mrf.mxu1  ;;  %v8045_v61 = vadd.f32 %v7969_v13, %v16821_v9  ;;  %v8047_v37 = vadd.f32 %v7969_v13, %v16823_v34  ;;  %v8049_v50 = vadd.f32 %v7969_v13, %v16903_v57  ;;  %v8051_v28 = vadd.f32 %v7969_v13, %v16907_v0  ;;  %v16927_v0 = vld [vmem:[#allocation75_spill] sm:$0xff] }
0x14a3   :  { %13066 = vtanh.f32 %v8041_v2 }
0x14a4   :  { %v7973_v39 = vpop.f32.mrf.mxu1  ;;  %13068 = vtanh.f32 %v8037_v1 }
0x14a5   :  { %13070 = vtanh.f32 %v8043_v31  ;;  %v8040_v52 = vadd.f32 %v7973_v39, %v16822_v14  ;;  %v8042_v45 = vadd.f32 %v7973_v39, %v16824_v63  ;;  %v8044_v62 = vadd.f32 %v7973_v39, %v16904_v16  ;;  %v16909_v31 = vld [vmem:[#allocation47_spill] sm:$0xff] }
0x14a6   :  { %13072 = vtanh.f32 %v8039_v56  ;;  %v8038_v24 = vadd.f32 %v7973_v39, %v16905_v30  ;;  %v8046_v36 = vadd.f32 %v7973_v39, %v16906_v15  ;;  %v8048_v35 = vadd.f32 %v7973_v39, %v16908_v6 }
0x14a7   :  { %13074 = vtanh.f32 %v8045_v61  ;;  %v8050_v56 = vadd.f32 %v7973_v39, %v16909_v31 }
0x14a8   :  { %13076 = vtanh.f32 %v8040_v52 }
0x14a9   :  { %13078 = vtanh.f32 %v8047_v37 }
0x14aa   :  { %13080 = vtanh.f32 %v8042_v45  ;;  %v16910_v45 = vld [vmem:[#allocation51_spill] sm:$0xff] }
0x14ab   :  { %13082 = vtanh.f32 %v8049_v50  ;;  %v8052_v50 = vadd.f32 %v7973_v39, %v16910_v45 }
0x14ac   :  { %13084 = vtanh.f32 %v8044_v62 }
0x14ad   :  { %13086 = vtanh.f32 %v8038_v24 }
0x14ae   :  { %13088 = vtanh.f32 %v8046_v36 }
0x14af   :  { %13090 = vtanh.f32 %v8051_v28 }
0x14b0   :  { %v13067_v42 = vpop.eup %13066  ;;  %13092 = vtanh.f32 %v8048_v35 }
0x14b1   :  { %v13069_v53 = vpop.eup %13068  ;;  %v8080_v55 = vmul.f32 %v13067_v42, %v16070_v22  ;;  %13094 = vtanh.f32 %v8050_v56 }
0x14b2   :  { %v13071_v59 = vpop.eup %13070  ;;  %v8076_v23 = vmul.f32 %v13069_v53, %v16070_v22  ;;  %13096 = vtanh.f32 %v8052_v50 }
0x14b3   :  { %v13073_v54 = vpop.eup %13072  ;;  %8100 = vadd.xlane.f32.xlu1 %v8080_v55  ;;  %v8082_v48 = vmul.f32 %v13071_v59, %v16070_v22 }
0x14b4   :  { %8092 = vadd.xlane.f32.xlu0 %v8076_v23  ;;  %v13075_v49 = vpop.eup %13074  ;;  %v8078_v21 = vmul.f32 %v13073_v54, %v16070_v22 }
0x14b5   :  { %v13077_v41 = vpop.eup %13076  ;;  %v8084_v32 = vmul.f32 %v13075_v49, %v16070_v22 }
0x14b6   :  { %v13079_v2 = vpop.eup %13078  ;;  %v8079_v1 = vmul.f32 %v13077_v41, %v16070_v22 }
0x14b7   :  { %8104 = vadd.xlane.f32.xlu1 %v8082_v48  ;;  %v13081_v61 = vpop.eup %13080  ;;  %v8086_v13 = vmul.f32 %v13079_v2, %v16070_v22 }
0x14b8   :  { %8096 = vadd.xlane.f32.xlu0 %v8078_v21  ;;  %v13083_v52 = vpop.eup %13082  ;;  %v8081_v37 = vmul.f32 %v13081_v61, %v16070_v22 }
0x14b9   :  { %v13085_v62 = vpop.eup %13084  ;;  %v8088_v42 = vmul.f32 %v13083_v52, %v16070_v22 }
0x14ba   :  { %v13087_v53 = vpop.eup %13086  ;;  %v8083_v55 = vmul.f32 %v13085_v62, %v16070_v22 }
0x14bb   :  { %8108 = vadd.xlane.f32.xlu1 %v8084_v32  ;;  %v13089_v24 = vpop.eup %13088  ;;  %v8077_v59 = vmul.f32 %v13087_v53, %v16070_v22 }
0x14bc   :  { %8098 = vadd.xlane.f32.xlu0 %v8079_v1  ;;  %v13091_v23 = vpop.eup %13090  ;;  %v8085_v36 = vmul.f32 %v13089_v24, %v16070_v22 }
0x14bd   :  { %v13093_v54 = vpop.eup %13092  ;;  %v8090_v39 = vmul.f32 %v13091_v23, %v16070_v22 }
0x14be   :  { %v8087_v48 = vmul.f32 %v13093_v54, %v16070_v22  ;;  %v13095_v28 = vpop.eup %13094 }
0x14bf   :  { %8112 = vadd.xlane.f32.xlu1 %v8086_v13  ;;  %v8089_v49 = vmul.f32 %v13095_v28, %v16070_v22  ;;  %v13097_v21 = vpop.eup %13096 }
0x14c0   :  { %8102 = vadd.xlane.f32.xlu0 %v8081_v37  ;;  %v8091_v35 = vmul.f32 %v13097_v21, %v16070_v22  ;;  %v16911_v37 = vld [vmem:[#allocation20_spill] sm:$0xff]  ;;  %v16917_v22 = vld [vmem:[#allocation70_spill] sm:$0xff] }
0x14c1   :  { %vm16912_vm5 = vcmp.gt.f32.partialorder %v16911_v37, 0.0  ;;  %vm16918_vm8 = vcmp.gt.f32.partialorder %v16917_v22, 0.0 }
0x14c3   :  { %8116 = vadd.xlane.f32.xlu1 %v8088_v42  ;;  %v16913_v42 = vld [vmem:[#allocation22_spill] sm:$0xff] }
0x14c4   :  { %8106 = vadd.xlane.f32.xlu0 %v8083_v55  ;;  %vm16914_vm6 = vcmp.gt.f32.partialorder %v16913_v42, 0.0  ;;  %v16915_v55 = vld [vmem:[#allocation69_spill] sm:$0xff] }
0x14c5   :  { %vm16916_vm7 = vcmp.gt.f32.partialorder %v16915_v55, 0.0  ;;  %v16925_v55 = vld [vmem:[#allocation74_spill] sm:$0xff] }
0x14c6   :  { %vm16926_vm4 = vcmp.gt.f32.partialorder %v16925_v55, 0.0 }
0x14c7   :  { %8094 = vadd.xlane.f32.xlu1 %v8077_v59 }
0x14c8   :  { %8110 = vadd.xlane.f32.xlu0 %v8085_v36  ;;  %v16919_v36 = vld [vmem:[#allocation71_spill] sm:$0xff] }
0x14c9   :  { %vm16920_vm10 = vcmp.gt.f32.partialorder %v16919_v36, 0.0 }
0x14cb   :  { %8120 = vadd.xlane.f32.xlu1 %v8090_v39  ;;  %v16921_v39 = vld [vmem:[#allocation72_spill] sm:$0xff] }
0x14cc   :  { %8114 = vadd.xlane.f32.xlu0 %v8087_v48  ;;  %vm16922_vm11 = vcmp.gt.f32.partialorder %v16921_v39, 0.0 }
0x14d0   :  { %8118 = vadd.xlane.f32.xlu0 %v8089_v49 }
0x14d4   :  { %8122 = vadd.xlane.f32.xlu0 %v8091_v35 }
0x153c   :  { %v8101_v41 = vpop.xlane.xlu1 %8100 }
0x153d   :  { %v8093_v32 = vpop.xlane.xlu0 %8092  ;;  %v8128_v50 = vsel %vm16912_vm5, %v8101_v41, -1e+10  ;;  %vm16928_vm5 = vcmp.gt.f32.partialorder %v16927_v0, 0.0 }
0x153e   :  { %v8124_v53 = vsel %vm16914_vm6, %v8093_v32, -1e+10  ;;  %v8142_v28 = vsel %vm4384_vm15, %v8128_v50, -inf  ;;  %v16923_v32 = vld [vmem:[#allocation73_spill] sm:$0xff] }
0x153f   :  { %v8140_v49 = vsel %vm4384_vm15, %v8124_v53, -inf  ;;  %vm16924_vm14 = vcmp.gt.f32.partialorder %v16923_v32, 0.0 }
0x1540   :  { %v8105_v2 = vpop.xlane.xlu1 %8104  ;;  %v8143_v36 = vmax.f32 %v8140_v49, %v8142_v28 }
0x1541   :  { %v8097_v1 = vpop.xlane.xlu0 %8096  ;;  %v8130_v24 = vsel %vm16916_vm7, %v8105_v2, -1e+10 }
0x1542   :  { %v8126_v59 = vsel %vm16918_vm8, %v8097_v1, -1e+10  ;;  %v8144_v21 = vsel %vm4384_vm15, %v8130_v24, -inf }
0x1543   :  { %v8141_v35 = vsel %vm4384_vm15, %v8126_v59, -inf }
0x1544   :  { %v8109_v56 = vpop.xlane.xlu1 %8108  ;;  %v8145_v39 = vmax.f32 %v8141_v35, %v8144_v21 }
0x1545   :  { %v8099_v61 = vpop.xlane.xlu0 %8098  ;;  %v8132_v54 = vsel %vm16920_vm10, %v8109_v56, -1e+10 }
0x1546   :  { %v8146_v22 = vsel %vm4384_vm15, %v8132_v54, -inf }
0x1547   :  { %v8147_v45 = vmax.f32 %v8143_v36, %v8146_v22  ;;  %v8127_v22 = vsel %vm4355_vm1, %v8099_v61, -1e+10 }
0x1548   :  { %v8113_v13 = vpop.xlane.xlu1 %8112  ;;  %v8156_v61 = vsel %vm4384_vm15, %v8127_v22, -inf }
0x1549   :  { %v8103_v52 = vpop.xlane.xlu0 %8102  ;;  %v8134_v48 = vsel %vm16922_vm11, %v8113_v13, -1e+10 }
0x154a   :  { %v8148_v56 = vsel %vm4384_vm15, %v8134_v48, -inf  ;;  %v8129_v15 = vsel %vm4357_vm0, %v8103_v52, -1e+10 }
0x154b   :  { %v8149_v31 = vmax.f32 %v8145_v39, %v8148_v56  ;;  %v8157_v36 = vsel %vm4384_vm15, %v8129_v15, -inf  ;;  %v16932_v39 = vld [vmem:[#allocation80_spill] sm:$0xff] }
0x154c   :  { %v8117_v62 = vpop.xlane.xlu1 %8116  ;;  %vm16933_vm6 = vcmp.gt.f32.partialorder %v16932_v39, 0.0 }
0x154d   :  { %v8107_v23 = vpop.xlane.xlu0 %8106  ;;  %v8136_v2 = vsel %vm16924_vm14, %v8117_v62, -1e+10 }
0x154e   :  { %v8150_v13 = vsel %vm4384_vm15, %v8136_v2, -inf  ;;  %v8131_v49 = vsel %vm4359_vm2, %v8107_v23, -1e+10 }
0x154f   :  { %v8151_v16 = vmax.f32 %v8147_v45, %v8150_v13  ;;  %v8159_v62 = vsel %vm4384_vm15, %v8131_v49, -inf }
0x1550   :  { %v8095_v41 = vpop.xlane.xlu1 %8094 }
0x1551   :  { %v8111_v1 = vpop.xlane.xlu0 %8110  ;;  %v8125_v42 = vsel %vm16926_vm4, %v8095_v41, -1e+10 }
0x1552   :  { %v8155_v21 = vsel %vm4384_vm15, %v8125_v42, -inf  ;;  %v8133_v13 = vsel %vm4361_vm12, %v8111_v1, -1e+10 }
0x1553   :  { %v8158_v23 = vmax.f32 %v8155_v21, %v8157_v36  ;;  %v8161_v1 = vsel %vm4384_vm15, %v8133_v13, -inf }
0x1554   :  { %v8121_v37 = vpop.xlane.xlu1 %8120 }
0x1555   :  { %v8115_v6 = vpop.xlane.xlu0 %8114  ;;  %v8138_v32 = vsel %vm16928_vm5, %v8121_v37, -1e+10 }
0x1556   :  { %v8152_v30 = vsel %vm4384_vm15, %v8138_v32, -inf  ;;  %v16131_v37 = vsel %vm16933_vm6, %v8115_v6, -1e+10  ;;  %v8160_v6 = vmax.f32 %v8156_v61, %v8159_v62 }
0x1557   :  { %v8153_v35 = vmax.f32 %v8149_v31, %v8152_v30  ;;  %v8163_v41 = vsel %vm4384_vm15, %v16131_v37, -inf }
0x1559   :  { %v8154_v56 = vmax.f32 %v8151_v16, %v8153_v35  ;;  %v8119_v52 = vpop.xlane.xlu0 %8118 }
0x155a   :  { %v8137_v16 = vsel %vm4365_vm3, %v8119_v52, -1e+10 }
0x155b   :  { %v8170_v28 = vsub.f32 %v8124_v53, %v8154_v56  ;;  %v8172_v0 = vsub.f32 %v8126_v59, %v8154_v56  ;;  %v8174_v30 = vsub.f32 %v8128_v50, %v8154_v56  ;;  %v8176_v31 = vsub.f32 %v8130_v24, %v8154_v56 }
0x155c   :  { %v8178_v39 = vsub.f32 %v8132_v54, %v8154_v56  ;;  %v8180_v53 = vsub.f32 %v8134_v48, %v8154_v56  ;;  %v8164_v50 = vmax.f32 %v8160_v6, %v8163_v41  ;;  %v8162_v24 = vmax.f32 %v8158_v23, %v8161_v1 }
0x155d   :  { %v8186_v35 = vmul.f32 1.442695, %v8170_v28  ;;  %v8190_v55 = vmul.f32 1.442695, %v8172_v0  ;;  %v8194_v57 = vmul.f32 1.442695, %v8174_v30  ;;  %v8123_v45 = vpop.xlane.xlu0 %8122  ;;  %v8182_v36 = vsub.f32 %v8136_v2, %v8154_v56 }
0x155e   :  { %v8198_v59 = vmul.f32 1.442695, %v8176_v31  ;;  %v8165_v21 = vsel %vm4384_vm15, %v8137_v16, -inf  ;;  %v8202_v54 = vmul.f32 1.442695, %v8178_v39  ;;  %v8184_v62 = vsub.f32 %v8138_v32, %v8154_v56 }
0x155f   :  { %13098 = vpow2.f32 %v8186_v35  ;;  %v8139_v52 = vsel %vm4367_vm13, %v8123_v45, -1e+10  ;;  %v8206_v28 = vmul.f32 1.442695, %v8180_v53  ;;  %v8166_v30 = vmax.f32 %v8162_v24, %v8165_v21 }
0x1560   :  { %13100 = vpow2.f32 %v8190_v55  ;;  %v8167_v0 = vsel %vm4384_vm15, %v8139_v52, -inf  ;;  %v8210_v41 = vmul.f32 1.442695, %v8182_v36  ;;  %v8214_v23 = vmul.f32 1.442695, %v8184_v62 }
0x1561   :  { %13102 = vpow2.f32 %v8194_v57  ;;  %v8168_v48 = vmax.f32 %v8164_v50, %v8167_v0 }
0x1562   :  { %13104 = vpow2.f32 %v8198_v59 }
0x1563   :  { %13106 = vpow2.f32 %v8202_v54  ;;  %v8169_v31 = vmax.f32 %v8166_v30, %v8168_v48 }
0x1564   :  { %13108 = vpow2.f32 %v8206_v28 }
0x1565   :  { %v8171_v61 = vsub.f32 %v8125_v42, %v8169_v31  ;;  %v8173_v2 = vsub.f32 %v8127_v22, %v8169_v31  ;;  %v8175_v55 = vsub.f32 %v8129_v15, %v8169_v31  ;;  %v8177_v39 = vsub.f32 %v8131_v49, %v8169_v31 }
0x1566   :  { %v8179_v6 = vsub.f32 %v8133_v13, %v8169_v31  ;;  %13110 = vpow2.f32 %v8210_v41  ;;  %v8181_v56 = vsub.f32 %v16131_v37, %v8169_v31  ;;  %v8183_v1 = vsub.f32 %v8137_v16, %v8169_v31 }
0x1567   :  { %v8188_v45 = vmul.f32 1.442695, %v8171_v61  ;;  %v8192_v32 = vmul.f32 1.442695, %v8173_v2  ;;  %v8196_v57 = vmul.f32 1.442695, %v8175_v55  ;;  %13112 = vpow2.f32 %v8214_v23 }
0x1568   :  { %v8200_v35 = vmul.f32 1.442695, %v8177_v39  ;;  %v8204_v53 = vmul.f32 1.442695, %v8179_v6  ;;  %v8185_v15 = vsub.f32 %v8139_v52, %v8169_v31  ;;  %v8208_v49 = vmul.f32 1.442695, %v8181_v56 }
0x1569   :  { %13114 = vpow2.f32 %v8188_v45  ;;  %v8212_v37 = vmul.f32 1.442695, %v8183_v1 }
0x156a   :  { %13116 = vpow2.f32 %v8192_v32  ;;  %v8216_v62 = vmul.f32 1.442695, %v8185_v15 }
0x156b   :  { %13118 = vpow2.f32 %v8196_v57 }
0x156c   :  { %v13099_v59 = vpop.eup %13098  ;;  %13120 = vpow2.f32 %v8200_v35 }
0x156d   :  { %v13101_v50 = vpop.eup %13100  ;;  %v8218_v42 = vsel %vm4384_vm15, %v13099_v59, 0.0  ;;  %13122 = vpow2.f32 %v8204_v53 }
0x156e   :  { %v13103_v22 = vpop.eup %13102  ;;  %v8219_v13 = vsel %vm4384_vm15, %v13101_v50, 0.0  ;;  %13124 = vpow2.f32 %v8208_v49 }
0x156f   :  { %v13105_v24 = vpop.eup %13104  ;;  %v8220_v21 = vadd.f32 %v8219_v13, %v8218_v42  ;;  %v8221_v36 = vsel %vm4384_vm15, %v13103_v22, 0.0  ;;  %13126 = vpow2.f32 %v8212_v37 }
0x1570   :  { %v13107_v16 = vpop.eup %13106  ;;  %v8223_v0 = vsel %vm4384_vm15, %v13105_v24, 0.0  ;;  %13128 = vpow2.f32 %v8216_v62 }
0x1571   :  { %v8222_v54 = vadd.f32 %v8221_v36, %v8220_v21  ;;  %v16151_v28 = vpop.eup %13108  ;;  %v8225_v30 = vsel %vm4384_vm15, %v13107_v16, 0.0 }
0x1572   :  { %v8227_v23 = vsel %vm4384_vm15, %v16151_v28, 0.0 }
0x1573   :  { %v8224_v52 = vadd.f32 %v8223_v0, %v8222_v54  ;;  %v16154_v48 = vpop.eup %13110 }
0x1574   :  { %v16156_v31 = vpop.eup %13112  ;;  %v8229_v39 = vsel %vm4384_vm15, %v16154_v48, 0.0 }
0x1575   :  { %v8226_v41 = vadd.f32 %v8225_v30, %v8224_v52  ;;  %v8231_v35 = vsel %vm4384_vm15, %v16156_v31, 0.0 }
0x1576   :  { %v13115_v61 = vpop.eup %13114 }
0x1577   :  { %v8228_v2 = vadd.f32 %v8227_v23, %v8226_v41  ;;  %v13117_v55 = vpop.eup %13116  ;;  %v8233_v6 = vsel %vm4384_vm15, %v13115_v61, 0.0 }
0x1578   :  { %v13119_v45 = vpop.eup %13118  ;;  %v8234_v57 = vsel %vm4384_vm15, %v13117_v55, 0.0 }
0x1579   :  { %v8230_v32 = vadd.f32 %v8229_v39, %v8228_v2  ;;  %v13121_v56 = vpop.eup %13120  ;;  %v8235_v1 = vadd.f32 %v8234_v57, %v8233_v6  ;;  %v8236_v42 = vsel %vm4384_vm15, %v13119_v45, 0.0 }
0x157a   :  { %v16167_v15 = vpop.eup %13122  ;;  %v8238_v13 = vsel %vm4384_vm15, %v13121_v56, 0.0 }
0x157b   :  { %v8232_v53 = vadd.f32 %v8231_v35, %v8230_v32  ;;  %v8237_v49 = vadd.f32 %v8236_v42, %v8235_v1  ;;  %v16170_v21 = vpop.eup %13124  ;;  %v8240_v36 = vsel %vm4384_vm15, %v16167_v15, 0.0  ;;  %v12478_v42 = vld [vmem:[#allocation11 + $0xac] ss:$12 sps:$4 sm:$0xff]  }
0x157c   :  { %v16174_v54 = vpop.eup %13126  ;;  %v8242_v0 = vsel %vm4384_vm15, %v16170_v21, 0.0  ;;  %8560 = vmatprep.subr.bf16.mxu1 %v12478_v42 }
0x157d   :  { %13130 = vrcp.f32 %v8232_v53  ;;  %v8239_v37 = vadd.f32 %v8238_v13, %v8237_v49  ;;  %v16178_v52 = vpop.eup %13128  ;;  %v8244_v41 = vsel %vm4384_vm15, %v16174_v54, 0.0  ;;  %v12476_v53 = vld [vmem:[#allocation11 + $0xa8] ss:$12 sps:$4 sm:$0xff]   ;;  %v12479_v49 = vld [vmem:[#allocation11 + $0xb0] ss:$12 sps:$4 sm:$0xff]  }
0x157e   :  { %v8246_v2 = vsel %vm4384_vm15, %v16178_v52, 0.0  ;;  %11791 = vmatpush3.bf16.msra.mxu0 %v12479_v49  ;;  %8561 = vmatpush1.bf16.msra.mxu1 %v12476_v53  ;;  %v12498_v53 = vld [vmem:[#allocation11 + $0x34] ss:$12 sps:$4 sm:$0xff]  }
0x157f   :  { %v8241_v62 = vadd.f32 %v8240_v36, %v8239_v37  ;;  %v16187_v37 = vld [vmem:[%s16583_s19] sm:$0xff] }
0x1580   :  { %11792 = vmatprep.subr.bf16.mxu0 %v16187_v37  ;;  %v12503_v49 = vld [vmem:[#allocation11 + $0x20] ss:$12 sps:$4 sm:$0xff]  }
0x1581   :  { %v8243_v30 = vadd.f32 %v8242_v0, %v8241_v62  ;;  %v12484_v0 = vld [vmem:[#allocation11 + $0x78] ss:$12 sps:$4 sm:$0xff]  }
0x1583   :  { %v8245_v23 = vadd.f32 %v8244_v41, %v8243_v30  ;;  %v12486_v30 = vld [vmem:[#allocation11 + $0x7c] ss:$12 sps:$4 sm:$0xff]   ;;  %v12487_v41 = vld [vmem:[#allocation11 + $0x80] ss:$12 sps:$4 sm:$0xff]  }
0x1585   :  { %v8247_v39 = vadd.f32 %v8246_v2, %v8245_v23 }
0x1587   :  { %13132 = vrcp.f32 %v8247_v39  ;;  %v12491_v39 = vld [vmem:[#allocation11 + $0x68] ss:$12 sps:$4 sm:$0xff]  }
0x158a   :  { %v13131_v6 = vpop.eup %13130 }
0x158b   :  { %v8254_v32 = vmul.f32 %v13131_v6, %v13103_v22  ;;  %v8250_v57 = vmul.f32 %v13131_v6, %v13099_v59  ;;  %v8256_v35 = vmul.f32 %v13131_v6, %v13105_v24  ;;  %v8252_v1 = vmul.f32 %v13131_v6, %v13101_v50  ;;  %v12480_v22 = vld [vmem:[#allocation11 + $0x90] ss:$12 sps:$4 sm:$0xff]   ;;  %v12482_v50 = vld [vmem:[#allocation11 + $0x94] ss:$12 sps:$4 sm:$0xff]   ;;  %v12483_v24 = vld [vmem:[#allocation11 + $0x98] ss:$12 sps:$4 sm:$0xff]  }
0x158c   :  { %v8258_v13 = vmul.f32 %v13131_v6, %v13107_v16  ;;  %8562 = vmatprep.subr.bf16.mxu1 %v12482_v50  ;;  %11793 = vmatpush3.bf16.msra.mxu0 %v12483_v24  ;;  %v8260_v23 = vmul.f32 %v13131_v6, %v16151_v28  ;;  %v12492_v28 = vld [vmem:[#allocation11 + $0x48] ss:$12 sps:$4 sm:$0xff]  }
0x158d   :  { %8304 = vperm.xlu0 %11882, %v8254_v32   ;;  %8284 = vperm.xlu1 %11883, %v8250_v57   ;;  %v12494_v57 = vld [vmem:[#allocation11 + $0x4c] ss:$12 sps:$4 sm:$0xff]   ;;  %v12507_v50 = vld [vmem:[#allocation11 + $0x8] ss:$12 sps:$4 sm:$0xff]  }
0x158e   :  { %8563 = vmatpush1.bf16.msra.mxu1 %v12480_v22  ;;  %11794 = vmatprep.subr.bf16.mxu0 %v16187_v37  ;;  %v12506_v22 = vld [vmem:[#allocation11 + $0x4] ss:$12 sps:$4 sm:$0xff]  }
0x158f   :  { %8564 = vmatprep.subr.bf16.mxu1 %v12486_v30 }
0x1590   :  { %11795 = vmatpush3.bf16.msra.mxu0 %v12487_v41 }
0x1591   :  { %8314 = vperm.xlu0 %11882, %v8256_v35   ;;  %8294 = vperm.xlu1 %11883, %v8252_v1   ;;  %v8264_v35 = vmul.f32 %v13131_v6, %v16156_v31  ;;  %v12496_v1 = vld [vmem:[#allocation11 + $0x30] ss:$12 sps:$4 sm:$0xff]   ;;  %v12500_v31 = vld [vmem:[#allocation11 + $0x18] ss:$12 sps:$4 sm:$0xff]  }
0x1592   :  { %8565 = vmatpush1.bf16.msra.mxu1 %v12484_v0  ;;  %11796 = vmatprep.subr.bf16.mxu0 %v16187_v37 }
0x1594   :  { %v13133_v59 = vpop.eup %13132  ;;  %11797 = vmatpush3.bf16.msra.mxu0 %v12491_v39 }
0x1595   :  { %8324 = vperm.xlu0 %11882, %v8258_v13   ;;  %v8253_v36 = vmul.f32 %v13133_v59, %v13117_v55  ;;  %v8251_v62 = vmul.f32 %v13133_v59, %v13115_v61  ;;  %v8255_v16 = vmul.f32 %v13133_v59, %v13119_v45  ;;  %v8257_v2 = vmul.f32 %v13133_v59, %v13121_v56  ;;  %v12488_v61 = vld [vmem:[#allocation11 + $0x60] ss:$12 sps:$4 sm:$0xff]   ;;  %v12490_v55 = vld [vmem:[#allocation11 + $0x64] ss:$12 sps:$4 sm:$0xff]  }
0x1596   :  { %v8262_v45 = vmul.f32 %v13131_v6, %v16154_v48  ;;  %8566 = vmatprep.subr.bf16.mxu1 %v12490_v55  ;;  %v8259_v32 = vmul.f32 %v13133_v59, %v16167_v15  ;;  %11798 = vmatprep.subr.bf16.mxu0 %v16187_v37  ;;  %v12495_v56 = vld [vmem:[#allocation11 + $0x50] ss:$12 sps:$4 sm:$0xff]   ;;  %v8261_v48 = vmul.f32 %v13133_v59, %v16170_v21  ;;  %v12499_v15 = vld [vmem:[#allocation11 + $0x38] ss:$12 sps:$4 sm:$0xff]   ;;  %v12504_v13 = vld [vmem:[#allocation11] ss:$12 sps:$4 sm:$0xff]  }
0x1597   :  { %8299 = vperm.xlu1 %11883, %v8253_v36   ;;  %8567 = vmatpush1.bf16.msra.mxu1 %v12488_v61  ;;  %v8263_v42 = vmul.f32 %v13133_v59, %v16174_v54  ;;  %v12502_v6 = vld [vmem:[#allocation11 + $0x1c] ss:$12 sps:$4 sm:$0xff]   ;;  %v8265_v21 = vmul.f32 %v13133_v59, %v16178_v52 }
0x1598   :  { %8568 = vmatprep.subr.bf16.mxu1 %v12494_v57  ;;  %11799 = vmatpush3.bf16.msra.mxu0 %v12495_v56 }
0x1599   :  { %8289 = vperm.xlu0 %11882, %v8251_v62   ;;  %11800 = vmatprep.subr.bf16.mxu0 %v16187_v37 }
0x159b   :  { %8309 = vperm.xlu1 %11883, %v8255_v16   ;;  %8569 = vmatpush1.bf16.msra.mxu1 %v12492_v28 }
0x159c   :  { %8570 = vmatprep.subr.bf16.mxu1 %v12498_v53  ;;  %11801 = vmatpush3.bf16.msra.mxu0 %v12499_v15 }
0x159d   :  { %8334 = vperm.xlu0 %11882, %v8260_v23   ;;  %11802 = vmatprep.subr.bf16.mxu0 %v16187_v37 }
0x159f   :  { %8319 = vperm.xlu1 %11883, %v8257_v2   ;;  %8571 = vmatpush1.bf16.msra.mxu1 %v12496_v1 }
0x15a0   :  { %8572 = vmatprep.subr.bf16.mxu1 %v12502_v6  ;;  %11803 = vmatpush3.bf16.msra.mxu0 %v12503_v49 }
0x15a1   :  { %8344 = vperm.xlu0 %11882, %v8262_v45   ;;  %11804 = vmatprep.subr.bf16.mxu0 %v16187_v37 }
0x15a3   :  { %8329 = vperm.xlu1 %11883, %v8259_v32   ;;  %8573 = vmatpush1.bf16.msra.mxu1 %v12500_v31 }
0x15a4   :  { %8574 = vmatprep.subr.bf16.mxu1 %v12506_v22  ;;  %11805 = vmatpush3.bf16.msra.mxu0 %v12507_v50 }
0x15a5   :  { %8354 = vperm.xlu0 %11882, %v8264_v35   ;;  %11810 = vmatprep.subr.bf16.mxu0 %v16187_v37 }
0x15a7   :  { %8339 = vperm.xlu1 %11883, %v8261_v48   ;;  %8575 = vmatpush1.bf16.msra.mxu1 %v12504_v13 }
0x15ab   :  { %8349 = vperm.xlu1 %11883, %v8263_v42  }
0x15af   :  { %8359 = vperm.xlu1 %11883, %v8265_v21  }
0x1608   :  { %v8305_v54 = vpop.permute.xlu0 %8304  ;;  %v8285_v24 = vpop.permute.xlu1 %8284 }
0x1609   :  { %v8362_v41 = vmul.f32 %v8285_v24, %v14206_v3  ;;  %v8366_v45 = vmul.f32 %v8305_v54, %v15197_v4 }
0x160c   :  { %v8315_v36 = vpop.permute.xlu0 %8314  ;;  %v8295_v62 = vpop.permute.xlu1 %8294 }
0x160d   :  { %v8364_v59 = vmul.f32 %v8295_v62, %v15183_v7  ;;  %v8368_v48 = vmul.f32 %v8315_v36, %v15209_v10 }
0x160f   :  { %v8378_v55 = vadd.f32 %v8364_v59, %v8362_v41 }
0x1610   :  { %v8325_v16 = vpop.permute.xlu0 %8324 }
0x1611   :  { %v8379_v57 = vadd.f32 %v8378_v55, %v8366_v45  ;;  %v8370_v6 = vmul.f32 %v8325_v16, %v15227_v47  ;;  %v12508_v55 = vld [vmem:[#allocation13 + $0xb8] sm:$0xff]   ;;  %v12509_v45 = vld [vmem:[#allocation13 + $0xb0] sm:$0xff]  }
0x1612   :  { %v8300_v0 = vpop.permute.xlu1 %8299 }
0x1613   :  { %v8365_v39 = vmul.f32 %v8300_v0, %v15191_v18  ;;  %v8380_v42 = vadd.f32 %v8379_v57, %v8368_v48  ;;  %v12512_v57 = vld [vmem:[#allocation13 + $0x98] sm:$0xff]   ;;  %v12515_v48 = vld [vmem:[#allocation13 + $0x80] sm:$0xff]  }
0x1614   :  { %v8290_v30 = vpop.permute.xlu0 %8289 }
0x1615   :  { %v8363_v23 = vmul.f32 %v8290_v30, %v14216_v17  ;;  %v8381_v54 = vadd.f32 %v8380_v42, %v8370_v6  ;;  %v12518_v42 = vld [vmem:[%s16576_s12 + $0xe8] ss:$16 sps:$4 sm:$0xff]   ;;  %v12522_v6 = vld [vmem:[#allocation13 + $0x30] sm:$0xff]  }
0x1616   :  { %v8310_v52 = vpop.permute.xlu1 %8309 }
0x1617   :  { %v8385_v32 = vadd.f32 %v8365_v39, %v8363_v23  ;;  %v8367_v56 = vmul.f32 %v8310_v52, %v15203_v26 }
0x1618   :  { %v8335_v2 = vpop.permute.xlu0 %8334 }
0x1619   :  { %v8386_v1 = vadd.f32 %v8385_v32, %v8367_v56  ;;  %v8372_v49 = vmul.f32 %v8335_v2, %v15232_v33  ;;  %v12510_v32 = vld [vmem:[#allocation13 + $0xa8] sm:$0xff]   ;;  %v12513_v56 = vld [vmem:[#allocation13 + $0x90] sm:$0xff]  }
0x161a   :  { %v8320_v61 = vpop.permute.xlu1 %8319 }
0x161b   :  { %v8369_v53 = vmul.f32 %v8320_v61, %v15214_v29  ;;  %v8382_v0 = vadd.f32 %v8381_v54, %v8372_v49  ;;  %v12525_v49 = vld [vmem:[%s16576_s12 + $0xcc] ss:$16 sps:$4 sm:$0xff]   ;;  %v12528_v54 = vld [vmem:[%s16576_s12 + $0xa8] ss:$16 sps:$4 sm:$0xff]  }
0x161c   :  { %v8345_v35 = vpop.permute.xlu0 %8344 }
0x161d   :  { %v8387_v21 = vadd.f32 %v8386_v1, %v8369_v53  ;;  %v8374_v24 = vmul.f32 %v8345_v35, %v15245_v43  ;;  %v12514_v35 = vld [vmem:[#allocation13 + $0x88] sm:$0xff]   ;;  %v12516_v1 = vld [vmem:[#allocation13 + $0x78] sm:$0xff]  }
0x161e   :  { %v8330_v28 = vpop.permute.xlu1 %8329  ;;  %v12517_v53 = vld [vmem:[#allocation13 + $0x38] sm:$0xff]   ;;  %11319 = vmatprep.subr.bf16.mxu1 %v12516_v1  ;;  %v12559_v1 = vld [vmem:[%s16576_s12 + $0xe4] ss:$16 sps:$4 sm:$0xff]  }
0x161f   :  { %v8371_v31 = vmul.f32 %v8330_v28, %v15221_v58  ;;  %v8383_v41 = vadd.f32 %v8382_v0, %v8374_v24  ;;  %v12511_v28 = vld [vmem:[#allocation13 + $0xa0] sm:$0xff]   ;;  %v12533_v0 = vld [vmem:[%s16576_s12 + $0x88] ss:$16 sps:$4 sm:$0xff]  }
0x1620   :  { %v8355_v22 = vpop.permute.xlu0 %8354  ;;  %v12531_v24 = vld [vmem:[#allocation13 + $0x60] sm:$0xff]  }
0x1621   :  { %v8388_v36 = vadd.f32 %v8387_v21, %v8371_v31  ;;  %v8376_v30 = vmul.f32 %v8355_v22, %v15257_v60  ;;  %v12521_v31 = vld [vmem:[#allocation13 + $0x70] sm:$0xff]   ;;  %v12523_v21 = vld [vmem:[%s16576_s12 + $0xc8] ss:$16 sps:$4 sm:$0xff]  }
0x1622   :  { %v8340_v15 = vpop.permute.xlu1 %8339  ;;  %v12527_v22 = vld [vmem:[#allocation13 + $0x28] sm:$0xff]  }
0x1623   :  { %v8373_v13 = vmul.f32 %v8340_v15, %v15237_v20  ;;  %v8384_v2 = vadd.f32 %v8383_v41, %v8376_v30  ;;  %v12520_v15 = vld [vmem:[%s16576_s12 + $0xec] ss:$16 sps:$4 sm:$0xff]  }
0x1624   :  { %v12536_v30 = vld [vmem:[#allocation13 + $0x58] sm:$0xff]  }
0x1625   :  { %v8389_v52 = vadd.f32 %v8388_v36, %v8373_v13  ;;  %v12526_v13 = vld [vmem:[#allocation13 + $0x68] sm:$0xff]   ;;  %v12537_v41 = vld [vmem:[#allocation13 + $0x18] sm:$0xff]  }
0x1626   :  { %v8350_v50 = vpop.permute.xlu1 %8349  ;;  %v12535_v36 = vld [vmem:[%s16576_s12 + $0x8c] ss:$16 sps:$4 sm:$0xff]  }
0x1627   :  { %v8375_v62 = vmul.f32 %v8350_v50, %v15250_v40  ;;  %v12530_v50 = vld [vmem:[%s16576_s12 + $0xac] ss:$16 sps:$4 sm:$0xff]  }
0x1629   :  { %v8390_v16 = vadd.f32 %v8389_v52, %v8375_v62  ;;  %v12532_v62 = vld [vmem:[#allocation13 + $0x20] sm:$0xff]   ;;  %v12540_v52 = vld [vmem:[%s16576_s12 + $0x6c] ss:$16 sps:$4 sm:$0xff]  }
0x162a   :  { %v8360_v59 = vpop.permute.xlu1 %8359 }
0x162b   :  { %v8377_v23 = vmul.f32 %v8360_v59, %v15263_v46  ;;  %v12556_v59 = vld [vmem:[%s16686_s26 + $0x18] sm:$0xff]  }
0x162d   :  { %v8391_v61 = vadd.f32 %v8390_v16, %v8377_v23  ;;  %v12538_v16 = vld [vmem:[%s16576_s12 + $0x68] ss:$16 sps:$4 sm:$0xff]   ;;  %v12541_v23 = vld [vmem:[#allocation13 + $0x50] sm:$0xff]  }
0x162f   :  { %v8392_v39 = vpack.c.bf16 %v8391_v61, %v8384_v2  ;;  %v12545_v2 = vld [vmem:[%s16576_s12 + $0x4c] ss:$16 sps:$4 sm:$0xff]   ;;  %v12542_v61 = vld [vmem:[#allocation13 + $0x10] sm:$0xff]  }
0x1631   :  { %8593 = vmatmul.mubr.bf16.vlgmr.msra.gmra.mxu1 %v8392_v39  ;;  %11807 = vmatmul.mubr.bf16.vlgmr.msra.gmra.mxu0 %v8392_v39 }
0x1632   :  { %11811 = vmatpush3.bf16.msra.mxu0 %v12508_v55  ;;  %11826 = vmatprep.mubr.msk.bf16.mxu0 %vm16805_vm9, %v16187_v37  ;;  %v12543_v55 = vld [vmem:[%s16576_s12 + $0x48] ss:$16 sps:$4 sm:$0xff]  }
0x1633   :  { %11812 = vmatprep.subr.bf16.mxu0 %v16187_v37  ;;  %11320 = vmatpush3.bf16.msra.mxu1 %v12517_v53  ;;  %v8012_v53 = vpop.f32.mrf.mxu0 }
0x1634   :  { %11321 = vmatprep.subr.bf16.mxu1 %v12521_v31  ;;  %8939 = vmatprep.mubr.bf16.mxu1 %v12556_v59  ;;  %v16937_v59 = vld [vmem:[#allocation50_spill] sm:$0xff] }
0x1636   :  { %11813 = vmatpush3.bf16.msra.mxu0 %v12509_v45  ;;  %v12550_v45 = vld [vmem:[%s16576_s12 + $0x2c] ss:$16 sps:$4 sm:$0xff]  }
0x1637   :  { %11814 = vmatprep.subr.bf16.mxu0 %v16187_v37  ;;  %11322 = vmatpush3.bf16.msra.mxu1 %v12522_v6  ;;  %v7975_v6 = vpop.f32.mrf.mxu1 }
0x1638   :  { %11323 = vmatprep.subr.bf16.mxu1 %v12526_v13  ;;  %v16935_v13 = vld [vmem:[#allocation46_spill] sm:$0xff] }
0x163a   :  { %11815 = vmatpush3.bf16.msra.mxu0 %v12510_v32  ;;  %v12547_v32 = vld [vmem:[#allocation13 + $0x8] sm:$0xff]  }
0x163b   :  { %11816 = vmatprep.subr.bf16.mxu0 %v16187_v37  ;;  %11324 = vmatpush3.bf16.msra.mxu1 %v12527_v22 }
0x163c   :  { %11325 = vmatprep.subr.bf16.mxu1 %v12531_v24 }
0x163e   :  { %11817 = vmatpush3.bf16.msra.mxu0 %v12511_v28  ;;  %v12548_v28 = vld [vmem:[%s16576_s12 + $0x28] ss:$16 sps:$4 sm:$0xff]  }
0x163f   :  { %11818 = vmatprep.subr.bf16.mxu0 %v16187_v37  ;;  %11326 = vmatpush3.bf16.msra.mxu1 %v12532_v62 }
0x1640   :  { %11327 = vmatprep.subr.bf16.mxu1 %v12536_v30  ;;  %v16936_v30 = vld [vmem:[#allocation48_spill] sm:$0xff] }
0x1642   :  { %11819 = vmatpush3.bf16.msra.mxu0 %v12512_v57  ;;  %v12551_v57 = vld [vmem:[#allocation13 + $0x40] sm:$0xff]  }
0x1643   :  { %11820 = vmatprep.subr.bf16.mxu0 %v16187_v37  ;;  %11328 = vmatpush3.bf16.msra.mxu1 %v12537_v41 }
0x1644   :  { %11329 = vmatprep.subr.bf16.mxu1 %v12541_v23 }
0x1646   :  { %11821 = vmatpush3.bf16.msra.mxu0 %v12513_v56  ;;  %v12555_v56 = vld [vmem:[%s16576_s12 + $0xc] ss:$16 sps:$4 sm:$0xff]  }
0x1647   :  { %11822 = vmatprep.subr.bf16.mxu0 %v16187_v37  ;;  %11330 = vmatpush3.bf16.msra.mxu1 %v12542_v61  ;;  %v16938_v61 = vld [vmem:[#allocation52_spill] sm:$0xff] }
0x164a   :  { %11823 = vmatpush3.bf16.msra.mxu0 %v12514_v35  ;;  %v12552_v35 = vld [vmem:[#allocation13] sm:$0xff]  }
0x164b   :  { %11824 = vmatprep.subr.bf16.mxu0 %v16187_v37 }
0x164e   :  { %11825 = vmatpush3.bf16.msra.mxu0 %v12515_v48  ;;  %v12553_v48 = vld [vmem:[%s16576_s12 + $0x8] ss:$16 sps:$4 sm:$0xff]  }
0x164f   :  { %9230 = vmatprep.subr.bf16.mxu0 %v12520_v15  ;;  %v8014_v15 = vpop.f32.mrf.mxu0 }
0x1651   :  { %11827 = vmatmul.mubr.bf16.vlgmr.msra.gmra.mxu0 %v8392_v39  ;;  %v12546_v39 = vld [vmem:[#allocation13 + $0x48] sm:$0xff]  }
0x1652   :  { %9262 = vmatprep.mubr.bf16.mxu0 %v16806_v8  ;;  %9231 = vmatpush1.bf16.msra.mxu0 %v12518_v42  ;;  %v8016_v42 = vpop.f32.mrf.mxu0 }
0x1653   :  { %9232 = vmatprep.subr.bf16.mxu0 %v12525_v49  ;;  %11331 = vmatprep.subr.bf16.mxu1 %v12546_v39 }
0x1654   :  { %11332 = vmatpush3.bf16.msra.mxu1 %v12547_v32  ;;  %v8018_v31 = vpop.f32.mrf.mxu0 }
0x1655   :  { %11333 = vmatprep.subr.bf16.mxu1 %v12551_v57 }
0x1656   :  { %9233 = vmatpush1.bf16.msra.mxu0 %v12523_v21 }
0x1657   :  { %9234 = vmatprep.subr.bf16.mxu0 %v12530_v50 }
0x1658   :  { %11334 = vmatpush3.bf16.msra.mxu1 %v12552_v35 }
0x1659   :  { %9187 = vmatprep.subr.bf16.mxu1 %v12559_v1 }
0x165a   :  { %9235 = vmatpush1.bf16.msra.mxu0 %v12528_v54 }
0x165b   :  { %9236 = vmatprep.subr.bf16.mxu0 %v12535_v36 }
0x165e   :  { %9237 = vmatpush1.bf16.msra.mxu0 %v12533_v0 }
0x165f   :  { %9238 = vmatprep.subr.bf16.mxu0 %v12540_v52 }
0x1662   :  { %9239 = vmatpush1.bf16.msra.mxu0 %v12538_v16 }
0x1663   :  { %9240 = vmatprep.subr.bf16.mxu0 %v12545_v2 }
0x1666   :  { %9241 = vmatpush1.bf16.msra.mxu0 %v12543_v55 }
0x1667   :  { %9242 = vmatprep.subr.bf16.mxu0 %v12550_v45 }
0x166a   :  { %9243 = vmatpush1.bf16.msra.mxu0 %v12548_v28 }
0x166b   :  { %9244 = vmatprep.subr.bf16.mxu0 %v12555_v56 }
0x166e   :  { %9245 = vmatpush1.bf16.msra.mxu0 %v12553_v48 }
0x166f   :  { %11830 = vmatprep.subr.bf16.mxu0 %v16187_v37 }
0x16f1   :  { %v8594_v49 = vpop.f32.mrf.mxu1  ;;  %v8637_v21 = vpop.f32.mrf.mxu0 }
0x16f2   :  { %v8644_v22 = vadd.f32 %v8594_v49, %v16935_v13 }
0x16f3   :  { %v8596_v50 = vpop.f32.mrf.mxu1  ;;  %v11808_v54 = vpop.f32.mrf.mxu0 }
0x16f4   :  { %v8650_v24 = vadd.f32 %v8644_v22, %v16059_v5  ;;  %v8645_v52 = vadd.f32 %v8596_v50, %v16936_v30 }
0x16f5   :  { %v8598_v36 = vpop.f32.mrf.mxu1  ;;  %v8640_v62 = vpop.f32.mrf.mxu0 }
0x16f6   :  { %v10915_v0 = vmul.f32 -1.442695, %v8650_v24  ;;  %v8647_v41 = vadd.f32 %v8598_v36, %v16937_v59  ;;  %v8664_v39 = vadd.f32 %v8645_v52, %v8012_v53  ;;  %v16939_v36 = vld [vmem:[#allocation63_spill] sm:$0xff] }
0x16f7   :  { %v8600_v16 = vpop.f32.mrf.mxu1  ;;  %v11809_v23 = vpop.f32.mrf.mxu0 }
0x16f8   :  { %13134 = vpow2.f32 %v10915_v0  ;;  %v8651_v2 = vadd.f32 %v8647_v41, %v7975_v6  ;;  %v8648_v55 = vadd.f32 %v8600_v16, %v16938_v61  ;;  %v10917_v28 = vmul.f32 -1.442695, %v8664_v39  ;;  %v10919_v6 = vld [vmem:[%s16580_s16] ss:$0 sm:$0xff]  ;;  %v16940_v23 = vld [vmem:[#allocation64_spill] sm:$0xff] }
0x16f9   :  { %v8685_v22 = vadd.f32 %v10919_v6, %v8014_v15  ;;  %v8646_v0 = vadd.f32 %v8637_v21, %v16939_v36  ;;  %v8686_v59 = vadd.f32 %v10919_v6, %v8018_v31  ;;  %v12565_v6 = vld [vmem:[%s16576_s12 + $0xa4] ss:$16 sps:$4 sm:$0xff]  }
0x16fa   :  { %v10916_v45 = vmul.f32 -1.442695, %v8651_v2  ;;  %v8665_v32 = vadd.f32 %v8648_v55, %v8016_v42  ;;  %v8649_v2 = vadd.f32 %v8640_v62, %v16940_v23  ;;  %v12557_v62 = vld [vmem:[%s16576_s12 + $0xe0] ss:$16 sps:$4 sm:$0xff]   ;;  %v12577_v36 = vld [vmem:[%s16576_s12 + $0x24] ss:$16 sps:$4 sm:$0xff]  }
0x16fc   :  { %13136 = vpow2.f32 %v10916_v45  ;;  %v10918_v57 = vmul.f32 -1.442695, %v8665_v32 }
0x16fd   :  { %13138 = vpow2.f32 %v10917_v28 }
0x16fe   :  { %13140 = vpow2.f32 %v10918_v57 }
0x1705   :  { %v13135_v5 = vpop.eup %13134 }
0x1706   :  { %v8658_v56 = vadd.f32 1.0, %v13135_v5 }
0x1708   :  { %13142 = vrcp.f32 %v8658_v56 }
0x1709   :  { %v13137_v35 = vpop.eup %13136 }
0x170a   :  { %v8659_v48 = vadd.f32 1.0, %v13137_v35  ;;  %v13139_v1 = vpop.eup %13138 }
0x170b   :  { %v13141_v53 = vpop.eup %13140  ;;  %v8672_v13 = vadd.f32 1.0, %v13139_v1 }
0x170c   :  { %13144 = vrcp.f32 %v8659_v48  ;;  %v8673_v54 = vadd.f32 1.0, %v13141_v53  ;;  %v12563_v53 = vld [vmem:[%s16576_s12 + $0xa0] ss:$16 sps:$4 sm:$0xff]  }
0x170d   :  { %13146 = vrcp.f32 %v8672_v13  ;;  %v12568_v13 = vld [vmem:[%s16576_s12 + $0x84] ss:$16 sps:$4 sm:$0xff]  }
0x170e   :  { %13148 = vrcp.f32 %v8673_v54  ;;  %v12572_v54 = vld [vmem:[%s16576_s12 + $0x40] ss:$16 sps:$4 sm:$0xff]  }
0x1711   :  { %v16293_v49 = vpop.f32.mrf.mxu0 }
0x1713   :  { %v11828_v42 = vpop.f32.mrf.mxu0 }
0x1714   :  { %v12566_v42 = vld [vmem:[%s16576_s12 + $0x80] ss:$16 sps:$4 sm:$0xff]  }
0x1715   :  { %v13143_v50 = vpop.eup %13142  ;;  %v16295_v24 = vpop.f32.mrf.mxu0 }
0x1716   :  { %v8687_v30 = vmul.f32 %v13143_v50, %v8685_v22  ;;  %v12569_v22 = vld [vmem:[%s16576_s12 + $0x60] ss:$16 sps:$4 sm:$0xff]   ;;  %v12574_v50 = vld [vmem:[%s16576_s12 + $0x44] ss:$16 sps:$4 sm:$0xff]  }
0x1717   :  { %v11829_v52 = vpop.f32.mrf.mxu0 }
0x1718   :  { %v8689_v41 = vadd.f32 %v8687_v30, %v8646_v0  ;;  %v12575_v0 = vld [vmem:[%s16576_s12 + $0x20] ss:$16 sps:$4 sm:$0xff]   ;;  %v12580_v30 = vld [vmem:[%s16576_s12 + $0x4] ss:$16 sps:$4 sm:$0xff]  }
0x1719   :  { %v13145_v16 = vpop.eup %13144  ;;  %v12578_v52 = vld [vmem:[%s16576_s12] ss:$16 sps:$4 sm:$0xff]  }
0x171a   :  { %13150 = vtanh.f32 %v8689_v41  ;;  %v8688_v61 = vmul.f32 %v13145_v16, %v8686_v59  ;;  %v13147_v15 = vpop.eup %13146  ;;  %v10921_v41 = vld [vmem:[%s16582_s18] ss:$0 sm:$0xff] }
0x171b   :  { %v13149_v39 = vpop.eup %13148  ;;  %v8693_v45 = vsub.f32 1.0, %v13147_v15  ;;  %v8697_v21 = vmul.f32 %v13147_v15, %v15989_v12  ;;  %v12562_v12 = vld [vmem:[%s16576_s12 + $0xc4] ss:$16 sps:$4 sm:$0xff]  }
0x171c   :  { %v8690_v55 = vadd.f32 %v8688_v61, %v8649_v2  ;;  %v8694_v57 = vsub.f32 1.0, %v13149_v39  ;;  %v8698_v35 = vmul.f32 %v13149_v39, %v15992_v19  ;;  %v12560_v19 = vld [vmem:[%s16576_s12 + $0xc0] ss:$16 sps:$4 sm:$0xff]  }
0x171e   :  { %13152 = vtanh.f32 %v8690_v55 }
0x1727   :  { %v13151_v32 = vpop.eup %13150 }
0x1728   :  { %v8695_v28 = vmul.f32 %v13151_v32, %v8693_v45 }
0x172a   :  { %v16300_v5 = vadd.f32 %v8697_v21, %v8695_v28 }
0x172b   :  { %v13153_v31 = vpop.eup %13152 }
0x172c   :  { %v8696_v56 = vmul.f32 %v13153_v31, %v8694_v57 }
0x172e   :  { %v16303_v48 = vadd.f32 %v8698_v35, %v8696_v56 }
0x1730   :  { %v8701_v1 = vpack.c.bf16 %v16303_v48, %v16300_v5 }
0x1732   :  { %8940 = vmatmul.mubr.bf16.vlgmr.msra.gmra.mxu1 %v8701_v1  ;;  %9263 = vmatmul.mubr.bf16.vlgmr.msra.gmra.mxu0 %v8701_v1 }
0x1733   :  { %9188 = vmatpush1.bf16.msra.mxu1 %v12557_v62  ;;  %9219 = vmatprep.mubr.bf16.mxu1 %v16806_v8 }
0x1734   :  { %9189 = vmatprep.subr.bf16.mxu1 %v12562_v12  ;;  %11846 = vmatprep.mubr.msk.bf16.mxu0 %vm16805_vm9, %v16187_v37  ;;  %v12571_v37 = vld [vmem:[%s16576_s12 + $0x64] ss:$16 sps:$4 sm:$0xff]  }
0x1737   :  { %9190 = vmatpush1.bf16.msra.mxu1 %v12560_v19 }
0x1738   :  { %9191 = vmatprep.subr.bf16.mxu1 %v12565_v6 }
0x173b   :  { %9192 = vmatpush1.bf16.msra.mxu1 %v12563_v53 }
0x173c   :  { %9193 = vmatprep.subr.bf16.mxu1 %v12568_v13  ;;  %v16944_v13 = vld [vmem:[#allocation68_spill] sm:$0xff] }
0x173f   :  { %9194 = vmatpush1.bf16.msra.mxu1 %v12566_v42 }
0x1740   :  { %9195 = vmatprep.subr.bf16.mxu1 %v12571_v37 }
0x1743   :  { %9196 = vmatpush1.bf16.msra.mxu1 %v12569_v22 }
0x1744   :  { %9197 = vmatprep.subr.bf16.mxu1 %v12574_v50  ;;  %v16945_v50 = vld [vmem:[#allocation45_spill] sm:$0xff] }
0x1747   :  { %9198 = vmatpush1.bf16.msra.mxu1 %v12572_v54 }
0x1748   :  { %9199 = vmatprep.subr.bf16.mxu1 %v12577_v36 }
0x174b   :  { %9200 = vmatpush1.bf16.msra.mxu1 %v12575_v0 }
0x174c   :  { %9201 = vmatprep.subr.bf16.mxu1 %v12580_v30  ;;  %v16946_v30 = vld [vmem:[#allocation49_spill] sm:$0xff] }
0x174f   :  { %9202 = vmatpush1.bf16.msra.mxu1 %v12578_v52 }
0x1752   :  { %9220 = vmatmul.mubr.bf16.vlgmr.msra.gmra.mxu1 %v8701_v1  ;;  %v16942_v1 = vld [vmem:[#allocation23_spill] sm:$0xff] }
0x1753   :  { %9844 = vmatprep.mubr.bf16.mxu1 %v16806_v8 }
0x17f2   :  { %v11335_v59 = vpop.f32.mrf.mxu1 }
0x17f4   :  { %v11336_v16 = vpop.f32.mrf.mxu1 }
0x17f5   :  { %v11337_v23 = vadd.f32 %v11336_v16, %v11335_v59 }
0x17f6   :  { %v11338_v2 = vpop.f32.mrf.mxu1 }
0x17f7   :  { %v8942_v61 = vadd.f32 %v11337_v23, %v10921_v41 }
0x17f8   :  { %v11339_v55 = vpop.f32.mrf.mxu1 }
0x17f9   :  { %v8983_v15 = vadd.f32 %v16293_v49, %v8942_v61  ;;  %v11340_v39 = vadd.f32 %v11339_v55, %v11338_v2  ;;  %v16947_v2 = vld [vmem:[#allocation47_spill] sm:$0xff] }
0x17fb   :  { %10946 = vst [vmem:[%s16583_s19 + $0x40] sm:$0xff] %v8983_v15  ;;  %v8945_v45 = vadd.f32 %v11340_v39, %v10921_v41 }
0x17fd   :  { %v8986_v8 = vadd.f32 %v16295_v24, %v8945_v45 }
0x17ff   :  { %10947 = vst [vmem:[%s16583_s19 + $0x48] sm:$0xff] %v8986_v8  ;;  %v16948_v8 = vld [vmem:[#allocation51_spill] sm:$0xff] }
0x1812   :  { %v9221_v32 = vpop.f32.mrf.mxu1 }
0x1813   :  { %v9293_v28 = vadd.f32 %v9221_v32, %v16817_v27  ;;  %v9289_v21 = vadd.f32 %v9221_v32, %v16818_v44  ;;  %v9295_v57 = vadd.f32 %v9221_v32, %v16819_v25  ;;  %v9291_v31 = vadd.f32 %v9221_v32, %v16820_v38  ;;  %v16941_v25 = vld [vmem:[#allocation21_spill] sm:$0xff] }
0x1814   :  { %v16370_v49 = vpop.f32.mrf.mxu1  ;;  %v9297_v24 = vadd.f32 %v9221_v32, %v16821_v9  ;;  %v9299_v27 = vadd.f32 %v9221_v32, %v16823_v34  ;;  %v9301_v62 = vadd.f32 %v9221_v32, %v16941_v25  ;;  %v16381_v38 = vld [vmem:[%s16575_s11] ss:$0 sm:$0xff]  ;;  %v16943_v34 = vld [vmem:[#allocation67_spill] sm:$0xff]  ;;  %v9303_v54 = vadd.f32 %v9221_v32, %v16945_v50 }
0x1815   :  { %13154 = vtanh.f32 %v9293_v28 }
0x1816   :  { %v9225_v56 = vpop.f32.mrf.mxu1  ;;  %13156 = vtanh.f32 %v9289_v21 }
0x1817   :  { %13158 = vtanh.f32 %v9295_v57  ;;  %v9292_v35 = vadd.f32 %v9225_v56, %v16822_v14  ;;  %v9294_v44 = vadd.f32 %v9225_v56, %v16824_v63  ;;  %v9296_v9 = vadd.f32 %v9225_v56, %v16942_v1 }
0x1818   :  { %13160 = vtanh.f32 %v9291_v31  ;;  %v9290_v6 = vadd.f32 %v9225_v56, %v16943_v34  ;;  %v9298_v42 = vadd.f32 %v9225_v56, %v16944_v13  ;;  %v9300_v52 = vadd.f32 %v9225_v56, %v16946_v30  ;;  %v16953_v30 = vld [vmem:[#allocation69_spill] sm:$0xff] }
0x1819   :  { %13162 = vtanh.f32 %v9297_v24  ;;  %v9302_v61 = vadd.f32 %v9225_v56, %v16947_v2  ;;  %v9304_v32 = vadd.f32 %v9225_v56, %v16948_v8  ;;  %vm16954_vm10 = vcmp.gt.f32.partialorder %v16953_v30, 0.0  ;;  %v16959_v2 = vld [vmem:[#allocation72_spill] sm:$0xff] }
0x181a   :  { %13164 = vtanh.f32 %v9292_v35  ;;  %vm16960_vm4 = vcmp.gt.f32.partialorder %v16959_v2, 0.0 }
0x181b   :  { %13166 = vtanh.f32 %v9299_v27 }
0x181c   :  { %13168 = vtanh.f32 %v9294_v44 }
0x181d   :  { %13170 = vtanh.f32 %v9301_v62 }
0x181e   :  { %13172 = vtanh.f32 %v9296_v9 }
0x181f   :  { %13174 = vtanh.f32 %v9290_v6 }
0x1820   :  { %13176 = vtanh.f32 %v9298_v42 }
0x1821   :  { %13178 = vtanh.f32 %v9303_v54 }
0x1822   :  { %v13155_v12 = vpop.eup %13154  ;;  %13180 = vtanh.f32 %v9300_v52 }
0x1823   :  { %v13157_v19 = vpop.eup %13156  ;;  %v9332_v14 = vmul.f32 %v13155_v12, %v16381_v38  ;;  %13182 = vtanh.f32 %v9302_v61 }
0x1824   :  { %v13159_v53 = vpop.eup %13158  ;;  %v9328_v63 = vmul.f32 %v13157_v19, %v16381_v38  ;;  %13184 = vtanh.f32 %v9304_v32  ;;  %v16961_v32 = vld [vmem:[#allocation73_spill] sm:$0xff] }
0x1825   :  { %v13161_v37 = vpop.eup %13160  ;;  %9352 = vadd.xlane.f32.xlu1 %v9332_v14  ;;  %v9334_v22 = vmul.f32 %v13159_v53, %v16381_v38  ;;  %vm16962_vm5 = vcmp.gt.f32.partialorder %v16961_v32, 0.0 }
0x1826   :  { %9344 = vadd.xlane.f32.xlu0 %v9328_v63  ;;  %v13163_v36 = vpop.eup %13162  ;;  %v9330_v0 = vmul.f32 %v13161_v37, %v16381_v38 }
0x1827   :  { %v13165_v59 = vpop.eup %13164  ;;  %v9336_v41 = vmul.f32 %v13163_v36, %v16381_v38  ;;  %v16951_v36 = vld [vmem:[#allocation22_spill] sm:$0xff] }
0x1828   :  { %v13167_v16 = vpop.eup %13166  ;;  %v9331_v23 = vmul.f32 %v13165_v59, %v16381_v38  ;;  %vm16952_vm8 = vcmp.gt.f32.partialorder %v16951_v36, 0.0 }
0x1829   :  { %9356 = vadd.xlane.f32.xlu1 %v9334_v22  ;;  %v13169_v55 = vpop.eup %13168  ;;  %v9338_v15 = vmul.f32 %v13167_v16, %v16381_v38  ;;  %v16949_v22 = vld [vmem:[#allocation20_spill] sm:$0xff]  ;;  %v16957_v16 = vld [vmem:[#allocation71_spill] sm:$0xff] }
0x182a   :  { %9348 = vadd.xlane.f32.xlu0 %v9330_v0  ;;  %v13171_v39 = vpop.eup %13170  ;;  %v9333_v45 = vmul.f32 %v13169_v55, %v16381_v38  ;;  %vm16950_vm7 = vcmp.gt.f32.partialorder %v16949_v22, 0.0  ;;  %vm16958_vm14 = vcmp.gt.f32.partialorder %v16957_v16, 0.0  ;;  %v16970_v16 = vld [vmem:[#allocation80_spill] sm:$0xff] }
0x182b   :  { %v13173_v28 = vpop.eup %13172  ;;  %v9340_v21 = vmul.f32 %v13171_v39, %v16381_v38 }
0x182c   :  { %v13175_v57 = vpop.eup %13174  ;;  %v9335_v31 = vmul.f32 %v13173_v28, %v16381_v38 }
0x182d   :  { %9360 = vadd.xlane.f32.xlu1 %v9336_v41  ;;  %v13177_v24 = vpop.eup %13176  ;;  %v9329_v35 = vmul.f32 %v13175_v57, %v16381_v38 }
0x182e   :  { %9350 = vadd.xlane.f32.xlu0 %v9331_v23  ;;  %v13179_v27 = vpop.eup %13178  ;;  %v9337_v44 = vmul.f32 %v13177_v24, %v16381_v38 }
0x182f   :  { %v13181_v25 = vpop.eup %13180  ;;  %v9342_v56 = vmul.f32 %v13179_v27, %v16381_v38 }
0x1830   :  { %v9339_v62 = vmul.f32 %v13181_v25, %v16381_v38  ;;  %v13183_v1 = vpop.eup %13182 }
0x1831   :  { %9364 = vadd.xlane.f32.xlu1 %v9338_v15  ;;  %v9341_v9 = vmul.f32 %v13183_v1, %v16381_v38  ;;  %v13185_v12 = vpop.eup %13184 }
0x1832   :  { %9354 = vadd.xlane.f32.xlu0 %v9333_v45  ;;  %v9343_v19 = vmul.f32 %v13185_v12, %v16381_v38  ;;  %v16955_v38 = vld [vmem:[#allocation70_spill] sm:$0xff]  ;;  %v16965_v12 = vld [vmem:[#allocation75_spill] sm:$0xff] }
0x1833   :  { %vm16956_vm11 = vcmp.gt.f32.partialorder %v16955_v38, 0.0 }
0x1835   :  { %9368 = vadd.xlane.f32.xlu1 %v9340_v21 }
0x1836   :  { %9358 = vadd.xlane.f32.xlu0 %v9335_v31 }
0x1839   :  { %9346 = vadd.xlane.f32.xlu1 %v9329_v35 }
0x183a   :  { %9362 = vadd.xlane.f32.xlu0 %v9337_v44  ;;  %v16963_v44 = vld [vmem:[#allocation74_spill] sm:$0xff] }
0x183b   :  { %vm16964_vm6 = vcmp.gt.f32.partialorder %v16963_v44, 0.0 }
0x183d   :  { %9372 = vadd.xlane.f32.xlu1 %v9342_v56 }
0x183e   :  { %9366 = vadd.xlane.f32.xlu0 %v9339_v62 }
0x1842   :  { %9370 = vadd.xlane.f32.xlu0 %v9341_v9 }
0x1846   :  { %9374 = vadd.xlane.f32.xlu0 %v9343_v19 }
0x18ae   :  { %v9353_v14 = vpop.xlane.xlu1 %9352 }
0x18af   :  { %v9345_v34 = vpop.xlane.xlu0 %9344  ;;  %v9380_v50 = vsel %vm16950_vm7, %v9353_v14, -1e+10  ;;  %vm16966_vm7 = vcmp.gt.f32.partialorder %v16965_v12, 0.0 }
0x18b0   :  { %v9376_v0 = vsel %vm16952_vm8, %v9345_v34, -1e+10  ;;  %v9394_v55 = vsel %vm4384_vm15, %v9380_v50, -inf  ;;  %vm16971_vm8 = vcmp.gt.f32.partialorder %v16970_v16, 0.0 }
0x18b1   :  { %v9392_v15 = vsel %vm4384_vm15, %v9376_v0, -inf }
0x18b2   :  { %v9357_v6 = vpop.xlane.xlu1 %9356  ;;  %v9395_v24 = vmax.f32 %v9392_v15, %v9394_v55 }
0x18b3   :  { %v9349_v53 = vpop.xlane.xlu0 %9348  ;;  %v9382_v52 = vsel %vm16954_vm10, %v9357_v6, -1e+10 }
0x18b4   :  { %v9378_v59 = vsel %vm16956_vm11, %v9349_v53, -1e+10  ;;  %v9396_v39 = vsel %vm4384_vm15, %v9382_v52, -inf }
0x18b5   :  { %v9393_v45 = vsel %vm4384_vm15, %v9378_v59, -inf }
0x18b6   :  { %v9361_v63 = vpop.xlane.xlu1 %9360  ;;  %v9397_v35 = vmax.f32 %v9393_v45, %v9396_v39 }
0x18b7   :  { %v9351_v13 = vpop.xlane.xlu0 %9350  ;;  %v9384_v23 = vsel %vm16958_vm14, %v9361_v63, -1e+10 }
0x18b8   :  { %v9398_v57 = vsel %vm4384_vm15, %v9384_v23, -inf  ;;  %v9379_v30 = vsel %vm4355_vm1, %v9351_v13, -1e+10 }
0x18b9   :  { %v9399_v62 = vmax.f32 %v9395_v24, %v9398_v57  ;;  %v9408_v13 = vsel %vm4384_vm15, %v9379_v30, -inf }
0x18ba   :  { %v9365_v42 = vpop.xlane.xlu1 %9364 }
0x18bb   :  { %v9355_v37 = vpop.xlane.xlu0 %9354  ;;  %v9386_v61 = vsel %vm16960_vm4, %v9365_v42, -1e+10 }
0x18bc   :  { %v9400_v31 = vsel %vm4384_vm15, %v9386_v61, -inf  ;;  %v9381_v34 = vsel %vm4357_vm0, %v9355_v37, -1e+10 }
0x18bd   :  { %v9401_v1 = vmax.f32 %v9397_v35, %v9400_v31  ;;  %v9409_v38 = vsel %vm4384_vm15, %v9381_v34, -inf }
0x18be   :  { %v9369_v54 = vpop.xlane.xlu1 %9368 }
0x18bf   :  { %v9359_v41 = vpop.xlane.xlu0 %9358  ;;  %v9388_v28 = vsel %vm16962_vm5, %v9369_v54, -1e+10 }
0x18c0   :  { %v9402_v27 = vsel %vm4384_vm15, %v9388_v28, -inf  ;;  %v9383_v42 = vsel %vm4359_vm2, %v9359_v41, -1e+10 }
0x18c1   :  { %v9403_v53 = vmax.f32 %v9399_v62, %v9402_v27  ;;  %v9411_v15 = vsel %vm4384_vm15, %v9383_v42, -inf }
0x18c2   :  { %v9347_v8 = vpop.xlane.xlu1 %9346  ;;  %v9412_v44 = vmax.f32 %v9408_v13, %v9411_v15 }
0x18c3   :  { %v9363_v21 = vpop.xlane.xlu0 %9362  ;;  %v9377_v25 = vsel %vm16964_vm6, %v9347_v8, -1e+10 }
0x18c4   :  { %v9407_v22 = vsel %vm4384_vm15, %v9377_v25, -inf  ;;  %v9385_v45 = vsel %vm4361_vm12, %v9363_v21, -1e+10 }
0x18c5   :  { %v9410_v41 = vmax.f32 %v9407_v22, %v9409_v38  ;;  %v9413_v21 = vsel %vm4384_vm15, %v9385_v45, -inf }
0x18c6   :  { %v9373_v56 = vpop.xlane.xlu1 %9372 }
0x18c7   :  { %v9367_v9 = vpop.xlane.xlu0 %9366  ;;  %v9390_v19 = vsel %vm16966_vm7, %v9373_v56, -1e+10 }
0x18c8   :  { %v9404_v6 = vsel %vm4384_vm15, %v9390_v19, -inf  ;;  %v16442_v2 = vsel %vm16971_vm8, %v9367_v9, -1e+10 }
0x18c9   :  { %v9405_v54 = vmax.f32 %v9401_v1, %v9404_v6  ;;  %v9415_v24 = vsel %vm4384_vm15, %v16442_v2, -inf }
0x18cb   :  { %v9406_v55 = vmax.f32 %v9403_v53, %v9405_v54  ;;  %v9371_v37 = vpop.xlane.xlu0 %9370 }
0x18cc   :  { %v9389_v27 = vsel %vm4365_vm3, %v9371_v37, -1e+10 }
0x18cd   :  { %v9422_v8 = vsub.f32 %v9376_v0, %v9406_v55  ;;  %v9424_v32 = vsub.f32 %v9378_v59, %v9406_v55  ;;  %v9426_v57 = vsub.f32 %v9380_v50, %v9406_v55  ;;  %v9428_v31 = vsub.f32 %v9382_v52, %v9406_v55 }
0x18ce   :  { %v9430_v35 = vsub.f32 %v9384_v23, %v9406_v55  ;;  %v9432_v0 = vsub.f32 %v9386_v61, %v9406_v55  ;;  %v9416_v50 = vmax.f32 %v9412_v44, %v9415_v24  ;;  %v9414_v52 = vmax.f32 %v9410_v41, %v9413_v21 }
0x18cf   :  { %v9438_v56 = vmul.f32 1.442695, %v9422_v8  ;;  %v9442_v62 = vmul.f32 1.442695, %v9424_v32  ;;  %v9446_v1 = vmul.f32 1.442695, %v9426_v57  ;;  %v9375_v9 = vpop.xlane.xlu0 %9374  ;;  %v9434_v14 = vsub.f32 %v9388_v28, %v9406_v55 }
0x18d0   :  { %v9450_v59 = vmul.f32 1.442695, %v9428_v31  ;;  %v9417_v12 = vsel %vm4384_vm15, %v9389_v27, -inf  ;;  %v9454_v23 = vmul.f32 1.442695, %v9430_v35  ;;  %v9436_v6 = vsub.f32 %v9390_v19, %v9406_v55 }
0x18d1   :  { %13186 = vpow2.f32 %v9438_v56  ;;  %v9391_v11 = vsel %vm4367_vm13, %v9375_v9, -1e+10  ;;  %v9458_v63 = vmul.f32 1.442695, %v9432_v0  ;;  %v9418_v22 = vmax.f32 %v9414_v52, %v9417_v12 }
0x18d2   :  { %13188 = vpow2.f32 %v9442_v62  ;;  %v9419_v53 = vsel %vm4384_vm15, %v9391_v11, -inf  ;;  %v9462_v54 = vmul.f32 1.442695, %v9434_v14  ;;  %v9466_v38 = vmul.f32 1.442695, %v9436_v6 }
0x18d3   :  { %13190 = vpow2.f32 %v9446_v1  ;;  %v9420_v61 = vmax.f32 %v9416_v50, %v9419_v53 }
0x18d4   :  { %13192 = vpow2.f32 %v9450_v59 }
0x18d5   :  { %13194 = vpow2.f32 %v9454_v23  ;;  %v9421_v36 = vmax.f32 %v9418_v22, %v9420_v61 }
0x18d6   :  { %13196 = vpow2.f32 %v9458_v63 }
0x18d7   :  { %v9423_v16 = vsub.f32 %v9377_v25, %v9421_v36  ;;  %v9425_v28 = vsub.f32 %v9379_v30, %v9421_v36  ;;  %v9427_v37 = vsub.f32 %v9381_v34, %v9421_v36  ;;  %v9429_v15 = vsub.f32 %v9383_v42, %v9421_v36 }
0x18d8   :  { %v9431_v39 = vsub.f32 %v9385_v45, %v9421_v36  ;;  %13198 = vpow2.f32 %v9462_v54  ;;  %v9433_v41 = vsub.f32 %v16442_v2, %v9421_v36  ;;  %v9435_v32 = vsub.f32 %v9389_v27, %v9421_v36 }
0x18d9   :  { %v9440_v51 = vmul.f32 1.442695, %v9423_v16  ;;  %v9444_v19 = vmul.f32 1.442695, %v9425_v28  ;;  %v9448_v55 = vmul.f32 1.442695, %v9427_v37  ;;  %13200 = vpow2.f32 %v9466_v38 }
0x18da   :  { %v9452_v8 = vmul.f32 1.442695, %v9429_v15  ;;  %v9456_v57 = vmul.f32 1.442695, %v9431_v39  ;;  %v9437_v34 = vsub.f32 %v9391_v11, %v9421_v36  ;;  %v9460_v42 = vmul.f32 1.442695, %v9433_v41 }
0x18db   :  { %13202 = vpow2.f32 %v9440_v51  ;;  %v9464_v2 = vmul.f32 1.442695, %v9435_v32 }
0x18dc   :  { %13204 = vpow2.f32 %v9444_v19  ;;  %v9468_v62 = vmul.f32 1.442695, %v9437_v34 }
0x18dd   :  { %13206 = vpow2.f32 %v9448_v55 }
0x18de   :  { %v13187_v31 = vpop.eup %13186  ;;  %13208 = vpow2.f32 %v9452_v8 }
0x18df   :  { %v13189_v13 = vpop.eup %13188  ;;  %v9470_v25 = vsel %vm4384_vm15, %v13187_v31, 0.0  ;;  %13210 = vpow2.f32 %v9456_v57 }
0x18e0   :  { %v13191_v30 = vpop.eup %13190  ;;  %v9471_v45 = vsel %vm4384_vm15, %v13189_v13, 0.0  ;;  %13212 = vpow2.f32 %v9460_v42 }
0x18e1   :  { %v13193_v24 = vpop.eup %13192  ;;  %v9472_v35 = vadd.f32 %v9471_v45, %v9470_v25  ;;  %v9473_v44 = vsel %vm4384_vm15, %v13191_v30, 0.0  ;;  %13214 = vpow2.f32 %v9464_v2 }
0x18e2   :  { %v13195_v27 = vpop.eup %13194  ;;  %v9475_v1 = vsel %vm4384_vm15, %v13193_v24, 0.0  ;;  %13216 = vpow2.f32 %v9468_v62 }
0x18e3   :  { %v9474_v56 = vadd.f32 %v9473_v44, %v9472_v35  ;;  %v16462_v9 = vpop.eup %13196  ;;  %v9477_v0 = vsel %vm4384_vm15, %v13195_v27, 0.0 }
0x18e4   :  { %v9479_v12 = vsel %vm4384_vm15, %v16462_v9, 0.0 }
0x18e5   :  { %v9476_v21 = vadd.f32 %v9475_v1, %v9474_v56  ;;  %v16465_v59 = vpop.eup %13198 }
0x18e6   :  { %v16467_v52 = vpop.eup %13200  ;;  %v9481_v6 = vsel %vm4384_vm15, %v16465_v59, 0.0 }
0x18e7   :  { %v9478_v50 = vadd.f32 %v9477_v0, %v9476_v21  ;;  %v9483_v36 = vsel %vm4384_vm15, %v16467_v52, 0.0  ;;  %v12581_v21 = vld [vmem:[#allocation11 + $0xa8] ss:$12 sps:$4 sm:$0xff]   ;;  %v12583_v0 = vld [vmem:[#allocation11 + $0xac] ss:$12 sps:$4 sm:$0xff]  }
0x18e8   :  { %v13203_v14 = vpop.eup %13202  ;;  %9812 = vmatprep.subr.bf16.mxu1 %v12583_v0 }
0x18e9   :  { %v9480_v23 = vadd.f32 %v9479_v12, %v9478_v50  ;;  %v13205_v11 = vpop.eup %13204  ;;  %v9485_v53 = vsel %vm4384_vm15, %v13203_v14, 0.0  ;;  %v12584_v50 = vld [vmem:[#allocation11 + $0xb0] ss:$12 sps:$4 sm:$0xff]   ;;  %9813 = vmatpush1.bf16.msra.mxu1 %v12581_v21 }
0x18ea   :  { %v13207_v63 = vpop.eup %13206  ;;  %v9486_v61 = vsel %vm4384_vm15, %v13205_v11, 0.0  ;;  %11831 = vmatpush3.bf16.msra.mxu0 %v12584_v50 }
0x18eb   :  { %v9482_v22 = vadd.f32 %v9481_v6, %v9480_v23  ;;  %v13209_v54 = vpop.eup %13208  ;;  %v9487_v38 = vadd.f32 %v9486_v61, %v9485_v53  ;;  %v9488_v28 = vsel %vm4384_vm15, %v13207_v63, 0.0  ;;  %v16498_v23 = vld [vmem:[%s16583_s19] sm:$0xff]  ;;  %v12591_v61 = vld [vmem:[#allocation11 + $0x7c] ss:$12 sps:$4 sm:$0xff]  }
0x18ec   :  { %v16478_v37 = vpop.eup %13210  ;;  %v9490_v39 = vsel %vm4384_vm15, %v13209_v54, 0.0  ;;  %11832 = vmatprep.subr.bf16.mxu0 %v16498_v23 }
0x18ed   :  { %v9484_v16 = vadd.f32 %v9483_v36, %v9482_v22  ;;  %v9489_v15 = vadd.f32 %v9488_v28, %v9487_v38  ;;  %v16481_v51 = vpop.eup %13212  ;;  %v9492_v55 = vsel %vm4384_vm15, %v16478_v37, 0.0  ;;  %v12589_v22 = vld [vmem:[#allocation11 + $0x78] ss:$12 sps:$4 sm:$0xff]   ;;  %v12592_v36 = vld [vmem:[#allocation11 + $0x80] ss:$12 sps:$4 sm:$0xff]  }
0x18ee   :  { %v16485_v41 = vpop.eup %13214  ;;  %v9494_v32 = vsel %vm4384_vm15, %v16481_v51, 0.0  ;;  %v12596_v28 = vld [vmem:[#allocation11 + $0x68] ss:$12 sps:$4 sm:$0xff]  }
0x18ef   :  { %13218 = vrcp.f32 %v9484_v16  ;;  %v9491_v19 = vadd.f32 %v9490_v39, %v9489_v15  ;;  %v16489_v57 = vpop.eup %13216  ;;  %v9496_v34 = vsel %vm4384_vm15, %v16485_v41, 0.0  ;;  %v12599_v39 = vld [vmem:[#allocation11 + $0x4c] ss:$12 sps:$4 sm:$0xff]  }
0x18f0   :  { %v9498_v45 = vsel %vm4384_vm15, %v16489_v57, 0.0 }
0x18f1   :  { %v9493_v8 = vadd.f32 %v9492_v55, %v9491_v19  ;;  %v12601_v55 = vld [vmem:[#allocation11 + $0x30] ss:$12 sps:$4 sm:$0xff]  }
0x18f3   :  { %v9495_v25 = vadd.f32 %v9494_v32, %v9493_v8  ;;  %v12603_v8 = vld [vmem:[#allocation11 + $0x34] ss:$12 sps:$4 sm:$0xff]  }
0x18f5   :  { %v9497_v42 = vadd.f32 %v9496_v34, %v9495_v25  ;;  %v12607_v25 = vld [vmem:[#allocation11 + $0x1c] ss:$12 sps:$4 sm:$0xff]   ;;  %v12608_v34 = vld [vmem:[#allocation11 + $0x20] ss:$12 sps:$4 sm:$0xff]  }
0x18f7   :  { %v9499_v35 = vadd.f32 %v9498_v45, %v9497_v42  ;;  %v12609_v42 = vld [vmem:[#allocation11] ss:$12 sps:$4 sm:$0xff]   ;;  %v12611_v45 = vld [vmem:[#allocation11 + $0x4] ss:$12 sps:$4 sm:$0xff]  }
0x18f9   :  { %13220 = vrcp.f32 %v9499_v35  ;;  %v12612_v35 = vld [vmem:[#allocation11 + $0x8] ss:$12 sps:$4 sm:$0xff]  }
0x18fc   :  { %v13219_v2 = vpop.eup %13218 }
0x18fd   :  { %v9506_v44 = vmul.f32 %v13219_v2, %v13191_v30  ;;  %v9502_v56 = vmul.f32 %v13219_v2, %v13187_v31  ;;  %v9508_v62 = vmul.f32 %v13219_v2, %v13193_v24  ;;  %v9504_v1 = vmul.f32 %v13219_v2, %v13189_v13  ;;  %v12585_v30 = vld [vmem:[#allocation11 + $0x90] ss:$12 sps:$4 sm:$0xff]   ;;  %v12587_v13 = vld [vmem:[#allocation11 + $0x94] ss:$12 sps:$4 sm:$0xff]   ;;  %v12588_v24 = vld [vmem:[#allocation11 + $0x98] ss:$12 sps:$4 sm:$0xff]  }
0x18fe   :  { %v9510_v12 = vmul.f32 %v13219_v2, %v13195_v27  ;;  %9814 = vmatprep.subr.bf16.mxu1 %v12587_v13  ;;  %11833 = vmatpush3.bf16.msra.mxu0 %v12588_v24  ;;  %v9512_v38 = vmul.f32 %v13219_v2, %v16462_v9  ;;  %v12597_v9 = vld [vmem:[#allocation11 + $0x48] ss:$12 sps:$4 sm:$0xff]   ;;  %v9516_v19 = vmul.f32 %v13219_v2, %v16467_v52  ;;  %v12605_v52 = vld [vmem:[#allocation11 + $0x18] ss:$12 sps:$4 sm:$0xff]  }
0x18ff   :  { %9556 = vperm.xlu0 %11882, %v9506_v44   ;;  %9536 = vperm.xlu1 %11883, %v9502_v56  }
0x1900   :  { %9815 = vmatpush1.bf16.msra.mxu1 %v12585_v30  ;;  %11834 = vmatprep.subr.bf16.mxu0 %v16498_v23 }
0x1901   :  { %9816 = vmatprep.subr.bf16.mxu1 %v12591_v61 }
0x1902   :  { %11835 = vmatpush3.bf16.msra.mxu0 %v12592_v36 }
0x1903   :  { %9566 = vperm.xlu0 %11882, %v9508_v62   ;;  %9546 = vperm.xlu1 %11883, %v9504_v1  }
0x1904   :  { %9817 = vmatpush1.bf16.msra.mxu1 %v12589_v22  ;;  %11836 = vmatprep.subr.bf16.mxu0 %v16498_v23 }
0x1906   :  { %v13221_v31 = vpop.eup %13220  ;;  %11837 = vmatpush3.bf16.msra.mxu0 %v12596_v28 }
0x1907   :  { %9576 = vperm.xlu0 %11882, %v9510_v12   ;;  %v9505_v6 = vmul.f32 %v13221_v31, %v13205_v11  ;;  %v9503_v53 = vmul.f32 %v13221_v31, %v13203_v14  ;;  %v9507_v27 = vmul.f32 %v13221_v31, %v13207_v63  ;;  %v9509_v16 = vmul.f32 %v13221_v31, %v13209_v54  ;;  %v12593_v14 = vld [vmem:[#allocation11 + $0x60] ss:$12 sps:$4 sm:$0xff]   ;;  %v12595_v11 = vld [vmem:[#allocation11 + $0x64] ss:$12 sps:$4 sm:$0xff]  }
0x1908   :  { %v9514_v63 = vmul.f32 %v13219_v2, %v16465_v59  ;;  %9818 = vmatprep.subr.bf16.mxu1 %v12595_v11  ;;  %v9511_v15 = vmul.f32 %v13221_v31, %v16478_v37  ;;  %11838 = vmatprep.subr.bf16.mxu0 %v16498_v23  ;;  %v12600_v54 = vld [vmem:[#allocation11 + $0x50] ss:$12 sps:$4 sm:$0xff]   ;;  %v9513_v59 = vmul.f32 %v13221_v31, %v16481_v51  ;;  %v12604_v37 = vld [vmem:[#allocation11 + $0x38] ss:$12 sps:$4 sm:$0xff]  }
0x1909   :  { %9551 = vperm.xlu1 %11883, %v9505_v6   ;;  %9819 = vmatpush1.bf16.msra.mxu1 %v12593_v14  ;;  %v9515_v32 = vmul.f32 %v13221_v31, %v16485_v41  ;;  %v9517_v51 = vmul.f32 %v13221_v31, %v16489_v57 }
0x190a   :  { %9820 = vmatprep.subr.bf16.mxu1 %v12599_v39  ;;  %11839 = vmatpush3.bf16.msra.mxu0 %v12600_v54 }
0x190b   :  { %9541 = vperm.xlu0 %11882, %v9503_v53   ;;  %11840 = vmatprep.subr.bf16.mxu0 %v16498_v23 }
0x190d   :  { %9561 = vperm.xlu1 %11883, %v9507_v27   ;;  %9821 = vmatpush1.bf16.msra.mxu1 %v12597_v9 }
0x190e   :  { %9822 = vmatprep.subr.bf16.mxu1 %v12603_v8  ;;  %11841 = vmatpush3.bf16.msra.mxu0 %v12604_v37 }
0x190f   :  { %9586 = vperm.xlu0 %11882, %v9512_v38   ;;  %11842 = vmatprep.subr.bf16.mxu0 %v16498_v23 }
0x1911   :  { %9571 = vperm.xlu1 %11883, %v9509_v16   ;;  %9823 = vmatpush1.bf16.msra.mxu1 %v12601_v55 }
0x1912   :  { %9824 = vmatprep.subr.bf16.mxu1 %v12607_v25  ;;  %11843 = vmatpush3.bf16.msra.mxu0 %v12608_v34  ;;  %v12620_v25 = vld [vmem:[#allocation13 + $0x80] sm:$0xff]   ;;  %v12621_v34 = vld [vmem:[#allocation13 + $0x78] sm:$0xff]  }
0x1913   :  { %9596 = vperm.xlu0 %11882, %v9514_v63   ;;  %11844 = vmatprep.subr.bf16.mxu0 %v16498_v23 }
0x1915   :  { %9581 = vperm.xlu1 %11883, %v9511_v15   ;;  %9825 = vmatpush1.bf16.msra.mxu1 %v12605_v52  ;;  %v12619_v52 = vld [vmem:[#allocation13 + $0x88] sm:$0xff]  }
0x1916   :  { %9826 = vmatprep.subr.bf16.mxu1 %v12611_v45  ;;  %11845 = vmatpush3.bf16.msra.mxu0 %v12612_v35  ;;  %v12624_v45 = vld [vmem:[#allocation13 + $0x30] sm:$0xff]   ;;  %v12625_v35 = vld [vmem:[#allocation13 + $0x68] sm:$0xff]  }
0x1917   :  { %9606 = vperm.xlu0 %11882, %v9516_v19   ;;  %11850 = vmatprep.subr.bf16.mxu0 %v16498_v23 }
0x1919   :  { %9591 = vperm.xlu1 %11883, %v9513_v59   ;;  %9827 = vmatpush1.bf16.msra.mxu1 %v12609_v42  ;;  %v12623_v42 = vld [vmem:[#allocation13 + $0x70] sm:$0xff]  }
0x191a   :  { %11359 = vmatprep.subr.bf16.mxu1 %v12621_v34 }
0x191d   :  { %9601 = vperm.xlu1 %11883, %v9515_v32   ;;  %v12618_v32 = vld [vmem:[#allocation13 + $0x90] sm:$0xff]  }
0x1921   :  { %9611 = vperm.xlu1 %11883, %v9517_v51   ;;  %v12622_v51 = vld [vmem:[#allocation13 + $0x38] sm:$0xff]  }
0x197a   :  { %v9557_v41 = vpop.permute.xlu0 %9556  ;;  %v9537_v2 = vpop.permute.xlu1 %9536 }
0x197b   :  { %v9614_v50 = vmul.f32 %v9537_v2, %v14206_v3  ;;  %v9618_v6 = vmul.f32 %v9557_v41, %v15197_v4  ;;  %v12626_v41 = vld [vmem:[#allocation13 + $0x28] sm:$0xff]   ;;  %v12627_v2 = vld [vmem:[#allocation13 + $0x60] sm:$0xff]  }
0x197e   :  { %v9567_v44 = vpop.permute.xlu0 %9566  ;;  %v9547_v56 = vpop.permute.xlu1 %9546 }
0x197f   :  { %v9616_v0 = vmul.f32 %v9547_v56, %v15183_v7  ;;  %v9620_v38 = vmul.f32 %v9567_v44, %v15209_v10  ;;  %v12637_v44 = vld [vmem:[%s16686_s26 + $0x20] sm:$0xff]   ;;  %v12629_v56 = vld [vmem:[#allocation13 + $0x58] sm:$0xff]  }
0x1981   :  { %v9630_v13 = vadd.f32 %v9616_v0, %v9614_v50  ;;  %v12634_v0 = vld [vmem:[#allocation13 + $0x8] sm:$0xff]   ;;  %v12635_v50 = vld [vmem:[#allocation13 + $0x40] sm:$0xff]  }
0x1982   :  { %v9577_v62 = vpop.permute.xlu0 %9576 }
0x1983   :  { %v9631_v22 = vadd.f32 %v9630_v13, %v9618_v6  ;;  %v9622_v11 = vmul.f32 %v9577_v62, %v15227_v47  ;;  %v12630_v62 = vld [vmem:[#allocation13 + $0x18] sm:$0xff]   ;;  %v9227_v6 = vpop.f32.mrf.mxu1 }
0x1984   :  { %v9552_v1 = vpop.permute.xlu1 %9551 }
0x1985   :  { %v9617_v24 = vmul.f32 %v9552_v1, %v15191_v18  ;;  %v12631_v1 = vld [vmem:[#allocation13 + $0x50] sm:$0xff]  }
0x1986   :  { %v9542_v21 = vpop.permute.xlu0 %9541 }
0x1987   :  { %v9615_v12 = vmul.f32 %v9542_v21, %v14216_v17  ;;  %v9632_v17 = vadd.f32 %v9631_v22, %v9620_v38  ;;  %v12632_v21 = vld [vmem:[#allocation13 + $0x10] sm:$0xff]   ;;  %v16973_v22 = vld [vmem:[#allocation53_spill] sm:$0xff] }
0x1988   :  { %v9562_v57 = vpop.permute.xlu1 %9561 }
0x1989   :  { %v9637_v53 = vadd.f32 %v9617_v24, %v9615_v12  ;;  %v9619_v61 = vmul.f32 %v9562_v57, %v15203_v26  ;;  %v9633_v26 = vadd.f32 %v9632_v17, %v9622_v11  ;;  %v12633_v57 = vld [vmem:[#allocation13 + $0x48] sm:$0xff]   ;;  %v12636_v12 = vld [vmem:[#allocation13] sm:$0xff]  }
0x198a   :  { %v9587_v31 = vpop.permute.xlu0 %9586 }
0x198b   :  { %v9638_v7 = vadd.f32 %v9637_v53, %v9619_v61  ;;  %v9624_v18 = vmul.f32 %v9587_v31, %v15232_v33  ;;  %v9264_v31 = vpop.f32.mrf.mxu0 }
0x198c   :  { %v9572_v30 = vpop.permute.xlu1 %9571 }
0x198d   :  { %v9621_v3 = vmul.f32 %v9572_v30, %v15214_v29  ;;  %v9634_v29 = vadd.f32 %v9633_v26, %v9624_v18  ;;  %v9266_v30 = vpop.f32.mrf.mxu0  ;;  %v16975_v18 = vld [vmem:[#allocation56_spill] sm:$0xff]  ;;  %v16976_v26 = vld [vmem:[#allocation58_spill] sm:$0xff] }
0x198e   :  { %v9597_v36 = vpop.permute.xlu0 %9596 }
0x198f   :  { %v9639_v4 = vadd.f32 %v9638_v7, %v9621_v3  ;;  %v9626_v9 = vmul.f32 %v9597_v36, %v15245_v43  ;;  %v12614_v43 = vld [vmem:[#allocation13 + $0xb0] sm:$0xff]   ;;  %v9268_v13 = vpop.f32.mrf.mxu0 }
0x1990   :  { %v9582_v27 = vpop.permute.xlu1 %9581 }
0x1991   :  { %v9623_v14 = vmul.f32 %v9582_v27, %v15221_v58  ;;  %v9635_v59 = vadd.f32 %v9634_v29, %v9626_v9  ;;  %v9270_v24 = vpop.f32.mrf.mxu0 }
0x1992   :  { %v9607_v63 = vpop.permute.xlu0 %9606 }
0x1993   :  { %v9640_v10 = vadd.f32 %v9639_v4, %v9623_v14  ;;  %v9628_v54 = vmul.f32 %v9607_v63, %v15257_v60  ;;  %v12616_v60 = vld [vmem:[#allocation13 + $0xa0] sm:$0xff]   ;;  %v16974_v14 = vld [vmem:[#allocation55_spill] sm:$0xff] }
0x1994   :  { %v9592_v16 = vpop.permute.xlu1 %9591 }
0x1995   :  { %v9625_v28 = vmul.f32 %v9592_v16, %v15237_v20  ;;  %v9636_v55 = vadd.f32 %v9635_v59, %v9628_v54  ;;  %v12613_v20 = vld [vmem:[#allocation13 + $0xb8] sm:$0xff]  }
0x1997   :  { %v9641_v19 = vadd.f32 %v9640_v10, %v9625_v28 }
0x1998   :  { %v9602_v15 = vpop.permute.xlu1 %9601 }
0x1999   :  { %v9627_v39 = vmul.f32 %v9602_v15, %v15250_v40  ;;  %v12615_v40 = vld [vmem:[#allocation13 + $0xa8] sm:$0xff]  }
0x199b   :  { %v9642_v47 = vadd.f32 %v9641_v19, %v9627_v39 }
0x199c   :  { %v9612_v58 = vpop.permute.xlu1 %9611 }
0x199d   :  { %v9629_v33 = vmul.f32 %v9612_v58, %v15263_v46  ;;  %v12617_v46 = vld [vmem:[#allocation13 + $0x98] sm:$0xff]  }
0x199f   :  { %v9643_v8 = vadd.f32 %v9642_v47, %v9629_v33 }
0x19a1   :  { %v9644_v37 = vpack.c.bf16 %v9643_v8, %v9636_v55  ;;  %v11011_v55 = vld [vmem:[%s16580_s16] ss:$0 sm:$0xff] }
0x19a3   :  { %9845 = vmatmul.mubr.bf16.vlgmr.msra.gmra.mxu1 %v9644_v37  ;;  %11847 = vmatmul.mubr.bf16.vlgmr.msra.gmra.mxu0 %v9644_v37 }
0x19a4   :  { %11851 = vmatpush3.bf16.msra.mxu0 %v12613_v20  ;;  %11866 = vmatprep.mubr.msk.bf16.mxu0 %vm16805_vm9, %v16498_v23 }
0x19a5   :  { %11852 = vmatprep.subr.bf16.mxu0 %v16498_v23  ;;  %11360 = vmatpush3.bf16.msra.mxu1 %v12622_v51 }
0x19a6   :  { %11361 = vmatprep.subr.bf16.mxu1 %v12623_v42  ;;  %10191 = vmatprep.mubr.bf16.mxu1 %v12637_v44  ;;  %v9938_v42 = vadd.f32 %v11011_v55, %v9270_v24 }
0x19a8   :  { %11853 = vmatpush3.bf16.msra.mxu0 %v12614_v43 }
0x19a9   :  { %11854 = vmatprep.subr.bf16.mxu0 %v16498_v23  ;;  %11362 = vmatpush3.bf16.msra.mxu1 %v12624_v45 }
0x19aa   :  { %11363 = vmatprep.subr.bf16.mxu1 %v12625_v35 }
0x19ac   :  { %11855 = vmatpush3.bf16.msra.mxu0 %v12615_v40  ;;  %v9937_v40 = vadd.f32 %v11011_v55, %v9266_v30 }
0x19ad   :  { %11856 = vmatprep.subr.bf16.mxu0 %v16498_v23  ;;  %11364 = vmatpush3.bf16.msra.mxu1 %v12626_v41  ;;  %v16978_v41 = vld [vmem:[#allocation66_spill] sm:$0xff] }
0x19ae   :  { %11365 = vmatprep.subr.bf16.mxu1 %v12627_v2 }
0x19b0   :  { %11857 = vmatpush3.bf16.msra.mxu0 %v12616_v60 }
0x19b1   :  { %11858 = vmatprep.subr.bf16.mxu0 %v16498_v23 }
0x19b4   :  { %11859 = vmatpush3.bf16.msra.mxu0 %v12617_v46 }
0x19b5   :  { %11860 = vmatprep.subr.bf16.mxu0 %v16498_v23 }
0x19b8   :  { %11861 = vmatpush3.bf16.msra.mxu0 %v12618_v32 }
0x19b9   :  { %11862 = vmatprep.subr.bf16.mxu0 %v16498_v23 }
0x19bc   :  { %11863 = vmatpush3.bf16.msra.mxu0 %v12619_v52  ;;  %v16977_v52 = vld [vmem:[#allocation65_spill] sm:$0xff] }
0x19bd   :  { %11864 = vmatprep.subr.bf16.mxu0 %v16498_v23  ;;  %v12628_v23 = vld [vmem:[#allocation13 + $0x20] sm:$0xff]  }
0x19be   :  { %11366 = vmatpush3.bf16.msra.mxu1 %v12628_v23 }
0x19bf   :  { %11367 = vmatprep.subr.bf16.mxu1 %v12629_v56 }
0x19c0   :  { %11865 = vmatpush3.bf16.msra.mxu0 %v12620_v25 }
0x19c2   :  { %11368 = vmatpush3.bf16.msra.mxu1 %v12630_v62 }
0x19c3   :  { %11867 = vmatmul.mubr.bf16.vlgmr.msra.gmra.mxu0 %v9644_v37  ;;  %11369 = vmatprep.subr.bf16.mxu1 %v12631_v1 }
0x19c6   :  { %11370 = vmatpush3.bf16.msra.mxu1 %v12632_v21 }
0x19c7   :  { %11371 = vmatprep.subr.bf16.mxu1 %v12633_v57 }
0x19ca   :  { %11372 = vmatpush3.bf16.msra.mxu1 %v12634_v0 }
0x19cb   :  { %11373 = vmatprep.subr.bf16.mxu1 %v12635_v50 }
0x19ce   :  { %11374 = vmatpush3.bf16.msra.mxu1 %v12636_v12 }
0x1a63   :  { %v9846_v53 = vpop.f32.mrf.mxu1  ;;  %v9889_v27 = vpop.f32.mrf.mxu0 }
0x1a64   :  { %v9896_v61 = vadd.f32 %v9846_v53, %v16973_v22  ;;  %v9898_v25 = vadd.f32 %v9889_v27, %v16977_v52  ;;  %v11013_v27 = vld [vmem:[%s16582_s18] ss:$0 sm:$0xff] }
0x1a65   :  { %v9848_v36 = vpop.f32.mrf.mxu1  ;;  %v11848_v38 = vpop.f32.mrf.mxu0 }
0x1a66   :  { %v9902_v7 = vadd.f32 %v9896_v61, %v16370_v49  ;;  %v9897_v11 = vadd.f32 %v9848_v36, %v16974_v14 }
0x1a67   :  { %v9850_v3 = vpop.f32.mrf.mxu1  ;;  %v9892_v16 = vpop.f32.mrf.mxu0 }
0x1a68   :  { %v11007_v17 = vmul.f32 -1.442695, %v9902_v7  ;;  %v9899_v4 = vadd.f32 %v9850_v3, %v16975_v18  ;;  %v9916_v10 = vadd.f32 %v9897_v11, %v9264_v31  ;;  %v9901_v2 = vadd.f32 %v9892_v16, %v16978_v41 }
0x1a69   :  { %v9852_v28 = vpop.f32.mrf.mxu1  ;;  %v11849_v63 = vpop.f32.mrf.mxu0 }
0x1a6a   :  { %13222 = vpow2.f32 %v11007_v17  ;;  %v9903_v15 = vadd.f32 %v9899_v4, %v9227_v6  ;;  %v9900_v9 = vadd.f32 %v9852_v28, %v16976_v26  ;;  %v11009_v54 = vmul.f32 -1.442695, %v9916_v10 }
0x1a6c   :  { %v11008_v39 = vmul.f32 -1.442695, %v9903_v15  ;;  %v9917_v29 = vadd.f32 %v9900_v9, %v9268_v13 }
0x1a6e   :  { %13224 = vpow2.f32 %v11008_v39  ;;  %v11010_v19 = vmul.f32 -1.442695, %v9917_v29 }
0x1a6f   :  { %13226 = vpow2.f32 %v11009_v54 }
0x1a70   :  { %13228 = vpow2.f32 %v11010_v19 }
0x1a77   :  { %v13223_v49 = vpop.eup %13222 }
0x1a78   :  { %v9910_v58 = vadd.f32 1.0, %v13223_v49 }
0x1a7a   :  { %13230 = vrcp.f32 %v9910_v58 }
0x1a7b   :  { %v13225_v59 = vpop.eup %13224 }
0x1a7c   :  { %v9911_v47 = vadd.f32 1.0, %v13225_v59  ;;  %v13227_v33 = vpop.eup %13226 }
0x1a7d   :  { %v13229_v20 = vpop.eup %13228  ;;  %v9924_v37 = vadd.f32 1.0, %v13227_v33 }
0x1a7e   :  { %13232 = vrcp.f32 %v9911_v47  ;;  %v9925_v46 = vadd.f32 1.0, %v13229_v20 }
0x1a7f   :  { %13234 = vrcp.f32 %v9924_v37 }
0x1a80   :  { %13236 = vrcp.f32 %v9925_v46 }
0x1a83   :  { %v10234_v8 = vpop.f32.mrf.mxu0 }
0x1a85   :  { %v11868_v43 = vpop.f32.mrf.mxu0 }
0x1a87   :  { %v13231_v60 = vpop.eup %13230  ;;  %v10237_v32 = vpop.f32.mrf.mxu0 }
0x1a88   :  { %v9939_v34 = vmul.f32 %v13231_v60, %v9937_v40 }
0x1a89   :  { %v11869_v51 = vpop.f32.mrf.mxu0 }
0x1a8a   :  { %v9941_v45 = vadd.f32 %v9939_v34, %v9898_v25 }
0x1a8b   :  { %v13233_v35 = vpop.eup %13232 }
0x1a8c   :  { %13238 = vtanh.f32 %v9941_v45  ;;  %v9940_v44 = vmul.f32 %v13233_v35, %v9938_v42  ;;  %v13235_v56 = vpop.eup %13234 }
0x1a8d   :  { %v13237_v62 = vpop.eup %13236  ;;  %v9945_v1 = vsub.f32 1.0, %v13235_v56  ;;  %v9949_v0 = vmul.f32 %v13235_v56, %v16300_v5 }
0x1a8e   :  { %v9942_v23 = vadd.f32 %v9940_v44, %v9901_v2  ;;  %v9946_v50 = vsub.f32 1.0, %v13237_v62  ;;  %v9950_v13 = vmul.f32 %v13237_v62, %v16303_v48 }
0x1a90   :  { %13240 = vtanh.f32 %v9942_v23 }
0x1a99   :  { %v13239_v21 = vpop.eup %13238 }
0x1a9a   :  { %v9947_v57 = vmul.f32 %v13239_v21, %v9945_v1 }
0x1a9c   :  { %v9951_v12 = vadd.f32 %v9949_v0, %v9947_v57 }
0x1a9d   :  { %v13241_v31 = vpop.eup %13240 }
0x1a9e   :  { %v9948_v30 = vmul.f32 %v13241_v31, %v9946_v50 }
0x1aa0   :  { %v9952_v24 = vadd.f32 %v9950_v13, %v9948_v30 }
0x1aa2   :  { %v9953_v6 = vpack.c.bf16 %v9952_v24, %v9951_v12 }
0x1aa4   :  { %10192 = vmatmul.mubr.bf16.vlgmr.msra.gmra.mxu1 %v9953_v6 }
0x1b64   :  { %v11375_v53 = vpop.f32.mrf.mxu1 }
0x1b66   :  { %v11376_v22 = vpop.f32.mrf.mxu1 }
0x1b67   :  { %v11377_v61 = vadd.f32 %v11376_v22, %v11375_v53 }
0x1b68   :  { %v11378_v36 = vpop.f32.mrf.mxu1 }
0x1b69   :  { %v10194_v38 = vadd.f32 %v11377_v61, %v11013_v27 }
0x1b6a   :  { %v11379_v7 = vpop.f32.mrf.mxu1 }
0x1b6b   :  { %v10235_v5 = vadd.f32 %v10234_v8, %v10194_v38  ;;  %v11380_v3 = vadd.f32 %v11379_v7, %v11378_v36 }
0x1b6d   :  { %11038 = vst [vmem:[%s16583_s19 + $0x50] sm:$0xff] %v10235_v5  ;;  %v10197_v48 = vadd.f32 %v11380_v3, %v11013_v27 }
0x1b6f   :  { %v10238_v16 = vadd.f32 %v10237_v32, %v10197_v48 }
0x1b71   :  { %11039 = vst [vmem:[%s16583_s19 + $0x58] sm:$0xff] %v10238_v16 }
0x1b72   :  { %10248 = vsyncpa [#allocation7], 1 }
0x1b73   :  { %10249 = vsyncpa [#allocation9], 1 }
0x1b74   :  { %10250 = vsyncpa [#allocation12], 1 }

</bundles_post_ra>
